<compile_context>
chip_gen: v5e
topology: v5e:2x2
jax: 0.10.0
libtpu: 0.0.40
codegen_flags: <defaults>
</compile_context>

<pallas_src>
import numpy as np
import jax
import jax.numpy as jnp
from jax import lax
from jax.experimental import pallas as pl
from jax.experimental.pallas import tpu as pltpu


def _round_up(x, m):
    return ((x + m - 1) // m) * m


# ----------------------------------------------------------------------------
# Kernel A: fused multi-layer LSTM recurrence, time-blocked.
#   grid = (Td // Tt,); layer-0 input gates (x @ Wih0 + b0) precomputed outside.
# ----------------------------------------------------------------------------
def make_fused_lstm_kernel(L, H, Tt):
    n_in = 4 + 3 * (L - 1)

    def kernel(*refs):
        xg_ref, h0_ref, c0_ref, whh0_ref = refs[:4]
        layer_refs = refs[4:n_in]
        y_ref, ho_ref, co_ref = refs[n_in:n_in + 3]
        h_s, c_s, hb_s = refs[n_in + 3:n_in + 6]   # f32 h, f32 c, bf16 h copy

        t = pl.program_id(0)

        @pl.when(t == 0)
        def _():
            h_s[...] = h0_ref[...]
            c_s[...] = c0_ref[...]
            hb_s[...] = h0_ref[...].astype(jnp.bfloat16)

        def cell(gates, c_prev):
            i_g = jax.nn.sigmoid(gates[:, 0 * H:1 * H])
            f_g = jax.nn.sigmoid(gates[:, 1 * H:2 * H])
            g_g = jnp.tanh(gates[:, 2 * H:3 * H])
            o_g = jax.nn.sigmoid(gates[:, 3 * H:4 * H])
            c_new = f_g * c_prev + i_g * g_g
            h_new = o_g * jnp.tanh(c_new)
            return h_new, c_new

        def step(tt, carry):
            # ---- layer 0: input-to-hidden part precomputed (hoisted). ----
            gates0 = xg_ref[tt] + jnp.dot(hb_s[0], whh0_ref[...],
                                          preferred_element_type=jnp.float32)
            h_new, c_new = cell(gates0, c_s[0])
            h_s[0] = h_new
            c_s[0] = c_new
            x_b = h_new.astype(jnp.bfloat16)
            hb_s[0] = x_b

            # ---- layers 1..L-1 (dropout between layers = identity). ----
            for l in range(1, L):
                wih_ref, whh_ref, b_ref = layer_refs[3 * (l - 1):3 * l]
                gates = (jnp.dot(x_b, wih_ref[...],
                                 preferred_element_type=jnp.float32)
                         + jnp.dot(hb_s[l], whh_ref[...],
                                   preferred_element_type=jnp.float32)
                         + b_ref[...])
                h_new, c_new = cell(gates, c_s[l])
                h_s[l] = h_new
                c_s[l] = c_new
                x_b = h_new.astype(jnp.bfloat16)
                hb_s[l] = x_b

            y_ref[tt] = x_b
            return carry

        lax.fori_loop(0, Tt, step, 0, unroll=True)

        @pl.when(t == pl.num_programs(0) - 1)
        def _():
            ho_ref[...] = h_s[...]
            co_ref[...] = c_s[...]

    return kernel


def fused_lstm(xg, h0, c0, whh0_b, rest, Td, B, H, L, Tt):
    in_specs = [pl.BlockSpec((Tt, B, 4 * H), lambda t: (t, 0, 0)),
                pl.BlockSpec((L, B, H), lambda t: (0, 0, 0)),
                pl.BlockSpec((L, B, H), lambda t: (0, 0, 0)),
                pl.BlockSpec((H, 4 * H), lambda t: (0, 0))]
    for _ in range(L - 1):
        in_specs += [pl.BlockSpec((H, 4 * H), lambda t: (0, 0)),
                     pl.BlockSpec((H, 4 * H), lambda t: (0, 0)),
                     pl.BlockSpec((1, 4 * H), lambda t: (0, 0))]
    out_specs = [pl.BlockSpec((Tt, B, H), lambda t: (t, 0, 0)),
                 pl.BlockSpec((L, B, H), lambda t: (0, 0, 0)),
                 pl.BlockSpec((L, B, H), lambda t: (0, 0, 0))]
    return pl.pallas_call(
        make_fused_lstm_kernel(L, H, Tt),
        out_shape=(jax.ShapeDtypeStruct((Td, B, H), jnp.bfloat16),
                   jax.ShapeDtypeStruct((L, B, H), jnp.float32),
                   jax.ShapeDtypeStruct((L, B, H), jnp.float32)),
        grid_spec=pltpu.PrefetchScalarGridSpec(
            num_scalar_prefetch=0,
            grid=(Td // Tt,),
            in_specs=in_specs,
            out_specs=out_specs,
            scratch_shapes=[pltpu.VMEM((L, B, H), jnp.float32),
                            pltpu.VMEM((L, B, H), jnp.float32),
                            pltpu.VMEM((L, B, H), jnp.bfloat16)]),
        compiler_params=pltpu.CompilerParams(
            dimension_semantics=("arbitrary",),
            vmem_limit_bytes=32 * 1024 * 1024),
    )(xg, h0, c0, whh0_b, *rest)


# ----------------------------------------------------------------------------
# Kernel B: attention (batched scores / masked softmax / weighted sum) +
# hoisted concat-linear + tanh, batch-major, single invocation (no grid).
# Emits att as bf16 in a matmul-ready 2-D layout (B*Td, H).
# ----------------------------------------------------------------------------
def make_attention_kernel(B, Td, H):
    def kernel(dec_ref, enc_ref, mask_ref, wdec_ref, wws_ref, bc_ref, att_ref):
        dec = dec_ref[...]                                   # (B, Td, H) bf16
        enc = enc_ref[...]                                   # (B, Te, H) bf16
        # scores[b, t, s] = dec[b, t, :] . enc[b, s, :]  (softmax over encoder s)
        scores = jnp.einsum('bth,bsh->bts', dec, enc,
                            preferred_element_type=jnp.float32)
        pad = mask_ref[...][:, None, :]                      # (B, 1, Te), 1.0 = pad
        scores = jnp.where(pad > 0.5, jnp.float32(1e-10), scores)
        mx = jnp.max(scores, axis=-1, keepdims=True)
        e = jnp.exp(scores - mx)
        w = e * pl.reciprocal(jnp.sum(e, axis=-1, keepdims=True), approx=True)
        ws = jnp.einsum('bts,bsh->bth', w.astype(jnp.bfloat16), enc,
                        preferred_element_type=jnp.float32)  # (B, Td, H)
        # Hoisted concat-linear: two big (B*Td, H) x (H, H) matmuls + bias.
        dec_flat = dec.reshape(B * Td, H)
        ws_flat = ws.astype(jnp.bfloat16).reshape(B * Td, H)
        pre = (jnp.dot(dec_flat, wdec_ref[...], preferred_element_type=jnp.float32)
               + jnp.dot(ws_flat, wws_ref[...], preferred_element_type=jnp.float32)
               + bc_ref[...])
        att_ref[...] = jnp.tanh(pre).astype(att_ref.dtype)

    return kernel


def attention_block(dec_bm, enc_bm, mask_bf, wdec_b, wws_b, bc):
    B, Td, H = dec_bm.shape
    return pl.pallas_call(
        make_attention_kernel(B, Td, H),
        out_shape=jax.ShapeDtypeStruct((B * Td, H), jnp.bfloat16),
    )(dec_bm, enc_bm, mask_bf, wdec_b, wws_b, bc)


# ----------------------------------------------------------------------------
# Kernel C: vocab-tiled output projection.  att is resident; the vocab grid
# axis is "parallel" (no cross-iteration scratch), padded last tile.
# ----------------------------------------------------------------------------
def vocab_proj_kernel(att_ref, wout_ref, bout_ref, out_ref):
    out_ref[...] = (jnp.dot(att_ref[...], wout_ref[...],
                            preferred_element_type=jnp.float32)
                    + bout_ref[...]).astype(out_ref.dtype)


def vocab_projection(att, wout_b, bout, tv):
    M, H = att.shape
    Vp = wout_b.shape[1]
    nv = Vp // tv
    return pl.pallas_call(
        vocab_proj_kernel,
        out_shape=jax.ShapeDtypeStruct((M, Vp), jnp.float32),
        grid_spec=pltpu.PrefetchScalarGridSpec(
            num_scalar_prefetch=0,
            grid=(nv,),
            in_specs=[pl.BlockSpec((M, H), lambda j: (0, 0)),
                      pl.BlockSpec((H, tv), lambda j: (0, j)),
                      pl.BlockSpec((1, tv), lambda j: (0, j))],
            out_specs=pl.BlockSpec((M, tv), lambda j: (0, j))),
        compiler_params=pltpu.CompilerParams(
            dimension_semantics=("parallel",),
            vmem_limit_bytes=32 * 1024 * 1024),
    )(att, wout_b, bout)


# ----------------------------------------------------------------------------
# Full decoder forward (train=True branch).
# ----------------------------------------------------------------------------
def decoder_forward(params, x_tokens, h_i, c_i, encoder_output, attention_mask):
    bf16, f32 = jnp.bfloat16, jnp.float32
    L, B, H = h_i.shape
    Td = x_tokens.shape[0]
    V = params["wout_t"].shape[1]

    # Embedding gather + dropout-as-identity (plain JAX glue).
    emb = params["embedding"][x_tokens]                          # (Td, B, E)
    E = emb.shape[-1]

    # Hoisted layer-0 input projection: one (Td*B, E)x(E, 4H) bf16 matmul.
    wih0, whh0, b0 = params["lstm"][0]
    xg = (jnp.dot(emb.reshape(Td * B, E).astype(bf16), wih0.astype(bf16),
                  preferred_element_type=f32) + b0).reshape(Td, B, 4 * H)

    rest = []
    for l in range(1, L):
        wih_t, whh_t, b = params["lstm"][l]
        rest += [wih_t.astype(bf16), whh_t.astype(bf16), b]

    Tt = next(t for t in (16, 8, 4, 2, 1) if Td % t == 0)
    lstm_out, h_o, c_o = fused_lstm(xg, h_i, c_i, whh0.astype(bf16), rest,
                                    Td, B, H, L, Tt)             # (Td,B,H) bf16

    # Attention inputs in batch-major layout (cheap wrapper transposes of the
    # small activation tensors; logits never need transposing).
    dec_bm = jnp.transpose(lstm_out, (1, 0, 2))                  # (B, Td, H) bf16
    enc_bm = jnp.transpose(encoder_output, (1, 0, 2)).astype(bf16)  # (B, Te, H)
    mask_bf = attention_mask.T.astype(f32)                       # (B, Te)
    wc_t = params["wc_t"]                                        # (2H, H)
    att_bm = attention_block(dec_bm, enc_bm, mask_bf,
                             wc_t[:H].astype(bf16), wc_t[H:].astype(bf16),
                             params["bc"])                       # (B*Td, H) bf16
    att_tm = jnp.transpose(att_bm.reshape(B, Td, H),
                           (1, 0, 2)).reshape(Td * B, H)         # time-major flat

    # Vocab projection with padded tiles (handles arbitrary V, e.g. 50265).
    tv = min(2048, _round_up(V, 128))
    Vp = _round_up(V, tv)
    wout_b = params["wout_t"].astype(bf16)
    bout = params["bout"]
    if Vp != V:
        wout_b = jnp.pad(wout_b, ((0, 0), (0, Vp - V)))
        bout = jnp.pad(bout, ((0, 0), (0, Vp - V)))
    logits_flat = vocab_projection(att_tm, wout_b, bout, tv)     # (Td*B, Vp)
    logits = logits_flat[:, :V].reshape(Td, B, V)
    return logits, h_o, c_o


# ----------------------------------------------------------------------------
# Deterministic parameter init (PyTorch-style, stored transposed for the MXU).
# ----------------------------------------------------------------------------
def init_params(key, V, E, H, L):
    keys = jax.random.split(key, 4 * L + 8)
    ki = iter(keys)

    def u(k, shape, bound):
        return jax.random.uniform(k, shape, jnp.float32, -bound, bound)

    params = {"embedding": jax.random.normal(next(ki), (V, E), jnp.float32)}
    lstm = []
    bound = 1.0 / np.sqrt(H)
    for l in range(L):
        I = E if l == 0 else H
        wih_t = u(next(ki), (I, 4 * H), bound)        # weight_ih_l{l}.T
        whh_t = u(next(ki), (H, 4 * H), bound)        # weight_hh_l{l}.T
        bias = u(next(ki), (1, 4 * H), bound) + u(next(ki), (1, 4 * H), bound)
        lstm.append((wih_t, whh_t, bias))
    params["lstm"] = lstm
    cb = 1.0 / np.sqrt(2 * H)
    params["wc_t"] = u(next(ki), (2 * H, H), cb)      # attention_concat.weight.T
    params["bc"] = u(next(ki), (1, H), cb)
    ob = 1.0 / np.sqrt(H)
    params["wout_t"] = u(next(ki), (H, V), ob)        # out.weight.T
    params["bout"] = u(next(ki), (1, V), ob)
    return params


# ----------------------------------------------------------------------------
# Pure-JAX reference mirroring the kernels' precision (bf16 operands, f32 accum).
# ----------------------------------------------------------------------------
def reference_forward(params, x_tokens, h_i, c_i, encoder_output, attention_mask):
    bf16, f32 = jnp.bfloat16, jnp.float32
    emb = params["embedding"][x_tokens]
    L, H = h_i.shape[0], h_i.shape[-1]
    inp = emb
    h_list, c_list = [], []
    for l in range(L):
        wih_t, whh_t, b = params["lstm"][l]
        wih_b, whh_b = wih_t.astype(bf16), whh_t.astype(bf16)
        h, c = h_i[l], c_i[l]
        ys = []
        for t in range(inp.shape[0]):
            gates = (jnp.dot(inp[t].astype(bf16), wih_b, preferred_element_type=f32)
                     + jnp.dot(h.astype(bf16), whh_b, preferred_element_type=f32)
                     + b)
            i_g = jax.nn.sigmoid(gates[:, :H])
            f_g = jax.nn.sigmoid(gates[:, H:2 * H])
            g_g = jnp.tanh(gates[:, 2 * H:3 * H])
            o_g = jax.nn.sigmoid(gates[:, 3 * H:])
            c = f_g * c + i_g * g_g
            h = o_g * jnp.tanh(c)
            ys.append(h)
        inp = jnp.stack(ys, 0)
        h_list.append(h)
        c_list.append(c)
    lstm_out = inp                                               # (Td, B, H)
    enc_b = jnp.transpose(encoder_output, (1, 0, 2)).astype(bf16)  # (B, Te, H)
    dec_b = jnp.transpose(lstm_out, (1, 0, 2)).astype(bf16)        # (B, Td, H)
    scores = jnp.einsum('bmh,bnh->bmn', dec_b, enc_b,
                        preferred_element_type=f32)              # (B, Td, Te)
    scores = jnp.where(attention_mask.T[:, None, :], jnp.float32(1e-10), scores)
    w = jax.nn.softmax(scores, axis=-1)
    ws = jnp.einsum('bmn,bnh->bmh', w.astype(bf16), enc_b,
                    preferred_element_type=f32)                  # (B, Td, H)
    wc_t = params["wc_t"]
    pre = (jnp.einsum('bmh,hk->bmk', dec_b, wc_t[:H].astype(bf16),
                      preferred_element_type=f32)
           + jnp.einsum('bmh,hk->bmk', ws.astype(bf16), wc_t[H:].astype(bf16),
                        preferred_element_type=f32)
           + params["bc"])
    att = jnp.tanh(pre)
    logits_b = (jnp.einsum('bmh,hv->bmv', att.astype(bf16),
                           params["wout_t"].astype(bf16),
                           preferred_element_type=f32) + params["bout"])
    logits = jnp.transpose(logits_b, (1, 0, 2))                  # (Td, B, V)
    return logits, jnp.stack(h_list), jnp.stack(c_list)


if __name__ == "__main__":
    # Small, tile-friendly shapes consistent with the module's forward.
    V, E, H, L = 256, 128, 128, 2          # vocab, embed, hidden, num_layers
    Td, Te, B = 8, 8, 8                    # decoder seq, encoder seq, batch

    key = jax.random.PRNGKey(0)
    k_par, k_x, k_h, k_c, k_enc, k_len = jax.random.split(key, 6)
    params = init_params(k_par, V, E, H, L)

    x_tokens = jax.random.randint(k_x, (Td, B), 0, V)                   # (Td, B)
    h_i = 0.1 * jax.random.normal(k_h, (L, B, H), jnp.float32)
    c_i = 0.1 * jax.random.normal(k_c, (L, B, H), jnp.float32)
    encoder_output = jax.random.normal(k_enc, (Te, B, H), jnp.float32)
    lengths = jax.random.randint(k_len, (B,), 3, Te + 1)
    attention_mask = jnp.arange(Te)[:, None] >= lengths[None, :]        # (Te, B)

    fwd = jax.jit(decoder_forward)
    logits, h_o, c_o = fwd(params, x_tokens, h_i, c_i, encoder_output,
                           attention_mask)
    jax.block_until_ready((logits, h_o, c_o))

    assert logits.shape == (Td, B, V)
    assert h_o.shape == (L, B, H) and c_o.shape == (L, B, H)
    assert bool(jnp.all(jnp.isfinite(logits)))

    ref_logits, ref_h, ref_c = jax.jit(reference_forward)(
        params, x_tokens, h_i, c_i, encoder_output, attention_mask)
    err_state = max(float(jnp.max(jnp.abs(h_o - ref_h))),
                    float(jnp.max(jnp.abs(c_o - ref_c))))
    err_logits = float(jnp.max(jnp.abs(logits - ref_logits)))
    assert err_state < 2e-2, f"state mismatch vs reference: {err_state}"
    assert err_logits < 5e-2, f"logits mismatch vs reference: {err_logits}"

    print("KERNEL_OK")
</pallas_src>

<mosaic_0001>
module attributes {stable_mosaic.version = 11 : i64} {
  func.func @kernel(%arg0: memref<8x8x128xbf16, #tpu.memory_space<vmem>>, %arg1: memref<8x8x128xbf16, #tpu.memory_space<vmem>>, %arg2: memref<8x8xf32, #tpu.memory_space<vmem>>, %arg3: memref<128x128xbf16, #tpu.memory_space<vmem>>, %arg4: memref<128x128xbf16, #tpu.memory_space<vmem>>, %arg5: memref<1x128xf32, #tpu.memory_space<vmem>>, %arg6: memref<64x128xbf16, #tpu.memory_space<vmem>>) attributes {dimension_semantics = [], scalar_prefetch = 0 : i64, scratch_operands = 0 : i64, tpu.core_type = #tpu.core_type<tc>} {
    %c0 = arith.constant 0 : index
    %c0_0 = arith.constant 0 : index
    %c0_1 = arith.constant 0 : index
    %0 = vector.load %arg0[%c0, %c0_0, %c0_1] : memref<8x8x128xbf16, #tpu.memory_space<vmem>>, vector<8x8x128xbf16>
    %c0_2 = arith.constant 0 : index
    %c0_3 = arith.constant 0 : index
    %c0_4 = arith.constant 0 : index
    %1 = vector.load %arg1[%c0_2, %c0_3, %c0_4] : memref<8x8x128xbf16, #tpu.memory_space<vmem>>, vector<8x8x128xbf16>
    "tpu.trace_start"() <{level = 10 : i32, message = "bth,bsh->bts"}> : () -> ()
    %cst = arith.constant dense<0.000000e+00> : vector<8x8x8xf32>
    %2 = tpu.matmul %0, %1, %cst {dimension_numbers = #tpu.dot_dimension_numbers<[2], [2], [1], [1], [0, 0, 0, 1, 1, 1], [0], [0]>} : vector<8x8x128xbf16>, vector<8x8x128xbf16>, vector<8x8x8xf32> -> vector<8x8x8xf32>
    "tpu.trace_stop"() : () -> ()
    %c0_5 = arith.constant 0 : index
    %c0_6 = arith.constant 0 : index
    %3 = vector.load %arg2[%c0_5, %c0_6] : memref<8x8xf32, #tpu.memory_space<vmem>>, vector<8x8xf32>
    %4 = vector.shape_cast %3 : vector<8x8xf32> to vector<8x1x8xf32>
    %cst_7 = arith.constant 5.000000e-01 : f32
    %5 = vector.broadcast %cst_7 : f32 to vector<8x1x8xf32>
    %6 = arith.cmpf ogt, %4, %5 : vector<8x1x8xf32>
    %cst_8 = arith.constant 1.000000e-10 : f32
    %7 = vector.shape_cast %6 : vector<8x1x8xi1> to vector<8x1x8xi1>
    %8 = vector.broadcast %7 : vector<8x1x8xi1> to vector<8x8x8xi1>
    %9 = vector.broadcast %cst_8 : f32 to vector<8x8x8xf32>
    %10 = arith.select %8, %9, %2 : vector<8x8x8xi1>, vector<8x8x8xf32>
    %cst_9 = arith.constant dense<0xFF800000> : vector<8x8xf32>
    %11 = vector.multi_reduction <maximumf>, %10, %cst_9 [2] : vector<8x8x8xf32> to vector<8x8xf32>
    %12 = vector.shape_cast %11 : vector<8x8xf32> to vector<8x8x1xf32>
    %13 = vector.broadcast %12 : vector<8x8x1xf32> to vector<8x8x8xf32>
    %14 = arith.subf %10, %13 : vector<8x8x8xf32>
    %15 = math.exp %14 : vector<8x8x8xf32>
    %cst_10 = arith.constant dense<0.000000e+00> : vector<8x8xf32>
    %16 = vector.multi_reduction <add>, %15, %cst_10 [2] : vector<8x8x8xf32> to vector<8x8xf32>
    %17 = vector.shape_cast %16 : vector<8x8xf32> to vector<8x8x1xf32>
    %18 = tpu.reciprocal %17 {approx = true} : vector<8x8x1xf32> -> vector<8x8x1xf32>
    %19 = vector.broadcast %18 : vector<8x8x1xf32> to vector<8x8x8xf32>
    %20 = arith.mulf %15, %19 : vector<8x8x8xf32>
    %21 = arith.truncf %20 : vector<8x8x8xf32> to vector<8x8x8xbf16>
    "tpu.trace_start"() <{level = 10 : i32, message = "bts,bsh->bth"}> : () -> ()
    %cst_11 = arith.constant dense<0.000000e+00> : vector<8x8x128xf32>
    %22 = tpu.matmul %21, %1, %cst_11 {dimension_numbers = #tpu.dot_dimension_numbers<[2], [1], [1], [2], [0, 0, 0, 1, 1, 2], [0], [0]>} : vector<8x8x8xbf16>, vector<8x8x128xbf16>, vector<8x8x128xf32> -> vector<8x8x128xf32>
    "tpu.trace_stop"() : () -> ()
    %23 = vector.shape_cast %0 : vector<8x8x128xbf16> to vector<64x128xbf16>
    %24 = arith.truncf %22 : vector<8x8x128xf32> to vector<8x8x128xbf16>
    %25 = vector.shape_cast %24 : vector<8x8x128xbf16> to vector<64x128xbf16>
    %c0_12 = arith.constant 0 : index
    %c0_13 = arith.constant 0 : index
    %26 = vector.load %arg3[%c0_12, %c0_13] : memref<128x128xbf16, #tpu.memory_space<vmem>>, vector<128x128xbf16>
    %cst_14 = arith.constant dense<0.000000e+00> : vector<64x128xf32>
    %27 = tpu.matmul %23, %26, %cst_14 {dimension_numbers = #tpu.dot_dimension_numbers<[1], [0], [0], [1], [0, 0, 1, 1], [], []>} : vector<64x128xbf16>, vector<128x128xbf16>, vector<64x128xf32> -> vector<64x128xf32>
    %c0_15 = arith.constant 0 : index
    %c0_16 = arith.constant 0 : index
    %28 = vector.load %arg4[%c0_15, %c0_16] : memref<128x128xbf16, #tpu.memory_space<vmem>>, vector<128x128xbf16>
    %cst_17 = arith.constant dense<0.000000e+00> : vector<64x128xf32>
    %29 = tpu.matmul %25, %28, %cst_17 {dimension_numbers = #tpu.dot_dimension_numbers<[1], [0], [0], [1], [0, 0, 1, 1], [], []>} : vector<64x128xbf16>, vector<128x128xbf16>, vector<64x128xf32> -> vector<64x128xf32>
    %30 = arith.addf %27, %29 : vector<64x128xf32>
    %c0_18 = arith.constant 0 : index
    %c0_19 = arith.constant 0 : index
    %31 = vector.load %arg5[%c0_18, %c0_19] : memref<1x128xf32, #tpu.memory_space<vmem>>, vector<1x128xf32>
    %32 = vector.broadcast %31 : vector<1x128xf32> to vector<64x128xf32>
    %33 = arith.addf %30, %32 : vector<64x128xf32>
    %34 = math.tanh %33 : vector<64x128xf32>
    %35 = arith.truncf %34 : vector<64x128xf32> to vector<64x128xbf16>
    %c0_20 = arith.constant 0 : index
    %c0_21 = arith.constant 0 : index
    %36 = vector.load %arg6[%c0_20, %c0_21] : memref<64x128xbf16, #tpu.memory_space<vmem>>, vector<64x128xbf16>
    tpu.vector_store %arg6[%c0_20, %c0_21], %35 {strides = array<i32>} : memref<64x128xbf16, #tpu.memory_space<vmem>>, vector<64x128xbf16>,
    return
  }
}

module attributes {stable_mosaic.version = 11 : i64} {
  func.func @vocab_proj_kernel(%arg0: i32, %arg1: memref<64x128xbf16, #tpu.memory_space<vmem>>, %arg2: memref<128x256xbf16, #tpu.memory_space<vmem>>, %arg3: memref<1x256xf32, #tpu.memory_space<vmem>>, %arg4: memref<64x256xf32, #tpu.memory_space<vmem>>) attributes {dimension_semantics = [#tpu.dimension_semantics<parallel>], iteration_bounds = array<i64: 1>, scalar_prefetch = 0 : i64, scratch_operands = 0 : i64, tpu.core_type = #tpu.core_type<tc>, window_params = [{pipeline_mode = #tpu.pipeline_mode<synchronous>, transform_indices = @transform_0, window_bounds = array<i64: 64, 128>}, {transform_indices = @transform_1, window_bounds = array<i64: 128, 256>}, {transform_indices = @transform_2, window_bounds = array<i64: 1, 256>}, {transform_indices = @transform_3, window_bounds = array<i64: 64, 256>}]} {
    %c0 = arith.constant 0 : index
    %c0_0 = arith.constant 0 : index
    %0 = vector.load %arg1[%c0, %c0_0] : memref<64x128xbf16, #tpu.memory_space<vmem>>, vector<64x128xbf16>
    %c0_1 = arith.constant 0 : index
    %c0_2 = arith.constant 0 : index
    %1 = vector.load %arg2[%c0_1, %c0_2] : memref<128x256xbf16, #tpu.memory_space<vmem>>, vector<128x256xbf16>
    %cst = arith.constant dense<0.000000e+00> : vector<64x256xf32>
    %2 = tpu.matmul %0, %1, %cst {dimension_numbers = #tpu.dot_dimension_numbers<[1], [0], [0], [1], [0, 0, 1, 1], [], []>} : vector<64x128xbf16>, vector<128x256xbf16>, vector<64x256xf32> -> vector<64x256xf32>
    %c0_3 = arith.constant 0 : index
    %c0_4 = arith.constant 0 : index
    %3 = vector.load %arg3[%c0_3, %c0_4] : memref<1x256xf32, #tpu.memory_space<vmem>>, vector<1x256xf32>
    %4 = vector.broadcast %3 : vector<1x256xf32> to vector<64x256xf32>
    %5 = arith.addf %2, %4 : vector<64x256xf32>
    %c0_5 = arith.constant 0 : index
    %c0_6 = arith.constant 0 : index
    %6 = vector.load %arg4[%c0_5, %c0_6] : memref<64x256xf32, #tpu.memory_space<vmem>>, vector<64x256xf32>
    tpu.vector_store %arg4[%c0_5, %c0_6], %5 {strides = array<i32>} : memref<64x256xf32, #tpu.memory_space<vmem>>, vector<64x256xf32>,
    return
  }
  func.func @transform_0(%arg0: i32) -> (i32, i32) {
    %c0_i32 = arith.constant 0 : i32
    %c0_i32_0 = arith.constant 0 : i32
    %c0_i32_1 = arith.constant 0 : i32
    return %c0_i32, %c0_i32_0 : i32, i32
  }
  func.func @transform_1(%arg0: i32) -> (i32, i32) {
    %c0_i32 = arith.constant 0 : i32
    %c0_i32_0 = arith.constant 0 : i32
    return %c0_i32, %arg0 : i32, i32
  }
  func.func @transform_2(%arg0: i32) -> (i32, i32) {
    %c0_i32 = arith.constant 0 : i32
    %c0_i32_0 = arith.constant 0 : i32
    return %c0_i32, %arg0 : i32, i32
  }
  func.func @transform_3(%arg0: i32) -> (i32, i32) {
    %c0_i32 = arith.constant 0 : i32
    %c0_i32_0 = arith.constant 0 : i32
    return %c0_i32, %arg0 : i32, i32
  }
}

module attributes {stable_mosaic.version = 11 : i64} {
  func.func @kernel(%arg0: i32, %arg1: memref<8x8x512xf32, #tpu.memory_space<vmem>>, %arg2: memref<2x8x128xf32, #tpu.memory_space<vmem>>, %arg3: memref<2x8x128xf32, #tpu.memory_space<vmem>>, %arg4: memref<128x512xbf16, #tpu.memory_space<vmem>>, %arg5: memref<128x512xbf16, #tpu.memory_space<vmem>>, %arg6: memref<128x512xbf16, #tpu.memory_space<vmem>>, %arg7: memref<1x512xf32, #tpu.memory_space<vmem>>, %arg8: memref<8x8x128xbf16, #tpu.memory_space<vmem>>, %arg9: memref<2x8x128xf32, #tpu.memory_space<vmem>>, %arg10: memref<2x8x128xf32, #tpu.memory_space<vmem>>, %arg11: memref<2x8x128xf32, #tpu.memory_space<vmem>>, %arg12: memref<2x8x128xf32, #tpu.memory_space<vmem>>, %arg13: memref<2x8x128xbf16, #tpu.memory_space<vmem>>) attributes {dimension_semantics = [#tpu.dimension_semantics<arbitrary>], iteration_bounds = array<i64: 1>, scalar_prefetch = 0 : i64, scratch_operands = 3 : i64, tpu.core_type = #tpu.core_type<tc>, window_params = [{transform_indices = @transform_0, window_bounds = array<i64: 8, 8, 512>}, {pipeline_mode = #tpu.pipeline_mode<synchronous>, transform_indices = @transform_1, window_bounds = array<i64: 2, 8, 128>}, {pipeline_mode = #tpu.pipeline_mode<synchronous>, transform_indices = @transform_2, window_bounds = array<i64: 2, 8, 128>}, {pipeline_mode = #tpu.pipeline_mode<synchronous>, transform_indices = @transform_3, window_bounds = array<i64: 128, 512>}, {pipeline_mode = #tpu.pipeline_mode<synchronous>, transform_indices = @transform_4, window_bounds = array<i64: 128, 512>}, {pipeline_mode = #tpu.pipeline_mode<synchronous>, transform_indices = @transform_5, window_bounds = array<i64: 128, 512>}, {pipeline_mode = #tpu.pipeline_mode<synchronous>, transform_indices = @transform_6, window_bounds = array<i64: 1, 512>}, {transform_indices = @transform_7, window_bounds = array<i64: 8, 8, 128>}, {pipeline_mode = #tpu.pipeline_mode<synchronous>, transform_indices = @transform_8, window_bounds = array<i64: 2, 8, 128>}, {pipeline_mode = #tpu.pipeline_mode<synchronous>, transform_indices = @transform_9, window_bounds = array<i64: 2, 8, 128>}]} {
    %c0_i32 = arith.constant 0 : i32
    %0 = arith.cmpi eq, %arg0, %c0_i32 : i32
    %1 = arith.extui %0 : i1 to i32
    %c0_i32_0 = arith.constant 0 : i32
    %2 = arith.cmpi ne, %1, %c0_i32_0 : i32
    scf.if %2 {
      %c0_409 = arith.constant 0 : index
      %c0_410 = arith.constant 0 : index
      %c0_411 = arith.constant 0 : index
      %774 = vector.load %arg2[%c0_409, %c0_410, %c0_411] : memref<2x8x128xf32, #tpu.memory_space<vmem>>, vector<2x8x128xf32>
      %c0_412 = arith.constant 0 : index
      %c0_413 = arith.constant 0 : index
      %c0_414 = arith.constant 0 : index
      %775 = vector.load %arg11[%c0_412, %c0_413, %c0_414] : memref<2x8x128xf32, #tpu.memory_space<vmem>>, vector<2x8x128xf32>
      tpu.vector_store %arg11[%c0_412, %c0_413, %c0_414], %774 {strides = array<i32>} : memref<2x8x128xf32, #tpu.memory_space<vmem>>, vector<2x8x128xf32>,
      %c0_415 = arith.constant 0 : index
      %c0_416 = arith.constant 0 : index
      %c0_417 = arith.constant 0 : index
      %776 = vector.load %arg3[%c0_415, %c0_416, %c0_417] : memref<2x8x128xf32, #tpu.memory_space<vmem>>, vector<2x8x128xf32>
      %c0_418 = arith.constant 0 : index
      %c0_419 = arith.constant 0 : index
      %c0_420 = arith.constant 0 : index
      %777 = vector.load %arg12[%c0_418, %c0_419, %c0_420] : memref<2x8x128xf32, #tpu.memory_space<vmem>>, vector<2x8x128xf32>
      tpu.vector_store %arg12[%c0_418, %c0_419, %c0_420], %776 {strides = array<i32>} : memref<2x8x128xf32, #tpu.memory_space<vmem>>, vector<2x8x128xf32>,
      %c0_421 = arith.constant 0 : index
      %c0_422 = arith.constant 0 : index
      %c0_423 = arith.constant 0 : index
      %778 = vector.load %arg2[%c0_421, %c0_422, %c0_423] : memref<2x8x128xf32, #tpu.memory_space<vmem>>, vector<2x8x128xf32>
      %779 = arith.truncf %778 : vector<2x8x128xf32> to vector<2x8x128xbf16>
      %c0_424 = arith.constant 0 : index
      %c0_425 = arith.constant 0 : index
      %c0_426 = arith.constant 0 : index
      %780 = vector.load %arg13[%c0_424, %c0_425, %c0_426] : memref<2x8x128xbf16, #tpu.memory_space<vmem>>, vector<2x8x128xbf16>
      tpu.vector_store %arg13[%c0_424, %c0_425, %c0_426], %779 {strides = array<i32>} : memref<2x8x128xbf16, #tpu.memory_space<vmem>>, vector<2x8x128xbf16>,
    } else {
    }
    %c0_i32_1 = arith.constant 0 : i32
    %3 = arith.index_cast %c0_i32_1 : i32 to index
    %c0 = arith.constant 0 : index
    %c0_2 = arith.constant 0 : index
    %4 = vector.load %arg1[%3, %c0, %c0_2] : memref<8x8x512xf32, #tpu.memory_space<vmem>>, vector<1x8x512xf32>
    %5 = vector.shape_cast %4 : vector<1x8x512xf32> to vector<8x512xf32>
    %c0_3 = arith.constant 0 : index
    %c0_4 = arith.constant 0 : index
    %c0_5 = arith.constant 0 : index
    %6 = vector.load %arg13[%c0_3, %c0_4, %c0_5] : memref<2x8x128xbf16, #tpu.memory_space<vmem>>, vector<1x8x128xbf16>
    %7 = vector.shape_cast %6 : vector<1x8x128xbf16> to vector<8x128xbf16>
    %c0_6 = arith.constant 0 : index
    %c0_7 = arith.constant 0 : index
    %8 = vector.load %arg4[%c0_6, %c0_7] : memref<128x512xbf16, #tpu.memory_space<vmem>>, vector<128x512xbf16>
    %cst = arith.constant dense<0.000000e+00> : vector<8x512xf32>
    %9 = tpu.matmul %7, %8, %cst {dimension_numbers = #tpu.dot_dimension_numbers<[1], [0], [0], [1], [0, 0, 1, 1], [], []>} : vector<8x128xbf16>, vector<128x512xbf16>, vector<8x512xf32> -> vector<8x512xf32>
    %10 = arith.addf %5, %9 : vector<8x512xf32>
    %c0_8 = arith.constant 0 : index
    %c0_9 = arith.constant 0 : index
    %c0_10 = arith.constant 0 : index
    %11 = vector.load %arg12[%c0_8, %c0_9, %c0_10] : memref<2x8x128xf32, #tpu.memory_space<vmem>>, vector<1x8x128xf32>
    %12 = vector.shape_cast %11 : vector<1x8x128xf32> to vector<8x128xf32>
    %13 = vector.extract_strided_slice %10 {offsets = [0, 0], sizes = [8, 128], strides = [1, 1]} : vector<8x512xf32> to vector<8x128xf32>
    %14 = arith.negf %13 : vector<8x128xf32>
    %15 = math.exp %14 : vector<8x128xf32>
    %cst_11 = arith.constant 1.000000e+00 : f32
    %16 = vector.broadcast %cst_11 : f32 to vector<8x128xf32>
    %17 = arith.addf %16, %15 : vector<8x128xf32>
    %18 = arith.divf %16, %17 : vector<8x128xf32>
    %19 = vector.extract_strided_slice %10 {offsets = [0, 128], sizes = [8, 128], strides = [1, 1]} : vector<8x512xf32> to vector<8x128xf32>
    %20 = arith.negf %19 : vector<8x128xf32>
    %21 = math.exp %20 : vector<8x128xf32>
    %cst_12 = arith.constant 1.000000e+00 : f32
    %22 = vector.broadcast %cst_12 : f32 to vector<8x128xf32>
    %23 = arith.addf %22, %21 : vector<8x128xf32>
    %24 = arith.divf %22, %23 : vector<8x128xf32>
    %25 = vector.extract_strided_slice %10 {offsets = [0, 256], sizes = [8, 128], strides = [1, 1]} : vector<8x512xf32> to vector<8x128xf32>
    %26 = math.tanh %25 : vector<8x128xf32>
    %27 = vector.extract_strided_slice %10 {offsets = [0, 384], sizes = [8, 128], strides = [1, 1]} : vector<8x512xf32> to vector<8x128xf32>
    %28 = arith.negf %27 : vector<8x128xf32>
    %29 = math.exp %28 : vector<8x128xf32>
    %cst_13 = arith.constant 1.000000e+00 : f32
    %30 = vector.broadcast %cst_13 : f32 to vector<8x128xf32>
    %31 = arith.addf %30, %29 : vector<8x128xf32>
    %32 = arith.divf %30, %31 : vector<8x128xf32>
    %33 = arith.mulf %24, %12 : vector<8x128xf32>
    %34 = arith.mulf %18, %26 : vector<8x128xf32>
    %35 = arith.addf %33, %34 : vector<8x128xf32>
    %36 = math.tanh %35 : vector<8x128xf32>
    %37 = arith.mulf %32, %36 : vector<8x128xf32>
    %c0_14 = arith.constant 0 : index
    %c0_15 = arith.constant 0 : index
    %c0_16 = arith.constant 0 : index
    %38 = vector.load %arg11[%c0_14, %c0_15, %c0_16] : memref<2x8x128xf32, #tpu.memory_space<vmem>>, vector<1x8x128xf32>
    %39 = vector.shape_cast %38 : vector<1x8x128xf32> to vector<8x128xf32>
    %40 = vector.shape_cast %37 : vector<8x128xf32> to vector<1x8x128xf32>
    tpu.vector_store %arg11[%c0_14, %c0_15, %c0_16], %40 {strides = array<i32>} : memref<2x8x128xf32, #tpu.memory_space<vmem>>, vector<1x8x128xf32>,
    %c0_17 = arith.constant 0 : index
    %c0_18 = arith.constant 0 : index
    %c0_19 = arith.constant 0 : index
    %41 = vector.load %arg12[%c0_17, %c0_18, %c0_19] : memref<2x8x128xf32, #tpu.memory_space<vmem>>, vector<1x8x128xf32>
    %42 = vector.shape_cast %41 : vector<1x8x128xf32> to vector<8x128xf32>
    %43 = vector.shape_cast %35 : vector<8x128xf32> to vector<1x8x128xf32>
    tpu.vector_store %arg12[%c0_17, %c0_18, %c0_19], %43 {strides = array<i32>} : memref<2x8x128xf32, #tpu.memory_space<vmem>>, vector<1x8x128xf32>,
    %44 = arith.truncf %37 : vector<8x128xf32> to vector<8x128xbf16>
    %c0_20 = arith.constant 0 : index
    %c0_21 = arith.constant 0 : index
    %c0_22 = arith.constant 0 : index
    %45 = vector.load %arg13[%c0_20, %c0_21, %c0_22] : memref<2x8x128xbf16, #tpu.memory_space<vmem>>, vector<1x8x128xbf16>
    %46 = vector.shape_cast %45 : vector<1x8x128xbf16> to vector<8x128xbf16>
    %47 = vector.shape_cast %44 : vector<8x128xbf16> to vector<1x8x128xbf16>
    tpu.vector_store %arg13[%c0_20, %c0_21, %c0_22], %47 {strides = array<i32>} : memref<2x8x128xbf16, #tpu.memory_space<vmem>>, vector<1x8x128xbf16>,
    %c0_23 = arith.constant 0 : index
    %c0_24 = arith.constant 0 : index
    %48 = vector.load %arg5[%c0_23, %c0_24] : memref<128x512xbf16, #tpu.memory_space<vmem>>, vector<128x512xbf16>
    %cst_25 = arith.constant dense<0.000000e+00> : vector<8x512xf32>
    %49 = tpu.matmul %44, %48, %cst_25 {dimension_numbers = #tpu.dot_dimension_numbers<[1], [0], [0], [1], [0, 0, 1, 1], [], []>} : vector<8x128xbf16>, vector<128x512xbf16>, vector<8x512xf32> -> vector<8x512xf32>
    %c1 = arith.constant 1 : index
    %c0_26 = arith.constant 0 : index
    %c0_27 = arith.constant 0 : index
    %50 = vector.load %arg13[%c1, %c0_26, %c0_27] : memref<2x8x128xbf16, #tpu.memory_space<vmem>>, vector<1x8x128xbf16>
    %51 = vector.shape_cast %50 : vector<1x8x128xbf16> to vector<8x128xbf16>
    %c0_28 = arith.constant 0 : index
    %c0_29 = arith.constant 0 : index
    %52 = vector.load %arg6[%c0_28, %c0_29] : memref<128x512xbf16, #tpu.memory_space<vmem>>, vector<128x512xbf16>
    %cst_30 = arith.constant dense<0.000000e+00> : vector<8x512xf32>
    %53 = tpu.matmul %51, %52, %cst_30 {dimension_numbers = #tpu.dot_dimension_numbers<[1], [0], [0], [1], [0, 0, 1, 1], [], []>} : vector<8x128xbf16>, vector<128x512xbf16>, vector<8x512xf32> -> vector<8x512xf32>
    %54 = arith.addf %49, %53 : vector<8x512xf32>
    %c0_31 = arith.constant 0 : index
    %c0_32 = arith.constant 0 : index
    %55 = vector.load %arg7[%c0_31, %c0_32] : memref<1x512xf32, #tpu.memory_space<vmem>>, vector<1x512xf32>
    %56 = vector.broadcast %55 : vector<1x512xf32> to vector<8x512xf32>
    %57 = arith.addf %54, %56 : vector<8x512xf32>
    %c1_33 = arith.constant 1 : index
    %c0_34 = arith.constant 0 : index
    %c0_35 = arith.constant 0 : index
    %58 = vector.load %arg12[%c1_33, %c0_34, %c0_35] : memref<2x8x128xf32, #tpu.memory_space<vmem>>, vector<1x8x128xf32>
    %59 = vector.shape_cast %58 : vector<1x8x128xf32> to vector<8x128xf32>
    %60 = vector.extract_strided_slice %57 {offsets = [0, 0], sizes = [8, 128], strides = [1, 1]} : vector<8x512xf32> to vector<8x128xf32>
    %61 = arith.negf %60 : vector<8x128xf32>
    %62 = math.exp %61 : vector<8x128xf32>
    %cst_36 = arith.constant 1.000000e+00 : f32
    %63 = vector.broadcast %cst_36 : f32 to vector<8x128xf32>
    %64 = arith.addf %63, %62 : vector<8x128xf32>
    %65 = arith.divf %63, %64 : vector<8x128xf32>
    %66 = vector.extract_strided_slice %57 {offsets = [0, 128], sizes = [8, 128], strides = [1, 1]} : vector<8x512xf32> to vector<8x128xf32>
    %67 = arith.negf %66 : vector<8x128xf32>
    %68 = math.exp %67 : vector<8x128xf32>
    %cst_37 = arith.constant 1.000000e+00 : f32
    %69 = vector.broadcast %cst_37 : f32 to vector<8x128xf32>
    %70 = arith.addf %69, %68 : vector<8x128xf32>
    %71 = arith.divf %69, %70 : vector<8x128xf32>
    %72 = vector.extract_strided_slice %57 {offsets = [0, 256], sizes = [8, 128], strides = [1, 1]} : vector<8x512xf32> to vector<8x128xf32>
    %73 = math.tanh %72 : vector<8x128xf32>
    %74 = vector.extract_strided_slice %57 {offsets = [0, 384], sizes = [8, 128], strides = [1, 1]} : vector<8x512xf32> to vector<8x128xf32>
    %75 = arith.negf %74 : vector<8x128xf32>
    %76 = math.exp %75 : vector<8x128xf32>
    %cst_38 = arith.constant 1.000000e+00 : f32
    %77 = vector.broadcast %cst_38 : f32 to vector<8x128xf32>
    %78 = arith.addf %77, %76 : vector<8x128xf32>
    %79 = arith.divf %77, %78 : vector<8x128xf32>
    %80 = arith.mulf %71, %59 : vector<8x128xf32>
    %81 = arith.mulf %65, %73 : vector<8x128xf32>
    %82 = arith.addf %80, %81 : vector<8x128xf32>
    %83 = math.tanh %82 : vector<8x128xf32>
    %84 = arith.mulf %79, %83 : vector<8x128xf32>
    %c1_39 = arith.constant 1 : index
    %c0_40 = arith.constant 0 : index
    %c0_41 = arith.constant 0 : index
    %85 = vector.load %arg11[%c1_39, %c0_40, %c0_41] : memref<2x8x128xf32, #tpu.memory_space<vmem>>, vector<1x8x128xf32>
    %86 = vector.shape_cast %85 : vector<1x8x128xf32> to vector<8x128xf32>
    %87 = vector.shape_cast %84 : vector<8x128xf32> to vector<1x8x128xf32>
    tpu.vector_store %arg11[%c1_39, %c0_40, %c0_41], %87 {strides = array<i32>} : memref<2x8x128xf32, #tpu.memory_space<vmem>>, vector<1x8x128xf32>,
    %c1_42 = arith.constant 1 : index
    %c0_43 = arith.constant 0 : index
    %c0_44 = arith.constant 0 : index
    %88 = vector.load %arg12[%c1_42, %c0_43, %c0_44] : memref<2x8x128xf32, #tpu.memory_space<vmem>>, vector<1x8x128xf32>
    %89 = vector.shape_cast %88 : vector<1x8x128xf32> to vector<8x128xf32>
    %90 = vector.shape_cast %82 : vector<8x128xf32> to vector<1x8x128xf32>
    tpu.vector_store %arg12[%c1_42, %c0_43, %c0_44], %90 {strides = array<i32>} : memref<2x8x128xf32, #tpu.memory_space<vmem>>, vector<1x8x128xf32>,
    %91 = arith.truncf %84 : vector<8x128xf32> to vector<8x128xbf16>
    %c1_45 = arith.constant 1 : index
    %c0_46 = arith.constant 0 : index
    %c0_47 = arith.constant 0 : index
    %92 = vector.load %arg13[%c1_45, %c0_46, %c0_47] : memref<2x8x128xbf16, #tpu.memory_space<vmem>>, vector<1x8x128xbf16>
    %93 = vector.shape_cast %92 : vector<1x8x128xbf16> to vector<8x128xbf16>
    %94 = vector.shape_cast %91 : vector<8x128xbf16> to vector<1x8x128xbf16>
    tpu.vector_store %arg13[%c1_45, %c0_46, %c0_47], %94 {strides = array<i32>} : memref<2x8x128xbf16, #tpu.memory_space<vmem>>, vector<1x8x128xbf16>,
    %95 = arith.index_cast %c0_i32_1 : i32 to index
    %c0_48 = arith.constant 0 : index
    %c0_49 = arith.constant 0 : index
    %96 = vector.load %arg8[%95, %c0_48, %c0_49] : memref<8x8x128xbf16, #tpu.memory_space<vmem>>, vector<1x8x128xbf16>
    %97 = vector.shape_cast %96 : vector<1x8x128xbf16> to vector<8x128xbf16>
    %98 = vector.shape_cast %91 : vector<8x128xbf16> to vector<1x8x128xbf16>
    tpu.vector_store %arg8[%95, %c0_48, %c0_49], %98 {strides = array<i32>} : memref<8x8x128xbf16, #tpu.memory_space<vmem>>, vector<1x8x128xbf16>,
    %c1_i32 = arith.constant 1 : i32
    %99 = arith.index_cast %c1_i32 : i32 to index
    %c0_50 = arith.constant 0 : index
    %c0_51 = arith.constant 0 : index
    %100 = vector.load %arg1[%99, %c0_50, %c0_51] : memref<8x8x512xf32, #tpu.memory_space<vmem>>, vector<1x8x512xf32>
    %101 = vector.shape_cast %100 : vector<1x8x512xf32> to vector<8x512xf32>
    %c0_52 = arith.constant 0 : index
    %c0_53 = arith.constant 0 : index
    %c0_54 = arith.constant 0 : index
    %102 = vector.load %arg13[%c0_52, %c0_53, %c0_54] : memref<2x8x128xbf16, #tpu.memory_space<vmem>>, vector<1x8x128xbf16>
    %103 = vector.shape_cast %102 : vector<1x8x128xbf16> to vector<8x128xbf16>
    %c0_55 = arith.constant 0 : index
    %c0_56 = arith.constant 0 : index
    %104 = vector.load %arg4[%c0_55, %c0_56] : memref<128x512xbf16, #tpu.memory_space<vmem>>, vector<128x512xbf16>
    %cst_57 = arith.constant dense<0.000000e+00> : vector<8x512xf32>
    %105 = tpu.matmul %103, %104, %cst_57 {dimension_numbers = #tpu.dot_dimension_numbers<[1], [0], [0], [1], [0, 0, 1, 1], [], []>} : vector<8x128xbf16>, vector<128x512xbf16>, vector<8x512xf32> -> vector<8x512xf32>
    %106 = arith.addf %101, %105 : vector<8x512xf32>
    %c0_58 = arith.constant 0 : index
    %c0_59 = arith.constant 0 : index
    %c0_60 = arith.constant 0 : index
    %107 = vector.load %arg12[%c0_58, %c0_59, %c0_60] : memref<2x8x128xf32, #tpu.memory_space<vmem>>, vector<1x8x128xf32>
    %108 = vector.shape_cast %107 : vector<1x8x128xf32> to vector<8x128xf32>
    %109 = vector.extract_strided_slice %106 {offsets = [0, 0], sizes = [8, 128], strides = [1, 1]} : vector<8x512xf32> to vector<8x128xf32>
    %110 = arith.negf %109 : vector<8x128xf32>
    %111 = math.exp %110 : vector<8x128xf32>
    %cst_61 = arith.constant 1.000000e+00 : f32
    %112 = vector.broadcast %cst_61 : f32 to vector<8x128xf32>
    %113 = arith.addf %112, %111 : vector<8x128xf32>
    %114 = arith.divf %112, %113 : vector<8x128xf32>
    %115 = vector.extract_strided_slice %106 {offsets = [0, 128], sizes = [8, 128], strides = [1, 1]} : vector<8x512xf32> to vector<8x128xf32>
    %116 = arith.negf %115 : vector<8x128xf32>
    %117 = math.exp %116 : vector<8x128xf32>
    %cst_62 = arith.constant 1.000000e+00 : f32
    %118 = vector.broadcast %cst_62 : f32 to vector<8x128xf32>
    %119 = arith.addf %118, %117 : vector<8x128xf32>
    %120 = arith.divf %118, %119 : vector<8x128xf32>
    %121 = vector.extract_strided_slice %106 {offsets = [0, 256], sizes = [8, 128], strides = [1, 1]} : vector<8x512xf32> to vector<8x128xf32>
    %122 = math.tanh %121 : vector<8x128xf32>
    %123 = vector.extract_strided_slice %106 {offsets = [0, 384], sizes = [8, 128], strides = [1, 1]} : vector<8x512xf32> to vector<8x128xf32>
    %124 = arith.negf %123 : vector<8x128xf32>
    %125 = math.exp %124 : vector<8x128xf32>
    %cst_63 = arith.constant 1.000000e+00 : f32
    %126 = vector.broadcast %cst_63 : f32 to vector<8x128xf32>
    %127 = arith.addf %126, %125 : vector<8x128xf32>
    %128 = arith.divf %126, %127 : vector<8x128xf32>
    %129 = arith.mulf %120, %108 : vector<8x128xf32>
    %130 = arith.mulf %114, %122 : vector<8x128xf32>
    %131 = arith.addf %129, %130 : vector<8x128xf32>
    %132 = math.tanh %131 : vector<8x128xf32>
    %133 = arith.mulf %128, %132 : vector<8x128xf32>
    %c0_64 = arith.constant 0 : index
    %c0_65 = arith.constant 0 : index
    %c0_66 = arith.constant 0 : index
    %134 = vector.load %arg11[%c0_64, %c0_65, %c0_66] : memref<2x8x128xf32, #tpu.memory_space<vmem>>, vector<1x8x128xf32>
    %135 = vector.shape_cast %134 : vector<1x8x128xf32> to vector<8x128xf32>
    %136 = vector.shape_cast %133 : vector<8x128xf32> to vector<1x8x128xf32>
    tpu.vector_store %arg11[%c0_64, %c0_65, %c0_66], %136 {strides = array<i32>} : memref<2x8x128xf32, #tpu.memory_space<vmem>>, vector<1x8x128xf32>,
    %c0_67 = arith.constant 0 : index
    %c0_68 = arith.constant 0 : index
    %c0_69 = arith.constant 0 : index
    %137 = vector.load %arg12[%c0_67, %c0_68, %c0_69] : memref<2x8x128xf32, #tpu.memory_space<vmem>>, vector<1x8x128xf32>
    %138 = vector.shape_cast %137 : vector<1x8x128xf32> to vector<8x128xf32>
    %139 = vector.shape_cast %131 : vector<8x128xf32> to vector<1x8x128xf32>
    tpu.vector_store %arg12[%c0_67, %c0_68, %c0_69], %139 {strides = array<i32>} : memref<2x8x128xf32, #tpu.memory_space<vmem>>, vector<1x8x128xf32>,
    %140 = arith.truncf %133 : vector<8x128xf32> to vector<8x128xbf16>
    %c0_70 = arith.constant 0 : index
    %c0_71 = arith.constant 0 : index
    %c0_72 = arith.constant 0 : index
    %141 = vector.load %arg13[%c0_70, %c0_71, %c0_72] : memref<2x8x128xbf16, #tpu.memory_space<vmem>>, vector<1x8x128xbf16>
    %142 = vector.shape_cast %141 : vector<1x8x128xbf16> to vector<8x128xbf16>
    %143 = vector.shape_cast %140 : vector<8x128xbf16> to vector<1x8x128xbf16>
    tpu.vector_store %arg13[%c0_70, %c0_71, %c0_72], %143 {strides = array<i32>} : memref<2x8x128xbf16, #tpu.memory_space<vmem>>, vector<1x8x128xbf16>,
    %c0_73 = arith.constant 0 : index
    %c0_74 = arith.constant 0 : index
    %144 = vector.load %arg5[%c0_73, %c0_74] : memref<128x512xbf16, #tpu.memory_space<vmem>>, vector<128x512xbf16>
    %cst_75 = arith.constant dense<0.000000e+00> : vector<8x512xf32>
    %145 = tpu.matmul %140, %144, %cst_75 {dimension_numbers = #tpu.dot_dimension_numbers<[1], [0], [0], [1], [0, 0, 1, 1], [], []>} : vector<8x128xbf16>, vector<128x512xbf16>, vector<8x512xf32> -> vector<8x512xf32>
    %c1_76 = arith.constant 1 : index
    %c0_77 = arith.constant 0 : index
    %c0_78 = arith.constant 0 : index
    %146 = vector.load %arg13[%c1_76, %c0_77, %c0_78] : memref<2x8x128xbf16, #tpu.memory_space<vmem>>, vector<1x8x128xbf16>
    %147 = vector.shape_cast %146 : vector<1x8x128xbf16> to vector<8x128xbf16>
    %c0_79 = arith.constant 0 : index
    %c0_80 = arith.constant 0 : index
    %148 = vector.load %arg6[%c0_79, %c0_80] : memref<128x512xbf16, #tpu.memory_space<vmem>>, vector<128x512xbf16>
    %cst_81 = arith.constant dense<0.000000e+00> : vector<8x512xf32>
    %149 = tpu.matmul %147, %148, %cst_81 {dimension_numbers = #tpu.dot_dimension_numbers<[1], [0], [0], [1], [0, 0, 1, 1], [], []>} : vector<8x128xbf16>, vector<128x512xbf16>, vector<8x512xf32> -> vector<8x512xf32>
    %150 = arith.addf %145, %149 : vector<8x512xf32>
    %c0_82 = arith.constant 0 : index
    %c0_83 = arith.constant 0 : index
    %151 = vector.load %arg7[%c0_82, %c0_83] : memref<1x512xf32, #tpu.memory_space<vmem>>, vector<1x512xf32>
    %152 = vector.broadcast %151 : vector<1x512xf32> to vector<8x512xf32>
    %153 = arith.addf %150, %152 : vector<8x512xf32>
    %c1_84 = arith.constant 1 : index
    %c0_85 = arith.constant 0 : index
    %c0_86 = arith.constant 0 : index
    %154 = vector.load %arg12[%c1_84, %c0_85, %c0_86] : memref<2x8x128xf32, #tpu.memory_space<vmem>>, vector<1x8x128xf32>
    %155 = vector.shape_cast %154 : vector<1x8x128xf32> to vector<8x128xf32>
    %156 = vector.extract_strided_slice %153 {offsets = [0, 0], sizes = [8, 128], strides = [1, 1]} : vector<8x512xf32> to vector<8x128xf32>
    %157 = arith.negf %156 : vector<8x128xf32>
    %158 = math.exp %157 : vector<8x128xf32>
    %cst_87 = arith.constant 1.000000e+00 : f32
    %159 = vector.broadcast %cst_87 : f32 to vector<8x128xf32>
    %160 = arith.addf %159, %158 : vector<8x128xf32>
    %161 = arith.divf %159, %160 : vector<8x128xf32>
    %162 = vector.extract_strided_slice %153 {offsets = [0, 128], sizes = [8, 128], strides = [1, 1]} : vector<8x512xf32> to vector<8x128xf32>
    %163 = arith.negf %162 : vector<8x128xf32>
    %164 = math.exp %163 : vector<8x128xf32>
    %cst_88 = arith.constant 1.000000e+00 : f32
    %165 = vector.broadcast %cst_88 : f32 to vector<8x128xf32>
    %166 = arith.addf %165, %164 : vector<8x128xf32>
    %167 = arith.divf %165, %166 : vector<8x128xf32>
    %168 = vector.extract_strided_slice %153 {offsets = [0, 256], sizes = [8, 128], strides = [1, 1]} : vector<8x512xf32> to vector<8x128xf32>
    %169 = math.tanh %168 : vector<8x128xf32>
    %170 = vector.extract_strided_slice %153 {offsets = [0, 384], sizes = [8, 128], strides = [1, 1]} : vector<8x512xf32> to vector<8x128xf32>
    %171 = arith.negf %170 : vector<8x128xf32>
    %172 = math.exp %171 : vector<8x128xf32>
    %cst_89 = arith.constant 1.000000e+00 : f32
    %173 = vector.broadcast %cst_89 : f32 to vector<8x128xf32>
    %174 = arith.addf %173, %172 : vector<8x128xf32>
    %175 = arith.divf %173, %174 : vector<8x128xf32>
    %176 = arith.mulf %167, %155 : vector<8x128xf32>
    %177 = arith.mulf %161, %169 : vector<8x128xf32>
    %178 = arith.addf %176, %177 : vector<8x128xf32>
    %179 = math.tanh %178 : vector<8x128xf32>
    %180 = arith.mulf %175, %179 : vector<8x128xf32>
    %c1_90 = arith.constant 1 : index
    %c0_91 = arith.constant 0 : index
    %c0_92 = arith.constant 0 : index
    %181 = vector.load %arg11[%c1_90, %c0_91, %c0_92] : memref<2x8x128xf32, #tpu.memory_space<vmem>>, vector<1x8x128xf32>
    %182 = vector.shape_cast %181 : vector<1x8x128xf32> to vector<8x128xf32>
    %183 = vector.shape_cast %180 : vector<8x128xf32> to vector<1x8x128xf32>
    tpu.vector_store %arg11[%c1_90, %c0_91, %c0_92], %183 {strides = array<i32>} : memref<2x8x128xf32, #tpu.memory_space<vmem>>, vector<1x8x128xf32>,
    %c1_93 = arith.constant 1 : index
    %c0_94 = arith.constant 0 : index
    %c0_95 = arith.constant 0 : index
    %184 = vector.load %arg12[%c1_93, %c0_94, %c0_95] : memref<2x8x128xf32, #tpu.memory_space<vmem>>, vector<1x8x128xf32>
    %185 = vector.shape_cast %184 : vector<1x8x128xf32> to vector<8x128xf32>
    %186 = vector.shape_cast %178 : vector<8x128xf32> to vector<1x8x128xf32>
    tpu.vector_store %arg12[%c1_93, %c0_94, %c0_95], %186 {strides = array<i32>} : memref<2x8x128xf32, #tpu.memory_space<vmem>>, vector<1x8x128xf32>,
    %187 = arith.truncf %180 : vector<8x128xf32> to vector<8x128xbf16>
    %c1_96 = arith.constant 1 : index
    %c0_97 = arith.constant 0 : index
    %c0_98 = arith.constant 0 : index
    %188 = vector.load %arg13[%c1_96, %c0_97, %c0_98] : memref<2x8x128xbf16, #tpu.memory_space<vmem>>, vector<1x8x128xbf16>
    %189 = vector.shape_cast %188 : vector<1x8x128xbf16> to vector<8x128xbf16>
    %190 = vector.shape_cast %187 : vector<8x128xbf16> to vector<1x8x128xbf16>
    tpu.vector_store %arg13[%c1_96, %c0_97, %c0_98], %190 {strides = array<i32>} : memref<2x8x128xbf16, #tpu.memory_space<vmem>>, vector<1x8x128xbf16>,
    %191 = arith.index_cast %c1_i32 : i32 to index
    %c0_99 = arith.constant 0 : index
    %c0_100 = arith.constant 0 : index
    %192 = vector.load %arg8[%191, %c0_99, %c0_100] : memref<8x8x128xbf16, #tpu.memory_space<vmem>>, vector<1x8x128xbf16>
    %193 = vector.shape_cast %192 : vector<1x8x128xbf16> to vector<8x128xbf16>
    %194 = vector.shape_cast %187 : vector<8x128xbf16> to vector<1x8x128xbf16>
    tpu.vector_store %arg8[%191, %c0_99, %c0_100], %194 {strides = array<i32>} : memref<8x8x128xbf16, #tpu.memory_space<vmem>>, vector<1x8x128xbf16>,
    %c2_i32 = arith.constant 2 : i32
    %195 = arith.index_cast %c2_i32 : i32 to index
    %c0_101 = arith.constant 0 : index
    %c0_102 = arith.constant 0 : index
    %196 = vector.load %arg1[%195, %c0_101, %c0_102] : memref<8x8x512xf32, #tpu.memory_space<vmem>>, vector<1x8x512xf32>
    %197 = vector.shape_cast %196 : vector<1x8x512xf32> to vector<8x512xf32>
    %c0_103 = arith.constant 0 : index
    %c0_104 = arith.constant 0 : index
    %c0_105 = arith.constant 0 : index
    %198 = vector.load %arg13[%c0_103, %c0_104, %c0_105] : memref<2x8x128xbf16, #tpu.memory_space<vmem>>, vector<1x8x128xbf16>
    %199 = vector.shape_cast %198 : vector<1x8x128xbf16> to vector<8x128xbf16>
    %c0_106 = arith.constant 0 : index
    %c0_107 = arith.constant 0 : index
    %200 = vector.load %arg4[%c0_106, %c0_107] : memref<128x512xbf16, #tpu.memory_space<vmem>>, vector<128x512xbf16>
    %cst_108 = arith.constant dense<0.000000e+00> : vector<8x512xf32>
    %201 = tpu.matmul %199, %200, %cst_108 {dimension_numbers = #tpu.dot_dimension_numbers<[1], [0], [0], [1], [0, 0, 1, 1], [], []>} : vector<8x128xbf16>, vector<128x512xbf16>, vector<8x512xf32> -> vector<8x512xf32>
    %202 = arith.addf %197, %201 : vector<8x512xf32>
    %c0_109 = arith.constant 0 : index
    %c0_110 = arith.constant 0 : index
    %c0_111 = arith.constant 0 : index
    %203 = vector.load %arg12[%c0_109, %c0_110, %c0_111] : memref<2x8x128xf32, #tpu.memory_space<vmem>>, vector<1x8x128xf32>
    %204 = vector.shape_cast %203 : vector<1x8x128xf32> to vector<8x128xf32>
    %205 = vector.extract_strided_slice %202 {offsets = [0, 0], sizes = [8, 128], strides = [1, 1]} : vector<8x512xf32> to vector<8x128xf32>
    %206 = arith.negf %205 : vector<8x128xf32>
    %207 = math.exp %206 : vector<8x128xf32>
    %cst_112 = arith.constant 1.000000e+00 : f32
    %208 = vector.broadcast %cst_112 : f32 to vector<8x128xf32>
    %209 = arith.addf %208, %207 : vector<8x128xf32>
    %210 = arith.divf %208, %209 : vector<8x128xf32>
    %211 = vector.extract_strided_slice %202 {offsets = [0, 128], sizes = [8, 128], strides = [1, 1]} : vector<8x512xf32> to vector<8x128xf32>
    %212 = arith.negf %211 : vector<8x128xf32>
    %213 = math.exp %212 : vector<8x128xf32>
    %cst_113 = arith.constant 1.000000e+00 : f32
    %214 = vector.broadcast %cst_113 : f32 to vector<8x128xf32>
    %215 = arith.addf %214, %213 : vector<8x128xf32>
    %216 = arith.divf %214, %215 : vector<8x128xf32>
    %217 = vector.extract_strided_slice %202 {offsets = [0, 256], sizes = [8, 128], strides = [1, 1]} : vector<8x512xf32> to vector<8x128xf32>
    %218 = math.tanh %217 : vector<8x128xf32>
    %219 = vector.extract_strided_slice %202 {offsets = [0, 384], sizes = [8, 128], strides = [1, 1]} : vector<8x512xf32> to vector<8x128xf32>
    %220 = arith.negf %219 : vector<8x128xf32>
    %221 = math.exp %220 : vector<8x128xf32>
    %cst_114 = arith.constant 1.000000e+00 : f32
    %222 = vector.broadcast %cst_114 : f32 to vector<8x128xf32>
    %223 = arith.addf %222, %221 : vector<8x128xf32>
    %224 = arith.divf %222, %223 : vector<8x128xf32>
    %225 = arith.mulf %216, %204 : vector<8x128xf32>
    %226 = arith.mulf %210, %218 : vector<8x128xf32>
    %227 = arith.addf %225, %226 : vector<8x128xf32>
    %228 = math.tanh %227 : vector<8x128xf32>
    %229 = arith.mulf %224, %228 : vector<8x128xf32>
    %c0_115 = arith.constant 0 : index
    %c0_116 = arith.constant 0 : index
    %c0_117 = arith.constant 0 : index
    %230 = vector.load %arg11[%c0_115, %c0_116, %c0_117] : memref<2x8x128xf32, #tpu.memory_space<vmem>>, vector<1x8x128xf32>
    %231 = vector.shape_cast %230 : vector<1x8x128xf32> to vector<8x128xf32>
    %232 = vector.shape_cast %229 : vector<8x128xf32> to vector<1x8x128xf32>
    tpu.vector_store %arg11[%c0_115, %c0_116, %c0_117], %232 {strides = array<i32>} : memref<2x8x128xf32, #tpu.memory_space<vmem>>, vector<1x8x128xf32>,
    %c0_118 = arith.constant 0 : index
    %c0_119 = arith.constant 0 : index
    %c0_120 = arith.constant 0 : index
    %233 = vector.load %arg12[%c0_118, %c0_119, %c0_120] : memref<2x8x128xf32, #tpu.memory_space<vmem>>, vector<1x8x128xf32>
    %234 = vector.shape_cast %233 : vector<1x8x128xf32> to vector<8x128xf32>
    %235 = vector.shape_cast %227 : vector<8x128xf32> to vector<1x8x128xf32>
    tpu.vector_store %arg12[%c0_118, %c0_119, %c0_120], %235 {strides = array<i32>} : memref<2x8x128xf32, #tpu.memory_space<vmem>>, vector<1x8x128xf32>,
    %236 = arith.truncf %229 : vector<8x128xf32> to vector<8x128xbf16>
    %c0_121 = arith.constant 0 : index
    %c0_122 = arith.constant 0 : index
    %c0_123 = arith.constant 0 : index
    %237 = vector.load %arg13[%c0_121, %c0_122, %c0_123] : memref<2x8x128xbf16, #tpu.memory_space<vmem>>, vector<1x8x128xbf16>
    %238 = vector.shape_cast %237 : vector<1x8x128xbf16> to vector<8x128xbf16>
    %239 = vector.shape_cast %236 : vector<8x128xbf16> to vector<1x8x128xbf16>
    tpu.vector_store %arg13[%c0_121, %c0_122, %c0_123], %239 {strides = array<i32>} : memref<2x8x128xbf16, #tpu.memory_space<vmem>>, vector<1x8x128xbf16>,
    %c0_124 = arith.constant 0 : index
    %c0_125 = arith.constant 0 : index
    %240 = vector.load %arg5[%c0_124, %c0_125] : memref<128x512xbf16, #tpu.memory_space<vmem>>, vector<128x512xbf16>
    %cst_126 = arith.constant dense<0.000000e+00> : vector<8x512xf32>
    %241 = tpu.matmul %236, %240, %cst_126 {dimension_numbers = #tpu.dot_dimension_numbers<[1], [0], [0], [1], [0, 0, 1, 1], [], []>} : vector<8x128xbf16>, vector<128x512xbf16>, vector<8x512xf32> -> vector<8x512xf32>
    %c1_127 = arith.constant 1 : index
    %c0_128 = arith.constant 0 : index
    %c0_129 = arith.constant 0 : index
    %242 = vector.load %arg13[%c1_127, %c0_128, %c0_129] : memref<2x8x128xbf16, #tpu.memory_space<vmem>>, vector<1x8x128xbf16>
    %243 = vector.shape_cast %242 : vector<1x8x128xbf16> to vector<8x128xbf16>
    %c0_130 = arith.constant 0 : index
    %c0_131 = arith.constant 0 : index
    %244 = vector.load %arg6[%c0_130, %c0_131] : memref<128x512xbf16, #tpu.memory_space<vmem>>, vector<128x512xbf16>
    %cst_132 = arith.constant dense<0.000000e+00> : vector<8x512xf32>
    %245 = tpu.matmul %243, %244, %cst_132 {dimension_numbers = #tpu.dot_dimension_numbers<[1], [0], [0], [1], [0, 0, 1, 1], [], []>} : vector<8x128xbf16>, vector<128x512xbf16>, vector<8x512xf32> -> vector<8x512xf32>
    %246 = arith.addf %241, %245 : vector<8x512xf32>
    %c0_133 = arith.constant 0 : index
    %c0_134 = arith.constant 0 : index
    %247 = vector.load %arg7[%c0_133, %c0_134] : memref<1x512xf32, #tpu.memory_space<vmem>>, vector<1x512xf32>
    %248 = vector.broadcast %247 : vector<1x512xf32> to vector<8x512xf32>
    %249 = arith.addf %246, %248 : vector<8x512xf32>
    %c1_135 = arith.constant 1 : index
    %c0_136 = arith.constant 0 : index
    %c0_137 = arith.constant 0 : index
    %250 = vector.load %arg12[%c1_135, %c0_136, %c0_137] : memref<2x8x128xf32, #tpu.memory_space<vmem>>, vector<1x8x128xf32>
    %251 = vector.shape_cast %250 : vector<1x8x128xf32> to vector<8x128xf32>
    %252 = vector.extract_strided_slice %249 {offsets = [0, 0], sizes = [8, 128], strides = [1, 1]} : vector<8x512xf32> to vector<8x128xf32>
    %253 = arith.negf %252 : vector<8x128xf32>
    %254 = math.exp %253 : vector<8x128xf32>
    %cst_138 = arith.constant 1.000000e+00 : f32
    %255 = vector.broadcast %cst_138 : f32 to vector<8x128xf32>
    %256 = arith.addf %255, %254 : vector<8x128xf32>
    %257 = arith.divf %255, %256 : vector<8x128xf32>
    %258 = vector.extract_strided_slice %249 {offsets = [0, 128], sizes = [8, 128], strides = [1, 1]} : vector<8x512xf32> to vector<8x128xf32>
    %259 = arith.negf %258 : vector<8x128xf32>
    %260 = math.exp %259 : vector<8x128xf32>
    %cst_139 = arith.constant 1.000000e+00 : f32
    %261 = vector.broadcast %cst_139 : f32 to vector<8x128xf32>
    %262 = arith.addf %261, %260 : vector<8x128xf32>
    %263 = arith.divf %261, %262 : vector<8x128xf32>
    %264 = vector.extract_strided_slice %249 {offsets = [0, 256], sizes = [8, 128], strides = [1, 1]} : vector<8x512xf32> to vector<8x128xf32>
    %265 = math.tanh %264 : vector<8x128xf32>
    %266 = vector.extract_strided_slice %249 {offsets = [0, 384], sizes = [8, 128], strides = [1, 1]} : vector<8x512xf32> to vector<8x128xf32>
    %267 = arith.negf %266 : vector<8x128xf32>
    %268 = math.exp %267 : vector<8x128xf32>
    %cst_140 = arith.constant 1.000000e+00 : f32
    %269 = vector.broadcast %cst_140 : f32 to vector<8x128xf32>
    %270 = arith.addf %269, %268 : vector<8x128xf32>
    %271 = arith.divf %269, %270 : vector<8x128xf32>
    %272 = arith.mulf %263, %251 : vector<8x128xf32>
    %273 = arith.mulf %257, %265 : vector<8x128xf32>
    %274 = arith.addf %272, %273 : vector<8x128xf32>
    %275 = math.tanh %274 : vector<8x128xf32>
    %276 = arith.mulf %271, %275 : vector<8x128xf32>
    %c1_141 = arith.constant 1 : index
    %c0_142 = arith.constant 0 : index
    %c0_143 = arith.constant 0 : index
    %277 = vector.load %arg11[%c1_141, %c0_142, %c0_143] : memref<2x8x128xf32, #tpu.memory_space<vmem>>, vector<1x8x128xf32>
    %278 = vector.shape_cast %277 : vector<1x8x128xf32> to vector<8x128xf32>
    %279 = vector.shape_cast %276 : vector<8x128xf32> to vector<1x8x128xf32>
    tpu.vector_store %arg11[%c1_141, %c0_142, %c0_143], %279 {strides = array<i32>} : memref<2x8x128xf32, #tpu.memory_space<vmem>>, vector<1x8x128xf32>,
    %c1_144 = arith.constant 1 : index
    %c0_145 = arith.constant 0 : index
    %c0_146 = arith.constant 0 : index
    %280 = vector.load %arg12[%c1_144, %c0_145, %c0_146] : memref<2x8x128xf32, #tpu.memory_space<vmem>>, vector<1x8x128xf32>
    %281 = vector.shape_cast %280 : vector<1x8x128xf32> to vector<8x128xf32>
    %282 = vector.shape_cast %274 : vector<8x128xf32> to vector<1x8x128xf32>
    tpu.vector_store %arg12[%c1_144, %c0_145, %c0_146], %282 {strides = array<i32>} : memref<2x8x128xf32, #tpu.memory_space<vmem>>, vector<1x8x128xf32>,
    %283 = arith.truncf %276 : vector<8x128xf32> to vector<8x128xbf16>
    %c1_147 = arith.constant 1 : index
    %c0_148 = arith.constant 0 : index
    %c0_149 = arith.constant 0 : index
    %284 = vector.load %arg13[%c1_147, %c0_148, %c0_149] : memref<2x8x128xbf16, #tpu.memory_space<vmem>>, vector<1x8x128xbf16>
    %285 = vector.shape_cast %284 : vector<1x8x128xbf16> to vector<8x128xbf16>
    %286 = vector.shape_cast %283 : vector<8x128xbf16> to vector<1x8x128xbf16>
    tpu.vector_store %arg13[%c1_147, %c0_148, %c0_149], %286 {strides = array<i32>} : memref<2x8x128xbf16, #tpu.memory_space<vmem>>, vector<1x8x128xbf16>,
    %287 = arith.index_cast %c2_i32 : i32 to index
    %c0_150 = arith.constant 0 : index
    %c0_151 = arith.constant 0 : index
    %288 = vector.load %arg8[%287, %c0_150, %c0_151] : memref<8x8x128xbf16, #tpu.memory_space<vmem>>, vector<1x8x128xbf16>
    %289 = vector.shape_cast %288 : vector<1x8x128xbf16> to vector<8x128xbf16>
    %290 = vector.shape_cast %283 : vector<8x128xbf16> to vector<1x8x128xbf16>
    tpu.vector_store %arg8[%287, %c0_150, %c0_151], %290 {strides = array<i32>} : memref<8x8x128xbf16, #tpu.memory_space<vmem>>, vector<1x8x128xbf16>,
    %c3_i32 = arith.constant 3 : i32
    %291 = arith.index_cast %c3_i32 : i32 to index
    %c0_152 = arith.constant 0 : index
    %c0_153 = arith.constant 0 : index
    %292 = vector.load %arg1[%291, %c0_152, %c0_153] : memref<8x8x512xf32, #tpu.memory_space<vmem>>, vector<1x8x512xf32>
    %293 = vector.shape_cast %292 : vector<1x8x512xf32> to vector<8x512xf32>
    %c0_154 = arith.constant 0 : index
    %c0_155 = arith.constant 0 : index
    %c0_156 = arith.constant 0 : index
    %294 = vector.load %arg13[%c0_154, %c0_155, %c0_156] : memref<2x8x128xbf16, #tpu.memory_space<vmem>>, vector<1x8x128xbf16>
    %295 = vector.shape_cast %294 : vector<1x8x128xbf16> to vector<8x128xbf16>
    %c0_157 = arith.constant 0 : index
    %c0_158 = arith.constant 0 : index
    %296 = vector.load %arg4[%c0_157, %c0_158] : memref<128x512xbf16, #tpu.memory_space<vmem>>, vector<128x512xbf16>
    %cst_159 = arith.constant dense<0.000000e+00> : vector<8x512xf32>
    %297 = tpu.matmul %295, %296, %cst_159 {dimension_numbers = #tpu.dot_dimension_numbers<[1], [0], [0], [1], [0, 0, 1, 1], [], []>} : vector<8x128xbf16>, vector<128x512xbf16>, vector<8x512xf32> -> vector<8x512xf32>
    %298 = arith.addf %293, %297 : vector<8x512xf32>
    %c0_160 = arith.constant 0 : index
    %c0_161 = arith.constant 0 : index
    %c0_162 = arith.constant 0 : index
    %299 = vector.load %arg12[%c0_160, %c0_161, %c0_162] : memref<2x8x128xf32, #tpu.memory_space<vmem>>, vector<1x8x128xf32>
    %300 = vector.shape_cast %299 : vector<1x8x128xf32> to vector<8x128xf32>
    %301 = vector.extract_strided_slice %298 {offsets = [0, 0], sizes = [8, 128], strides = [1, 1]} : vector<8x512xf32> to vector<8x128xf32>
    %302 = arith.negf %301 : vector<8x128xf32>
    %303 = math.exp %302 : vector<8x128xf32>
    %cst_163 = arith.constant 1.000000e+00 : f32
    %304 = vector.broadcast %cst_163 : f32 to vector<8x128xf32>
    %305 = arith.addf %304, %303 : vector<8x128xf32>
    %306 = arith.divf %304, %305 : vector<8x128xf32>
    %307 = vector.extract_strided_slice %298 {offsets = [0, 128], sizes = [8, 128], strides = [1, 1]} : vector<8x512xf32> to vector<8x128xf32>
    %308 = arith.negf %307 : vector<8x128xf32>
    %309 = math.exp %308 : vector<8x128xf32>
    %cst_164 = arith.constant 1.000000e+00 : f32
    %310 = vector.broadcast %cst_164 : f32 to vector<8x128xf32>
    %311 = arith.addf %310, %309 : vector<8x128xf32>
    %312 = arith.divf %310, %311 : vector<8x128xf32>
    %313 = vector.extract_strided_slice %298 {offsets = [0, 256], sizes = [8, 128], strides = [1, 1]} : vector<8x512xf32> to vector<8x128xf32>
    %314 = math.tanh %313 : vector<8x128xf32>
    %315 = vector.extract_strided_slice %298 {offsets = [0, 384], sizes = [8, 128], strides = [1, 1]} : vector<8x512xf32> to vector<8x128xf32>
    %316 = arith.negf %315 : vector<8x128xf32>
    %317 = math.exp %316 : vector<8x128xf32>
    %cst_165 = arith.constant 1.000000e+00 : f32
    %318 = vector.broadcast %cst_165 : f32 to vector<8x128xf32>
    %319 = arith.addf %318, %317 : vector<8x128xf32>
    %320 = arith.divf %318, %319 : vector<8x128xf32>
    %321 = arith.mulf %312, %300 : vector<8x128xf32>
    %322 = arith.mulf %306, %314 : vector<8x128xf32>
    %323 = arith.addf %321, %322 : vector<8x128xf32>
    %324 = math.tanh %323 : vector<8x128xf32>
    %325 = arith.mulf %320, %324 : vector<8x128xf32>
    %c0_166 = arith.constant 0 : index
    %c0_167 = arith.constant 0 : index
    %c0_168 = arith.constant 0 : index
    %326 = vector.load %arg11[%c0_166, %c0_167, %c0_168] : memref<2x8x128xf32, #tpu.memory_space<vmem>>, vector<1x8x128xf32>
    %327 = vector.shape_cast %326 : vector<1x8x128xf32> to vector<8x128xf32>
    %328 = vector.shape_cast %325 : vector<8x128xf32> to vector<1x8x128xf32>
    tpu.vector_store %arg11[%c0_166, %c0_167, %c0_168], %328 {strides = array<i32>} : memref<2x8x128xf32, #tpu.memory_space<vmem>>, vector<1x8x128xf32>,
    %c0_169 = arith.constant 0 : index
    %c0_170 = arith.constant 0 : index
    %c0_171 = arith.constant 0 : index
    %329 = vector.load %arg12[%c0_169, %c0_170, %c0_171] : memref<2x8x128xf32, #tpu.memory_space<vmem>>, vector<1x8x128xf32>
    %330 = vector.shape_cast %329 : vector<1x8x128xf32> to vector<8x128xf32>
    %331 = vector.shape_cast %323 : vector<8x128xf32> to vector<1x8x128xf32>
    tpu.vector_store %arg12[%c0_169, %c0_170, %c0_171], %331 {strides = array<i32>} : memref<2x8x128xf32, #tpu.memory_space<vmem>>, vector<1x8x128xf32>,
    %332 = arith.truncf %325 : vector<8x128xf32> to vector<8x128xbf16>
    %c0_172 = arith.constant 0 : index
    %c0_173 = arith.constant 0 : index
    %c0_174 = arith.constant 0 : index
    %333 = vector.load %arg13[%c0_172, %c0_173, %c0_174] : memref<2x8x128xbf16, #tpu.memory_space<vmem>>, vector<1x8x128xbf16>
    %334 = vector.shape_cast %333 : vector<1x8x128xbf16> to vector<8x128xbf16>
    %335 = vector.shape_cast %332 : vector<8x128xbf16> to vector<1x8x128xbf16>
    tpu.vector_store %arg13[%c0_172, %c0_173, %c0_174], %335 {strides = array<i32>} : memref<2x8x128xbf16, #tpu.memory_space<vmem>>, vector<1x8x128xbf16>,
    %c0_175 = arith.constant 0 : index
    %c0_176 = arith.constant 0 : index
    %336 = vector.load %arg5[%c0_175, %c0_176] : memref<128x512xbf16, #tpu.memory_space<vmem>>, vector<128x512xbf16>
    %cst_177 = arith.constant dense<0.000000e+00> : vector<8x512xf32>
    %337 = tpu.matmul %332, %336, %cst_177 {dimension_numbers = #tpu.dot_dimension_numbers<[1], [0], [0], [1], [0, 0, 1, 1], [], []>} : vector<8x128xbf16>, vector<128x512xbf16>, vector<8x512xf32> -> vector<8x512xf32>
    %c1_178 = arith.constant 1 : index
    %c0_179 = arith.constant 0 : index
    %c0_180 = arith.constant 0 : index
    %338 = vector.load %arg13[%c1_178, %c0_179, %c0_180] : memref<2x8x128xbf16, #tpu.memory_space<vmem>>, vector<1x8x128xbf16>
    %339 = vector.shape_cast %338 : vector<1x8x128xbf16> to vector<8x128xbf16>
    %c0_181 = arith.constant 0 : index
    %c0_182 = arith.constant 0 : index
    %340 = vector.load %arg6[%c0_181, %c0_182] : memref<128x512xbf16, #tpu.memory_space<vmem>>, vector<128x512xbf16>
    %cst_183 = arith.constant dense<0.000000e+00> : vector<8x512xf32>
    %341 = tpu.matmul %339, %340, %cst_183 {dimension_numbers = #tpu.dot_dimension_numbers<[1], [0], [0], [1], [0, 0, 1, 1], [], []>} : vector<8x128xbf16>, vector<128x512xbf16>, vector<8x512xf32> -> vector<8x512xf32>
    %342 = arith.addf %337, %341 : vector<8x512xf32>
    %c0_184 = arith.constant 0 : index
    %c0_185 = arith.constant 0 : index
    %343 = vector.load %arg7[%c0_184, %c0_185] : memref<1x512xf32, #tpu.memory_space<vmem>>, vector<1x512xf32>
    %344 = vector.broadcast %343 : vector<1x512xf32> to vector<8x512xf32>
    %345 = arith.addf %342, %344 : vector<8x512xf32>
    %c1_186 = arith.constant 1 : index
    %c0_187 = arith.constant 0 : index
    %c0_188 = arith.constant 0 : index
    %346 = vector.load %arg12[%c1_186, %c0_187, %c0_188] : memref<2x8x128xf32, #tpu.memory_space<vmem>>, vector<1x8x128xf32>
    %347 = vector.shape_cast %346 : vector<1x8x128xf32> to vector<8x128xf32>
    %348 = vector.extract_strided_slice %345 {offsets = [0, 0], sizes = [8, 128], strides = [1, 1]} : vector<8x512xf32> to vector<8x128xf32>
    %349 = arith.negf %348 : vector<8x128xf32>
    %350 = math.exp %349 : vector<8x128xf32>
    %cst_189 = arith.constant 1.000000e+00 : f32
    %351 = vector.broadcast %cst_189 : f32 to vector<8x128xf32>
    %352 = arith.addf %351, %350 : vector<8x128xf32>
    %353 = arith.divf %351, %352 : vector<8x128xf32>
    %354 = vector.extract_strided_slice %345 {offsets = [0, 128], sizes = [8, 128], strides = [1, 1]} : vector<8x512xf32> to vector<8x128xf32>
    %355 = arith.negf %354 : vector<8x128xf32>
    %356 = math.exp %355 : vector<8x128xf32>
    %cst_190 = arith.constant 1.000000e+00 : f32
    %357 = vector.broadcast %cst_190 : f32 to vector<8x128xf32>
    %358 = arith.addf %357, %356 : vector<8x128xf32>
    %359 = arith.divf %357, %358 : vector<8x128xf32>
    %360 = vector.extract_strided_slice %345 {offsets = [0, 256], sizes = [8, 128], strides = [1, 1]} : vector<8x512xf32> to vector<8x128xf32>
    %361 = math.tanh %360 : vector<8x128xf32>
    %362 = vector.extract_strided_slice %345 {offsets = [0, 384], sizes = [8, 128], strides = [1, 1]} : vector<8x512xf32> to vector<8x128xf32>
    %363 = arith.negf %362 : vector<8x128xf32>
    %364 = math.exp %363 : vector<8x128xf32>
    %cst_191 = arith.constant 1.000000e+00 : f32
    %365 = vector.broadcast %cst_191 : f32 to vector<8x128xf32>
    %366 = arith.addf %365, %364 : vector<8x128xf32>
    %367 = arith.divf %365, %366 : vector<8x128xf32>
    %368 = arith.mulf %359, %347 : vector<8x128xf32>
    %369 = arith.mulf %353, %361 : vector<8x128xf32>
    %370 = arith.addf %368, %369 : vector<8x128xf32>
    %371 = math.tanh %370 : vector<8x128xf32>
    %372 = arith.mulf %367, %371 : vector<8x128xf32>
    %c1_192 = arith.constant 1 : index
    %c0_193 = arith.constant 0 : index
    %c0_194 = arith.constant 0 : index
    %373 = vector.load %arg11[%c1_192, %c0_193, %c0_194] : memref<2x8x128xf32, #tpu.memory_space<vmem>>, vector<1x8x128xf32>
    %374 = vector.shape_cast %373 : vector<1x8x128xf32> to vector<8x128xf32>
    %375 = vector.shape_cast %372 : vector<8x128xf32> to vector<1x8x128xf32>
    tpu.vector_store %arg11[%c1_192, %c0_193, %c0_194], %375 {strides = array<i32>} : memref<2x8x128xf32, #tpu.memory_space<vmem>>, vector<1x8x128xf32>,
    %c1_195 = arith.constant 1 : index
    %c0_196 = arith.constant 0 : index
    %c0_197 = arith.constant 0 : index
    %376 = vector.load %arg12[%c1_195, %c0_196, %c0_197] : memref<2x8x128xf32, #tpu.memory_space<vmem>>, vector<1x8x128xf32>
    %377 = vector.shape_cast %376 : vector<1x8x128xf32> to vector<8x128xf32>
    %378 = vector.shape_cast %370 : vector<8x128xf32> to vector<1x8x128xf32>
    tpu.vector_store %arg12[%c1_195, %c0_196, %c0_197], %378 {strides = array<i32>} : memref<2x8x128xf32, #tpu.memory_space<vmem>>, vector<1x8x128xf32>,
    %379 = arith.truncf %372 : vector<8x128xf32> to vector<8x128xbf16>
    %c1_198 = arith.constant 1 : index
    %c0_199 = arith.constant 0 : index
    %c0_200 = arith.constant 0 : index
    %380 = vector.load %arg13[%c1_198, %c0_199, %c0_200] : memref<2x8x128xbf16, #tpu.memory_space<vmem>>, vector<1x8x128xbf16>
    %381 = vector.shape_cast %380 : vector<1x8x128xbf16> to vector<8x128xbf16>
    %382 = vector.shape_cast %379 : vector<8x128xbf16> to vector<1x8x128xbf16>
    tpu.vector_store %arg13[%c1_198, %c0_199, %c0_200], %382 {strides = array<i32>} : memref<2x8x128xbf16, #tpu.memory_space<vmem>>, vector<1x8x128xbf16>,
    %383 = arith.index_cast %c3_i32 : i32 to index
    %c0_201 = arith.constant 0 : index
    %c0_202 = arith.constant 0 : index
    %384 = vector.load %arg8[%383, %c0_201, %c0_202] : memref<8x8x128xbf16, #tpu.memory_space<vmem>>, vector<1x8x128xbf16>
    %385 = vector.shape_cast %384 : vector<1x8x128xbf16> to vector<8x128xbf16>
    %386 = vector.shape_cast %379 : vector<8x128xbf16> to vector<1x8x128xbf16>
    tpu.vector_store %arg8[%383, %c0_201, %c0_202], %386 {strides = array<i32>} : memref<8x8x128xbf16, #tpu.memory_space<vmem>>, vector<1x8x128xbf16>,
    %c4_i32 = arith.constant 4 : i32
    %387 = arith.index_cast %c4_i32 : i32 to index
    %c0_203 = arith.constant 0 : index
    %c0_204 = arith.constant 0 : index
    %388 = vector.load %arg1[%387, %c0_203, %c0_204] : memref<8x8x512xf32, #tpu.memory_space<vmem>>, vector<1x8x512xf32>
    %389 = vector.shape_cast %388 : vector<1x8x512xf32> to vector<8x512xf32>
    %c0_205 = arith.constant 0 : index
    %c0_206 = arith.constant 0 : index
    %c0_207 = arith.constant 0 : index
    %390 = vector.load %arg13[%c0_205, %c0_206, %c0_207] : memref<2x8x128xbf16, #tpu.memory_space<vmem>>, vector<1x8x128xbf16>
    %391 = vector.shape_cast %390 : vector<1x8x128xbf16> to vector<8x128xbf16>
    %c0_208 = arith.constant 0 : index
    %c0_209 = arith.constant 0 : index
    %392 = vector.load %arg4[%c0_208, %c0_209] : memref<128x512xbf16, #tpu.memory_space<vmem>>, vector<128x512xbf16>
    %cst_210 = arith.constant dense<0.000000e+00> : vector<8x512xf32>
    %393 = tpu.matmul %391, %392, %cst_210 {dimension_numbers = #tpu.dot_dimension_numbers<[1], [0], [0], [1], [0, 0, 1, 1], [], []>} : vector<8x128xbf16>, vector<128x512xbf16>, vector<8x512xf32> -> vector<8x512xf32>
    %394 = arith.addf %389, %393 : vector<8x512xf32>
    %c0_211 = arith.constant 0 : index
    %c0_212 = arith.constant 0 : index
    %c0_213 = arith.constant 0 : index
    %395 = vector.load %arg12[%c0_211, %c0_212, %c0_213] : memref<2x8x128xf32, #tpu.memory_space<vmem>>, vector<1x8x128xf32>
    %396 = vector.shape_cast %395 : vector<1x8x128xf32> to vector<8x128xf32>
    %397 = vector.extract_strided_slice %394 {offsets = [0, 0], sizes = [8, 128], strides = [1, 1]} : vector<8x512xf32> to vector<8x128xf32>
    %398 = arith.negf %397 : vector<8x128xf32>
    %399 = math.exp %398 : vector<8x128xf32>
    %cst_214 = arith.constant 1.000000e+00 : f32
    %400 = vector.broadcast %cst_214 : f32 to vector<8x128xf32>
    %401 = arith.addf %400, %399 : vector<8x128xf32>
    %402 = arith.divf %400, %401 : vector<8x128xf32>
    %403 = vector.extract_strided_slice %394 {offsets = [0, 128], sizes = [8, 128], strides = [1, 1]} : vector<8x512xf32> to vector<8x128xf32>
    %404 = arith.negf %403 : vector<8x128xf32>
    %405 = math.exp %404 : vector<8x128xf32>
    %cst_215 = arith.constant 1.000000e+00 : f32
    %406 = vector.broadcast %cst_215 : f32 to vector<8x128xf32>
    %407 = arith.addf %406, %405 : vector<8x128xf32>
    %408 = arith.divf %406, %407 : vector<8x128xf32>
    %409 = vector.extract_strided_slice %394 {offsets = [0, 256], sizes = [8, 128], strides = [1, 1]} : vector<8x512xf32> to vector<8x128xf32>
    %410 = math.tanh %409 : vector<8x128xf32>
    %411 = vector.extract_strided_slice %394 {offsets = [0, 384], sizes = [8, 128], strides = [1, 1]} : vector<8x512xf32> to vector<8x128xf32>
    %412 = arith.negf %411 : vector<8x128xf32>
    %413 = math.exp %412 : vector<8x128xf32>
    %cst_216 = arith.constant 1.000000e+00 : f32
    %414 = vector.broadcast %cst_216 : f32 to vector<8x128xf32>
    %415 = arith.addf %414, %413 : vector<8x128xf32>
    %416 = arith.divf %414, %415 : vector<8x128xf32>
    %417 = arith.mulf %408, %396 : vector<8x128xf32>
    %418 = arith.mulf %402, %410 : vector<8x128xf32>
    %419 = arith.addf %417, %418 : vector<8x128xf32>
    %420 = math.tanh %419 : vector<8x128xf32>
    %421 = arith.mulf %416, %420 : vector<8x128xf32>
    %c0_217 = arith.constant 0 : index
    %c0_218 = arith.constant 0 : index
    %c0_219 = arith.constant 0 : index
    %422 = vector.load %arg11[%c0_217, %c0_218, %c0_219] : memref<2x8x128xf32, #tpu.memory_space<vmem>>, vector<1x8x128xf32>
    %423 = vector.shape_cast %422 : vector<1x8x128xf32> to vector<8x128xf32>
    %424 = vector.shape_cast %421 : vector<8x128xf32> to vector<1x8x128xf32>
    tpu.vector_store %arg11[%c0_217, %c0_218, %c0_219], %424 {strides = array<i32>} : memref<2x8x128xf32, #tpu.memory_space<vmem>>, vector<1x8x128xf32>,
    %c0_220 = arith.constant 0 : index
    %c0_221 = arith.constant 0 : index
    %c0_222 = arith.constant 0 : index
    %425 = vector.load %arg12[%c0_220, %c0_221, %c0_222] : memref<2x8x128xf32, #tpu.memory_space<vmem>>, vector<1x8x128xf32>
    %426 = vector.shape_cast %425 : vector<1x8x128xf32> to vector<8x128xf32>
    %427 = vector.shape_cast %419 : vector<8x128xf32> to vector<1x8x128xf32>
    tpu.vector_store %arg12[%c0_220, %c0_221, %c0_222], %427 {strides = array<i32>} : memref<2x8x128xf32, #tpu.memory_space<vmem>>, vector<1x8x128xf32>,
    %428 = arith.truncf %421 : vector<8x128xf32> to vector<8x128xbf16>
    %c0_223 = arith.constant 0 : index
    %c0_224 = arith.constant 0 : index
    %c0_225 = arith.constant 0 : index
    %429 = vector.load %arg13[%c0_223, %c0_224, %c0_225] : memref<2x8x128xbf16, #tpu.memory_space<vmem>>, vector<1x8x128xbf16>
    %430 = vector.shape_cast %429 : vector<1x8x128xbf16> to vector<8x128xbf16>
    %431 = vector.shape_cast %428 : vector<8x128xbf16> to vector<1x8x128xbf16>
    tpu.vector_store %arg13[%c0_223, %c0_224, %c0_225], %431 {strides = array<i32>} : memref<2x8x128xbf16, #tpu.memory_space<vmem>>, vector<1x8x128xbf16>,
    %c0_226 = arith.constant 0 : index
    %c0_227 = arith.constant 0 : index
    %432 = vector.load %arg5[%c0_226, %c0_227] : memref<128x512xbf16, #tpu.memory_space<vmem>>, vector<128x512xbf16>
    %cst_228 = arith.constant dense<0.000000e+00> : vector<8x512xf32>
    %433 = tpu.matmul %428, %432, %cst_228 {dimension_numbers = #tpu.dot_dimension_numbers<[1], [0], [0], [1], [0, 0, 1, 1], [], []>} : vector<8x128xbf16>, vector<128x512xbf16>, vector<8x512xf32> -> vector<8x512xf32>
    %c1_229 = arith.constant 1 : index
    %c0_230 = arith.constant 0 : index
    %c0_231 = arith.constant 0 : index
    %434 = vector.load %arg13[%c1_229, %c0_230, %c0_231] : memref<2x8x128xbf16, #tpu.memory_space<vmem>>, vector<1x8x128xbf16>
    %435 = vector.shape_cast %434 : vector<1x8x128xbf16> to vector<8x128xbf16>
    %c0_232 = arith.constant 0 : index
    %c0_233 = arith.constant 0 : index
    %436 = vector.load %arg6[%c0_232, %c0_233] : memref<128x512xbf16, #tpu.memory_space<vmem>>, vector<128x512xbf16>
    %cst_234 = arith.constant dense<0.000000e+00> : vector<8x512xf32>
    %437 = tpu.matmul %435, %436, %cst_234 {dimension_numbers = #tpu.dot_dimension_numbers<[1], [0], [0], [1], [0, 0, 1, 1], [], []>} : vector<8x128xbf16>, vector<128x512xbf16>, vector<8x512xf32> -> vector<8x512xf32>
    %438 = arith.addf %433, %437 : vector<8x512xf32>
    %c0_235 = arith.constant 0 : index
    %c0_236 = arith.constant 0 : index
    %439 = vector.load %arg7[%c0_235, %c0_236] : memref<1x512xf32, #tpu.memory_space<vmem>>, vector<1x512xf32>
    %440 = vector.broadcast %439 : vector<1x512xf32> to vector<8x512xf32>
    %441 = arith.addf %438, %440 : vector<8x512xf32>
    %c1_237 = arith.constant 1 : index
    %c0_238 = arith.constant 0 : index
    %c0_239 = arith.constant 0 : index
    %442 = vector.load %arg12[%c1_237, %c0_238, %c0_239] : memref<2x8x128xf32, #tpu.memory_space<vmem>>, vector<1x8x128xf32>
    %443 = vector.shape_cast %442 : vector<1x8x128xf32> to vector<8x128xf32>
    %444 = vector.extract_strided_slice %441 {offsets = [0, 0], sizes = [8, 128], strides = [1, 1]} : vector<8x512xf32> to vector<8x128xf32>
    %445 = arith.negf %444 : vector<8x128xf32>
    %446 = math.exp %445 : vector<8x128xf32>
    %cst_240 = arith.constant 1.000000e+00 : f32
    %447 = vector.broadcast %cst_240 : f32 to vector<8x128xf32>
    %448 = arith.addf %447, %446 : vector<8x128xf32>
    %449 = arith.divf %447, %448 : vector<8x128xf32>
    %450 = vector.extract_strided_slice %441 {offsets = [0, 128], sizes = [8, 128], strides = [1, 1]} : vector<8x512xf32> to vector<8x128xf32>
    %451 = arith.negf %450 : vector<8x128xf32>
    %452 = math.exp %451 : vector<8x128xf32>
    %cst_241 = arith.constant 1.000000e+00 : f32
    %453 = vector.broadcast %cst_241 : f32 to vector<8x128xf32>
    %454 = arith.addf %453, %452 : vector<8x128xf32>
    %455 = arith.divf %453, %454 : vector<8x128xf32>
    %456 = vector.extract_strided_slice %441 {offsets = [0, 256], sizes = [8, 128], strides = [1, 1]} : vector<8x512xf32> to vector<8x128xf32>
    %457 = math.tanh %456 : vector<8x128xf32>
    %458 = vector.extract_strided_slice %441 {offsets = [0, 384], sizes = [8, 128], strides = [1, 1]} : vector<8x512xf32> to vector<8x128xf32>
    %459 = arith.negf %458 : vector<8x128xf32>
    %460 = math.exp %459 : vector<8x128xf32>
    %cst_242 = arith.constant 1.000000e+00 : f32
    %461 = vector.broadcast %cst_242 : f32 to vector<8x128xf32>
    %462 = arith.addf %461, %460 : vector<8x128xf32>
    %463 = arith.divf %461, %462 : vector<8x128xf32>
    %464 = arith.mulf %455, %443 : vector<8x128xf32>
    %465 = arith.mulf %449, %457 : vector<8x128xf32>
    %466 = arith.addf %464, %465 : vector<8x128xf32>
    %467 = math.tanh %466 : vector<8x128xf32>
    %468 = arith.mulf %463, %467 : vector<8x128xf32>
    %c1_243 = arith.constant 1 : index
    %c0_244 = arith.constant 0 : index
    %c0_245 = arith.constant 0 : index
    %469 = vector.load %arg11[%c1_243, %c0_244, %c0_245] : memref<2x8x128xf32, #tpu.memory_space<vmem>>, vector<1x8x128xf32>
    %470 = vector.shape_cast %469 : vector<1x8x128xf32> to vector<8x128xf32>
    %471 = vector.shape_cast %468 : vector<8x128xf32> to vector<1x8x128xf32>
    tpu.vector_store %arg11[%c1_243, %c0_244, %c0_245], %471 {strides = array<i32>} : memref<2x8x128xf32, #tpu.memory_space<vmem>>, vector<1x8x128xf32>,
    %c1_246 = arith.constant 1 : index
    %c0_247 = arith.constant 0 : index
    %c0_248 = arith.constant 0 : index
    %472 = vector.load %arg12[%c1_246, %c0_247, %c0_248] : memref<2x8x128xf32, #tpu.memory_space<vmem>>, vector<1x8x128xf32>
    %473 = vector.shape_cast %472 : vector<1x8x128xf32> to vector<8x128xf32>
    %474 = vector.shape_cast %466 : vector<8x128xf32> to vector<1x8x128xf32>
    tpu.vector_store %arg12[%c1_246, %c0_247, %c0_248], %474 {strides = array<i32>} : memref<2x8x128xf32, #tpu.memory_space<vmem>>, vector<1x8x128xf32>,
    %475 = arith.truncf %468 : vector<8x128xf32> to vector<8x128xbf16>
    %c1_249 = arith.constant 1 : index
    %c0_250 = arith.constant 0 : index
    %c0_251 = arith.constant 0 : index
    %476 = vector.load %arg13[%c1_249, %c0_250, %c0_251] : memref<2x8x128xbf16, #tpu.memory_space<vmem>>, vector<1x8x128xbf16>
    %477 = vector.shape_cast %476 : vector<1x8x128xbf16> to vector<8x128xbf16>
    %478 = vector.shape_cast %475 : vector<8x128xbf16> to vector<1x8x128xbf16>
    tpu.vector_store %arg13[%c1_249, %c0_250, %c0_251], %478 {strides = array<i32>} : memref<2x8x128xbf16, #tpu.memory_space<vmem>>, vector<1x8x128xbf16>,
    %479 = arith.index_cast %c4_i32 : i32 to index
    %c0_252 = arith.constant 0 : index
    %c0_253 = arith.constant 0 : index
    %480 = vector.load %arg8[%479, %c0_252, %c0_253] : memref<8x8x128xbf16, #tpu.memory_space<vmem>>, vector<1x8x128xbf16>
    %481 = vector.shape_cast %480 : vector<1x8x128xbf16> to vector<8x128xbf16>
    %482 = vector.shape_cast %475 : vector<8x128xbf16> to vector<1x8x128xbf16>
    tpu.vector_store %arg8[%479, %c0_252, %c0_253], %482 {strides = array<i32>} : memref<8x8x128xbf16, #tpu.memory_space<vmem>>, vector<1x8x128xbf16>,
    %c5_i32 = arith.constant 5 : i32
    %483 = arith.index_cast %c5_i32 : i32 to index
    %c0_254 = arith.constant 0 : index
    %c0_255 = arith.constant 0 : index
    %484 = vector.load %arg1[%483, %c0_254, %c0_255] : memref<8x8x512xf32, #tpu.memory_space<vmem>>, vector<1x8x512xf32>
    %485 = vector.shape_cast %484 : vector<1x8x512xf32> to vector<8x512xf32>
    %c0_256 = arith.constant 0 : index
    %c0_257 = arith.constant 0 : index
    %c0_258 = arith.constant 0 : index
    %486 = vector.load %arg13[%c0_256, %c0_257, %c0_258] : memref<2x8x128xbf16, #tpu.memory_space<vmem>>, vector<1x8x128xbf16>
    %487 = vector.shape_cast %486 : vector<1x8x128xbf16> to vector<8x128xbf16>
    %c0_259 = arith.constant 0 : index
    %c0_260 = arith.constant 0 : index
    %488 = vector.load %arg4[%c0_259, %c0_260] : memref<128x512xbf16, #tpu.memory_space<vmem>>, vector<128x512xbf16>
    %cst_261 = arith.constant dense<0.000000e+00> : vector<8x512xf32>
    %489 = tpu.matmul %487, %488, %cst_261 {dimension_numbers = #tpu.dot_dimension_numbers<[1], [0], [0], [1], [0, 0, 1, 1], [], []>} : vector<8x128xbf16>, vector<128x512xbf16>, vector<8x512xf32> -> vector<8x512xf32>
    %490 = arith.addf %485, %489 : vector<8x512xf32>
    %c0_262 = arith.constant 0 : index
    %c0_263 = arith.constant 0 : index
    %c0_264 = arith.constant 0 : index
    %491 = vector.load %arg12[%c0_262, %c0_263, %c0_264] : memref<2x8x128xf32, #tpu.memory_space<vmem>>, vector<1x8x128xf32>
    %492 = vector.shape_cast %491 : vector<1x8x128xf32> to vector<8x128xf32>
    %493 = vector.extract_strided_slice %490 {offsets = [0, 0], sizes = [8, 128], strides = [1, 1]} : vector<8x512xf32> to vector<8x128xf32>
    %494 = arith.negf %493 : vector<8x128xf32>
    %495 = math.exp %494 : vector<8x128xf32>
    %cst_265 = arith.constant 1.000000e+00 : f32
    %496 = vector.broadcast %cst_265 : f32 to vector<8x128xf32>
    %497 = arith.addf %496, %495 : vector<8x128xf32>
    %498 = arith.divf %496, %497 : vector<8x128xf32>
    %499 = vector.extract_strided_slice %490 {offsets = [0, 128], sizes = [8, 128], strides = [1, 1]} : vector<8x512xf32> to vector<8x128xf32>
    %500 = arith.negf %499 : vector<8x128xf32>
    %501 = math.exp %500 : vector<8x128xf32>
    %cst_266 = arith.constant 1.000000e+00 : f32
    %502 = vector.broadcast %cst_266 : f32 to vector<8x128xf32>
    %503 = arith.addf %502, %501 : vector<8x128xf32>
    %504 = arith.divf %502, %503 : vector<8x128xf32>
    %505 = vector.extract_strided_slice %490 {offsets = [0, 256], sizes = [8, 128], strides = [1, 1]} : vector<8x512xf32> to vector<8x128xf32>
    %506 = math.tanh %505 : vector<8x128xf32>
    %507 = vector.extract_strided_slice %490 {offsets = [0, 384], sizes = [8, 128], strides = [1, 1]} : vector<8x512xf32> to vector<8x128xf32>
    %508 = arith.negf %507 : vector<8x128xf32>
    %509 = math.exp %508 : vector<8x128xf32>
    %cst_267 = arith.constant 1.000000e+00 : f32
    %510 = vector.broadcast %cst_267 : f32 to vector<8x128xf32>
    %511 = arith.addf %510, %509 : vector<8x128xf32>
    %512 = arith.divf %510, %511 : vector<8x128xf32>
    %513 = arith.mulf %504, %492 : vector<8x128xf32>
    %514 = arith.mulf %498, %506 : vector<8x128xf32>
    %515 = arith.addf %513, %514 : vector<8x128xf32>
    %516 = math.tanh %515 : vector<8x128xf32>
    %517 = arith.mulf %512, %516 : vector<8x128xf32>
    %c0_268 = arith.constant 0 : index
    %c0_269 = arith.constant 0 : index
    %c0_270 = arith.constant 0 : index
    %518 = vector.load %arg11[%c0_268, %c0_269, %c0_270] : memref<2x8x128xf32, #tpu.memory_space<vmem>>, vector<1x8x128xf32>
    %519 = vector.shape_cast %518 : vector<1x8x128xf32> to vector<8x128xf32>
    %520 = vector.shape_cast %517 : vector<8x128xf32> to vector<1x8x128xf32>
    tpu.vector_store %arg11[%c0_268, %c0_269, %c0_270], %520 {strides = array<i32>} : memref<2x8x128xf32, #tpu.memory_space<vmem>>, vector<1x8x128xf32>,
    %c0_271 = arith.constant 0 : index
    %c0_272 = arith.constant 0 : index
    %c0_273 = arith.constant 0 : index
    %521 = vector.load %arg12[%c0_271, %c0_272, %c0_273] : memref<2x8x128xf32, #tpu.memory_space<vmem>>, vector<1x8x128xf32>
    %522 = vector.shape_cast %521 : vector<1x8x128xf32> to vector<8x128xf32>
    %523 = vector.shape_cast %515 : vector<8x128xf32> to vector<1x8x128xf32>
    tpu.vector_store %arg12[%c0_271, %c0_272, %c0_273], %523 {strides = array<i32>} : memref<2x8x128xf32, #tpu.memory_space<vmem>>, vector<1x8x128xf32>,
    %524 = arith.truncf %517 : vector<8x128xf32> to vector<8x128xbf16>
    %c0_274 = arith.constant 0 : index
    %c0_275 = arith.constant 0 : index
    %c0_276 = arith.constant 0 : index
    %525 = vector.load %arg13[%c0_274, %c0_275, %c0_276] : memref<2x8x128xbf16, #tpu.memory_space<vmem>>, vector<1x8x128xbf16>
    %526 = vector.shape_cast %525 : vector<1x8x128xbf16> to vector<8x128xbf16>
    %527 = vector.shape_cast %524 : vector<8x128xbf16> to vector<1x8x128xbf16>
    tpu.vector_store %arg13[%c0_274, %c0_275, %c0_276], %527 {strides = array<i32>} : memref<2x8x128xbf16, #tpu.memory_space<vmem>>, vector<1x8x128xbf16>,
    %c0_277 = arith.constant 0 : index
    %c0_278 = arith.constant 0 : index
    %528 = vector.load %arg5[%c0_277, %c0_278] : memref<128x512xbf16, #tpu.memory_space<vmem>>, vector<128x512xbf16>
    %cst_279 = arith.constant dense<0.000000e+00> : vector<8x512xf32>
    %529 = tpu.matmul %524, %528, %cst_279 {dimension_numbers = #tpu.dot_dimension_numbers<[1], [0], [0], [1], [0, 0, 1, 1], [], []>} : vector<8x128xbf16>, vector<128x512xbf16>, vector<8x512xf32> -> vector<8x512xf32>
    %c1_280 = arith.constant 1 : index
    %c0_281 = arith.constant 0 : index
    %c0_282 = arith.constant 0 : index
    %530 = vector.load %arg13[%c1_280, %c0_281, %c0_282] : memref<2x8x128xbf16, #tpu.memory_space<vmem>>, vector<1x8x128xbf16>
    %531 = vector.shape_cast %530 : vector<1x8x128xbf16> to vector<8x128xbf16>
    %c0_283 = arith.constant 0 : index
    %c0_284 = arith.constant 0 : index
    %532 = vector.load %arg6[%c0_283, %c0_284] : memref<128x512xbf16, #tpu.memory_space<vmem>>, vector<128x512xbf16>
    %cst_285 = arith.constant dense<0.000000e+00> : vector<8x512xf32>
    %533 = tpu.matmul %531, %532, %cst_285 {dimension_numbers = #tpu.dot_dimension_numbers<[1], [0], [0], [1], [0, 0, 1, 1], [], []>} : vector<8x128xbf16>, vector<128x512xbf16>, vector<8x512xf32> -> vector<8x512xf32>
    %534 = arith.addf %529, %533 : vector<8x512xf32>
    %c0_286 = arith.constant 0 : index
    %c0_287 = arith.constant 0 : index
    %535 = vector.load %arg7[%c0_286, %c0_287] : memref<1x512xf32, #tpu.memory_space<vmem>>, vector<1x512xf32>
    %536 = vector.broadcast %535 : vector<1x512xf32> to vector<8x512xf32>
    %537 = arith.addf %534, %536 : vector<8x512xf32>
    %c1_288 = arith.constant 1 : index
    %c0_289 = arith.constant 0 : index
    %c0_290 = arith.constant 0 : index
    %538 = vector.load %arg12[%c1_288, %c0_289, %c0_290] : memref<2x8x128xf32, #tpu.memory_space<vmem>>, vector<1x8x128xf32>
    %539 = vector.shape_cast %538 : vector<1x8x128xf32> to vector<8x128xf32>
    %540 = vector.extract_strided_slice %537 {offsets = [0, 0], sizes = [8, 128], strides = [1, 1]} : vector<8x512xf32> to vector<8x128xf32>
    %541 = arith.negf %540 : vector<8x128xf32>
    %542 = math.exp %541 : vector<8x128xf32>
    %cst_291 = arith.constant 1.000000e+00 : f32
    %543 = vector.broadcast %cst_291 : f32 to vector<8x128xf32>
    %544 = arith.addf %543, %542 : vector<8x128xf32>
    %545 = arith.divf %543, %544 : vector<8x128xf32>
    %546 = vector.extract_strided_slice %537 {offsets = [0, 128], sizes = [8, 128], strides = [1, 1]} : vector<8x512xf32> to vector<8x128xf32>
    %547 = arith.negf %546 : vector<8x128xf32>
    %548 = math.exp %547 : vector<8x128xf32>
    %cst_292 = arith.constant 1.000000e+00 : f32
    %549 = vector.broadcast %cst_292 : f32 to vector<8x128xf32>
    %550 = arith.addf %549, %548 : vector<8x128xf32>
    %551 = arith.divf %549, %550 : vector<8x128xf32>
    %552 = vector.extract_strided_slice %537 {offsets = [0, 256], sizes = [8, 128], strides = [1, 1]} : vector<8x512xf32> to vector<8x128xf32>
    %553 = math.tanh %552 : vector<8x128xf32>
    %554 = vector.extract_strided_slice %537 {offsets = [0, 384], sizes = [8, 128], strides = [1, 1]} : vector<8x512xf32> to vector<8x128xf32>
    %555 = arith.negf %554 : vector<8x128xf32>
    %556 = math.exp %555 : vector<8x128xf32>
    %cst_293 = arith.constant 1.000000e+00 : f32
    %557 = vector.broadcast %cst_293 : f32 to vector<8x128xf32>
    %558 = arith.addf %557, %556 : vector<8x128xf32>
    %559 = arith.divf %557, %558 : vector<8x128xf32>
    %560 = arith.mulf %551, %539 : vector<8x128xf32>
    %561 = arith.mulf %545, %553 : vector<8x128xf32>
    %562 = arith.addf %560, %561 : vector<8x128xf32>
    %563 = math.tanh %562 : vector<8x128xf32>
    %564 = arith.mulf %559, %563 : vector<8x128xf32>
    %c1_294 = arith.constant 1 : index
    %c0_295 = arith.constant 0 : index
    %c0_296 = arith.constant 0 : index
    %565 = vector.load %arg11[%c1_294, %c0_295, %c0_296] : memref<2x8x128xf32, #tpu.memory_space<vmem>>, vector<1x8x128xf32>
    %566 = vector.shape_cast %565 : vector<1x8x128xf32> to vector<8x128xf32>
    %567 = vector.shape_cast %564 : vector<8x128xf32> to vector<1x8x128xf32>
    tpu.vector_store %arg11[%c1_294, %c0_295, %c0_296], %567 {strides = array<i32>} : memref<2x8x128xf32, #tpu.memory_space<vmem>>, vector<1x8x128xf32>,
    %c1_297 = arith.constant 1 : index
    %c0_298 = arith.constant 0 : index
    %c0_299 = arith.constant 0 : index
    %568 = vector.load %arg12[%c1_297, %c0_298, %c0_299] : memref<2x8x128xf32, #tpu.memory_space<vmem>>, vector<1x8x128xf32>
    %569 = vector.shape_cast %568 : vector<1x8x128xf32> to vector<8x128xf32>
    %570 = vector.shape_cast %562 : vector<8x128xf32> to vector<1x8x128xf32>
    tpu.vector_store %arg12[%c1_297, %c0_298, %c0_299], %570 {strides = array<i32>} : memref<2x8x128xf32, #tpu.memory_space<vmem>>, vector<1x8x128xf32>,
    %571 = arith.truncf %564 : vector<8x128xf32> to vector<8x128xbf16>
    %c1_300 = arith.constant 1 : index
    %c0_301 = arith.constant 0 : index
    %c0_302 = arith.constant 0 : index
    %572 = vector.load %arg13[%c1_300, %c0_301, %c0_302] : memref<2x8x128xbf16, #tpu.memory_space<vmem>>, vector<1x8x128xbf16>
    %573 = vector.shape_cast %572 : vector<1x8x128xbf16> to vector<8x128xbf16>
    %574 = vector.shape_cast %571 : vector<8x128xbf16> to vector<1x8x128xbf16>
    tpu.vector_store %arg13[%c1_300, %c0_301, %c0_302], %574 {strides = array<i32>} : memref<2x8x128xbf16, #tpu.memory_space<vmem>>, vector<1x8x128xbf16>,
    %575 = arith.index_cast %c5_i32 : i32 to index
    %c0_303 = arith.constant 0 : index
    %c0_304 = arith.constant 0 : index
    %576 = vector.load %arg8[%575, %c0_303, %c0_304] : memref<8x8x128xbf16, #tpu.memory_space<vmem>>, vector<1x8x128xbf16>
    %577 = vector.shape_cast %576 : vector<1x8x128xbf16> to vector<8x128xbf16>
    %578 = vector.shape_cast %571 : vector<8x128xbf16> to vector<1x8x128xbf16>
    tpu.vector_store %arg8[%575, %c0_303, %c0_304], %578 {strides = array<i32>} : memref<8x8x128xbf16, #tpu.memory_space<vmem>>, vector<1x8x128xbf16>,
    %c6_i32 = arith.constant 6 : i32
    %579 = arith.index_cast %c6_i32 : i32 to index
    %c0_305 = arith.constant 0 : index
    %c0_306 = arith.constant 0 : index
    %580 = vector.load %arg1[%579, %c0_305, %c0_306] : memref<8x8x512xf32, #tpu.memory_space<vmem>>, vector<1x8x512xf32>
    %581 = vector.shape_cast %580 : vector<1x8x512xf32> to vector<8x512xf32>
    %c0_307 = arith.constant 0 : index
    %c0_308 = arith.constant 0 : index
    %c0_309 = arith.constant 0 : index
    %582 = vector.load %arg13[%c0_307, %c0_308, %c0_309] : memref<2x8x128xbf16, #tpu.memory_space<vmem>>, vector<1x8x128xbf16>
    %583 = vector.shape_cast %582 : vector<1x8x128xbf16> to vector<8x128xbf16>
    %c0_310 = arith.constant 0 : index
    %c0_311 = arith.constant 0 : index
    %584 = vector.load %arg4[%c0_310, %c0_311] : memref<128x512xbf16, #tpu.memory_space<vmem>>, vector<128x512xbf16>
    %cst_312 = arith.constant dense<0.000000e+00> : vector<8x512xf32>
    %585 = tpu.matmul %583, %584, %cst_312 {dimension_numbers = #tpu.dot_dimension_numbers<[1], [0], [0], [1], [0, 0, 1, 1], [], []>} : vector<8x128xbf16>, vector<128x512xbf16>, vector<8x512xf32> -> vector<8x512xf32>
    %586 = arith.addf %581, %585 : vector<8x512xf32>
    %c0_313 = arith.constant 0 : index
    %c0_314 = arith.constant 0 : index
    %c0_315 = arith.constant 0 : index
    %587 = vector.load %arg12[%c0_313, %c0_314, %c0_315] : memref<2x8x128xf32, #tpu.memory_space<vmem>>, vector<1x8x128xf32>
    %588 = vector.shape_cast %587 : vector<1x8x128xf32> to vector<8x128xf32>
    %589 = vector.extract_strided_slice %586 {offsets = [0, 0], sizes = [8, 128], strides = [1, 1]} : vector<8x512xf32> to vector<8x128xf32>
    %590 = arith.negf %589 : vector<8x128xf32>
    %591 = math.exp %590 : vector<8x128xf32>
    %cst_316 = arith.constant 1.000000e+00 : f32
    %592 = vector.broadcast %cst_316 : f32 to vector<8x128xf32>
    %593 = arith.addf %592, %591 : vector<8x128xf32>
    %594 = arith.divf %592, %593 : vector<8x128xf32>
    %595 = vector.extract_strided_slice %586 {offsets = [0, 128], sizes = [8, 128], strides = [1, 1]} : vector<8x512xf32> to vector<8x128xf32>
    %596 = arith.negf %595 : vector<8x128xf32>
    %597 = math.exp %596 : vector<8x128xf32>
    %cst_317 = arith.constant 1.000000e+00 : f32
    %598 = vector.broadcast %cst_317 : f32 to vector<8x128xf32>
    %599 = arith.addf %598, %597 : vector<8x128xf32>
    %600 = arith.divf %598, %599 : vector<8x128xf32>
    %601 = vector.extract_strided_slice %586 {offsets = [0, 256], sizes = [8, 128], strides = [1, 1]} : vector<8x512xf32> to vector<8x128xf32>
    %602 = math.tanh %601 : vector<8x128xf32>
    %603 = vector.extract_strided_slice %586 {offsets = [0, 384], sizes = [8, 128], strides = [1, 1]} : vector<8x512xf32> to vector<8x128xf32>
    %604 = arith.negf %603 : vector<8x128xf32>
    %605 = math.exp %604 : vector<8x128xf32>
    %cst_318 = arith.constant 1.000000e+00 : f32
    %606 = vector.broadcast %cst_318 : f32 to vector<8x128xf32>
    %607 = arith.addf %606, %605 : vector<8x128xf32>
    %608 = arith.divf %606, %607 : vector<8x128xf32>
    %609 = arith.mulf %600, %588 : vector<8x128xf32>
    %610 = arith.mulf %594, %602 : vector<8x128xf32>
    %611 = arith.addf %609, %610 : vector<8x128xf32>
    %612 = math.tanh %611 : vector<8x128xf32>
    %613 = arith.mulf %608, %612 : vector<8x128xf32>
    %c0_319 = arith.constant 0 : index
    %c0_320 = arith.constant 0 : index
    %c0_321 = arith.constant 0 : index
    %614 = vector.load %arg11[%c0_319, %c0_320, %c0_321] : memref<2x8x128xf32, #tpu.memory_space<vmem>>, vector<1x8x128xf32>
    %615 = vector.shape_cast %614 : vector<1x8x128xf32> to vector<8x128xf32>
    %616 = vector.shape_cast %613 : vector<8x128xf32> to vector<1x8x128xf32>
    tpu.vector_store %arg11[%c0_319, %c0_320, %c0_321], %616 {strides = array<i32>} : memref<2x8x128xf32, #tpu.memory_space<vmem>>, vector<1x8x128xf32>,
    %c0_322 = arith.constant 0 : index
    %c0_323 = arith.constant 0 : index
    %c0_324 = arith.constant 0 : index
    %617 = vector.load %arg12[%c0_322, %c0_323, %c0_324] : memref<2x8x128xf32, #tpu.memory_space<vmem>>, vector<1x8x128xf32>
    %618 = vector.shape_cast %617 : vector<1x8x128xf32> to vector<8x128xf32>
    %619 = vector.shape_cast %611 : vector<8x128xf32> to vector<1x8x128xf32>
    tpu.vector_store %arg12[%c0_322, %c0_323, %c0_324], %619 {strides = array<i32>} : memref<2x8x128xf32, #tpu.memory_space<vmem>>, vector<1x8x128xf32>,
    %620 = arith.truncf %613 : vector<8x128xf32> to vector<8x128xbf16>
    %c0_325 = arith.constant 0 : index
    %c0_326 = arith.constant 0 : index
    %c0_327 = arith.constant 0 : index
    %621 = vector.load %arg13[%c0_325, %c0_326, %c0_327] : memref<2x8x128xbf16, #tpu.memory_space<vmem>>, vector<1x8x128xbf16>
    %622 = vector.shape_cast %621 : vector<1x8x128xbf16> to vector<8x128xbf16>
    %623 = vector.shape_cast %620 : vector<8x128xbf16> to vector<1x8x128xbf16>
    tpu.vector_store %arg13[%c0_325, %c0_326, %c0_327], %623 {strides = array<i32>} : memref<2x8x128xbf16, #tpu.memory_space<vmem>>, vector<1x8x128xbf16>,
    %c0_328 = arith.constant 0 : index
    %c0_329 = arith.constant 0 : index
    %624 = vector.load %arg5[%c0_328, %c0_329] : memref<128x512xbf16, #tpu.memory_space<vmem>>, vector<128x512xbf16>
    %cst_330 = arith.constant dense<0.000000e+00> : vector<8x512xf32>
    %625 = tpu.matmul %620, %624, %cst_330 {dimension_numbers = #tpu.dot_dimension_numbers<[1], [0], [0], [1], [0, 0, 1, 1], [], []>} : vector<8x128xbf16>, vector<128x512xbf16>, vector<8x512xf32> -> vector<8x512xf32>
    %c1_331 = arith.constant 1 : index
    %c0_332 = arith.constant 0 : index
    %c0_333 = arith.constant 0 : index
    %626 = vector.load %arg13[%c1_331, %c0_332, %c0_333] : memref<2x8x128xbf16, #tpu.memory_space<vmem>>, vector<1x8x128xbf16>
    %627 = vector.shape_cast %626 : vector<1x8x128xbf16> to vector<8x128xbf16>
    %c0_334 = arith.constant 0 : index
    %c0_335 = arith.constant 0 : index
    %628 = vector.load %arg6[%c0_334, %c0_335] : memref<128x512xbf16, #tpu.memory_space<vmem>>, vector<128x512xbf16>
    %cst_336 = arith.constant dense<0.000000e+00> : vector<8x512xf32>
    %629 = tpu.matmul %627, %628, %cst_336 {dimension_numbers = #tpu.dot_dimension_numbers<[1], [0], [0], [1], [0, 0, 1, 1], [], []>} : vector<8x128xbf16>, vector<128x512xbf16>, vector<8x512xf32> -> vector<8x512xf32>
    %630 = arith.addf %625, %629 : vector<8x512xf32>
    %c0_337 = arith.constant 0 : index
    %c0_338 = arith.constant 0 : index
    %631 = vector.load %arg7[%c0_337, %c0_338] : memref<1x512xf32, #tpu.memory_space<vmem>>, vector<1x512xf32>
    %632 = vector.broadcast %631 : vector<1x512xf32> to vector<8x512xf32>
    %633 = arith.addf %630, %632 : vector<8x512xf32>
    %c1_339 = arith.constant 1 : index
    %c0_340 = arith.constant 0 : index
    %c0_341 = arith.constant 0 : index
    %634 = vector.load %arg12[%c1_339, %c0_340, %c0_341] : memref<2x8x128xf32, #tpu.memory_space<vmem>>, vector<1x8x128xf32>
    %635 = vector.shape_cast %634 : vector<1x8x128xf32> to vector<8x128xf32>
    %636 = vector.extract_strided_slice %633 {offsets = [0, 0], sizes = [8, 128], strides = [1, 1]} : vector<8x512xf32> to vector<8x128xf32>
    %637 = arith.negf %636 : vector<8x128xf32>
    %638 = math.exp %637 : vector<8x128xf32>
    %cst_342 = arith.constant 1.000000e+00 : f32
    %639 = vector.broadcast %cst_342 : f32 to vector<8x128xf32>
    %640 = arith.addf %639, %638 : vector<8x128xf32>
    %641 = arith.divf %639, %640 : vector<8x128xf32>
    %642 = vector.extract_strided_slice %633 {offsets = [0, 128], sizes = [8, 128], strides = [1, 1]} : vector<8x512xf32> to vector<8x128xf32>
    %643 = arith.negf %642 : vector<8x128xf32>
    %644 = math.exp %643 : vector<8x128xf32>
    %cst_343 = arith.constant 1.000000e+00 : f32
    %645 = vector.broadcast %cst_343 : f32 to vector<8x128xf32>
    %646 = arith.addf %645, %644 : vector<8x128xf32>
    %647 = arith.divf %645, %646 : vector<8x128xf32>
    %648 = vector.extract_strided_slice %633 {offsets = [0, 256], sizes = [8, 128], strides = [1, 1]} : vector<8x512xf32> to vector<8x128xf32>
    %649 = math.tanh %648 : vector<8x128xf32>
    %650 = vector.extract_strided_slice %633 {offsets = [0, 384], sizes = [8, 128], strides = [1, 1]} : vector<8x512xf32> to vector<8x128xf32>
    %651 = arith.negf %650 : vector<8x128xf32>
    %652 = math.exp %651 : vector<8x128xf32>
    %cst_344 = arith.constant 1.000000e+00 : f32
    %653 = vector.broadcast %cst_344 : f32 to vector<8x128xf32>
    %654 = arith.addf %653, %652 : vector<8x128xf32>
    %655 = arith.divf %653, %654 : vector<8x128xf32>
    %656 = arith.mulf %647, %635 : vector<8x128xf32>
    %657 = arith.mulf %641, %649 : vector<8x128xf32>
    %658 = arith.addf %656, %657 : vector<8x128xf32>
    %659 = math.tanh %658 : vector<8x128xf32>
    %660 = arith.mulf %655, %659 : vector<8x128xf32>
    %c1_345 = arith.constant 1 : index
    %c0_346 = arith.constant 0 : index
    %c0_347 = arith.constant 0 : index
    %661 = vector.load %arg11[%c1_345, %c0_346, %c0_347] : memref<2x8x128xf32, #tpu.memory_space<vmem>>, vector<1x8x128xf32>
    %662 = vector.shape_cast %661 : vector<1x8x128xf32> to vector<8x128xf32>
    %663 = vector.shape_cast %660 : vector<8x128xf32> to vector<1x8x128xf32>
    tpu.vector_store %arg11[%c1_345, %c0_346, %c0_347], %663 {strides = array<i32>} : memref<2x8x128xf32, #tpu.memory_space<vmem>>, vector<1x8x128xf32>,
    %c1_348 = arith.constant 1 : index
    %c0_349 = arith.constant 0 : index
    %c0_350 = arith.constant 0 : index
    %664 = vector.load %arg12[%c1_348, %c0_349, %c0_350] : memref<2x8x128xf32, #tpu.memory_space<vmem>>, vector<1x8x128xf32>
    %665 = vector.shape_cast %664 : vector<1x8x128xf32> to vector<8x128xf32>
    %666 = vector.shape_cast %658 : vector<8x128xf32> to vector<1x8x128xf32>
    tpu.vector_store %arg12[%c1_348, %c0_349, %c0_350], %666 {strides = array<i32>} : memref<2x8x128xf32, #tpu.memory_space<vmem>>, vector<1x8x128xf32>,
    %667 = arith.truncf %660 : vector<8x128xf32> to vector<8x128xbf16>
    %c1_351 = arith.constant 1 : index
    %c0_352 = arith.constant 0 : index
    %c0_353 = arith.constant 0 : index
    %668 = vector.load %arg13[%c1_351, %c0_352, %c0_353] : memref<2x8x128xbf16, #tpu.memory_space<vmem>>, vector<1x8x128xbf16>
    %669 = vector.shape_cast %668 : vector<1x8x128xbf16> to vector<8x128xbf16>
    %670 = vector.shape_cast %667 : vector<8x128xbf16> to vector<1x8x128xbf16>
    tpu.vector_store %arg13[%c1_351, %c0_352, %c0_353], %670 {strides = array<i32>} : memref<2x8x128xbf16, #tpu.memory_space<vmem>>, vector<1x8x128xbf16>,
    %671 = arith.index_cast %c6_i32 : i32 to index
    %c0_354 = arith.constant 0 : index
    %c0_355 = arith.constant 0 : index
    %672 = vector.load %arg8[%671, %c0_354, %c0_355] : memref<8x8x128xbf16, #tpu.memory_space<vmem>>, vector<1x8x128xbf16>
    %673 = vector.shape_cast %672 : vector<1x8x128xbf16> to vector<8x128xbf16>
    %674 = vector.shape_cast %667 : vector<8x128xbf16> to vector<1x8x128xbf16>
    tpu.vector_store %arg8[%671, %c0_354, %c0_355], %674 {strides = array<i32>} : memref<8x8x128xbf16, #tpu.memory_space<vmem>>, vector<1x8x128xbf16>,
    %c7_i32 = arith.constant 7 : i32
    %675 = arith.index_cast %c7_i32 : i32 to index
    %c0_356 = arith.constant 0 : index
    %c0_357 = arith.constant 0 : index
    %676 = vector.load %arg1[%675, %c0_356, %c0_357] : memref<8x8x512xf32, #tpu.memory_space<vmem>>, vector<1x8x512xf32>
    %677 = vector.shape_cast %676 : vector<1x8x512xf32> to vector<8x512xf32>
    %c0_358 = arith.constant 0 : index
    %c0_359 = arith.constant 0 : index
    %c0_360 = arith.constant 0 : index
    %678 = vector.load %arg13[%c0_358, %c0_359, %c0_360] : memref<2x8x128xbf16, #tpu.memory_space<vmem>>, vector<1x8x128xbf16>
    %679 = vector.shape_cast %678 : vector<1x8x128xbf16> to vector<8x128xbf16>
    %c0_361 = arith.constant 0 : index
    %c0_362 = arith.constant 0 : index
    %680 = vector.load %arg4[%c0_361, %c0_362] : memref<128x512xbf16, #tpu.memory_space<vmem>>, vector<128x512xbf16>
    %cst_363 = arith.constant dense<0.000000e+00> : vector<8x512xf32>
    %681 = tpu.matmul %679, %680, %cst_363 {dimension_numbers = #tpu.dot_dimension_numbers<[1], [0], [0], [1], [0, 0, 1, 1], [], []>} : vector<8x128xbf16>, vector<128x512xbf16>, vector<8x512xf32> -> vector<8x512xf32>
    %682 = arith.addf %677, %681 : vector<8x512xf32>
    %c0_364 = arith.constant 0 : index
    %c0_365 = arith.constant 0 : index
    %c0_366 = arith.constant 0 : index
    %683 = vector.load %arg12[%c0_364, %c0_365, %c0_366] : memref<2x8x128xf32, #tpu.memory_space<vmem>>, vector<1x8x128xf32>
    %684 = vector.shape_cast %683 : vector<1x8x128xf32> to vector<8x128xf32>
    %685 = vector.extract_strided_slice %682 {offsets = [0, 0], sizes = [8, 128], strides = [1, 1]} : vector<8x512xf32> to vector<8x128xf32>
    %686 = arith.negf %685 : vector<8x128xf32>
    %687 = math.exp %686 : vector<8x128xf32>
    %cst_367 = arith.constant 1.000000e+00 : f32
    %688 = vector.broadcast %cst_367 : f32 to vector<8x128xf32>
    %689 = arith.addf %688, %687 : vector<8x128xf32>
    %690 = arith.divf %688, %689 : vector<8x128xf32>
    %691 = vector.extract_strided_slice %682 {offsets = [0, 128], sizes = [8, 128], strides = [1, 1]} : vector<8x512xf32> to vector<8x128xf32>
    %692 = arith.negf %691 : vector<8x128xf32>
    %693 = math.exp %692 : vector<8x128xf32>
    %cst_368 = arith.constant 1.000000e+00 : f32
    %694 = vector.broadcast %cst_368 : f32 to vector<8x128xf32>
    %695 = arith.addf %694, %693 : vector<8x128xf32>
    %696 = arith.divf %694, %695 : vector<8x128xf32>
    %697 = vector.extract_strided_slice %682 {offsets = [0, 256], sizes = [8, 128], strides = [1, 1]} : vector<8x512xf32> to vector<8x128xf32>
    %698 = math.tanh %697 : vector<8x128xf32>
    %699 = vector.extract_strided_slice %682 {offsets = [0, 384], sizes = [8, 128], strides = [1, 1]} : vector<8x512xf32> to vector<8x128xf32>
    %700 = arith.negf %699 : vector<8x128xf32>
    %701 = math.exp %700 : vector<8x128xf32>
    %cst_369 = arith.constant 1.000000e+00 : f32
    %702 = vector.broadcast %cst_369 : f32 to vector<8x128xf32>
    %703 = arith.addf %702, %701 : vector<8x128xf32>
    %704 = arith.divf %702, %703 : vector<8x128xf32>
    %705 = arith.mulf %696, %684 : vector<8x128xf32>
    %706 = arith.mulf %690, %698 : vector<8x128xf32>
    %707 = arith.addf %705, %706 : vector<8x128xf32>
    %708 = math.tanh %707 : vector<8x128xf32>
    %709 = arith.mulf %704, %708 : vector<8x128xf32>
    %c0_370 = arith.constant 0 : index
    %c0_371 = arith.constant 0 : index
    %c0_372 = arith.constant 0 : index
    %710 = vector.load %arg11[%c0_370, %c0_371, %c0_372] : memref<2x8x128xf32, #tpu.memory_space<vmem>>, vector<1x8x128xf32>
    %711 = vector.shape_cast %710 : vector<1x8x128xf32> to vector<8x128xf32>
    %712 = vector.shape_cast %709 : vector<8x128xf32> to vector<1x8x128xf32>
    tpu.vector_store %arg11[%c0_370, %c0_371, %c0_372], %712 {strides = array<i32>} : memref<2x8x128xf32, #tpu.memory_space<vmem>>, vector<1x8x128xf32>,
    %c0_373 = arith.constant 0 : index
    %c0_374 = arith.constant 0 : index
    %c0_375 = arith.constant 0 : index
    %713 = vector.load %arg12[%c0_373, %c0_374, %c0_375] : memref<2x8x128xf32, #tpu.memory_space<vmem>>, vector<1x8x128xf32>
    %714 = vector.shape_cast %713 : vector<1x8x128xf32> to vector<8x128xf32>
    %715 = vector.shape_cast %707 : vector<8x128xf32> to vector<1x8x128xf32>
    tpu.vector_store %arg12[%c0_373, %c0_374, %c0_375], %715 {strides = array<i32>} : memref<2x8x128xf32, #tpu.memory_space<vmem>>, vector<1x8x128xf32>,
    %716 = arith.truncf %709 : vector<8x128xf32> to vector<8x128xbf16>
    %c0_376 = arith.constant 0 : index
    %c0_377 = arith.constant 0 : index
    %c0_378 = arith.constant 0 : index
    %717 = vector.load %arg13[%c0_376, %c0_377, %c0_378] : memref<2x8x128xbf16, #tpu.memory_space<vmem>>, vector<1x8x128xbf16>
    %718 = vector.shape_cast %717 : vector<1x8x128xbf16> to vector<8x128xbf16>
    %719 = vector.shape_cast %716 : vector<8x128xbf16> to vector<1x8x128xbf16>
    tpu.vector_store %arg13[%c0_376, %c0_377, %c0_378], %719 {strides = array<i32>} : memref<2x8x128xbf16, #tpu.memory_space<vmem>>, vector<1x8x128xbf16>,
    %c0_379 = arith.constant 0 : index
    %c0_380 = arith.constant 0 : index
    %720 = vector.load %arg5[%c0_379, %c0_380] : memref<128x512xbf16, #tpu.memory_space<vmem>>, vector<128x512xbf16>
    %cst_381 = arith.constant dense<0.000000e+00> : vector<8x512xf32>
    %721 = tpu.matmul %716, %720, %cst_381 {dimension_numbers = #tpu.dot_dimension_numbers<[1], [0], [0], [1], [0, 0, 1, 1], [], []>} : vector<8x128xbf16>, vector<128x512xbf16>, vector<8x512xf32> -> vector<8x512xf32>
    %c1_382 = arith.constant 1 : index
    %c0_383 = arith.constant 0 : index
    %c0_384 = arith.constant 0 : index
    %722 = vector.load %arg13[%c1_382, %c0_383, %c0_384] : memref<2x8x128xbf16, #tpu.memory_space<vmem>>, vector<1x8x128xbf16>
    %723 = vector.shape_cast %722 : vector<1x8x128xbf16> to vector<8x128xbf16>
    %c0_385 = arith.constant 0 : index
    %c0_386 = arith.constant 0 : index
    %724 = vector.load %arg6[%c0_385, %c0_386] : memref<128x512xbf16, #tpu.memory_space<vmem>>, vector<128x512xbf16>
    %cst_387 = arith.constant dense<0.000000e+00> : vector<8x512xf32>
    %725 = tpu.matmul %723, %724, %cst_387 {dimension_numbers = #tpu.dot_dimension_numbers<[1], [0], [0], [1], [0, 0, 1, 1], [], []>} : vector<8x128xbf16>, vector<128x512xbf16>, vector<8x512xf32> -> vector<8x512xf32>
    %726 = arith.addf %721, %725 : vector<8x512xf32>
    %c0_388 = arith.constant 0 : index
    %c0_389 = arith.constant 0 : index
    %727 = vector.load %arg7[%c0_388, %c0_389] : memref<1x512xf32, #tpu.memory_space<vmem>>, vector<1x512xf32>
    %728 = vector.broadcast %727 : vector<1x512xf32> to vector<8x512xf32>
    %729 = arith.addf %726, %728 : vector<8x512xf32>
    %c1_390 = arith.constant 1 : index
    %c0_391 = arith.constant 0 : index
    %c0_392 = arith.constant 0 : index
    %730 = vector.load %arg12[%c1_390, %c0_391, %c0_392] : memref<2x8x128xf32, #tpu.memory_space<vmem>>, vector<1x8x128xf32>
    %731 = vector.shape_cast %730 : vector<1x8x128xf32> to vector<8x128xf32>
    %732 = vector.extract_strided_slice %729 {offsets = [0, 0], sizes = [8, 128], strides = [1, 1]} : vector<8x512xf32> to vector<8x128xf32>
    %733 = arith.negf %732 : vector<8x128xf32>
    %734 = math.exp %733 : vector<8x128xf32>
    %cst_393 = arith.constant 1.000000e+00 : f32
    %735 = vector.broadcast %cst_393 : f32 to vector<8x128xf32>
    %736 = arith.addf %735, %734 : vector<8x128xf32>
    %737 = arith.divf %735, %736 : vector<8x128xf32>
    %738 = vector.extract_strided_slice %729 {offsets = [0, 128], sizes = [8, 128], strides = [1, 1]} : vector<8x512xf32> to vector<8x128xf32>
    %739 = arith.negf %738 : vector<8x128xf32>
    %740 = math.exp %739 : vector<8x128xf32>
    %cst_394 = arith.constant 1.000000e+00 : f32
    %741 = vector.broadcast %cst_394 : f32 to vector<8x128xf32>
    %742 = arith.addf %741, %740 : vector<8x128xf32>
    %743 = arith.divf %741, %742 : vector<8x128xf32>
    %744 = vector.extract_strided_slice %729 {offsets = [0, 256], sizes = [8, 128], strides = [1, 1]} : vector<8x512xf32> to vector<8x128xf32>
    %745 = math.tanh %744 : vector<8x128xf32>
    %746 = vector.extract_strided_slice %729 {offsets = [0, 384], sizes = [8, 128], strides = [1, 1]} : vector<8x512xf32> to vector<8x128xf32>
    %747 = arith.negf %746 : vector<8x128xf32>
    %748 = math.exp %747 : vector<8x128xf32>
    %cst_395 = arith.constant 1.000000e+00 : f32
    %749 = vector.broadcast %cst_395 : f32 to vector<8x128xf32>
    %750 = arith.addf %749, %748 : vector<8x128xf32>
    %751 = arith.divf %749, %750 : vector<8x128xf32>
    %752 = arith.mulf %743, %731 : vector<8x128xf32>
    %753 = arith.mulf %737, %745 : vector<8x128xf32>
    %754 = arith.addf %752, %753 : vector<8x128xf32>
    %755 = math.tanh %754 : vector<8x128xf32>
    %756 = arith.mulf %751, %755 : vector<8x128xf32>
    %c1_396 = arith.constant 1 : index
    %c0_397 = arith.constant 0 : index
    %c0_398 = arith.constant 0 : index
    %757 = vector.load %arg11[%c1_396, %c0_397, %c0_398] : memref<2x8x128xf32, #tpu.memory_space<vmem>>, vector<1x8x128xf32>
    %758 = vector.shape_cast %757 : vector<1x8x128xf32> to vector<8x128xf32>
    %759 = vector.shape_cast %756 : vector<8x128xf32> to vector<1x8x128xf32>
    tpu.vector_store %arg11[%c1_396, %c0_397, %c0_398], %759 {strides = array<i32>} : memref<2x8x128xf32, #tpu.memory_space<vmem>>, vector<1x8x128xf32>,
    %c1_399 = arith.constant 1 : index
    %c0_400 = arith.constant 0 : index
    %c0_401 = arith.constant 0 : index
    %760 = vector.load %arg12[%c1_399, %c0_400, %c0_401] : memref<2x8x128xf32, #tpu.memory_space<vmem>>, vector<1x8x128xf32>
    %761 = vector.shape_cast %760 : vector<1x8x128xf32> to vector<8x128xf32>
    %762 = vector.shape_cast %754 : vector<8x128xf32> to vector<1x8x128xf32>
    tpu.vector_store %arg12[%c1_399, %c0_400, %c0_401], %762 {strides = array<i32>} : memref<2x8x128xf32, #tpu.memory_space<vmem>>, vector<1x8x128xf32>,
    %763 = arith.truncf %756 : vector<8x128xf32> to vector<8x128xbf16>
    %c1_402 = arith.constant 1 : index
    %c0_403 = arith.constant 0 : index
    %c0_404 = arith.constant 0 : index
    %764 = vector.load %arg13[%c1_402, %c0_403, %c0_404] : memref<2x8x128xbf16, #tpu.memory_space<vmem>>, vector<1x8x128xbf16>
    %765 = vector.shape_cast %764 : vector<1x8x128xbf16> to vector<8x128xbf16>
    %766 = vector.shape_cast %763 : vector<8x128xbf16> to vector<1x8x128xbf16>
    tpu.vector_store %arg13[%c1_402, %c0_403, %c0_404], %766 {strides = array<i32>} : memref<2x8x128xbf16, #tpu.memory_space<vmem>>, vector<1x8x128xbf16>,
    %767 = arith.index_cast %c7_i32 : i32 to index
    %c0_405 = arith.constant 0 : index
    %c0_406 = arith.constant 0 : index
    %768 = vector.load %arg8[%767, %c0_405, %c0_406] : memref<8x8x128xbf16, #tpu.memory_space<vmem>>, vector<1x8x128xbf16>
    %769 = vector.shape_cast %768 : vector<1x8x128xbf16> to vector<8x128xbf16>
    %770 = vector.shape_cast %763 : vector<8x128xbf16> to vector<1x8x128xbf16>
    tpu.vector_store %arg8[%767, %c0_405, %c0_406], %770 {strides = array<i32>} : memref<8x8x128xbf16, #tpu.memory_space<vmem>>, vector<1x8x128xbf16>,
    %c8_i32 = arith.constant 8 : i32
    %c0_i32_407 = arith.constant 0 : i32
    %771 = arith.cmpi eq, %arg0, %c0_i32_407 : i32
    %772 = arith.extui %771 : i1 to i32
    %c0_i32_408 = arith.constant 0 : i32
    %773 = arith.cmpi ne, %772, %c0_i32_408 : i32
    scf.if %773 {
      %c0_409 = arith.constant 0 : index
      %c0_410 = arith.constant 0 : index
      %c0_411 = arith.constant 0 : index
      %774 = vector.load %arg11[%c0_409, %c0_410, %c0_411] : memref<2x8x128xf32, #tpu.memory_space<vmem>>, vector<2x8x128xf32>
      %c0_412 = arith.constant 0 : index
      %c0_413 = arith.constant 0 : index
      %c0_414 = arith.constant 0 : index
      %775 = vector.load %arg9[%c0_412, %c0_413, %c0_414] : memref<2x8x128xf32, #tpu.memory_space<vmem>>, vector<2x8x128xf32>
      tpu.vector_store %arg9[%c0_412, %c0_413, %c0_414], %774 {strides = array<i32>} : memref<2x8x128xf32, #tpu.memory_space<vmem>>, vector<2x8x128xf32>,
      %c0_415 = arith.constant 0 : index
      %c0_416 = arith.constant 0 : index
      %c0_417 = arith.constant 0 : index
      %776 = vector.load %arg12[%c0_415, %c0_416, %c0_417] : memref<2x8x128xf32, #tpu.memory_space<vmem>>, vector<2x8x128xf32>
      %c0_418 = arith.constant 0 : index
      %c0_419 = arith.constant 0 : index
      %c0_420 = arith.constant 0 : index
      %777 = vector.load %arg10[%c0_418, %c0_419, %c0_420] : memref<2x8x128xf32, #tpu.memory_space<vmem>>, vector<2x8x128xf32>
      tpu.vector_store %arg10[%c0_418, %c0_419, %c0_420], %776 {strides = array<i32>} : memref<2x8x128xf32, #tpu.memory_space<vmem>>, vector<2x8x128xf32>,
    } else {
    }
    return
  }
  func.func @transform_0(%arg0: i32) -> (i32, i32, i32) {
    %c0_i32 = arith.constant 0 : i32
    %c0_i32_0 = arith.constant 0 : i32
    %c0_i32_1 = arith.constant 0 : i32
    return %arg0, %c0_i32, %c0_i32_0 : i32, i32, i32
  }
  func.func @transform_1(%arg0: i32) -> (i32, i32, i32) {
    %c0_i32 = arith.constant 0 : i32
    %c0_i32_0 = arith.constant 0 : i32
    %c0_i32_1 = arith.constant 0 : i32
    %c0_i32_2 = arith.constant 0 : i32
    return %c0_i32, %c0_i32_0, %c0_i32_1 : i32, i32, i32
  }
  func.func @transform_2(%arg0: i32) -> (i32, i32, i32) {
    %c0_i32 = arith.constant 0 : i32
    %c0_i32_0 = arith.constant 0 : i32
    %c0_i32_1 = arith.constant 0 : i32
    %c0_i32_2 = arith.constant 0 : i32
    return %c0_i32, %c0_i32_0, %c0_i32_1 : i32, i32, i32
  }
  func.func @transform_3(%arg0: i32) -> (i32, i32) {
    %c0_i32 = arith.constant 0 : i32
    %c0_i32_0 = arith.constant 0 : i32
    %c0_i32_1 = arith.constant 0 : i32
    return %c0_i32, %c0_i32_0 : i32, i32
  }
  func.func @transform_4(%arg0: i32) -> (i32, i32) {
    %c0_i32 = arith.constant 0 : i32
    %c0_i32_0 = arith.constant 0 : i32
    %c0_i32_1 = arith.constant 0 : i32
    return %c0_i32, %c0_i32_0 : i32, i32
  }
  func.func @transform_5(%arg0: i32) -> (i32, i32) {
    %c0_i32 = arith.constant 0 : i32
    %c0_i32_0 = arith.constant 0 : i32
    %c0_i32_1 = arith.constant 0 : i32
    return %c0_i32, %c0_i32_0 : i32, i32
  }
  func.func @transform_6(%arg0: i32) -> (i32, i32) {
    %c0_i32 = arith.constant 0 : i32
    %c0_i32_0 = arith.constant 0 : i32
    %c0_i32_1 = arith.constant 0 : i32
    return %c0_i32, %c0_i32_0 : i32, i32
  }
  func.func @transform_7(%arg0: i32) -> (i32, i32, i32) {
    %c0_i32 = arith.constant 0 : i32
    %c0_i32_0 = arith.constant 0 : i32
    %c0_i32_1 = arith.constant 0 : i32
    return %arg0, %c0_i32, %c0_i32_0 : i32, i32, i32
  }
  func.func @transform_8(%arg0: i32) -> (i32, i32, i32) {
    %c0_i32 = arith.constant 0 : i32
    %c0_i32_0 = arith.constant 0 : i32
    %c0_i32_1 = arith.constant 0 : i32
    %c0_i32_2 = arith.constant 0 : i32
    return %c0_i32, %c0_i32_0, %c0_i32_1 : i32, i32, i32
  }
  func.func @transform_9(%arg0: i32) -> (i32, i32, i32) {
    %c0_i32 = arith.constant 0 : i32
    %c0_i32_0 = arith.constant 0 : i32
    %c0_i32_1 = arith.constant 0 : i32
    %c0_i32_2 = arith.constant 0 : i32
    return %c0_i32, %c0_i32_0, %c0_i32_1 : i32, i32, i32
  }
}

</mosaic_0001>

<bundles_post_ra>
// kernel: decoder_forward.5
= control target key start
LH: loop header
LB: loop body
LE: loop exit
PB: predicated region body
PF: predicated region fallthrough
CT: control target
= control target key end

     0   :  { %s523_s0 = inlined_call_operand.vmem [shape: bf16[64,128], index: 0, kind: input, shape index: {}]   ;;  %s524_s1 = inlined_call_operand.vmem [shape: bf16[128,256], index: 1, kind: input, shape index: {}]   ;;  %s525_s2 = inlined_call_operand.vmem [shape: f32[1,256], index: 2, kind: input, shape index: {}]   ;;  %s526_s3 = inlined_call_operand.hbm [shape: f32[64,256], index: 3, kind: output, shape index: {}]  }
   0x1   :  { %v315_v0 = vld [vmem:[%s524_s1 + $0x70] sm:$0xf]  ;;  %v340_v1 = vld [vmem:[%s524_s1 + $0x74] sm:$0xf0]  ;;  %v339_v2 = vld [vmem:[%s524_s1 + $0x74] sm:$0xf] }
   0x2   :  { %v316_v3 = vor.u32 %v340_v1, %v315_v0  ;;  %v317_v4 = vld [vmem:[%s524_s1 + $0x78] sm:$0xf0]  ;;  %v307_v5 = vld [vmem:[%s524_s1 + $0x60] sm:$0xf]  ;;  %v338_v6 = vld [vmem:[%s524_s1 + $0x64] sm:$0xf0] }
   0x3   :  { %v320_v7 = vor.u32 %v339_v2, %v317_v4  ;;  %v337_v8 = vld [vmem:[%s524_s1 + $0x64] sm:$0xf]  ;;  %v309_v9 = vld [vmem:[%s524_s1 + $0x68] sm:$0xf0]  ;;  %v308_v10 = vor.u32 %v338_v6, %v307_v5  ;;  %v299_v12 = vld [vmem:[%s524_s1 + $0x50] sm:$0xf] }
   0x4   :  { %149 = vmatpush.bf16.msra.mxu0 %v316_v3  ;;  %341 = vmatpush.bf16.msra.mxu2 %v316_v3  ;;  %v312_v11 = vor.u32 %v337_v8, %v309_v9  ;;  %v336_v13 = vld [vmem:[%s524_s1 + $0x54] sm:$0xf0]  ;;  %v335_v14 = vld [vmem:[%s524_s1 + $0x54] sm:$0xf]  ;;  %v301_v15 = vld [vmem:[%s524_s1 + $0x58] sm:$0xf0] }
   0x5   :  { %178 = vmatpush.bf16.msra.mxu1 %v320_v7  ;;  %349 = vmatpush.bf16.msra.mxu3 %v320_v7  ;;  %v300_v16 = vor.u32 %v336_v13, %v299_v12  ;;  %v304_v17 = vor.u32 %v335_v14, %v301_v15  ;;  %v291_v18 = vld [vmem:[%s524_s1 + $0x40] sm:$0xf]  ;;  %v334_v19 = vld [vmem:[%s524_s1 + $0x44] sm:$0xf0]  ;;  %v333_v20 = vld [vmem:[%s524_s1 + $0x44] sm:$0xf] }
   0x6   :  { %v293_v21 = vld [vmem:[%s524_s1 + $0x48] sm:$0xf0]  ;;  %v292_v22 = vor.u32 %v334_v19, %v291_v18 }
   0x8   :  { %150 = vmatpush.bf16.msra.mxu0 %v308_v10  ;;  %342 = vmatpush.bf16.msra.mxu2 %v308_v10 }
   0x9   :  { %179 = vmatpush.bf16.msra.mxu1 %v312_v11  ;;  %350 = vmatpush.bf16.msra.mxu3 %v312_v11 }
   0xc   :  { %151 = vmatpush.bf16.msra.mxu0 %v300_v16  ;;  %343 = vmatpush.bf16.msra.mxu2 %v300_v16 }
   0xd   :  { %8 = vsyncpa [#allocation3], 0  ;;  %180 = vmatpush.bf16.msra.mxu1 %v304_v17  ;;  %351 = vmatpush.bf16.msra.mxu3 %v304_v17  ;;  %v296_v23 = vor.u32 %v333_v20, %v293_v21  ;;  %v283_v24 = vld [vmem:[%s524_s1 + $0x30] sm:$0xf]  ;;  %v332_v25 = vld [vmem:[%s524_s1 + $0x34] sm:$0xf0] }
   0xe   :  { %v331_v26 = vld [vmem:[%s524_s1 + $0x34] sm:$0xf]  ;;  %v285_v27 = vld [vmem:[%s524_s1 + $0x38] sm:$0xf0]  ;;  %v284_v28 = vor.u32 %v332_v25, %v283_v24  ;;  %v275_v30 = vld [vmem:[%s524_s1 + $0x20] sm:$0xf] }
   0xf   :  { %v288_v29 = vor.u32 %v331_v26, %v285_v27  ;;  %v330_v31 = vld [vmem:[%s524_s1 + $0x24] sm:$0xf0]  ;;  %v329_v32 = vld [vmem:[%s524_s1 + $0x24] sm:$0xf]  ;;  %v277_v33 = vld [vmem:[%s524_s1 + $0x28] sm:$0xf0] }
  0x10   :  { %152 = vmatpush.bf16.msra.mxu0 %v292_v22  ;;  %344 = vmatpush.bf16.msra.mxu2 %v292_v22  ;;  %v276_v34 = vor.u32 %v330_v31, %v275_v30  ;;  %v280_v35 = vor.u32 %v329_v32, %v277_v33  ;;  %v267_v36 = vld [vmem:[%s524_s1 + $0x10] sm:$0xf]  ;;  %v328_v37 = vld [vmem:[%s524_s1 + $0x14] sm:$0xf0]  ;;  %v327_v38 = vld [vmem:[%s524_s1 + $0x14] sm:$0xf] }
  0x11   :  { %181 = vmatpush.bf16.msra.mxu1 %v296_v23  ;;  %352 = vmatpush.bf16.msra.mxu3 %v296_v23  ;;  %v269_v39 = vld [vmem:[%s524_s1 + $0x18] sm:$0xf0]  ;;  %v268_v40 = vor.u32 %v328_v37, %v267_v36  ;;  %v259_v42 = vld [vmem:[%s524_s1] sm:$0xf]  ;;  %v326_v43 = vld [vmem:[%s524_s1 + $0x4] sm:$0xf0] }
  0x12   :  { %v272_v41 = vor.u32 %v327_v38, %v269_v39  ;;  %v325_v44 = vld [vmem:[%s524_s1 + $0x4] sm:$0xf]  ;;  %v261_v45 = vld [vmem:[%s524_s1 + $0x8] sm:$0xf0]  ;;  %v260_v46 = vor.u32 %v326_v43, %v259_v42  ;;  %v323_v49 = vld [vmem:[%s523_s0 + $0x10] sm:$0xff]  ;;  %s229_s6 = sshll.u32 %s526_s3, 4  ;;  %s230_s6 = int_to_ptr.hbm [resolvable:$true] %s229_s6 }
  0x13   :  { %v264_v47 = vor.u32 %v325_v44, %v261_v45  ;;  %v321_v48 = vld [vmem:[%s523_s0] sm:$0xff]  ;;  %v322_v50 = vld [vmem:[%s523_s0 + $0x8] sm:$0xff]  ;;  %v324_v51 = vld [vmem:[%s523_s0 + $0x18] sm:$0xff]  ;;  %s386_s0 = smov [#allocation2]   ;;  %s387_s7 = smov 256  }
  0x14   :  { %153 = vmatpush.bf16.msra.mxu0 %v284_v28  ;;  %345 = vmatpush.bf16.msra.mxu2 %v284_v28  ;;  %v39_v52 = vld [vmem:[%s525_s2] sm:$0x3]  ;;  %s227_s2 = sshll.u32 %s386_s0, 4  ;;  %s388_s8 = smov 16   ;;  %s228_s2 = int_to_ptr.vmem [resolvable:$true] %s227_s2 }
  0x15   :  { %182 = vmatpush.bf16.msra.mxu1 %v288_v29  ;;  %353 = vmatpush.bf16.msra.mxu3 %v288_v29  ;;  %v41_v53 = vperm.slane %v39_v52, 0  ;;  %v42_v54 = vperm.slane %v39_v52, 1 }
  0x18   :  { %154 = vmatpush.bf16.msra.mxu0 %v276_v34  ;;  %346 = vmatpush.bf16.msra.mxu2 %v276_v34 }
  0x19   :  { %183 = vmatpush.bf16.msra.mxu1 %v280_v35  ;;  %354 = vmatpush.bf16.msra.mxu3 %v280_v35 }
  0x1c   :  { %155 = vmatpush.bf16.msra.mxu0 %v268_v40  ;;  %347 = vmatpush.bf16.msra.mxu2 %v268_v40 }
  0x1d   :  { %184 = vmatpush.bf16.msra.mxu1 %v272_v41  ;;  %355 = vmatpush.bf16.msra.mxu3 %v272_v41 }
  0x20   :  { %156 = vmatpush.bf16.msra.mxu0 %v260_v46  ;;  %348 = vmatpush.bf16.msra.mxu2 %v260_v46 }
  0x21   :  { %185 = vmatpush.bf16.msra.mxu1 %v264_v47  ;;  %356 = vmatpush.bf16.msra.mxu3 %v264_v47 }
  0x23   :  { %157 = vmatmul.bf16.vlgmr.msra.gmra.mxu0 %v321_v48  ;;  %167 = vmatmul.bf16.vlgmr.msra.gmra.mxu2 %v323_v49 }
  0x24   :  { %186 = vmatmul.bf16.vlgmr.msra.gmra.mxu1 %v321_v48  ;;  %196 = vmatmul.bf16.vlgmr.msra.gmra.mxu3 %v323_v49 }
  0x33   :  { %162 = vmatmul.bf16.gmra.mxu0 %v322_v50  ;;  %172 = vmatmul.bf16.gmra.mxu2 %v324_v51 }
  0x34   :  { %191 = vmatmul.bf16.gmra.mxu1 %v322_v50  ;;  %201 = vmatmul.bf16.gmra.mxu3 %v324_v51 }
  0xa0   :  { %v158_v55 = vpop.f32.mrf.mxu0 }
  0xa1   :  { %v159_v56 = vadd.f32 %v158_v55, %v41_v53  ;;  %v187_v57 = vpop.f32.mrf.mxu1 }
  0xa2   :  { %v188_v58 = vadd.f32 %v187_v57, %v42_v54 }
  0xa3   :  { %207 = vst [vmem:[#allocation2] sm:$0xff] %v159_v56 }
  0xa4   :  { %208 = vst [vmem:[#allocation2 + $0x8] sm:$0xff] %v188_v58 }
  0xa6   :  { %v168_v59 = vpop.f32.mrf.mxu2 }
  0xa7   :  { %v169_v60 = vadd.f32 %v168_v59, %v41_v53  ;;  %v197_v61 = vpop.f32.mrf.mxu3 }
  0xa8   :  { %v198_v62 = vadd.f32 %v197_v61, %v42_v54  ;;  %v160_v63 = vpop.f32.mrf.mxu0 }
  0xa9   :  { %215 = vst [vmem:[#allocation2 + $0x40] sm:$0xff] %v169_v60  ;;  %v161_v0 = vadd.f32 %v160_v63, %v41_v53  ;;  %v189_v1 = vpop.f32.mrf.mxu1 }
  0xaa   :  { %216 = vst [vmem:[#allocation2 + $0x48] sm:$0xff] %v198_v62  ;;  %v190_v2 = vadd.f32 %v189_v1, %v42_v54 }
  0xab   :  { %209 = vst [vmem:[#allocation2 + $0x10] sm:$0xff] %v161_v0 }
  0xac   :  { %210 = vst [vmem:[#allocation2 + $0x18] sm:$0xff] %v190_v2 }
  0xae   :  { %v170_v3 = vpop.f32.mrf.mxu2 }
  0xaf   :  { %v171_v4 = vadd.f32 %v170_v3, %v41_v53  ;;  %v199_v5 = vpop.f32.mrf.mxu3 }
  0xb0   :  { %v200_v6 = vadd.f32 %v199_v5, %v42_v54  ;;  %v163_v7 = vpop.f32.mrf.mxu0 }
  0xb1   :  { %217 = vst [vmem:[#allocation2 + $0x50] sm:$0xff] %v171_v4  ;;  %v164_v8 = vadd.f32 %v163_v7, %v41_v53  ;;  %v192_v9 = vpop.f32.mrf.mxu1 }
  0xb2   :  { %218 = vst [vmem:[#allocation2 + $0x58] sm:$0xff] %v200_v6  ;;  %v193_v10 = vadd.f32 %v192_v9, %v42_v54 }
  0xb3   :  { %211 = vst [vmem:[#allocation2 + $0x20] sm:$0xff] %v164_v8 }
  0xb4   :  { %212 = vst [vmem:[#allocation2 + $0x28] sm:$0xff] %v193_v10 }
  0xb6   :  { %v173_v11 = vpop.f32.mrf.mxu2 }
  0xb7   :  { %v174_v12 = vadd.f32 %v173_v11, %v41_v53  ;;  %v202_v13 = vpop.f32.mrf.mxu3 }
  0xb8   :  { %v203_v14 = vadd.f32 %v202_v13, %v42_v54  ;;  %v165_v15 = vpop.f32.mrf.mxu0 }
  0xb9   :  { %219 = vst [vmem:[#allocation2 + $0x60] sm:$0xff] %v174_v12  ;;  %v166_v16 = vadd.f32 %v165_v15, %v41_v53  ;;  %v194_v17 = vpop.f32.mrf.mxu1 }
  0xba   :  { %220 = vst [vmem:[#allocation2 + $0x68] sm:$0xff] %v203_v14  ;;  %v195_v18 = vadd.f32 %v194_v17, %v42_v54 }
  0xbb   :  { %213 = vst [vmem:[#allocation2 + $0x30] sm:$0xff] %v166_v16 }
  0xbc   :  { %214 = vst [vmem:[#allocation2 + $0x38] sm:$0xff] %v195_v18 }
  0xbe   :  { %v175_v19 = vpop.f32.mrf.mxu2 }
  0xbf   :  { %v176_v20 = vadd.f32 %v175_v19, %v41_v53  ;;  %v204_v21 = vpop.f32.mrf.mxu3 }
  0xc0   :  { %v205_v22 = vadd.f32 %v204_v21, %v42_v54 }
  0xc1   :  { %221 = vst [vmem:[#allocation2 + $0x70] sm:$0xff] %v176_v20 }
  0xc2   :  { %222 = vst [vmem:[#allocation2 + $0x78] sm:$0xff] %v205_v22 }
  0xc3   :  { %235 = dma.vmem_to_hbm [thread:$0]  %s228_s2, 2048, %s230_s6, [#allocation3], %s387_s7, %s387_s7, %s388_s8  }
  0xc4   :  { %384 = dma.done.wait [#allocation3], 2048  }
  0xc5   :  { %385 = vsyncadd [#allocation3], 4294965248 }
  0xc6   :  { %240 = vsyncpa [#allocation3], 1 }

// kernel: decoder_forward.4
= control target key start
LH: loop header
LB: loop body
LE: loop exit
PB: predicated region body
PF: predicated region fallthrough
CT: control target
= control target key end

     0   :  { %vm300_vm0 = vcmask 1043456   ;;  %v929_v26 = vmov 0   ;;  %vm200_vm5 = vcmask 64512   ;;  %s1143_s1 = inlined_call_operand.vmem [shape: bf16[8,8,128], index: 1, kind: input, shape index: {}]   ;;  %s1144_s0 = inlined_call_operand.vmem [shape: bf16[8,8,128], index: 0, kind: input, shape index: {}]   ;;  %s1145_s2 = inlined_call_operand.vmem [shape: f32[8,8], index: 2, kind: input, shape index: {}]   ;;  %s1146_s4 = inlined_call_operand.vmem [shape: bf16[128,128], index: 4, kind: input, shape index: {}]   ;;  %s1147_s3 = inlined_call_operand.vmem [shape: bf16[128,128], index: 3, kind: input, shape index: {}]   ;;  %s1148_s5 = inlined_call_operand.vmem [shape: f32[1,128], index: 5, kind: input, shape index: {}]   ;;  %s1149_s6 = inlined_call_operand.vmem [shape: bf16[64,128], index: 6, kind: output, shape index: {}]  }
   0x1   :  { %v32_v0 = vld [vmem:[%s1143_s1] sm:$0xf]  ;;  %v33_v1 = vld [vmem:[%s1143_s1 + $0x4] sm:$0xf]  ;;  %v34_v2 = vld [vmem:[%s1143_s1 + $0x8] sm:$0xf] }
   0x2   :  { %47 = vmatpush.bf16.xpose.msra.mxu0 %v32_v0  ;;  %60 = vmatpush.bf16.xpose.msra.mxu1 %v33_v1  ;;  %v35_v3 = vld [vmem:[%s1143_s1 + $0xc] sm:$0xf]  ;;  %v36_v4 = vld [vmem:[%s1143_s1 + $0x10] sm:$0xf]  ;;  %v37_v5 = vld [vmem:[%s1143_s1 + $0x14] sm:$0xf] }
   0x3   :  { %73 = vmatpush.bf16.xpose.msra.mxu2 %v34_v2  ;;  %86 = vmatpush.bf16.xpose.msra.mxu3 %v35_v3  ;;  %v38_v6 = vld [vmem:[%s1143_s1 + $0x18] sm:$0xf]  ;;  %v24_v7 = vld [vmem:[%s1144_s0] sm:$0xf]  ;;  %v25_v8 = vld [vmem:[%s1144_s0 + $0x4] sm:$0xf] }
   0x4   :  { %v39_v9 = vld [vmem:[%s1143_s1 + $0x1c] sm:$0xf]  ;;  %v26_v10 = vld [vmem:[%s1144_s0 + $0x8] sm:$0xf]  ;;  %v27_v11 = vld [vmem:[%s1144_s0 + $0xc] sm:$0xf] }
   0x5   :  { %v302_v12 = vsel %vm300_vm0, %v32_v0, 0  ;;  %v321_v13 = vsel %vm300_vm0, %v33_v1, 0  ;;  %v340_v14 = vsel %vm300_vm0, %v34_v2, 0  ;;  %v359_v15 = vsel %vm300_vm0, %v35_v3, 0  ;;  %v28_v16 = vld [vmem:[%s1144_s0 + $0x10] sm:$0xf] }
   0x6   :  { %v29_v17 = vld [vmem:[%s1144_s0 + $0x14] sm:$0xf]  ;;  %v30_v18 = vld [vmem:[%s1144_s0 + $0x18] sm:$0xf]  ;;  %v31_v19 = vld [vmem:[%s1144_s0 + $0x1c] sm:$0xf] }
   0x7   :  { %v378_v20 = vsel %vm300_vm0, %v36_v4, 0  ;;  %v397_v21 = vsel %vm300_vm0, %v37_v5, 0  ;;  %v416_v22 = vsel %vm300_vm0, %v38_v6, 0  ;;  %v435_v23 = vsel %vm300_vm0, %v39_v9, 0  ;;  %v144_v24 = vld [vmem:[%s1145_s2] sm:$0xff] }
   0x8   :  { %vm160_vm1 = vcmp.gt.f32.partialorder %v144_v24, 0.5  ;;  %v146_v25 = vrot.slane %v144_v24, 1  ;;  %v147_v28 = vrot.slane %v144_v24, 2  ;;  %v148_v31 = vrot.slane %v144_v24, 3 }
   0x9   :  { %48 = vmatmul.bf16.vlgmr.msra.gmra.mxu0 %v24_v7  ;;  %61 = vmatmul.bf16.vlgmr.msra.gmra.mxu1 %v25_v8  ;;  %v168_v27 = vsel %vm160_vm1, 1, %v929_v26  ;;  %v149_v36 = vrot.slane %v144_v24, 4  ;;  %v150_v41 = vrot.slane %v144_v24, 5  ;;  %v151_v47 = vrot.slane %v144_v24, 6 }
   0xa   :  { %99 = vmatpush.bf16.xpose.msrb.mxu0 %v36_v4  ;;  %112 = vmatpush.bf16.xpose.msrb.mxu1 %v37_v5  ;;  %vm161_vm2 = vcmp.gt.f32.partialorder %v146_v25, 0.5  ;;  %v176_v29 = vperm.slane %v168_v27, 0  ;;  %vm162_vm3 = vcmp.gt.f32.partialorder %v147_v28, 0.5  ;;  %vm163_vm6 = vcmp.gt.f32.partialorder %v148_v31, 0.5 }
   0xb   :  { %125 = vmatpush.bf16.xpose.msrb.mxu2 %v38_v6  ;;  %138 = vmatpush.bf16.xpose.msrb.mxu3 %v39_v9  ;;  %v169_v30 = vsel %vm161_vm2, 1, %v929_v26  ;;  %v170_v33 = vsel %vm162_vm3, 1, %v929_v26  ;;  %v171_v40 = vsel %vm163_vm6, 1, %v929_v26  ;;  %vm164_vm8 = vcmp.gt.f32.partialorder %v149_v36, 0.5 }
   0xc   :  { %74 = vmatmul.bf16.vlgmr.msra.gmra.mxu2 %v26_v10  ;;  %87 = vmatmul.bf16.vlgmr.msra.gmra.mxu3 %v27_v11  ;;  %vm184_vm4 = vcmp.eq.s32.totalorder %v176_v29, 1  ;;  %v177_v32 = vperm.slane %v169_v30, 0  ;;  %v178_v38 = vperm.slane %v170_v33, 0  ;;  %v179_v43 = vperm.slane %v171_v40, 0 }
   0xd   :  { %v172_v46 = vsel %vm164_vm8, 1, %v929_v26  ;;  %v152_v48 = vrot.slane %v144_v24, 7  ;;  %vm165_vm10 = vcmp.gt.f32.partialorder %v150_v41, 0.5  ;;  %vm166_vm12 = vcmp.gt.f32.partialorder %v151_v47, 0.5 }
   0xe   :  { %vm185_vm7 = vcmp.eq.s32.totalorder %v177_v32, 1  ;;  %vm186_vm9 = vcmp.eq.s32.totalorder %v178_v38, 1  ;;  %vm187_vm11 = vcmp.eq.s32.totalorder %v179_v43, 1  ;;  %v180_v54 = vperm.slane %v172_v46, 0 }
   0xf   :  { %v173_v55 = vsel %vm165_vm10, 1, %v929_v26  ;;  %vm167_vm13 = vcmp.gt.f32.partialorder %v152_v48, 0.5  ;;  %v174_v58 = vsel %vm166_vm12, 1, %v929_v26 }
  0x10   :  { %vm188_vm14 = vcmp.eq.s32.totalorder %v180_v54, 1  ;;  %v181_v57 = vperm.slane %v173_v55, 0  ;;  %v175_v59 = vsel %vm167_vm13, 1, %v929_v26  ;;  %v182_v2 = vperm.slane %v174_v58, 0 }
  0x11   :  { %v183_v3 = vperm.slane %v175_v59, 0 }
  0x12   :  { %311 = vmatpush.bf16.msra.mxu0 %v302_v12  ;;  %330 = vmatpush.bf16.msra.mxu1 %v321_v13  ;;  %vm189_vm15 = vcmp.eq.s32.totalorder %v181_v57, 1  ;;  %vm190_vm0 = vcmp.eq.s32.totalorder %v182_v2, 1 }
  0x13   :  { %349 = vmatpush.bf16.msra.mxu2 %v340_v14  ;;  %368 = vmatpush.bf16.msra.mxu3 %v359_v15  ;;  %vm191_vm1 = vcmp.eq.s32.totalorder %v183_v3, 1 }
  0x19   :  { %100 = vmatmul.bf16.vlgmr.msrb.gmra.mxu0 %v28_v16  ;;  %113 = vmatmul.bf16.vlgmr.msrb.gmra.mxu1 %v29_v17 }
  0x1a   :  { %387 = vmatpush.bf16.msrb.mxu0 %v378_v20  ;;  %406 = vmatpush.bf16.msrb.mxu1 %v397_v21 }
  0x1c   :  { %126 = vmatmul.bf16.vlgmr.msrb.gmra.mxu2 %v30_v18  ;;  %139 = vmatmul.bf16.vlgmr.msrb.gmra.mxu3 %v31_v19 }
  0x1d   :  { %425 = vmatpush.bf16.msrb.mxu2 %v416_v22  ;;  %444 = vmatpush.bf16.msrb.mxu3 %v435_v23 }
  0x86   :  { %v49_v34 = vpop.f32.mrf.mxu0  ;;  %v62_v35 = vpop.f32.mrf.mxu1 }
  0x87   :  { %v1024_v37 = vsel %vm184_vm4, 1e-10, %v49_v34  ;;  %v1028_v42 = vsel %vm185_vm7, 1e-10, %v62_v35 }
  0x88   :  { %v201_v39 = vsel %vm200_vm5, %v1024_v37, -inf  ;;  %v204_v52 = vsel %vm200_vm5, %v1028_v42, -inf }
  0x89   :  { %202 = vmax.xlane.f32.xlu0 %v201_v39 }
  0x8e   :  { %v51_v50 = vpop.f32.mrf.mxu0  ;;  %v64_v51 = vpop.f32.mrf.mxu1 }
  0x8f   :  { %v75_v44 = vpop.f32.mrf.mxu2  ;;  %v88_v45 = vpop.f32.mrf.mxu3 }
  0x90   :  { %v194_v49 = vsel %vm186_vm9, 1e-10, %v75_v44  ;;  %v195_v56 = vsel %vm187_vm11, 1e-10, %v88_v45 }
  0x91   :  { %v207_v53 = vsel %vm200_vm5, %v194_v49, -inf  ;;  %205 = vmax.xlane.f32.xlu0 %v204_v52  ;;  %v210_v62 = vsel %vm200_vm5, %v195_v56, -inf }
  0x92   :  { %208 = vmax.xlane.f32.xlu1 %v207_v53 }
  0x96   :  { %v101_v63 = vpop.f32.mrf.mxu0  ;;  %v114_v0 = vpop.f32.mrf.mxu1 }
  0x97   :  { %v77_v60 = vpop.f32.mrf.mxu2  ;;  %v90_v61 = vpop.f32.mrf.mxu3  ;;  %v196_v1 = vsel %vm188_vm14, 1e-10, %v101_v63  ;;  %v197_v5 = vsel %vm189_vm15, 1e-10, %v114_v0  ;;  %v839_v63 = vld [vmem:[%s1146_s4 + $0x38] sm:$0xff]  ;;  %v838_v0 = vld [vmem:[%s1146_s4 + $0x30] sm:$0xff] }
  0x98   :  { %v213_v4 = vsel %vm200_vm5, %v196_v1, -inf  ;;  %v216_v12 = vsel %vm200_vm5, %v197_v5, -inf }
  0x99   :  { %214 = vmax.xlane.f32.xlu2 %v213_v4 }
  0x9a   :  { %211 = vmax.xlane.f32.xlu1 %v210_v62 }
  0x9e   :  { %v103_v10 = vpop.f32.mrf.mxu0  ;;  %v116_v11 = vpop.f32.mrf.mxu1 }
  0x9f   :  { %v127_v6 = vpop.f32.mrf.mxu2  ;;  %v140_v7 = vpop.f32.mrf.mxu3  ;;  %v830_v11 = vld [vmem:[%s1147_s3 + $0x30] sm:$0xff] }
  0xa0   :  { %v198_v8 = vsel %vm190_vm0, 1e-10, %v127_v6  ;;  %v199_v9 = vsel %vm191_vm1, 1e-10, %v140_v7 }
  0xa1   :  { %v222_v13 = vsel %vm200_vm5, %v199_v9, -inf  ;;  %v219_v14 = vsel %vm200_vm5, %v198_v8, -inf  ;;  %217 = vmax.xlane.f32.xlu2 %v216_v12  ;;  %v836_v12 = vld [vmem:[%s1146_s4 + $0x20] sm:$0xff] }
  0xa2   :  { %223 = vmax.xlane.f32.xlu1 %v222_v13  ;;  %220 = vmax.xlane.f32.xlu0 %v219_v14 }
  0xa7   :  { %v129_v15 = vpop.f32.mrf.mxu2  ;;  %v142_v16 = vpop.f32.mrf.mxu3 }
  0xfc   :  { %v203_v17 = vpop.xlane.xlu0 %202 }
  0xfd   :  { %v225_v18 = vsub.f32 %v1024_v37, %v203_v17 }
  0xff   :  { %v233_v19 = vmul.f32 1.442695, %v225_v18 }
 0x101   :  { %881 = vpow2.f32 %v233_v19 }
 0x104   :  { %v206_v22 = vpop.xlane.xlu0 %205 }
 0x105   :  { %v209_v20 = vpop.xlane.xlu1 %208  ;;  %v226_v23 = vsub.f32 %v1028_v42, %v206_v22 }
 0x106   :  { %v227_v21 = vsub.f32 %v194_v49, %v209_v20 }
 0x107   :  { %v882_v25 = vpop.eup %881  ;;  %v235_v26 = vmul.f32 1.442695, %v226_v23  ;;  %v828_v23 = vld [vmem:[%s1147_s3 + $0x20] sm:$0xff] }
 0x108   :  { %v237_v24 = vmul.f32 1.442695, %v227_v21  ;;  %v249_v27 = vsel %vm200_vm5, %v882_v25, 0.0  ;;  %v829_v21 = vld [vmem:[%s1147_s3 + $0x28] sm:$0xff] }
 0x109   :  { %250 = vadd.xlane.f32.xlu2 %v249_v27 }
 0x10a   :  { %883 = vpow2.f32 %v237_v24 }
 0x10b   :  { %885 = vpow2.f32 %v235_v26 }
 0x10c   :  { %v215_v30 = vpop.xlane.xlu2 %214 }
 0x10d   :  { %v212_v28 = vpop.xlane.xlu1 %211  ;;  %v229_v31 = vsub.f32 %v196_v1, %v215_v30 }
 0x10e   :  { %v228_v29 = vsub.f32 %v195_v56, %v212_v28 }
 0x10f   :  { %v241_v35 = vmul.f32 1.442695, %v229_v31 }
 0x110   :  { %v884_v32 = vpop.eup %883  ;;  %v239_v33 = vmul.f32 1.442695, %v228_v29 }
 0x111   :  { %v886_v34 = vpop.eup %885  ;;  %v255_v36 = vsel %vm200_vm5, %v884_v32, 0.0 }
 0x112   :  { %887 = vpow2.f32 %v239_v33  ;;  %256 = vadd.xlane.f32.xlu1 %v255_v36  ;;  %v252_v37 = vsel %vm200_vm5, %v886_v34, 0.0  ;;  %v835_v33 = vld [vmem:[%s1146_s4 + $0x18] sm:$0xff]  ;;  %v826_v36 = vld [vmem:[%s1147_s3 + $0x10] sm:$0xff] }
 0x113   :  { %889 = vpow2.f32 %v241_v35  ;;  %253 = vadd.xlane.f32.xlu0 %v252_v37  ;;  %v834_v35 = vld [vmem:[%s1146_s4 + $0x10] sm:$0xff]  ;;  %v833_v37 = vld [vmem:[%s1146_s4 + $0x8] sm:$0xff] }
 0x114   :  { %v218_v42 = vpop.xlane.xlu2 %217 }
 0x115   :  { %v224_v38 = vpop.xlane.xlu1 %223  ;;  %v221_v39 = vpop.xlane.xlu0 %220  ;;  %v230_v43 = vsub.f32 %v197_v5, %v218_v42  ;;  %v822_v42 = vld [vmem:[%s1144_s0 + $0x10] sm:$0xff] }
 0x116   :  { %v232_v40 = vsub.f32 %v199_v9, %v224_v38  ;;  %v231_v41 = vsub.f32 %v198_v8, %v221_v39  ;;  %v831_v8 = vld [vmem:[%s1147_s3 + $0x38] sm:$0xff]  ;;  %v837_v9 = vld [vmem:[%s1146_s4 + $0x28] sm:$0xff]  ;;  %v832_v39 = vld [vmem:[%s1146_s4] sm:$0xff] }
 0x117   :  { %v243_v48 = vmul.f32 1.442695, %v230_v43  ;;  %v825_v38 = vld [vmem:[%s1147_s3 + $0x8] sm:$0xff] }
 0x118   :  { %v888_v44 = vpop.eup %887  ;;  %v247_v45 = vmul.f32 1.442695, %v232_v40  ;;  %v245_v46 = vmul.f32 1.442695, %v231_v41  ;;  %v824_v40 = vld [vmem:[%s1147_s3] sm:$0xff]  ;;  %v821_v43 = vld [vmem:[%s1144_s0 + $0x8] sm:$0xff] }
 0x119   :  { %v890_v47 = vpop.eup %889  ;;  %v258_v49 = vsel %vm200_vm5, %v888_v44, 0.0  ;;  %v820_v41 = vld [vmem:[%s1144_s0] sm:$0xff] }
 0x11a   :  { %891 = vpow2.f32 %v247_v45  ;;  %259 = vadd.xlane.f32.xlu2 %v258_v49  ;;  %v261_v50 = vsel %vm200_vm5, %v890_v47, 0.0 }
 0x11b   :  { %893 = vpow2.f32 %v245_v46  ;;  %262 = vadd.xlane.f32.xlu0 %v261_v50  ;;  %v823_v46 = vld [vmem:[%s1144_s0 + $0x18] sm:$0xff] }
 0x11c   :  { %895 = vpow2.f32 %v243_v48 }
 0x120   :  { %v1045_v51 = vpop.eup %891 }
 0x121   :  { %v1047_v52 = vpop.eup %893  ;;  %v270_v55 = vsel %vm200_vm5, %v1045_v51, 0.0 }
 0x122   :  { %v1049_v53 = vpop.eup %895  ;;  %v267_v54 = vsel %vm200_vm5, %v1047_v52, 0.0 }
 0x123   :  { %268 = vadd.xlane.f32.xlu2 %v267_v54  ;;  %271 = vadd.xlane.f32.xlu0 %v270_v55  ;;  %v264_v56 = vsel %vm200_vm5, %v1049_v53, 0.0 }
 0x124   :  { %265 = vadd.xlane.f32.xlu1 %v264_v56 }
 0x17c   :  { %v251_v57 = vpop.xlane.xlu2 %250 }
 0x17d   :  { %897 = vrcp.f32 %v251_v57 }
 0x183   :  { %v898_v58 = vpop.eup %897 }
 0x184   :  { %v281_v60 = vmul.f32 %v898_v58, %v882_v25 }
 0x185   :  { %v257_v59 = vpop.xlane.xlu1 %256 }
 0x186   :  { %899 = vrcp.f32 %v257_v59  ;;  %v254_v61 = vpop.xlane.xlu0 %253  ;;  %v289_v62 = vpack.c.bf16 %v281_v60, %v281_v60 }
 0x187   :  { %901 = vrcp.f32 %v254_v61 }
 0x188   :  { %732 = vmatmul.msk.bf16.vlgmr.msra.gmra.mxu0 %vm200_vm5, %v289_v62 }
 0x189   :  { %562 = vmatpush.bf16.msra.mxu0 %v839_v63 }
 0x18c   :  { %v900_v1 = vpop.eup %899 }
 0x18d   :  { %v902_v2 = vpop.eup %901  ;;  %v283_v3 = vmul.f32 %v900_v1, %v884_v32  ;;  %v260_v4 = vpop.xlane.xlu2 %259  ;;  %563 = vmatpush.bf16.msra.mxu0 %v838_v0 }
 0x18e   :  { %v282_v5 = vmul.f32 %v902_v2, %v886_v34  ;;  %903 = vrcp.f32 %v260_v4  ;;  %v263_v6 = vpop.xlane.xlu0 %262  ;;  %v827_v34 = vld [vmem:[%s1147_s3 + $0x18] sm:$0xff] }
 0x18f   :  { %v291_v7 = vpack.c.bf16 %v283_v3, %v283_v3  ;;  %905 = vrcp.f32 %v263_v6 }
 0x190   :  { %v290_v10 = vpack.c.bf16 %v282_v5, %v282_v5 }
 0x191   :  { %734 = vmatmul.msk.bf16.vlgmr.msra.gmra.mxu2 %vm200_vm5, %v291_v7  ;;  %564 = vmatpush.bf16.msra.mxu0 %v837_v9 }
 0x192   :  { %733 = vmatmul.msk.bf16.vlgmr.msra.gmra.mxu1 %vm200_vm5, %v290_v10  ;;  %863 = vmatpush.bf16.msra.mxu2 %v839_v63 }
 0x193   :  { %663 = vmatpush.bf16.msra.mxu1 %v831_v8 }
 0x194   :  { %v904_v13 = vpop.eup %903 }
 0x195   :  { %v906_v14 = vpop.eup %905  ;;  %v284_v15 = vmul.f32 %v904_v13, %v888_v44  ;;  %565 = vmatpush.bf16.msra.mxu0 %v836_v12 }
 0x196   :  { %v285_v16 = vmul.f32 %v906_v14, %v890_v47  ;;  %v269_v17 = vpop.xlane.xlu2 %268  ;;  %864 = vmatpush.bf16.msra.mxu2 %v838_v0  ;;  %v272_v19 = vpop.xlane.xlu0 %271 }
 0x197   :  { %v292_v18 = vpack.c.bf16 %v284_v15, %v284_v15  ;;  %907 = vrcp.f32 %v269_v17  ;;  %v266_v20 = vpop.xlane.xlu1 %265  ;;  %664 = vmatpush.bf16.msra.mxu1 %v830_v11 }
 0x198   :  { %v293_v22 = vpack.c.bf16 %v285_v16, %v285_v16  ;;  %909 = vrcp.f32 %v266_v20 }
 0x199   :  { %735 = vmatmul.msk.bf16.vlgmr.msra.gmra.mxu3 %vm200_vm5, %v292_v18  ;;  %911 = vrcp.f32 %v272_v19  ;;  %566 = vmatpush.bf16.msra.mxu0 %v835_v33 }
 0x19a   :  { %736 = vmatmul.msk.bf16.vlgmr.msrb.gmra.mxu0 %vm200_vm5, %v293_v22  ;;  %871 = vmatpush.bf16.msra.mxu3 %v831_v8 }
 0x19b   :  { %665 = vmatpush.bf16.msra.mxu1 %v829_v21  ;;  %865 = vmatpush.bf16.msra.mxu2 %v837_v9 }
 0x19d   :  { %v908_v24 = vpop.eup %907  ;;  %567 = vmatpush.bf16.msra.mxu0 %v834_v35 }
 0x19e   :  { %v287_v25 = vmul.f32 %v908_v24, %v1047_v52  ;;  %872 = vmatpush.bf16.msra.mxu3 %v830_v11  ;;  %v910_v26 = vpop.eup %909 }
 0x19f   :  { %666 = vmatpush.bf16.msra.mxu1 %v828_v23  ;;  %866 = vmatpush.bf16.msra.mxu2 %v836_v12  ;;  %v912_v27 = vpop.eup %911  ;;  %v286_v29 = vmul.f32 %v910_v26, %v1049_v53 }
 0x1a0   :  { %v295_v28 = vpack.c.bf16 %v287_v25, %v287_v25  ;;  %v288_v31 = vmul.f32 %v912_v27, %v1045_v51 }
 0x1a1   :  { %v294_v30 = vpack.c.bf16 %v286_v29, %v286_v29  ;;  %568 = vmatpush.bf16.msra.mxu0 %v833_v37 }
 0x1a2   :  { %738 = vmatmul.msk.bf16.vlgmr.msrb.gmra.mxu2 %vm200_vm5, %v295_v28  ;;  %873 = vmatpush.bf16.msra.mxu3 %v829_v21  ;;  %v296_v32 = vpack.c.bf16 %v288_v31, %v288_v31  ;;  %v880_v21 = vld [vmem:[%s1148_s5] ss:$0 sm:$0xff] }
 0x1a3   :  { %737 = vmatmul.msk.bf16.vlgmr.msrb.gmra.mxu1 %vm200_vm5, %v294_v30  ;;  %867 = vmatpush.bf16.msra.mxu2 %v835_v33 }
 0x1a4   :  { %667 = vmatpush.bf16.msra.mxu1 %v827_v34 }
 0x1a5   :  { %569 = vmatpush.bf16.msra.mxu0 %v832_v39 }
 0x1a6   :  { %874 = vmatpush.bf16.msra.mxu3 %v828_v23 }
 0x1a7   :  { %868 = vmatpush.bf16.msra.mxu2 %v834_v35 }
 0x1a8   :  { %668 = vmatpush.bf16.msra.mxu1 %v826_v36 }
 0x1a9   :  { %739 = vmatmul.msk.bf16.vlgmr.msrb.gmra.mxu3 %vm200_vm5, %v296_v32 }
 0x1aa   :  { %875 = vmatpush.bf16.msra.mxu3 %v827_v34 }
 0x1ab   :  { %869 = vmatpush.bf16.msra.mxu2 %v833_v37 }
 0x1ac   :  { %669 = vmatpush.bf16.msra.mxu1 %v825_v38 }
 0x1ae   :  { %876 = vmatpush.bf16.msra.mxu3 %v826_v36 }
 0x1af   :  { %870 = vmatpush.bf16.msra.mxu2 %v832_v39 }
 0x1b0   :  { %670 = vmatpush.bf16.msra.mxu1 %v824_v40 }
 0x1b2   :  { %877 = vmatpush.bf16.msra.mxu3 %v825_v38 }
 0x1b3   :  { %671 = vmatmul.bf16.vlgmr.msra.gmra.mxu1 %v820_v41 }
 0x1b6   :  { %878 = vmatpush.bf16.msra.mxu3 %v824_v40 }
 0x1b9   :  { %681 = vmatmul.bf16.vlgmr.msra.gmra.mxu3 %v822_v42 }
 0x1c3   :  { %676 = vmatmul.bf16.gmra.mxu1 %v821_v43 }
 0x1c9   :  { %686 = vmatmul.bf16.gmra.mxu3 %v823_v46 }
 0x205   :  { %v313_v44 = vpop.f32.mrf.mxu0 }
 0x206   :  { %v450_v45 = vpack.c.bf16 %v313_v44, %v313_v44 }
 0x208   :  { %v498_v50 = vunpack.c.l.b16 %v450_v45 }
 0x20d   :  { %v315_v47 = vpop.f32.mrf.mxu0 }
 0x20f   :  { %v332_v48 = vpop.f32.mrf.mxu1 }
 0x210   :  { %v451_v49 = vpack.c.bf16 %v332_v48, %v332_v48 }
 0x212   :  { %v499_v51 = vunpack.c.l.b16 %v451_v49 }
 0x214   :  { %v506_v52 = vpack.c.b16 %v499_v51, %v498_v50  ;;  %v351_v53 = vpop.f32.mrf.mxu2 }
 0x215   :  { %v452_v59 = vpack.c.bf16 %v351_v53, %v351_v53 }
 0x216   :  { %570 = vmatmul.bf16.vlgmr.msra.gmra.mxu0 %v506_v52 }
 0x217   :  { %v334_v54 = vpop.f32.mrf.mxu1  ;;  %v389_v55 = vpop.f32.mrf.mxu0  ;;  %v500_v0 = vunpack.c.l.b16 %v452_v59 }
 0x218   :  { %v454_v61 = vpack.c.bf16 %v389_v55, %v389_v55 }
 0x21a   :  { %v502_v2 = vunpack.c.l.b16 %v454_v61 }
 0x21c   :  { %v353_v56 = vpop.f32.mrf.mxu2  ;;  %v370_v57 = vpop.f32.mrf.mxu3 }
 0x21d   :  { %v453_v58 = vpack.c.bf16 %v370_v57, %v370_v57 }
 0x21f   :  { %v391_v60 = vpop.f32.mrf.mxu0  ;;  %v501_v62 = vunpack.c.l.b16 %v453_v58 }
 0x220   :  { %v408_v63 = vpop.f32.mrf.mxu1 }
 0x221   :  { %v455_v1 = vpack.c.bf16 %v408_v63, %v408_v63  ;;  %v507_v5 = vpack.c.b16 %v501_v62, %v500_v0 }
 0x223   :  { %v503_v3 = vunpack.c.l.b16 %v455_v1 }
 0x224   :  { %v372_v4 = vpop.f32.mrf.mxu3 }
 0x225   :  { %v427_v6 = vpop.f32.mrf.mxu2  ;;  %v508_v7 = vpack.c.b16 %v503_v3, %v502_v2 }
 0x226   :  { %575 = vmatmul.bf16.gmra.mxu0 %v507_v5  ;;  %v456_v12 = vpack.c.bf16 %v427_v6, %v427_v6 }
 0x227   :  { %580 = vmatmul.bf16.vlgmr.msra.gmra.mxu2 %v508_v7 }
 0x228   :  { %v410_v8 = vpop.f32.mrf.mxu1  ;;  %v504_v14 = vunpack.c.l.b16 %v456_v12 }
 0x22c   :  { %v446_v9 = vpop.f32.mrf.mxu3 }
 0x22d   :  { %v429_v10 = vpop.f32.mrf.mxu2  ;;  %v457_v11 = vpack.c.bf16 %v446_v9, %v446_v9 }
 0x22f   :  { %v505_v13 = vunpack.c.l.b16 %v457_v11 }
 0x230   :  { %v672_v17 = vpop.f32.mrf.mxu1 }
 0x231   :  { %v509_v16 = vpack.c.b16 %v505_v13, %v504_v14 }
 0x234   :  { %v448_v15 = vpop.f32.mrf.mxu3 }
 0x237   :  { %585 = vmatmul.bf16.gmra.mxu2 %v509_v16 }
 0x238   :  { %v674_v19 = vpop.f32.mrf.mxu1 }
 0x23c   :  { %v682_v29 = vpop.f32.mrf.mxu3 }
 0x240   :  { %v677_v26 = vpop.f32.mrf.mxu1 }
 0x244   :  { %v684_v40 = vpop.f32.mrf.mxu3 }
 0x248   :  { %v679_v33 = vpop.f32.mrf.mxu1 }
 0x24c   :  { %v687_v48 = vpop.f32.mrf.mxu3 }
 0x254   :  { %v689_v55 = vpop.f32.mrf.mxu3 }
 0x293   :  { %v571_v18 = vpop.f32.mrf.mxu0 }
 0x294   :  { %v673_v20 = vadd.f32 %v672_v17, %v571_v18 }
 0x296   :  { %v696_v22 = vadd.f32 %v880_v21, %v673_v20 }
 0x298   :  { %913 = vtanh.f32 %v696_v22 }
 0x29b   :  { %v573_v23 = vpop.f32.mrf.mxu0 }
 0x29c   :  { %v675_v24 = vadd.f32 %v674_v19, %v573_v23 }
 0x29e   :  { %v697_v25 = vadd.f32 %v880_v21, %v675_v24  ;;  %v914_v28 = vpop.eup %913 }
 0x2a0   :  { %915 = vtanh.f32 %v697_v25 }
 0x2a3   :  { %v576_v27 = vpop.f32.mrf.mxu0 }
 0x2a4   :  { %v678_v32 = vadd.f32 %v677_v26, %v576_v27 }
 0x2a6   :  { %v916_v30 = vpop.eup %915  ;;  %v698_v36 = vadd.f32 %v880_v21, %v678_v32 }
 0x2a7   :  { %v843_v31 = vpack.c.bf16 %v916_v30, %v914_v28 }
 0x2a8   :  { %917 = vtanh.f32 %v698_v36 }
 0x2a9   :  { %844 = vst [vmem:[%s1149_s6] sm:$0xff] %v843_v31  }
 0x2aa   :  { %v581_v34 = vpop.f32.mrf.mxu2 }
 0x2ab   :  { %v578_v35 = vpop.f32.mrf.mxu0  ;;  %v683_v39 = vadd.f32 %v682_v29, %v581_v34 }
 0x2ac   :  { %v680_v37 = vadd.f32 %v679_v33, %v578_v35 }
 0x2ad   :  { %v700_v41 = vadd.f32 %v880_v21, %v683_v39 }
 0x2ae   :  { %v699_v38 = vadd.f32 %v880_v21, %v680_v37  ;;  %v918_v44 = vpop.eup %917 }
 0x2b0   :  { %919 = vtanh.f32 %v699_v38 }
 0x2b1   :  { %921 = vtanh.f32 %v700_v41 }
 0x2b2   :  { %v583_v42 = vpop.f32.mrf.mxu2 }
 0x2b3   :  { %v685_v43 = vadd.f32 %v684_v40, %v583_v42 }
 0x2b5   :  { %v701_v45 = vadd.f32 %v880_v21, %v685_v43 }
 0x2b6   :  { %v920_v46 = vpop.eup %919 }
 0x2b7   :  { %v848_v47 = vpack.c.bf16 %v920_v46, %v918_v44  ;;  %923 = vtanh.f32 %v701_v45  ;;  %v922_v50 = vpop.eup %921 }
 0x2b9   :  { %860 = vst [vmem:[%s1149_s6 + $0x8] sm:$0xff] %v848_v47  }
 0x2ba   :  { %v586_v49 = vpop.f32.mrf.mxu2 }
 0x2bb   :  { %v688_v53 = vadd.f32 %v687_v48, %v586_v49 }
 0x2bd   :  { %v924_v51 = vpop.eup %923  ;;  %v702_v54 = vadd.f32 %v880_v21, %v688_v53 }
 0x2be   :  { %v853_v52 = vpack.c.bf16 %v924_v51, %v922_v50 }
 0x2bf   :  { %925 = vtanh.f32 %v702_v54 }
 0x2c0   :  { %861 = vst [vmem:[%s1149_s6 + $0x10] sm:$0xff] %v853_v52  }
 0x2c2   :  { %v588_v56 = vpop.f32.mrf.mxu2 }
 0x2c3   :  { %v690_v57 = vadd.f32 %v689_v55, %v588_v56 }
 0x2c5   :  { %v703_v58 = vadd.f32 %v880_v21, %v690_v57  ;;  %v926_v59 = vpop.eup %925 }
 0x2c7   :  { %927 = vtanh.f32 %v703_v58 }
 0x2cd   :  { %v928_v60 = vpop.eup %927 }
 0x2ce   :  { %v858_v61 = vpack.c.bf16 %v928_v60, %v926_v59 }
 0x2d0   :  { %862 = vst [vmem:[%s1149_s6 + $0x18] sm:$0xff] %v858_v61  }

// kernel: decoder_forward.3
= control target key start
LH: loop header
LB: loop body
LE: loop exit
PB: predicated region body
PF: predicated region fallthrough
CT: control target
= control target key end

     0   :  { %15 = vsyncpa [#allocation6], 0  ;;  %s17359_s0 = inlined_call_operand.vmem [shape: f32[8,8,512], index: 0, kind: input, shape index: {}]   ;;  %s17360_s1 = inlined_call_operand.vmem [shape: f32[2,8,128], index: 1, kind: input, shape index: {}]   ;;  %s17361_s2 = inlined_call_operand.vmem [shape: f32[2,8,128], index: 2, kind: input, shape index: {}]   ;;  %s17362_s3 = inlined_call_operand.vmem [shape: bf16[128,512], index: 3, kind: input, shape index: {}]   ;;  %s17363_s4 = inlined_call_operand.vmem [shape: bf16[128,512], index: 4, kind: input, shape index: {}]   ;;  %s17364_s5 = inlined_call_operand.vmem [shape: bf16[128,512], index: 5, kind: input, shape index: {}]   ;;  %s17365_s6 = inlined_call_operand.vmem [shape: f32[1,512], index: 6, kind: input, shape index: {}]   ;;  %s17366_s7 = inlined_call_operand.vmem [shape: bf16[8,8,128], index: 7, kind: output, shape index: {0}]   ;;  %s17367_s8 = inlined_call_operand.hbm [shape: f32[2,8,128], index: 8, kind: output, shape index: {1}]   ;;  %s17368_s9 = inlined_call_operand.hbm [shape: f32[2,8,128], index: 9, kind: output, shape index: {2}]  }
   0x1   :  { %v7375_v0 = vld [vmem:[%s17362_s3 + $0xe0] sm:$0xf]  ;;  %v10446_v1 = vld [vmem:[%s17362_s3 + $0xec] sm:$0xf0]  ;;  %v10444_v2 = vld [vmem:[%s17362_s3 + $0xe4] sm:$0xf] }
   0x2   :  { %v7376_v3 = vor.u32 %v10446_v1, %v7375_v0  ;;  %v7377_v4 = vld [vmem:[%s17362_s3 + $0xf0] sm:$0xf0]  ;;  %v10445_v5 = vld [vmem:[%s17362_s3 + $0xec] sm:$0xf]  ;;  %v7385_v6 = vld [vmem:[%s17362_s3 + $0xf8] sm:$0xf0] }
   0x3   :  { %v7380_v7 = vor.u32 %v10444_v2, %v7377_v4  ;;  %v7388_v8 = vor.u32 %v10445_v5, %v7385_v6  ;;  %v7359_v9 = vld [vmem:[%s17362_s3 + $0xc0] sm:$0xf]  ;;  %v10442_v10 = vld [vmem:[%s17362_s3 + $0xcc] sm:$0xf0]  ;;  %v10440_v11 = vld [vmem:[%s17362_s3 + $0xc4] sm:$0xf] }
   0x4   :  { %246 = vmatpush.bf16.msra.mxu0 %v7376_v3  ;;  %v7360_v12 = vor.u32 %v10442_v10, %v7359_v9  ;;  %v7361_v13 = vld [vmem:[%s17362_s3 + $0xd0] sm:$0xf0]  ;;  %v10441_v14 = vld [vmem:[%s17362_s3 + $0xcc] sm:$0xf]  ;;  %v7369_v15 = vld [vmem:[%s17362_s3 + $0xd8] sm:$0xf0] }
   0x5   :  { %259 = vmatpush.bf16.msra.mxu1 %v7380_v7  ;;  %285 = vmatpush.bf16.msra.mxu3 %v7388_v8  ;;  %v7364_v16 = vor.u32 %v10440_v11, %v7361_v13  ;;  %v7372_v17 = vor.u32 %v10441_v14, %v7369_v15  ;;  %v7383_v18 = vld [vmem:[%s17362_s3 + $0xe8] sm:$0xf]  ;;  %v10447_v19 = vld [vmem:[%s17362_s3 + $0xf4] sm:$0xf0]  ;;  %v7343_v20 = vld [vmem:[%s17362_s3 + $0xa0] sm:$0xf] }
   0x6   :  { %v7384_v21 = vor.u32 %v10447_v19, %v7383_v18  ;;  %v10438_v22 = vld [vmem:[%s17362_s3 + $0xac] sm:$0xf0]  ;;  %v10436_v23 = vld [vmem:[%s17362_s3 + $0xa4] sm:$0xf]  ;;  %v7345_v24 = vld [vmem:[%s17362_s3 + $0xb0] sm:$0xf0] }
   0x7   :  { %v10437_v25 = vld [vmem:[%s17362_s3 + $0xac] sm:$0xf]  ;;  %v7353_v26 = vld [vmem:[%s17362_s3 + $0xb8] sm:$0xf0]  ;;  %v7367_v27 = vld [vmem:[%s17362_s3 + $0xc8] sm:$0xf]  ;;  %v7344_v28 = vor.u32 %v10438_v22, %v7343_v20  ;;  %v7348_v32 = vor.u32 %v10436_v23, %v7345_v24 }
   0x8   :  { %247 = vmatpush.bf16.msra.mxu0 %v7360_v12  ;;  %272 = vmatpush.bf16.msra.mxu2 %v7384_v21  ;;  %v10443_v29 = vld [vmem:[%s17362_s3 + $0xd4] sm:$0xf0]  ;;  %v7327_v30 = vld [vmem:[%s17362_s3 + $0x80] sm:$0xf]  ;;  %v10434_v31 = vld [vmem:[%s17362_s3 + $0x8c] sm:$0xf0]  ;;  %v7356_v33 = vor.u32 %v10437_v25, %v7353_v26 }
   0x9   :  { %260 = vmatpush.bf16.msra.mxu1 %v7364_v16  ;;  %286 = vmatpush.bf16.msra.mxu3 %v7372_v17  ;;  %v7368_v34 = vor.u32 %v10443_v29, %v7367_v27  ;;  %v10432_v35 = vld [vmem:[%s17362_s3 + $0x84] sm:$0xf]  ;;  %v7329_v36 = vld [vmem:[%s17362_s3 + $0x90] sm:$0xf0]  ;;  %v10433_v37 = vld [vmem:[%s17362_s3 + $0x8c] sm:$0xf]  ;;  %v7328_v41 = vor.u32 %v10434_v31, %v7327_v30 }
   0xa   :  { %v7337_v38 = vld [vmem:[%s17362_s3 + $0x98] sm:$0xf0]  ;;  %v7351_v39 = vld [vmem:[%s17362_s3 + $0xa8] sm:$0xf]  ;;  %v10439_v40 = vld [vmem:[%s17362_s3 + $0xb4] sm:$0xf0]  ;;  %v7332_v45 = vor.u32 %v10432_v35, %v7329_v36 }
   0xb   :  { %v7352_v42 = vor.u32 %v10439_v40, %v7351_v39  ;;  %v7311_v43 = vld [vmem:[%s17362_s3 + $0x60] sm:$0xf]  ;;  %v10430_v44 = vld [vmem:[%s17362_s3 + $0x6c] sm:$0xf0]  ;;  %v7340_v46 = vor.u32 %v10433_v37, %v7337_v38  ;;  %v10428_v47 = vld [vmem:[%s17362_s3 + $0x64] sm:$0xf] }
   0xc   :  { %248 = vmatpush.bf16.msra.mxu0 %v7344_v28  ;;  %273 = vmatpush.bf16.msra.mxu2 %v7368_v34  ;;  %v7335_v48 = vld [vmem:[%s17362_s3 + $0x88] sm:$0xf]  ;;  %v10435_v49 = vld [vmem:[%s17362_s3 + $0x94] sm:$0xf0]  ;;  %v7313_v50 = vld [vmem:[%s17362_s3 + $0x70] sm:$0xf0]  ;;  %v7312_v53 = vor.u32 %v10430_v44, %v7311_v43 }
   0xd   :  { %261 = vmatpush.bf16.msra.mxu1 %v7348_v32  ;;  %287 = vmatpush.bf16.msra.mxu3 %v7356_v33  ;;  %v10429_v51 = vld [vmem:[%s17362_s3 + $0x6c] sm:$0xf]  ;;  %v7321_v52 = vld [vmem:[%s17362_s3 + $0x78] sm:$0xf0]  ;;  %v7336_v54 = vor.u32 %v10435_v49, %v7335_v48  ;;  %v7295_v55 = vld [vmem:[%s17362_s3 + $0x40] sm:$0xf]  ;;  %v7316_v57 = vor.u32 %v10428_v47, %v7313_v50 }
   0xe   :  { %v10426_v56 = vld [vmem:[%s17362_s3 + $0x4c] sm:$0xf0]  ;;  %v7324_v58 = vor.u32 %v10429_v51, %v7321_v52  ;;  %v10424_v59 = vld [vmem:[%s17362_s3 + $0x44] sm:$0xf]  ;;  %v7319_v60 = vld [vmem:[%s17362_s3 + $0x68] sm:$0xf] }
   0xf   :  { %v10431_v61 = vld [vmem:[%s17362_s3 + $0x74] sm:$0xf0]  ;;  %v7297_v62 = vld [vmem:[%s17362_s3 + $0x50] sm:$0xf0]  ;;  %v10425_v63 = vld [vmem:[%s17362_s3 + $0x4c] sm:$0xf]  ;;  %v7296_v2 = vor.u32 %v10426_v56, %v7295_v55 }
  0x10   :  { %249 = vmatpush.bf16.msra.mxu0 %v7328_v41  ;;  %274 = vmatpush.bf16.msra.mxu2 %v7352_v42  ;;  %v7305_v0 = vld [vmem:[%s17362_s3 + $0x58] sm:$0xf0]  ;;  %v7279_v1 = vld [vmem:[%s17362_s3 + $0x20] sm:$0xf]  ;;  %v7320_v3 = vor.u32 %v10431_v61, %v7319_v60  ;;  %v10422_v4 = vld [vmem:[%s17362_s3 + $0x2c] sm:$0xf0]  ;;  %v7300_v7 = vor.u32 %v10424_v59, %v7297_v62 }
  0x11   :  { %262 = vmatpush.bf16.msra.mxu1 %v7332_v45  ;;  %288 = vmatpush.bf16.msra.mxu3 %v7340_v46  ;;  %v10420_v5 = vld [vmem:[%s17362_s3 + $0x24] sm:$0xf]  ;;  %v7303_v6 = vld [vmem:[%s17362_s3 + $0x48] sm:$0xf]  ;;  %v7308_v8 = vor.u32 %v10425_v63, %v7305_v0  ;;  %v10427_v9 = vld [vmem:[%s17362_s3 + $0x54] sm:$0xf0]  ;;  %v7280_v17 = vor.u32 %v10422_v4, %v7279_v1 }
  0x12   :  { %v43_v10 = vld [vmem:[%s17360_s1] sm:$0xff]  ;;  %v44_v11 = vld [vmem:[%s17360_s1 + $0x8] sm:$0xff]  ;;  %v7281_v12 = vld [vmem:[%s17362_s3 + $0x30] sm:$0xf0]  ;;  %v7304_v18 = vor.u32 %v10427_v9, %v7303_v6 }
  0x13   :  { %v10421_v13 = vld [vmem:[%s17362_s3 + $0x2c] sm:$0xf]  ;;  %v7289_v14 = vld [vmem:[%s17362_s3 + $0x38] sm:$0xf0]  ;;  %v11187_v15 = vpack.c.bf16 %v44_v11, %v43_v10  ;;  %v7263_v16 = vld [vmem:[%s17362_s3] sm:$0xf]  ;;  %v7284_v21 = vor.u32 %v10420_v5, %v7281_v12 }
  0x14   :  { %250 = vmatpush.bf16.msra.mxu0 %v7312_v53  ;;  %275 = vmatpush.bf16.msra.mxu2 %v7336_v54  ;;  %v10418_v19 = vld [vmem:[%s17362_s3 + $0xc] sm:$0xf0]  ;;  %v10416_v20 = vld [vmem:[%s17362_s3 + $0x4] sm:$0xf]  ;;  %v7292_v22 = vor.u32 %v10421_v13, %v7289_v14  ;;  %v7265_v23 = vld [vmem:[%s17362_s3 + $0x10] sm:$0xf0] }
  0x15   :  { %263 = vmatpush.bf16.msra.mxu1 %v7316_v57  ;;  %289 = vmatpush.bf16.msra.mxu3 %v7324_v58  ;;  %11188 = vst [vmem:[#allocation4] sm:$0xff] %v11187_v15   ;;  %v7287_v24 = vld [vmem:[%s17362_s3 + $0x28] sm:$0xf]  ;;  %v10423_v25 = vld [vmem:[%s17362_s3 + $0x34] sm:$0xf0]  ;;  %v7264_v32 = vor.u32 %v10418_v19, %v7263_v16  ;;  %v7268_v36 = vor.u32 %v10416_v20, %v7265_v23 }
  0x16   :  { %v10417_v26 = vld [vmem:[%s17362_s3 + $0xc] sm:$0xf]  ;;  %v7273_v27 = vld [vmem:[%s17362_s3 + $0x18] sm:$0xf0]  ;;  %v7506_v28 = vld [vmem:[%s17364_s5 + $0xe0] sm:$0xf]  ;;  %v7288_v33 = vor.u32 %v10423_v25, %v7287_v24 }
  0x17   :  { %v10510_v29 = vld [vmem:[%s17364_s5 + $0xec] sm:$0xf0]  ;;  %v10508_v30 = vld [vmem:[%s17364_s5 + $0xe4] sm:$0xf]  ;;  %v7508_v31 = vld [vmem:[%s17364_s5 + $0xf0] sm:$0xf0]  ;;  %v7276_v37 = vor.u32 %v10417_v26, %v7273_v27 }
  0x18   :  { %251 = vmatpush.bf16.msra.mxu0 %v7296_v2  ;;  %276 = vmatpush.bf16.msra.mxu2 %v7320_v3  ;;  %v10509_v34 = vld [vmem:[%s17364_s5 + $0xec] sm:$0xf]  ;;  %v7516_v35 = vld [vmem:[%s17364_s5 + $0xf8] sm:$0xf0]  ;;  %v7271_v38 = vld [vmem:[%s17362_s3 + $0x8] sm:$0xf]  ;;  %v7507_v40 = vor.u32 %v10510_v29, %v7506_v28  ;;  %v7511_v41 = vor.u32 %v10508_v30, %v7508_v31 }
  0x19   :  { %264 = vmatpush.bf16.msra.mxu1 %v7300_v7  ;;  %290 = vmatpush.bf16.msra.mxu3 %v7308_v8  ;;  %v10419_v39 = vld [vmem:[%s17362_s3 + $0x14] sm:$0xf0]  ;;  %v7514_v42 = vld [vmem:[%s17364_s5 + $0xe8] sm:$0xf]  ;;  %v7490_v44 = vld [vmem:[%s17364_s5 + $0xc0] sm:$0xf]  ;;  %v7519_v45 = vor.u32 %v10509_v34, %v7516_v35 }
  0x1a   :  { %v10511_v43 = vld [vmem:[%s17364_s5 + $0xf4] sm:$0xf0]  ;;  %v10506_v46 = vld [vmem:[%s17364_s5 + $0xcc] sm:$0xf0]  ;;  %v10504_v47 = vld [vmem:[%s17364_s5 + $0xc4] sm:$0xf]  ;;  %v7272_v52 = vor.u32 %v10419_v39, %v7271_v38 }
  0x1b   :  { %v7492_v48 = vld [vmem:[%s17364_s5 + $0xd0] sm:$0xf0]  ;;  %v10505_v50 = vld [vmem:[%s17364_s5 + $0xcc] sm:$0xf]  ;;  %v7500_v51 = vld [vmem:[%s17364_s5 + $0xd8] sm:$0xf0]  ;;  %v7515_v53 = vor.u32 %v10511_v43, %v7514_v42  ;;  %v7491_v54 = vor.u32 %v10506_v46, %v7490_v44 }
  0x1c   :  { %252 = vmatpush.bf16.msra.mxu0 %v7280_v17  ;;  %277 = vmatpush.bf16.msra.mxu2 %v7304_v18  ;;  %v53_v49 = vld [vmem:[#allocation4] sm:$0xf]  ;;  %v7498_v55 = vld [vmem:[%s17364_s5 + $0xc8] sm:$0xf]  ;;  %v10507_v56 = vld [vmem:[%s17364_s5 + $0xd4] sm:$0xf0]  ;;  %v7495_v57 = vor.u32 %v10504_v47, %v7492_v48  ;;  %v7503_v58 = vor.u32 %v10505_v50, %v7500_v51 }
  0x1d   :  { %265 = vmatpush.bf16.msra.mxu1 %v7284_v21  ;;  %291 = vmatpush.bf16.msra.mxu3 %v7292_v22  ;;  %v7474_v59 = vld [vmem:[%s17364_s5 + $0xa0] sm:$0xf]  ;;  %v10502_v60 = vld [vmem:[%s17364_s5 + $0xac] sm:$0xf0]  ;;  %v10500_v61 = vld [vmem:[%s17364_s5 + $0xa4] sm:$0xf]  ;;  %v7499_v1 = vor.u32 %v10507_v56, %v7498_v55 }
  0x1e   :  { %v7476_v62 = vld [vmem:[%s17364_s5 + $0xb0] sm:$0xf0]  ;;  %v10501_v63 = vld [vmem:[%s17364_s5 + $0xac] sm:$0xf]  ;;  %v7484_v0 = vld [vmem:[%s17364_s5 + $0xb8] sm:$0xf0]  ;;  %v7475_v2 = vor.u32 %v10502_v60, %v7474_v59 }
  0x1f   :  { %v7482_v3 = vld [vmem:[%s17364_s5 + $0xa8] sm:$0xf]  ;;  %v10503_v4 = vld [vmem:[%s17364_s5 + $0xb4] sm:$0xf0]  ;;  %v7479_v5 = vor.u32 %v10500_v61, %v7476_v62  ;;  %v7487_v6 = vor.u32 %v10501_v63, %v7484_v0  ;;  %v7458_v7 = vld [vmem:[%s17364_s5 + $0x80] sm:$0xf] }
  0x20   :  { %253 = vmatpush.bf16.msra.mxu0 %v7264_v32  ;;  %278 = vmatpush.bf16.msra.mxu2 %v7288_v33  ;;  %v10498_v8 = vld [vmem:[%s17364_s5 + $0x8c] sm:$0xf0]  ;;  %v10496_v9 = vld [vmem:[%s17364_s5 + $0x84] sm:$0xf]  ;;  %v7460_v10 = vld [vmem:[%s17364_s5 + $0x90] sm:$0xf0]  ;;  %v7483_v13 = vor.u32 %v10503_v4, %v7482_v3 }
  0x21   :  { %266 = vmatpush.bf16.msra.mxu1 %v7268_v36  ;;  %292 = vmatpush.bf16.msra.mxu3 %v7276_v37  ;;  %v10497_v11 = vld [vmem:[%s17364_s5 + $0x8c] sm:$0xf]  ;;  %v7468_v12 = vld [vmem:[%s17364_s5 + $0x98] sm:$0xf0]  ;;  %v7459_v14 = vor.u32 %v10498_v8, %v7458_v7  ;;  %v7466_v15 = vld [vmem:[%s17364_s5 + $0x88] sm:$0xf] }
  0x22   :  { %v10499_v16 = vld [vmem:[%s17364_s5 + $0x94] sm:$0xf0] }
  0x23   :  { %254 = vmatmul.bf16.vlgmr.msra.gmra.mxu0 %v53_v49 }
  0x24   :  { %596 = vmatpush.bf16.msrb.mxu0 %v7507_v40  ;;  %267 = vmatmul.bf16.vlgmr.msra.gmra.mxu1 %v53_v49 }
  0x25   :  { %609 = vmatpush.bf16.msrb.mxu1 %v7511_v41  ;;  %635 = vmatpush.bf16.msrb.mxu3 %v7519_v45 }
  0x26   :  { %293 = vmatmul.bf16.vlgmr.msra.gmra.mxu3 %v53_v49  ;;  %279 = vmatpush.bf16.msra.mxu2 %v7272_v52 }
  0x28   :  { %597 = vmatpush.bf16.msrb.mxu0 %v7491_v54 }
  0x29   :  { %610 = vmatpush.bf16.msrb.mxu1 %v7495_v57  ;;  %636 = vmatpush.bf16.msrb.mxu3 %v7503_v58 }
  0x2a   :  { %622 = vmatpush.bf16.msrb.mxu2 %v7515_v53 }
  0x2b   :  { %280 = vmatmul.bf16.vlgmr.msra.gmra.mxu2 %v53_v49 }
  0x2c   :  { %598 = vmatpush.bf16.msrb.mxu0 %v7475_v2 }
  0x2e   :  { %623 = vmatpush.bf16.msrb.mxu2 %v7499_v1 }
  0x2f   :  { %16 = vsyncpa [#allocation8], 0  ;;  %611 = vmatpush.bf16.msrb.mxu1 %v7479_v5  ;;  %637 = vmatpush.bf16.msrb.mxu3 %v7487_v6  ;;  %v7463_v17 = vor.u32 %v10496_v9, %v7460_v10  ;;  %v7471_v18 = vor.u32 %v10497_v11, %v7468_v12  ;;  %v7442_v19 = vld [vmem:[%s17364_s5 + $0x60] sm:$0xf]  ;;  %v10494_v20 = vld [vmem:[%s17364_s5 + $0x6c] sm:$0xf0]  ;;  %v7467_v25 = vor.u32 %v10499_v16, %v7466_v15 }
  0x30   :  { %v10492_v21 = vld [vmem:[%s17364_s5 + $0x64] sm:$0xf]  ;;  %v7444_v22 = vld [vmem:[%s17364_s5 + $0x70] sm:$0xf0]  ;;  %v10493_v23 = vld [vmem:[%s17364_s5 + $0x6c] sm:$0xf]  ;;  %599 = vmatpush.bf16.msrb.mxu0 %v7459_v14  ;;  %v7443_v26 = vor.u32 %v10494_v20, %v7442_v19 }
  0x31   :  { %v7452_v24 = vld [vmem:[%s17364_s5 + $0x78] sm:$0xf0]  ;;  %v7450_v27 = vld [vmem:[%s17364_s5 + $0x68] sm:$0xf]  ;;  %v10495_v28 = vld [vmem:[%s17364_s5 + $0x74] sm:$0xf0]  ;;  %v7447_v29 = vor.u32 %v10492_v21, %v7444_v22 }
  0x32   :  { %624 = vmatpush.bf16.msrb.mxu2 %v7483_v13  ;;  %v7455_v30 = vor.u32 %v10493_v23, %v7452_v24  ;;  %v7426_v31 = vld [vmem:[%s17364_s5 + $0x40] sm:$0xf]  ;;  %v10490_v32 = vld [vmem:[%s17364_s5 + $0x4c] sm:$0xf0]  ;;  %v10488_v33 = vld [vmem:[%s17364_s5 + $0x44] sm:$0xf]  ;;  %v7451_v37 = vor.u32 %v10495_v28, %v7450_v27 }
  0x33   :  { %612 = vmatpush.bf16.msrb.mxu1 %v7463_v17  ;;  %638 = vmatpush.bf16.msrb.mxu3 %v7471_v18  ;;  %v7428_v34 = vld [vmem:[%s17364_s5 + $0x50] sm:$0xf0]  ;;  %v10489_v35 = vld [vmem:[%s17364_s5 + $0x4c] sm:$0xf]  ;;  %v7436_v36 = vld [vmem:[%s17364_s5 + $0x58] sm:$0xf0]  ;;  %v7427_v38 = vor.u32 %v10490_v32, %v7426_v31 }
  0x34   :  { %600 = vmatpush.bf16.msrb.mxu0 %v7443_v26  ;;  %v7434_v39 = vld [vmem:[%s17364_s5 + $0x48] sm:$0xf]  ;;  %v10491_v40 = vld [vmem:[%s17364_s5 + $0x54] sm:$0xf0]  ;;  %v7431_v41 = vor.u32 %v10488_v33, %v7428_v34  ;;  %v7439_v42 = vor.u32 %v10489_v35, %v7436_v36  ;;  %v7410_v43 = vld [vmem:[%s17364_s5 + $0x20] sm:$0xf] }
  0x35   :  { %v10486_v44 = vld [vmem:[%s17364_s5 + $0x2c] sm:$0xf0]  ;;  %v10484_v45 = vld [vmem:[%s17364_s5 + $0x24] sm:$0xf]  ;;  %v7412_v46 = vld [vmem:[%s17364_s5 + $0x30] sm:$0xf0]  ;;  %v7435_v49 = vor.u32 %v10491_v40, %v7434_v39 }
  0x36   :  { %625 = vmatpush.bf16.msrb.mxu2 %v7467_v25  ;;  %v10485_v47 = vld [vmem:[%s17364_s5 + $0x2c] sm:$0xf]  ;;  %v7420_v48 = vld [vmem:[%s17364_s5 + $0x38] sm:$0xf0]  ;;  %v7411_v50 = vor.u32 %v10486_v44, %v7410_v43  ;;  %v7415_v51 = vor.u32 %v10484_v45, %v7412_v46  ;;  %v7418_v52 = vld [vmem:[%s17364_s5 + $0x28] sm:$0xf] }
  0x37   :  { %613 = vmatpush.bf16.msrb.mxu1 %v7447_v29  ;;  %639 = vmatpush.bf16.msrb.mxu3 %v7455_v30  ;;  %v10487_v53 = vld [vmem:[%s17364_s5 + $0x34] sm:$0xf0]  ;;  %v7423_v54 = vor.u32 %v10485_v47, %v7420_v48  ;;  %v7394_v56 = vld [vmem:[%s17364_s5] sm:$0xf]  ;;  %v10482_v57 = vld [vmem:[%s17364_s5 + $0xc] sm:$0xf0] }
  0x38   :  { %601 = vmatpush.bf16.msrb.mxu0 %v7427_v38  ;;  %v7419_v55 = vor.u32 %v10487_v53, %v7418_v52  ;;  %v10480_v58 = vld [vmem:[%s17364_s5 + $0x4] sm:$0xf]  ;;  %v7395_v59 = vor.u32 %v10482_v57, %v7394_v56  ;;  %v7396_v60 = vld [vmem:[%s17364_s5 + $0x10] sm:$0xf0]  ;;  %v7402_v61 = vld [vmem:[%s17364_s5 + $0x8] sm:$0xf] }
  0x39   :  { %v10483_v62 = vld [vmem:[%s17364_s5 + $0x14] sm:$0xf0]  ;;  %v7399_v63 = vor.u32 %v10480_v58, %v7396_v60  ;;  %v10481_v1 = vld [vmem:[%s17364_s5 + $0xc] sm:$0xf]  ;;  %v7404_v2 = vld [vmem:[%s17364_s5 + $0x18] sm:$0xf0] }
  0x3a   :  { %626 = vmatpush.bf16.msrb.mxu2 %v7451_v37  ;;  %v7403_v0 = vor.u32 %v10483_v62, %v7402_v61  ;;  %v7407_v3 = vor.u32 %v10481_v1, %v7404_v2  ;;  %v7634_v4 = vld [vmem:[%s17363_s4 + $0xe0] sm:$0xf]  ;;  %v10478_v5 = vld [vmem:[%s17363_s4 + $0xec] sm:$0xf0]  ;;  %v10476_v6 = vld [vmem:[%s17363_s4 + $0xe4] sm:$0xf] }
  0x3b   :  { %614 = vmatpush.bf16.msrb.mxu1 %v7431_v41  ;;  %640 = vmatpush.bf16.msrb.mxu3 %v7439_v42  ;;  %v7635_v7 = vor.u32 %v10478_v5, %v7634_v4  ;;  %v7636_v8 = vld [vmem:[%s17363_s4 + $0xf0] sm:$0xf0]  ;;  %v7642_v9 = vld [vmem:[%s17363_s4 + $0xe8] sm:$0xf]  ;;  %v10479_v10 = vld [vmem:[%s17363_s4 + $0xf4] sm:$0xf0] }
  0x3c   :  { %602 = vmatpush.bf16.msrb.mxu0 %v7411_v50  ;;  %v7639_v11 = vor.u32 %v10476_v6, %v7636_v8  ;;  %v7643_v12 = vor.u32 %v10479_v10, %v7642_v9  ;;  %v10477_v13 = vld [vmem:[%s17363_s4 + $0xec] sm:$0xf]  ;;  %v7644_v14 = vld [vmem:[%s17363_s4 + $0xf8] sm:$0xf0]  ;;  %v7618_v15 = vld [vmem:[%s17363_s4 + $0xc0] sm:$0xf] }
  0x3d   :  { %v7647_v16 = vor.u32 %v10477_v13, %v7644_v14  ;;  %v10474_v17 = vld [vmem:[%s17363_s4 + $0xcc] sm:$0xf0]  ;;  %v10472_v18 = vld [vmem:[%s17363_s4 + $0xc4] sm:$0xf]  ;;  %v7620_v19 = vld [vmem:[%s17363_s4 + $0xd0] sm:$0xf0] }
  0x3e   :  { %627 = vmatpush.bf16.msrb.mxu2 %v7435_v49  ;;  %v7619_v20 = vor.u32 %v10474_v17, %v7618_v15  ;;  %v7623_v21 = vor.u32 %v10472_v18, %v7620_v19  ;;  %v7626_v22 = vld [vmem:[%s17363_s4 + $0xc8] sm:$0xf]  ;;  %v10475_v23 = vld [vmem:[%s17363_s4 + $0xd4] sm:$0xf0]  ;;  %v10473_v24 = vld [vmem:[%s17363_s4 + $0xcc] sm:$0xf] }
  0x3f   :  { %615 = vmatpush.bf16.msrb.mxu1 %v7415_v51  ;;  %641 = vmatpush.bf16.msrb.mxu3 %v7423_v54  ;;  %v7627_v25 = vor.u32 %v10475_v23, %v7626_v22  ;;  %v7628_v26 = vld [vmem:[%s17363_s4 + $0xd8] sm:$0xf0]  ;;  %v7602_v28 = vld [vmem:[%s17363_s4 + $0xa0] sm:$0xf]  ;;  %v10470_v29 = vld [vmem:[%s17363_s4 + $0xac] sm:$0xf0] }
  0x40   :  { %603 = vmatpush.bf16.msrb.mxu0 %v7395_v59  ;;  %v7631_v27 = vor.u32 %v10473_v24, %v7628_v26  ;;  %v10468_v30 = vld [vmem:[%s17363_s4 + $0xa4] sm:$0xf]  ;;  %v7603_v31 = vor.u32 %v10470_v29, %v7602_v28  ;;  %v7604_v32 = vld [vmem:[%s17363_s4 + $0xb0] sm:$0xf0]  ;;  %v7610_v33 = vld [vmem:[%s17363_s4 + $0xa8] sm:$0xf] }
  0x41   :  { %v10471_v34 = vld [vmem:[%s17363_s4 + $0xb4] sm:$0xf0]  ;;  %v7607_v35 = vor.u32 %v10468_v30, %v7604_v32  ;;  %v10469_v37 = vld [vmem:[%s17363_s4 + $0xac] sm:$0xf]  ;;  %v7612_v38 = vld [vmem:[%s17363_s4 + $0xb8] sm:$0xf0] }
  0x42   :  { %628 = vmatpush.bf16.msrb.mxu2 %v7419_v55  ;;  %v7611_v36 = vor.u32 %v10471_v34, %v7610_v33  ;;  %v7615_v39 = vor.u32 %v10469_v37, %v7612_v38  ;;  %v7586_v40 = vld [vmem:[%s17363_s4 + $0x80] sm:$0xf]  ;;  %v10466_v41 = vld [vmem:[%s17363_s4 + $0x8c] sm:$0xf0]  ;;  %v10464_v42 = vld [vmem:[%s17363_s4 + $0x84] sm:$0xf] }
  0x43   :  { %616 = vmatpush.bf16.msrb.mxu1 %v7399_v63  ;;  %642 = vmatpush.bf16.msrb.mxu3 %v7407_v3  ;;  %v7587_v43 = vor.u32 %v10466_v41, %v7586_v40  ;;  %v7588_v44 = vld [vmem:[%s17363_s4 + $0x90] sm:$0xf0]  ;;  %v7594_v45 = vld [vmem:[%s17363_s4 + $0x88] sm:$0xf]  ;;  %v10467_v46 = vld [vmem:[%s17363_s4 + $0x94] sm:$0xf0] }
  0x44   :  { %808 = vmatpush.bf16.msra.mxu0 %v7635_v7  ;;  %v7591_v47 = vor.u32 %v10464_v42, %v7588_v44  ;;  %v7595_v48 = vor.u32 %v10467_v46, %v7594_v45  ;;  %v10465_v49 = vld [vmem:[%s17363_s4 + $0x8c] sm:$0xf]  ;;  %v7596_v50 = vld [vmem:[%s17363_s4 + $0x98] sm:$0xf0]  ;;  %v7570_v52 = vld [vmem:[%s17363_s4 + $0x60] sm:$0xf] }
  0x45   :  { %v7599_v51 = vor.u32 %v10465_v49, %v7596_v50  ;;  %v10462_v53 = vld [vmem:[%s17363_s4 + $0x6c] sm:$0xf0]  ;;  %v10460_v54 = vld [vmem:[%s17363_s4 + $0x64] sm:$0xf]  ;;  %v7572_v56 = vld [vmem:[%s17363_s4 + $0x70] sm:$0xf0] }
  0x46   :  { %629 = vmatpush.bf16.msrb.mxu2 %v7403_v0  ;;  %v7571_v55 = vor.u32 %v10462_v53, %v7570_v52  ;;  %v7578_v57 = vld [vmem:[%s17363_s4 + $0x68] sm:$0xf]  ;;  %v10463_v58 = vld [vmem:[%s17363_s4 + $0x74] sm:$0xf0]  ;;  %v7575_v59 = vor.u32 %v10460_v54, %v7572_v56  ;;  %v10461_v61 = vld [vmem:[%s17363_s4 + $0x6c] sm:$0xf] }
  0x47   :  { %821 = vmatpush.bf16.msra.mxu1 %v7639_v11  ;;  %847 = vmatpush.bf16.msra.mxu3 %v7647_v16  ;;  %v7579_v60 = vor.u32 %v10463_v58, %v7578_v57  ;;  %v7580_v62 = vld [vmem:[%s17363_s4 + $0x78] sm:$0xf0]  ;;  %v7554_v0 = vld [vmem:[%s17363_s4 + $0x40] sm:$0xf]  ;;  %v10458_v1 = vld [vmem:[%s17363_s4 + $0x4c] sm:$0xf0] }
  0x48   :  { %809 = vmatpush.bf16.msra.mxu0 %v7619_v20  ;;  %v7583_v63 = vor.u32 %v10461_v61, %v7580_v62  ;;  %v10456_v2 = vld [vmem:[%s17363_s4 + $0x44] sm:$0xf]  ;;  %v7555_v3 = vor.u32 %v10458_v1, %v7554_v0  ;;  %v7556_v4 = vld [vmem:[%s17363_s4 + $0x50] sm:$0xf0]  ;;  %v7562_v5 = vld [vmem:[%s17363_s4 + $0x48] sm:$0xf] }
  0x49   :  { %v403_v6 = vld [vmem:[#allocation4 + $0x4] sm:$0xf]  ;;  %v7559_v7 = vor.u32 %v10456_v2, %v7556_v4  ;;  %v10459_v8 = vld [vmem:[%s17363_s4 + $0x54] sm:$0xf0]  ;;  %v10457_v9 = vld [vmem:[%s17363_s4 + $0x4c] sm:$0xf] }
  0x4a   :  { %834 = vmatpush.bf16.msra.mxu2 %v7643_v12  ;;  %604 = vmatmul.bf16.vlgmr.msrb.gmra.mxu0 %v403_v6  ;;  %v7563_v10 = vor.u32 %v10459_v8, %v7562_v5  ;;  %v7564_v11 = vld [vmem:[%s17363_s4 + $0x58] sm:$0xf0]  ;;  %v7538_v13 = vld [vmem:[%s17363_s4 + $0x20] sm:$0xf]  ;;  %v10454_v14 = vld [vmem:[%s17363_s4 + $0x2c] sm:$0xf0] }
  0x4b   :  { %822 = vmatpush.bf16.msra.mxu1 %v7623_v21  ;;  %848 = vmatpush.bf16.msra.mxu3 %v7631_v27  ;;  %v7567_v12 = vor.u32 %v10457_v9, %v7564_v11  ;;  %v10452_v15 = vld [vmem:[%s17363_s4 + $0x24] sm:$0xf]  ;;  %v7539_v16 = vor.u32 %v10454_v14, %v7538_v13  ;;  %v7540_v17 = vld [vmem:[%s17363_s4 + $0x30] sm:$0xf0]  ;;  %v7546_v18 = vld [vmem:[%s17363_s4 + $0x28] sm:$0xf] }
  0x4c   :  { %810 = vmatpush.bf16.msra.mxu0 %v7603_v31  ;;  %617 = vmatmul.bf16.vlgmr.msrb.gmra.mxu1 %v403_v6  ;;  %v10455_v19 = vld [vmem:[%s17363_s4 + $0x34] sm:$0xf0]  ;;  %v7543_v20 = vor.u32 %v10452_v15, %v7540_v17  ;;  %v10453_v22 = vld [vmem:[%s17363_s4 + $0x2c] sm:$0xf]  ;;  %v7548_v23 = vld [vmem:[%s17363_s4 + $0x38] sm:$0xf0] }
  0x4d   :  { %643 = vmatmul.bf16.vlgmr.msrb.gmra.mxu3 %v403_v6  ;;  %v7547_v21 = vor.u32 %v10455_v19, %v7546_v18  ;;  %630 = vmatmul.bf16.vlgmr.msrb.gmra.mxu2 %v403_v6  ;;  %v49_v24 = vld [vmem:[%s17359_s0] sm:$0xff]  ;;  %v10450_v27 = vld [vmem:[%s17363_s4 + $0xc] sm:$0xf0]  ;;  %v7524_v30 = vld [vmem:[%s17363_s4 + $0x10] sm:$0xf0]  ;;  %s7242_s28 = sshll.u32 %s17368_s9, 4  ;;  %s7243_s28 = int_to_ptr.hbm [resolvable:$true] %s7242_s28 }
  0x4e   :  { %835 = vmatpush.bf16.msra.mxu2 %v7627_v25  ;;  %v7551_v25 = vor.u32 %v10453_v22, %v7548_v23  ;;  %v7522_v26 = vld [vmem:[%s17363_s4] sm:$0xf]  ;;  %v10448_v28 = vld [vmem:[%s17363_s4 + $0x4] sm:$0xf]  ;;  %v7530_v31 = vld [vmem:[%s17363_s4 + $0x8] sm:$0xf] }
  0x4f   :  { %823 = vmatpush.bf16.msra.mxu1 %v7607_v35  ;;  %849 = vmatpush.bf16.msra.mxu3 %v7615_v39  ;;  %v7523_v29 = vor.u32 %v10450_v27, %v7522_v26  ;;  %v10451_v32 = vld [vmem:[%s17363_s4 + $0x14] sm:$0xf0]  ;;  %v50_v33 = vld [vmem:[%s17359_s0 + $0x8] sm:$0xff]  ;;  %v7527_v34 = vor.u32 %v10448_v28, %v7524_v30  ;;  %v7532_v37 = vld [vmem:[%s17363_s4 + $0x18] sm:$0xf0]  ;;  %s11502_s29 = smov 128  }
  0x50   :  { %811 = vmatpush.bf16.msra.mxu0 %v7587_v43  ;;  %v7531_v35 = vor.u32 %v10451_v32, %v7530_v31  ;;  %v7769_v40 = vld [vmem:[%s17362_s3 + $0xe0] sm:$0xf]  ;;  %v10542_v41 = vld [vmem:[%s17362_s3 + $0xec] sm:$0xf0]  ;;  %v10540_v42 = vld [vmem:[%s17362_s3 + $0xe4] sm:$0xf] }
  0x51   :  { %v7770_v45 = vor.u32 %v10542_v41, %v7769_v40  ;;  %v7771_v46 = vld [vmem:[%s17362_s3 + $0xf0] sm:$0xf0]  ;;  %v10541_v52 = vld [vmem:[%s17362_s3 + $0xec] sm:$0xf]  ;;  %v7779_v53 = vld [vmem:[%s17362_s3 + $0xf8] sm:$0xf0] }
  0x52   :  { %836 = vmatpush.bf16.msra.mxu2 %v7611_v36  ;;  %v10449_v36 = vld [vmem:[%s17363_s4 + $0xc] sm:$0xf]  ;;  %v7774_v50 = vor.u32 %v10540_v42, %v7771_v46  ;;  %v7753_v54 = vld [vmem:[%s17362_s3 + $0xc0] sm:$0xf]  ;;  %v52_v56 = vld [vmem:[%s17359_s0 + $0x18] sm:$0xff]  ;;  %v7782_v57 = vor.u32 %v10541_v52, %v7779_v53  ;;  %s11504_s9 = smov [#allocation5]  }
  0x53   :  { %824 = vmatpush.bf16.msra.mxu1 %v7591_v47  ;;  %850 = vmatpush.bf16.msra.mxu3 %v7599_v51  ;;  %v7535_v39 = vor.u32 %v10449_v36, %v7532_v37  ;;  %v7777_v47 = vld [vmem:[%s17362_s3 + $0xe8] sm:$0xf]  ;;  %v10538_v58 = vld [vmem:[%s17362_s3 + $0xcc] sm:$0xf0]  ;;  %v7755_v62 = vld [vmem:[%s17362_s3 + $0xd0] sm:$0xf0] }
  0x54   :  { %812 = vmatpush.bf16.msra.mxu0 %v7571_v55  ;;  %v7754_v61 = vor.u32 %v10538_v58, %v7753_v54  ;;  %v10539_v1 = vld [vmem:[%s17362_s3 + $0xd4] sm:$0xf0]  ;;  %v10537_v2 = vld [vmem:[%s17362_s3 + $0xcc] sm:$0xf]  ;;  %v7737_v6 = vld [vmem:[%s17362_s3 + $0xa0] sm:$0xf] }
  0x55   :  { %v10532_v8 = vld [vmem:[%s17362_s3 + $0xa4] sm:$0xf]  ;;  %v7739_v11 = vld [vmem:[%s17362_s3 + $0xb0] sm:$0xf0]  ;;  %v10535_v13 = vld [vmem:[%s17362_s3 + $0xb4] sm:$0xf0] }
  0x56   :  { %837 = vmatpush.bf16.msra.mxu2 %v7595_v48  ;;  %v10543_v48 = vld [vmem:[%s17362_s3 + $0xf4] sm:$0xf0]  ;;  %v10533_v18 = vld [vmem:[%s17362_s3 + $0xac] sm:$0xf]  ;;  %v7747_v19 = vld [vmem:[%s17362_s3 + $0xb8] sm:$0xf0] }
  0x57   :  { %825 = vmatpush.bf16.msra.mxu1 %v7575_v59  ;;  %851 = vmatpush.bf16.msra.mxu3 %v7583_v63  ;;  %v7778_v51 = vor.u32 %v10543_v48, %v7777_v47  ;;  %v10536_v59 = vld [vmem:[%s17362_s3 + $0xc4] sm:$0xf]  ;;  %v7761_v63 = vld [vmem:[%s17362_s3 + $0xc8] sm:$0xf]  ;;  %v7750_v22 = vor.u32 %v10533_v18, %v7747_v19  ;;  %v10530_v23 = vld [vmem:[%s17362_s3 + $0x8c] sm:$0xf0] }
  0x58   :  { %813 = vmatpush.bf16.msra.mxu0 %v7555_v3  ;;  %v7758_v0 = vor.u32 %v10536_v59, %v7755_v62  ;;  %v7763_v3 = vld [vmem:[%s17362_s3 + $0xd8] sm:$0xf0]  ;;  %v7762_v4 = vor.u32 %v10539_v1, %v7761_v63  ;;  %v7729_v27 = vld [vmem:[%s17362_s3 + $0x88] sm:$0xf]  ;;  %v10531_v28 = vld [vmem:[%s17362_s3 + $0x94] sm:$0xf0] }
  0x59   :  { %v7766_v5 = vor.u32 %v10537_v2, %v7763_v3  ;;  %v10529_v32 = vld [vmem:[%s17362_s3 + $0x8c] sm:$0xf]  ;;  %v7730_v37 = vor.u32 %v10531_v28, %v7729_v27  ;;  %v7705_v40 = vld [vmem:[%s17362_s3 + $0x60] sm:$0xf]  ;;  %v51_v41 = vld [vmem:[%s17359_s0 + $0x10] sm:$0xff]  ;;  %s7227_s30 = sshll.u32 %s11504_s9, 4  ;;  %s7228_s30 = int_to_ptr.vmem [resolvable:$true] %s7227_s30 }
  0x5a   :  { %838 = vmatpush.bf16.msra.mxu2 %v7579_v60  ;;  %v7707_v46 = vld [vmem:[%s17362_s3 + $0x70] sm:$0xf0]  ;;  %v10525_v54 = vld [vmem:[%s17362_s3 + $0x6c] sm:$0xf]  ;;  %v7697_v1 = vld [vmem:[%s17362_s3 + $0x48] sm:$0xf] }
  0x5b   :  { %826 = vmatpush.bf16.msra.mxu1 %v7559_v7  ;;  %852 = vmatpush.bf16.msra.mxu3 %v7567_v12  ;;  %v10534_v7 = vld [vmem:[%s17362_s3 + $0xac] sm:$0xf0]  ;;  %v7745_v12 = vld [vmem:[%s17362_s3 + $0xa8] sm:$0xf]  ;;  %v10523_v2 = vld [vmem:[%s17362_s3 + $0x54] sm:$0xf0] }
  0x5c   :  { %814 = vmatpush.bf16.msra.mxu0 %v7539_v16  ;;  %v7742_v16 = vor.u32 %v10532_v8, %v7739_v11  ;;  %v7746_v17 = vor.u32 %v10535_v13, %v7745_v12  ;;  %v10518_v11 = vld [vmem:[%s17362_s3 + $0x2c] sm:$0xf0]  ;;  %v10517_v27 = vld [vmem:[%s17362_s3 + $0x2c] sm:$0xf]  ;;  %v7683_v28 = vld [vmem:[%s17362_s3 + $0x38] sm:$0xf0] }
  0x5e   :  { %839 = vmatpush.bf16.msra.mxu2 %v7563_v10  ;;  %v7738_v10 = vor.u32 %v10534_v7, %v7737_v6  ;;  %v10521_v6 = vld [vmem:[%s17362_s3 + $0x4c] sm:$0xf]  ;;  %v7699_v7 = vld [vmem:[%s17362_s3 + $0x58] sm:$0xf0] }
  0x5f   :  { %827 = vmatpush.bf16.msra.mxu1 %v7543_v20  ;;  %853 = vmatpush.bf16.msra.mxu3 %v7551_v25  ;;  %v7721_v20 = vld [vmem:[%s17362_s3 + $0x80] sm:$0xf]  ;;  %v7723_v25 = vld [vmem:[%s17362_s3 + $0x90] sm:$0xf0] }
  0x60   :  { %815 = vmatpush.bf16.msra.mxu0 %v7523_v29  ;;  %v7722_v31 = vor.u32 %v10530_v23, %v7721_v20  ;;  %v7702_v20 = vor.u32 %v10521_v6, %v7699_v7  ;;  %v10519_v23 = vld [vmem:[%s17362_s3 + $0x34] sm:$0xf0]  ;;  %v10606_v7 = vld [vmem:[%s17364_s5 + $0xec] sm:$0xf0] }
  0x62   :  { %840 = vmatpush.bf16.msra.mxu2 %v7547_v21 }
  0x63   :  { %828 = vmatpush.bf16.msra.mxu1 %v7527_v34  ;;  %854 = vmatpush.bf16.msra.mxu3 %v7535_v39 }
  0x64   :  { %1143 = vmatpush.bf16.msrb.mxu0 %v7770_v45  ;;  %v10524_v45 = vld [vmem:[%s17362_s3 + $0x64] sm:$0xf] }
  0x65   :  { %v7710_v48 = vor.u32 %v10524_v45, %v7707_v46 }
  0x66   :  { %841 = vmatpush.bf16.msra.mxu2 %v7531_v35 }
  0x67   :  { %1156 = vmatpush.bf16.msrb.mxu1 %v7774_v50  ;;  %1182 = vmatpush.bf16.msrb.mxu3 %v7782_v57  ;;  %v10527_v50 = vld [vmem:[%s17362_s3 + $0x74] sm:$0xf0] }
  0x68   :  { %1144 = vmatpush.bf16.msrb.mxu0 %v7754_v61  ;;  %v10520_v61 = vld [vmem:[%s17362_s3 + $0x44] sm:$0xf] }
  0x6a   :  { %1169 = vmatpush.bf16.msrb.mxu2 %v7778_v51 }
  0x6b   :  { %1157 = vmatpush.bf16.msrb.mxu1 %v7758_v0  ;;  %1183 = vmatpush.bf16.msrb.mxu3 %v7766_v5  ;;  %v7691_v0 = vld [vmem:[%s17362_s3 + $0x50] sm:$0xf0] }
  0x6c   :  { %1145 = vmatpush.bf16.msrb.mxu0 %v7738_v10  ;;  %v7673_v10 = vld [vmem:[%s17362_s3 + $0x20] sm:$0xf] }
  0x6e   :  { %1170 = vmatpush.bf16.msrb.mxu2 %v7762_v4 }
  0x6f   :  { %1158 = vmatpush.bf16.msrb.mxu1 %v7742_v16  ;;  %1184 = vmatpush.bf16.msrb.mxu3 %v7750_v22  ;;  %v10516_v16 = vld [vmem:[%s17362_s3 + $0x24] sm:$0xf]  ;;  %v7681_v22 = vld [vmem:[%s17362_s3 + $0x28] sm:$0xf] }
  0x70   :  { %1146 = vmatpush.bf16.msrb.mxu0 %v7722_v31  ;;  %v7686_v31 = vor.u32 %v10517_v27, %v7683_v28  ;;  %v10602_v27 = vld [vmem:[%s17364_s5 + $0xcc] sm:$0xf0] }
  0x72   :  { %1171 = vmatpush.bf16.msrb.mxu2 %v7746_v17  ;;  %v7675_v17 = vld [vmem:[%s17362_s3 + $0x30] sm:$0xf0] }
  0x76   :  { %1172 = vmatpush.bf16.msrb.mxu2 %v7730_v37 }
  0xa0   :  { %v255_v38 = vpop.f32.mrf.mxu0 }
  0xa1   :  { %v298_v43 = vadd.f32 %v255_v38, %v49_v24  ;;  %v268_v44 = vpop.f32.mrf.mxu1  ;;  %v10528_v24 = vld [vmem:[%s17362_s3 + $0x84] sm:$0xf] }
  0xa2   :  { %v299_v49 = vadd.f32 %v268_v44, %v50_v33  ;;  %v7731_v33 = vld [vmem:[%s17362_s3 + $0x98] sm:$0xf0]  ;;  %v7726_v36 = vor.u32 %v10528_v24, %v7723_v25  ;;  %v7678_v25 = vor.u32 %v10516_v16, %v7675_v17 }
  0xa3   :  { %v7389_v55 = vmul.f32 -1.442695, %v298_v43  ;;  %v7734_v39 = vor.u32 %v10529_v32, %v7731_v33  ;;  %v10526_v43 = vld [vmem:[%s17362_s3 + $0x6c] sm:$0xf0]  ;;  %v10512_v33 = vld [vmem:[%s17362_s3 + $0x4] sm:$0xf] }
  0xa4   :  { %v7390_v60 = vmul.f32 -1.442695, %v299_v49  ;;  %1159 = vmatpush.bf16.msrb.mxu1 %v7726_v36  ;;  %v7706_v44 = vor.u32 %v10526_v43, %v7705_v40  ;;  %v7713_v49 = vld [vmem:[%s17362_s3 + $0x68] sm:$0xf]  ;;  %v10514_v32 = vld [vmem:[%s17362_s3 + $0xc] sm:$0xf0] }
  0xa5   :  { %11193 = vpow2.f32 %v7389_v55  ;;  %1185 = vmatpush.bf16.msrb.mxu3 %v7734_v39  ;;  %v7714_v53 = vor.u32 %v10527_v50, %v7713_v49  ;;  %v7715_v55 = vld [vmem:[%s17362_s3 + $0x78] sm:$0xf0]  ;;  %v7665_v40 = vld [vmem:[%s17362_s3 + $0x8] sm:$0xf] }
  0xa6   :  { %11195 = vpow2.f32 %v7390_v60  ;;  %1147 = vmatpush.bf16.msrb.mxu0 %v7706_v44  ;;  %v7718_v59 = vor.u32 %v10525_v54, %v7715_v55  ;;  %v10522_v60 = vld [vmem:[%s17362_s3 + $0x4c] sm:$0xf0]  ;;  %v7910_v16 = vld [vmem:[%s17364_s5 + $0xf8] sm:$0xf0] }
  0xa7   :  { %1173 = vmatpush.bf16.msrb.mxu2 %v7714_v53 }
  0xa8   :  { %v257_v15 = vpop.f32.mrf.mxu0  ;;  %1160 = vmatpush.bf16.msrb.mxu1 %v7710_v48  ;;  %v39_v48 = vld [vmem:[%s17361_s2] sm:$0xff] }
  0xa9   :  { %v294_v9 = vpop.f32.mrf.mxu3  ;;  %v270_v21 = vpop.f32.mrf.mxu1  ;;  %1186 = vmatpush.bf16.msrb.mxu3 %v7718_v59  ;;  %v7698_v15 = vor.u32 %v10523_v2, %v7697_v1 }
  0xaa   :  { %v301_v14 = vadd.f32 %v294_v9, %v52_v56  ;;  %v7689_v56 = vld [vmem:[%s17362_s3 + $0x40] sm:$0xf]  ;;  %v7674_v21 = vor.u32 %v10518_v11, %v7673_v10  ;;  %v7902_v10 = vld [vmem:[%s17364_s5 + $0xf0] sm:$0xf0]  ;;  %v7908_v11 = vld [vmem:[%s17364_s5 + $0xe8] sm:$0xf] }
  0xab   :  { %v11194_v29 = vpop.eup %11193  ;;  %v7690_v63 = vor.u32 %v10522_v60, %v7689_v56  ;;  %1174 = vmatpush.bf16.msrb.mxu2 %v7698_v15  ;;  %v10605_v15 = vld [vmem:[%s17364_s5 + $0xec] sm:$0xf] }
  0xac   :  { %v7391_v26 = vmul.f32 -1.442695, %v301_v14  ;;  %v11196_v34 = vpop.eup %11195  ;;  %v12242_v35 = vadd.f32 1.0, %v11194_v29  ;;  %v7694_v14 = vor.u32 %v10520_v61, %v7691_v0  ;;  %v7657_v29 = vld [vmem:[%s17362_s3] sm:$0xf]  ;;  %v7913_v17 = vor.u32 %v10605_v15, %v7910_v16 }
  0xad   :  { %v12244_v38 = vadd.f32 1.0, %v11196_v34  ;;  %1148 = vmatpush.bf16.msrb.mxu0 %v7690_v63  ;;  %1187 = vmatpush.bf16.msrb.mxu3 %v7702_v20  ;;  %v7659_v34 = vld [vmem:[%s17362_s3 + $0x10] sm:$0xf0]  ;;  %v7658_v39 = vor.u32 %v10514_v32, %v7657_v29  ;;  %v10600_v29 = vld [vmem:[%s17364_s5 + $0xc4] sm:$0xf] }
  0xae   :  { %v281_v30 = vpop.f32.mrf.mxu2  ;;  %11197 = vpow2.f32 %v7391_v26  ;;  %v316_v47 = vand.u32 2147483647, %v12242_v35  ;;  %v318_v5 = vand.u32 2147483648, %v12242_v35  ;;  %1161 = vmatpush.bf16.msrb.mxu1 %v7694_v14  ;;  %v7682_v26 = vor.u32 %v10519_v23, %v7681_v22  ;;  %v7892_v32 = vld [vmem:[%s17364_s5 + $0xc8] sm:$0xf] }
  0xaf   :  { %11199 = vrcp.f32 %v12242_v35  ;;  %v300_v52 = vadd.f32 %v281_v30, %v51_v41  ;;  %v335_v9 = vand.u32 2147483647, %v12244_v38  ;;  %v337_v13 = vand.u32 2147483648, %v12244_v38  ;;  %v10515_v41 = vld [vmem:[%s17362_s3 + $0x14] sm:$0xf0] }
  0xb0   :  { %11201 = vrcp.f32 %v12244_v38  ;;  %vm12326_vm0 = vcmp.eq.f32.partialorder %v316_v47, 8.507059e+37  ;;  %vm331_vm3 = vweird.f32 %v12244_v38  ;;  %vm312_vm4 = vweird.f32 %v12242_v35  ;;  %v7667_v47 = vld [vmem:[%s17362_s3 + $0x18] sm:$0xf0]  ;;  %1175 = vmatpush.bf16.msrb.mxu2 %v7682_v26  ;;  %v7884_v26 = vld [vmem:[%s17364_s5 + $0xc0] sm:$0xf] }
  0xb1   :  { %v296_v42 = vpop.f32.mrf.mxu3  ;;  %1149 = vmatpush.bf16.msrb.mxu0 %v7674_v21  ;;  %v338_v44 = vor.u32 1.1754944e-38, %v337_v13  ;;  %vm336_vm7 = vcmp.eq.f32.partialorder %v335_v9, 8.507059e+37  ;;  %v7662_v50 = vor.u32 %v10512_v33, %v7659_v34  ;;  %1188 = vmatpush.bf16.msrb.mxu3 %v7686_v31  ;;  %v7885_v28 = vor.u32 %v10602_v27, %v7884_v26  ;;  %v10603_v33 = vld [vmem:[%s17364_s5 + $0xd4] sm:$0xf0]  ;;  %v10601_v34 = vld [vmem:[%s17364_s5 + $0xcc] sm:$0xf] }
  0xb2   :  { %v10513_v42 = vld [vmem:[%s17362_s3 + $0xc] sm:$0xf]  ;;  %1162 = vmatpush.bf16.msrb.mxu1 %v7678_v25  ;;  %v7822_v15 = vld [vmem:[%s17364_s5 + $0x50] sm:$0xf0]  ;;  %v7828_v16 = vld [vmem:[%s17364_s5 + $0x48] sm:$0xf] }
  0xb3   :  { %v12549_v26 = vld [vmem:[%s17365_s6] sm:$0xf] }
  0xb4   :  { %v11198_v51 = vpop.eup %11197 }
  0xb5   :  { %v12279_v57 = vadd.f32 1.0, %v11198_v51  ;;  %v12287_v62 = vpop.eup %11199  ;;  %v7666_v51 = vor.u32 %v10515_v41, %v7665_v40  ;;  %1150 = vmatpush.bf16.msrb.mxu0 %v7658_v39  ;;  %v7868_v40 = vld [vmem:[%s17364_s5 + $0xa0] sm:$0xf]  ;;  %v10598_v41 = vld [vmem:[%s17364_s5 + $0xac] sm:$0xf0] }
  0xb6   :  { %v283_v58 = vpop.f32.mrf.mxu2  ;;  %v12298_v3 = vpop.eup %11201  ;;  %v308_v4 = vmul.f32 %v12287_v62, %v12242_v35  ;;  %vm313_vm1 = vweird.f32 %v12287_v62  ;;  %v319_v35 = vor.u32 1.1754944e-38, %v318_v5  ;;  %1163 = vmatpush.bf16.msrb.mxu1 %v7662_v50 }
  0xb7   :  { %11203 = vrcp.f32 %v12279_v57  ;;  %v327_v8 = vmul.f32 %v12298_v3, %v12244_v38  ;;  %vm332_vm2 = vweird.f32 %v12298_v3  ;;  %vm314_vm5 = vmor %vm312_vm4, %vm313_vm1  ;;  %v7670_v38 = vor.u32 %v10513_v42, %v7667_v47  ;;  %1176 = vmatpush.bf16.msrb.mxu2 %v7666_v51  ;;  %v10596_v42 = vld [vmem:[%s17364_s5 + $0xa4] sm:$0xf]  ;;  %v7852_v51 = vld [vmem:[%s17364_s5 + $0x80] sm:$0xf] }
  0xb8   :  { %11205 = vtanh.f32 %v300_v52  ;;  %v309_v12 = vsub.f32 1.0, %v308_v4  ;;  %vm333_vm6 = vmor %vm331_vm3, %vm332_vm2  ;;  %vm351_vm9 = vweird.f32 %v12279_v57  ;;  %v355_v63 = vand.u32 2147483647, %v12279_v57 }
  0xb9   :  { %v328_v18 = vsub.f32 1.0, %v327_v8  ;;  %1189 = vmatpush.bf16.msrb.mxu3 %v7670_v38  ;;  %v10604_v8 = vld [vmem:[%s17364_s5 + $0xe4] sm:$0xf]  ;;  %v7854_v38 = vld [vmem:[%s17364_s5 + $0x90] sm:$0xf0] }
  0xba   :  { %v310_v24 = vmul.f32 %v12287_v62, %v309_v12  ;;  %vm356_vm11 = vcmp.eq.f32.partialorder %v355_v63, 8.507059e+37  ;;  %v10607_v12 = vld [vmem:[%s17364_s5 + $0xf4] sm:$0xf0]  ;;  %v7905_v13 = vor.u32 %v10604_v8, %v7902_v10  ;;  %v10589_v8 = vld [vmem:[%s17364_s5 + $0x6c] sm:$0xf] }
  0xbb   :  { %v329_v30 = vmul.f32 %v12298_v3, %v328_v18  ;;  %v7909_v14 = vor.u32 %v10607_v12, %v7908_v11  ;;  %v7820_v11 = vld [vmem:[%s17364_s5 + $0x40] sm:$0xf]  ;;  %v10586_v12 = vld [vmem:[%s17364_s5 + $0x4c] sm:$0xf0] }
  0xbc   :  { %v311_v37 = vadd.f32 %v12287_v62, %v310_v24 }
  0xbd   :  { %v11204_v36 = vpop.eup %11203  ;;  %v330_v46 = vadd.f32 %v12298_v3, %v329_v30  ;;  %v7886_v30 = vld [vmem:[%s17364_s5 + $0xd0] sm:$0xf0] }
  0xbe   :  { %v11206_v43 = vpop.eup %11205  ;;  %v347_v45 = vmul.f32 %v11204_v36, %v12279_v57  ;;  %v315_v49 = vsel %vm314_vm5, %v12287_v62, %v311_v37  ;;  %vm352_vm8 = vweird.f32 %v11204_v36  ;;  %v357_v62 = vand.u32 2147483648, %v12279_v57  ;;  %v7900_v57 = vld [vmem:[%s17364_s5 + $0xe0] sm:$0xf]  ;;  %v7894_v37 = vld [vmem:[%s17364_s5 + $0xd8] sm:$0xf0] }
  0xbf   :  { %v320_v53 = vsel %vm12326_vm0, %v319_v35, %v315_v49  ;;  %v334_v54 = vsel %vm333_vm6, %v12298_v3, %v330_v46  ;;  %vm353_vm10 = vmor %vm351_vm9, %vm352_vm8  ;;  %v7901_v9 = vor.u32 %v10606_v7, %v7900_v57  ;;  %v7889_v31 = vor.u32 %v10600_v29, %v7886_v30  ;;  %v10599_v35 = vld [vmem:[%s17364_s5 + $0xb4] sm:$0xf0]  ;;  %v7878_v49 = vld [vmem:[%s17364_s5 + $0xb8] sm:$0xf0] }
  0xc0   :  { %v348_v52 = vsub.f32 1.0, %v347_v45  ;;  %v339_v55 = vsel %vm336_vm7, %v338_v44, %v334_v54  ;;  %v362_v56 = vmul.f32 %v11206_v43, %v320_v53  ;;  %v358_v1 = vor.u32 1.1754944e-38, %v357_v62  ;;  %v7870_v44 = vld [vmem:[%s17364_s5 + $0xb0] sm:$0xf0]  ;;  %v7876_v45 = vld [vmem:[%s17364_s5 + $0xa8] sm:$0xf] }
  0xc1   :  { %v361_v59 = vmul.f32 %v339_v55, %v39_v48  ;;  %v7897_v39 = vor.u32 %v10601_v34, %v7894_v37  ;;  %v7869_v43 = vor.u32 %v10598_v41, %v7868_v40  ;;  %v7873_v46 = vor.u32 %v10596_v42, %v7870_v44  ;;  %v10597_v48 = vld [vmem:[%s17364_s5 + $0xac] sm:$0xf]  ;;  %v10592_v53 = vld [vmem:[%s17364_s5 + $0x84] sm:$0xf]  ;;  %v7860_v55 = vld [vmem:[%s17364_s5 + $0x88] sm:$0xf] }
  0xc2   :  { %v349_v58 = vmul.f32 %v11204_v36, %v348_v52  ;;  %v7877_v47 = vor.u32 %v10599_v35, %v7876_v45  ;;  %v7881_v50 = vor.u32 %v10597_v48, %v7878_v49  ;;  %v10594_v52 = vld [vmem:[%s17364_s5 + $0x8c] sm:$0xf0]  ;;  %v7862_v62 = vld [vmem:[%s17364_s5 + $0x98] sm:$0xf0]  ;;  %v10580_v30 = vld [vmem:[%s17364_s5 + $0x24] sm:$0xf] }
  0xc3   :  { %v12388_v60 = vadd.f32 %v362_v56, %v361_v59  ;;  %v7853_v54 = vor.u32 %v10594_v52, %v7852_v51  ;;  %v10595_v56 = vld [vmem:[%s17364_s5 + $0x94] sm:$0xf0]  ;;  %v10582_v29 = vld [vmem:[%s17364_s5 + $0x2c] sm:$0xf0]  ;;  %v862_v40 = vperm.slane %v12549_v26, 0  ;;  %v863_v41 = vperm.slane %v12549_v26, 1 }
  0xc4   :  { %v350_v61 = vadd.f32 %v11204_v36, %v349_v58  ;;  %v7857_v58 = vor.u32 %v10592_v53, %v7854_v38  ;;  %v7861_v59 = vor.u32 %v10595_v56, %v7860_v55  ;;  %v10583_v34 = vld [vmem:[%s17364_s5 + $0x34] sm:$0xf0]  ;;  %v865_v42 = vperm.slane %v12549_v26, 3  ;;  %v7788_v45 = vld [vmem:[%s17364_s5] sm:$0xf] }
  0xc5   :  { %11207 = vtanh.f32 %v12388_v60  ;;  %v10578_v35 = vld [vmem:[%s17364_s5 + $0xc] sm:$0xf0]  ;;  %v7790_v48 = vld [vmem:[%s17364_s5 + $0x10] sm:$0xf0]  ;;  %v7796_v49 = vld [vmem:[%s17364_s5 + $0x8] sm:$0xf] }
  0xc6   :  { %v354_v0 = vsel %vm353_vm10, %v11204_v36, %v350_v61  ;;  %v7893_v36 = vor.u32 %v10603_v33, %v7892_v32  ;;  %v10593_v61 = vld [vmem:[%s17364_s5 + $0x8c] sm:$0xf]  ;;  %v7806_v32 = vld [vmem:[%s17364_s5 + $0x30] sm:$0xf0]  ;;  %v7812_v33 = vld [vmem:[%s17364_s5 + $0x28] sm:$0xf] }
  0xc7   :  { %v359_v3 = vsel %vm356_vm11, %v358_v1, %v354_v0  ;;  %v12418_v18 = vpop.f32.mrf.mxu0  ;;  %v7865_v63 = vor.u32 %v10593_v61, %v7862_v62  ;;  %v7836_v0 = vld [vmem:[%s17364_s5 + $0x60] sm:$0xf]  ;;  %v10590_v1 = vld [vmem:[%s17364_s5 + $0x6c] sm:$0xf0]  ;;  %v7813_v37 = vor.u32 %v10583_v34, %v7812_v33  ;;  %v10577_v53 = vld [vmem:[%s17364_s5 + $0xc] sm:$0xf] }
  0xc8   :  { %v8028_v38 = vld [vmem:[%s17363_s4 + $0xe0] sm:$0xf]  ;;  %v10572_v61 = vld [vmem:[%s17363_s4 + $0xe4] sm:$0xf]  ;;  %v8030_v62 = vld [vmem:[%s17363_s4 + $0xf0] sm:$0xf0] }
  0xc9   :  { %v12420_v19 = vpop.f32.mrf.mxu1  ;;  %v7998_v33 = vld [vmem:[%s17363_s4 + $0xb0] sm:$0xf0]  ;;  %v8004_v34 = vld [vmem:[%s17363_s4 + $0xa8] sm:$0xf] }
  0xcb   :  { %v11208_v2 = vpop.eup %11207 }
  0xcc   :  { %v365_v4 = vmul.f32 %v11208_v2, %v359_v3  ;;  %v10588_v2 = vld [vmem:[%s17364_s5 + $0x64] sm:$0xf]  ;;  %v7837_v3 = vor.u32 %v10590_v1, %v7836_v0 }
  0xce   :  { %v368_v5 = vpack.c.bf16 %v365_v4, %v365_v4  ;;  %v7838_v4 = vld [vmem:[%s17364_s5 + $0x70] sm:$0xf0] }
  0xcf   :  { %v607_v21 = vpop.f32.mrf.mxu0  ;;  %v7841_v57 = vor.u32 %v10588_v2, %v7838_v4  ;;  %v8036_v2 = vld [vmem:[%s17363_s4 + $0xe8] sm:$0xf]  ;;  %v10573_v4 = vld [vmem:[%s17363_s4 + $0xec] sm:$0xf] }
  0xd0   :  { %369 = vst [vmem:[#allocation4] sm:$0xf] %v368_v5  ;;  %816 = vmatmul.bf16.vlgmr.msra.gmra.mxu0 %v368_v5  ;;  %829 = vmatmul.bf16.vlgmr.msra.gmra.mxu1 %v368_v5  ;;  %v12422_v20 = vpop.f32.mrf.mxu3  ;;  %v12424_v23 = vpop.f32.mrf.mxu2 }
  0xd1   :  { %842 = vmatmul.bf16.vlgmr.msra.gmra.mxu2 %v368_v5  ;;  %855 = vmatmul.bf16.vlgmr.msra.gmra.mxu3 %v368_v5  ;;  %v620_v22 = vpop.f32.mrf.mxu1  ;;  %v7844_v5 = vld [vmem:[%s17364_s5 + $0x68] sm:$0xf] }
  0xd2   :  { %1492 = vmatpush.bf16.msra.mxu0 %v7901_v9  ;;  %1505 = vmatpush.bf16.msra.mxu1 %v7905_v13  ;;  %v7846_v9 = vld [vmem:[%s17364_s5 + $0x78] sm:$0xf0]  ;;  %v10584_v13 = vld [vmem:[%s17364_s5 + $0x44] sm:$0xf] }
  0xd3   :  { %1518 = vmatpush.bf16.msra.mxu2 %v7909_v14  ;;  %1531 = vmatpush.bf16.msra.mxu3 %v7913_v17  ;;  %v7849_v10 = vor.u32 %v10589_v8, %v7846_v9  ;;  %v7821_v14 = vor.u32 %v10586_v12, %v7820_v11  ;;  %v10587_v17 = vld [vmem:[%s17364_s5 + $0x54] sm:$0xf0]  ;;  %v7825_v21 = vor.u32 %v10584_v13, %v7822_v15  ;;  %v8014_v11 = vld [vmem:[%s17363_s4 + $0xd0] sm:$0xf0]  ;;  %v8020_v12 = vld [vmem:[%s17363_s4 + $0xc8] sm:$0xf] }
  0xd4   :  { %v7829_v22 = vor.u32 %v10587_v17, %v7828_v16  ;;  %v10571_v15 = vld [vmem:[%s17363_s4 + $0xd4] sm:$0xf0]  ;;  %v10569_v16 = vld [vmem:[%s17363_s4 + $0xcc] sm:$0xf]  ;;  %v8022_v17 = vld [vmem:[%s17363_s4 + $0xd8] sm:$0xf0] }
  0xd6   :  { %1493 = vmatpush.bf16.msra.mxu0 %v7885_v28  ;;  %1506 = vmatpush.bf16.msra.mxu1 %v7889_v31  ;;  %v7804_v28 = vld [vmem:[%s17364_s5 + $0x20] sm:$0xf] }
  0xd7   :  { %v950_v6 = vld [vmem:[#allocation4] sm:$0xf]  ;;  %1519 = vmatpush.bf16.msra.mxu2 %v7893_v36  ;;  %1532 = vmatpush.bf16.msra.mxu3 %v7897_v39  ;;  %v7805_v31 = vor.u32 %v10582_v29, %v7804_v28  ;;  %v7809_v36 = vor.u32 %v10580_v30, %v7806_v32  ;;  %v10581_v39 = vld [vmem:[%s17364_s5 + $0x2c] sm:$0xf]  ;;  %v10566_v28 = vld [vmem:[%s17363_s4 + $0xac] sm:$0xf0] }
  0xd8   :  { %v646_v24 = vpop.f32.mrf.mxu3  ;;  %v633_v25 = vpop.f32.mrf.mxu2  ;;  %v10564_v29 = vld [vmem:[%s17363_s4 + $0xa4] sm:$0xf] }
  0xd9   :  { %v10585_v24 = vld [vmem:[%s17364_s5 + $0x4c] sm:$0xf]  ;;  %v7830_v25 = vld [vmem:[%s17364_s5 + $0x58] sm:$0xf0] }
  0xda   :  { %1494 = vmatpush.bf16.msra.mxu0 %v7869_v43  ;;  %1507 = vmatpush.bf16.msra.mxu1 %v7873_v46  ;;  %v7833_v27 = vor.u32 %v10585_v24, %v7830_v25  ;;  %v7814_v43 = vld [vmem:[%s17364_s5 + $0x38] sm:$0xf0]  ;;  %v10576_v46 = vld [vmem:[%s17364_s5 + $0x4] sm:$0xf]  ;;  %v8021_v24 = vor.u32 %v10571_v15, %v8020_v12  ;;  %v8025_v25 = vor.u32 %v10569_v16, %v8022_v17  ;;  %v7948_v16 = vld [vmem:[%s17363_s4 + $0x40] sm:$0xf] }
  0xdb   :  { %1520 = vmatpush.bf16.msra.mxu2 %v7877_v47  ;;  %1533 = vmatpush.bf16.msra.mxu3 %v7881_v50  ;;  %v7817_v44 = vor.u32 %v10581_v39, %v7814_v43  ;;  %v7789_v47 = vor.u32 %v10578_v35, %v7788_v45  ;;  %v10579_v50 = vld [vmem:[%s17364_s5 + $0x14] sm:$0xf0]  ;;  %v7793_v51 = vor.u32 %v10576_v46, %v7790_v48  ;;  %v10565_v43 = vld [vmem:[%s17363_s4 + $0xac] sm:$0xf]  ;;  %v10560_v48 = vld [vmem:[%s17363_s4 + $0x84] sm:$0xf] }
  0xdc   :  { %v7797_v52 = vor.u32 %v10579_v50, %v7796_v49  ;;  %v7982_v50 = vld [vmem:[%s17363_s4 + $0x90] sm:$0xf0]  ;;  %v7974_v12 = vld [vmem:[%s17363_s4 + $0x78] sm:$0xf0]  ;;  %v10554_v17 = vld [vmem:[%s17363_s4 + $0x4c] sm:$0xf0] }
  0xde   :  { %1495 = vmatpush.bf16.msra.mxu0 %v7853_v54  ;;  %1508 = vmatpush.bf16.msra.mxu1 %v7857_v58  ;;  %v7798_v54 = vld [vmem:[%s17364_s5 + $0x18] sm:$0xf0] }
  0xdf   :  { %1521 = vmatpush.bf16.msra.mxu2 %v7861_v59  ;;  %1534 = vmatpush.bf16.msra.mxu3 %v7865_v63  ;;  %v7801_v58 = vor.u32 %v10577_v53, %v7798_v54  ;;  %v10574_v59 = vld [vmem:[%s17363_s4 + $0xec] sm:$0xf0]  ;;  %v7985_v53 = vor.u32 %v10560_v48, %v7982_v50 }
  0xe0   :  { %1151 = vmatmul.bf16.vlgmr.msrb.gmra.mxu0 %v950_v6  ;;  %1164 = vmatmul.bf16.vlgmr.msrb.gmra.mxu1 %v950_v6  ;;  %v8029_v1 = vor.u32 %v10574_v59, %v8028_v38  ;;  %v10561_v38 = vld [vmem:[%s17363_s4 + $0x8c] sm:$0xf]  ;;  %v10550_v50 = vld [vmem:[%s17363_s4 + $0x2c] sm:$0xf0] }
  0xe1   :  { %1177 = vmatmul.bf16.vlgmr.msrb.gmra.mxu2 %v950_v6  ;;  %1190 = vmatmul.bf16.vlgmr.msrb.gmra.mxu3 %v950_v6  ;;  %v10591_v6 = vld [vmem:[%s17364_s5 + $0x74] sm:$0xf0] }
  0xe2   :  { %v7845_v7 = vor.u32 %v10591_v6, %v7844_v5  ;;  %1496 = vmatpush.bf16.msra.mxu0 %v7837_v3  ;;  %1509 = vmatpush.bf16.msra.mxu1 %v7841_v57  ;;  %v10575_v3 = vld [vmem:[%s17363_s4 + $0xf4] sm:$0xf0]  ;;  %v8033_v5 = vor.u32 %v10572_v61, %v8030_v62  ;;  %v10570_v57 = vld [vmem:[%s17363_s4 + $0xcc] sm:$0xf0]  ;;  %v7964_v62 = vld [vmem:[%s17363_s4 + $0x60] sm:$0xf] }
  0xe3   :  { %1535 = vmatpush.bf16.msra.mxu3 %v7849_v10  ;;  %v8037_v6 = vor.u32 %v10575_v3, %v8036_v2  ;;  %v10568_v10 = vld [vmem:[%s17363_s4 + $0xc4] sm:$0xf]  ;;  %v864_v2 = vperm.slane %v12549_v26, 2  ;;  %v7966_v26 = vld [vmem:[%s17363_s4 + $0x70] sm:$0xf0] }
  0xe4   :  { %1522 = vmatpush.bf16.msra.mxu2 %v7845_v7 }
  0xe6   :  { %1497 = vmatpush.bf16.msra.mxu0 %v7821_v14  ;;  %1510 = vmatpush.bf16.msra.mxu1 %v7825_v21  ;;  %v8017_v14 = vor.u32 %v10568_v10, %v8014_v11  ;;  %v10557_v11 = vld [vmem:[%s17363_s4 + $0x6c] sm:$0xf] }
  0xe7   :  { %1536 = vmatpush.bf16.msra.mxu3 %v7833_v27  ;;  %v7996_v27 = vld [vmem:[%s17363_s4 + $0xa0] sm:$0xf] }
  0xe8   :  { %1523 = vmatpush.bf16.msra.mxu2 %v7829_v22  ;;  %v7997_v32 = vor.u32 %v10566_v28, %v7996_v27  ;;  %v7977_v27 = vor.u32 %v10557_v11, %v7974_v12  ;;  %v7949_v28 = vor.u32 %v10554_v17, %v7948_v16 }
  0xea   :  { %1498 = vmatpush.bf16.msra.mxu0 %v7805_v31  ;;  %1511 = vmatpush.bf16.msra.mxu1 %v7809_v36  ;;  %v10567_v36 = vld [vmem:[%s17363_s4 + $0xb4] sm:$0xf0] }
  0xeb   :  { %1537 = vmatpush.bf16.msra.mxu3 %v7817_v44  ;;  %v8006_v44 = vld [vmem:[%s17363_s4 + $0xb8] sm:$0xf0]  ;;  %v8005_v45 = vor.u32 %v10567_v36, %v8004_v34 }
  0xec   :  { %1524 = vmatpush.bf16.msra.mxu2 %v7813_v37  ;;  %v8009_v35 = vor.u32 %v10565_v43, %v8006_v44 }
  0xee   :  { %1499 = vmatpush.bf16.msra.mxu0 %v7789_v47  ;;  %1512 = vmatpush.bf16.msra.mxu1 %v7793_v51  ;;  %v10562_v47 = vld [vmem:[%s17363_s4 + $0x8c] sm:$0xf0]  ;;  %v10563_v51 = vld [vmem:[%s17363_s4 + $0x94] sm:$0xf0] }
  0xef   :  { %1538 = vmatpush.bf16.msra.mxu3 %v7801_v58 }
  0xf0   :  { %1525 = vmatpush.bf16.msra.mxu2 %v7797_v52 }
  0xf2   :  { %1704 = vmatpush.bf16.msrb.mxu0 %v8029_v1  ;;  %1717 = vmatpush.bf16.msrb.mxu1 %v8033_v5  ;;  %v7651_v5 = vld [vmem:[%s17359_s0 + $0x20] sm:$0xff] }
  0xf4   :  { %1730 = vmatpush.bf16.msrb.mxu2 %v8037_v6  ;;  %v7652_v6 = vld [vmem:[%s17359_s0 + $0x28] sm:$0xff] }
  0xf6   :  { %1718 = vmatpush.bf16.msrb.mxu1 %v8017_v14 }
  0xf8   :  { %1731 = vmatpush.bf16.msrb.mxu2 %v8021_v24 }
  0xfc   :  { %1732 = vmatpush.bf16.msrb.mxu2 %v8005_v45 }
 0x14d   :  { %v817_v55 = vpop.f32.mrf.mxu0  ;;  %v830_v56 = vpop.f32.mrf.mxu1 }
 0x14e   :  { %v818_v63 = vadd.f32 %v817_v55, %v12418_v18  ;;  %v831_v0 = vadd.f32 %v830_v56, %v12420_v19  ;;  %v8038_v18 = vld [vmem:[%s17363_s4 + $0xf8] sm:$0xf0]  ;;  %v8012_v19 = vld [vmem:[%s17363_s4 + $0xc0] sm:$0xf] }
 0x14f   :  { %v8041_v9 = vor.u32 %v10573_v4, %v8038_v18  ;;  %v8013_v13 = vor.u32 %v10570_v57, %v8012_v19  ;;  %v7990_v55 = vld [vmem:[%s17363_s4 + $0x98] sm:$0xf0] }
 0x150   :  { %v870_v7 = vadd.f32 %v862_v40, %v818_v63  ;;  %v871_v8 = vadd.f32 %v863_v41, %v831_v0  ;;  %v8001_v41 = vor.u32 %v10564_v29, %v7998_v33  ;;  %v7993_v58 = vor.u32 %v10561_v38, %v7990_v55  ;;  %v10558_v63 = vld [vmem:[%s17363_s4 + $0x6c] sm:$0xf0]  ;;  %v10552_v29 = vld [vmem:[%s17363_s4 + $0x44] sm:$0xf]  ;;  %v7950_v33 = vld [vmem:[%s17363_s4 + $0x50] sm:$0xf0] }
 0x151   :  { %1743 = vmatpush.bf16.msrb.mxu3 %v8041_v9  ;;  %1705 = vmatpush.bf16.msrb.mxu0 %v8013_v13  ;;  %v7965_v18 = vor.u32 %v10558_v63, %v7964_v62  ;;  %v7940_v38 = vld [vmem:[%s17363_s4 + $0x28] sm:$0xf]  ;;  %v10551_v55 = vld [vmem:[%s17363_s4 + $0x34] sm:$0xf0]  ;;  %v10549_v62 = vld [vmem:[%s17363_s4 + $0x2c] sm:$0xf] }
 0x152   :  { %v7648_v21 = vmul.f32 -1.442695, %v870_v7  ;;  %v7649_v22 = vmul.f32 -1.442695, %v871_v8  ;;  %1719 = vmatpush.bf16.msrb.mxu1 %v8001_v41  ;;  %v7972_v7 = vld [vmem:[%s17363_s4 + $0x68] sm:$0xf] }
 0x153   :  { %v10559_v8 = vld [vmem:[%s17363_s4 + $0x74] sm:$0xf0] }
 0x154   :  { %11209 = vpow2.f32 %v7648_v21  ;;  %v843_v30 = vpop.f32.mrf.mxu2  ;;  %v856_v31 = vpop.f32.mrf.mxu3  ;;  %v7973_v15 = vor.u32 %v10559_v8, %v7972_v7 }
 0x155   :  { %11211 = vpow2.f32 %v7649_v22  ;;  %v857_v37 = vadd.f32 %v856_v31, %v12422_v20  ;;  %v819_v39 = vpop.f32.mrf.mxu0  ;;  %v832_v40 = vpop.f32.mrf.mxu1  ;;  %1744 = vmatpush.bf16.msrb.mxu3 %v8025_v25  ;;  %v7980_v20 = vld [vmem:[%s17363_s4 + $0x80] sm:$0xf]  ;;  %1706 = vmatpush.bf16.msrb.mxu0 %v7997_v32  ;;  %v844_v1 = vadd.f32 %v843_v30, %v12424_v23  ;;  %v10556_v23 = vld [vmem:[%s17363_s4 + $0x64] sm:$0xf]  ;;  %v7654_v25 = vld [vmem:[%s17359_s0 + $0x38] sm:$0xff] }
 0x156   :  { %v7981_v49 = vor.u32 %v10562_v47, %v7980_v20  ;;  %1720 = vmatpush.bf16.msrb.mxu1 %v7985_v53  ;;  %v7969_v14 = vor.u32 %v10556_v23, %v7966_v26  ;;  %v7956_v39 = vld [vmem:[%s17363_s4 + $0x48] sm:$0xf]  ;;  %v10555_v40 = vld [vmem:[%s17363_s4 + $0x54] sm:$0xf0]  ;;  %v7932_v20 = vld [vmem:[%s17363_s4 + $0x20] sm:$0xf] }
 0x157   :  { %v873_v46 = vadd.f32 %v865_v42, %v857_v37  ;;  %v7988_v42 = vld [vmem:[%s17363_s4 + $0x88] sm:$0xf]  ;;  %v872_v13 = vadd.f32 %v864_v2, %v844_v1  ;;  %v7953_v37 = vor.u32 %v10552_v29, %v7950_v33  ;;  %v10546_v23 = vld [vmem:[%s17363_s4 + $0xc] sm:$0xf0] }
 0x158   :  { %v7989_v54 = vor.u32 %v10563_v51, %v7988_v42  ;;  %v10548_v42 = vld [vmem:[%s17363_s4 + $0x24] sm:$0xf]  ;;  %v7934_v51 = vld [vmem:[%s17363_s4 + $0x30] sm:$0xf0] }
 0x159   :  { %v7650_v52 = vmul.f32 -1.442695, %v873_v46  ;;  %1745 = vmatpush.bf16.msrb.mxu3 %v8009_v35  ;;  %1707 = vmatpush.bf16.msrb.mxu0 %v7981_v49  ;;  %v10553_v35 = vld [vmem:[%s17363_s4 + $0x4c] sm:$0xf]  ;;  %v7958_v46 = vld [vmem:[%s17363_s4 + $0x58] sm:$0xf0] }
 0x15a   :  { %v11210_v56 = vpop.eup %11209  ;;  %1733 = vmatpush.bf16.msrb.mxu2 %v7989_v54  ;;  %1721 = vmatpush.bf16.msrb.mxu1 %v7969_v14  ;;  %v7961_v2 = vor.u32 %v10553_v35, %v7958_v46  ;;  %v7653_v35 = vld [vmem:[%s17359_s0 + $0x30] sm:$0xff] }
 0x15b   :  { %v11212_v59 = vpop.eup %11211  ;;  %v12703_v61 = vadd.f32 1.0, %v11210_v56  ;;  %11213 = vpow2.f32 %v7650_v52 }
 0x15c   :  { %v12711_v0 = vadd.f32 1.0, %v11212_v59  ;;  %v845_v3 = vpop.f32.mrf.mxu2  ;;  %v858_v4 = vpop.f32.mrf.mxu3  ;;  %v7957_v59 = vor.u32 %v10555_v40, %v7956_v39 }
 0x15d   :  { %11215 = vrcp.f32 %v12703_v61  ;;  %v1152_v19 = vpop.f32.mrf.mxu0  ;;  %v1165_v57 = vpop.f32.mrf.mxu1  ;;  %1746 = vmatpush.bf16.msrb.mxu3 %v7993_v58  ;;  %1708 = vmatpush.bf16.msrb.mxu0 %v7965_v18  ;;  %v889_v22 = vand.u32 2147483647, %v12703_v61  ;;  %v891_v30 = vand.u32 2147483648, %v12703_v61  ;;  %vm885_vm13 = vweird.f32 %v12703_v61  ;;  %v7942_v3 = vld [vmem:[%s17363_s4 + $0x38] sm:$0xf0] }
 0x15e   :  { %11217 = vrcp.f32 %v12711_v0  ;;  %v1195_v9 = vadd.f32 %v7651_v5, %v1152_v19  ;;  %v1196_v10 = vadd.f32 %v7652_v6, %v1165_v57  ;;  %1734 = vmatpush.bf16.msrb.mxu2 %v7973_v15  ;;  %v908_v36 = vand.u32 2147483647, %v12711_v0  ;;  %1722 = vmatpush.bf16.msrb.mxu1 %v7953_v37  ;;  %v7916_v4 = vld [vmem:[%s17363_s4] sm:$0xf]  ;;  %v10547_v37 = vld [vmem:[%s17363_s4 + $0x14] sm:$0xf0] }
 0x15f   :  { %vm904_vm12 = vweird.f32 %v12711_v0  ;;  %v910_v53 = vand.u32 2147483648, %v12711_v0  ;;  %vm12806_vm15 = vcmp.eq.f32.partialorder %v889_v22, 8.507059e+37  ;;  %v7933_v18 = vor.u32 %v10550_v50, %v7932_v20 }
 0x160   :  { %v7783_v24 = vmul.f32 -1.442695, %v1195_v9  ;;  %v7784_v32 = vmul.f32 -1.442695, %v1196_v10  ;;  %v7937_v19 = vor.u32 %v10548_v42, %v7934_v51  ;;  %v7941_v57 = vor.u32 %v10551_v55, %v7940_v38 }
 0x161   :  { %v11214_v21 = vpop.eup %11213  ;;  %1747 = vmatpush.bf16.msrb.mxu3 %v7977_v27  ;;  %1709 = vmatpush.bf16.msrb.mxu0 %v7949_v28  ;;  %v7945_v9 = vor.u32 %v10549_v62, %v7942_v3  ;;  %v892_v12 = vor.u32 1.1754944e-38, %v891_v30  ;;  %v7917_v15 = vor.u32 %v10546_v23, %v7916_v4  ;;  %vm909_vm3 = vcmp.eq.f32.partialorder %v908_v36, 8.507059e+37  ;;  %v7924_v36 = vld [vmem:[%s17363_s4 + $0x8] sm:$0xf] }
 0x162   :  { %v12755_v31 = vadd.f32 1.0, %v11214_v21  ;;  %11219 = vpow2.f32 %v7783_v24  ;;  %1735 = vmatpush.bf16.msrb.mxu2 %v7957_v59  ;;  %1723 = vmatpush.bf16.msrb.mxu1 %v7937_v19  ;;  %v911_v21 = vor.u32 1.1754944e-38, %v910_v53 }
 0x163   :  { %v12760_v34 = vpop.eup %11215 }
 0x164   :  { %v12769_v41 = vpop.eup %11217  ;;  %v881_v43 = vmul.f32 %v12760_v34, %v12703_v61  ;;  %11221 = vrcp.f32 %v12755_v31  ;;  %v12774_v44 = vpop.f32.mrf.mxu2  ;;  %vm886_vm14 = vweird.f32 %v12760_v34  ;;  %v40_v61 = vld [vmem:[%s17361_s2 + $0x8] sm:$0xff]  ;;  %v930_v42 = vand.u32 2147483648, %v12755_v31 }
 0x165   :  { %v1191_v45 = vpop.f32.mrf.mxu3  ;;  %v900_v47 = vmul.f32 %v12769_v41, %v12711_v0  ;;  %11223 = vtanh.f32 %v872_v13  ;;  %v1154_v48 = vpop.f32.mrf.mxu0  ;;  %vm905_vm0 = vweird.f32 %v12769_v41  ;;  %1748 = vmatpush.bf16.msrb.mxu3 %v7961_v2  ;;  %vm12834_vm1 = vmor %vm885_vm13, %vm886_vm14  ;;  %1710 = vmatpush.bf16.msrb.mxu0 %v7933_v18  ;;  %v10544_v0 = vld [vmem:[%s17363_s4 + $0x4] sm:$0xf]  ;;  %v1197_v53 = vadd.f32 %v7653_v35, %v12774_v44 }
 0x166   :  { %v1167_v49 = vpop.f32.mrf.mxu1  ;;  %v882_v52 = vsub.f32 1.0, %v881_v43  ;;  %11225 = vpow2.f32 %v7784_v32  ;;  %v1198_v54 = vadd.f32 %v7654_v25, %v1191_v45  ;;  %vm12847_vm2 = vmor %vm904_vm12, %vm905_vm0  ;;  %1736 = vmatpush.bf16.msrb.mxu2 %v7941_v57  ;;  %v7918_v32 = vld [vmem:[%s17363_s4 + $0x10] sm:$0xf0]  ;;  %v7926_v43 = vld [vmem:[%s17363_s4 + $0x18] sm:$0xf0]  ;;  %v7925_v48 = vor.u32 %v10547_v37, %v7924_v36 }
 0x167   :  { %v901_v56 = vsub.f32 1.0, %v900_v47  ;;  %v7921_v46 = vor.u32 %v10544_v0, %v7918_v32  ;;  %vm924_vm5 = vweird.f32 %v12755_v31  ;;  %v931_v59 = vor.u32 1.1754944e-38, %v930_v42  ;;  %v10634_v0 = vld [vmem:[%s17362_s3 + $0xcc] sm:$0xf0]  ;;  %v10632_v32 = vld [vmem:[%s17362_s3 + $0xc4] sm:$0xf] }
 0x168   :  { %v883_v63 = vmul.f32 %v12760_v34, %v882_v52  ;;  %v7785_v1 = vmul.f32 -1.442695, %v1198_v54  ;;  %v11220_v5 = vpop.eup %11219  ;;  %v928_v54 = vand.u32 2147483647, %v12755_v31 }
 0x169   :  { %v902_v6 = vmul.f32 %v12769_v41, %v901_v56  ;;  %v12828_v8 = vadd.f32 1.0, %v11220_v5  ;;  %1749 = vmatpush.bf16.msrb.mxu3 %v7945_v9  ;;  %1711 = vmatpush.bf16.msrb.mxu0 %v7917_v15 }
 0x16a   :  { %v12825_v26 = vpop.eup %11221  ;;  %v884_v7 = vadd.f32 %v12760_v34, %v883_v63  ;;  %11227 = vpow2.f32 %v7785_v1  ;;  %1724 = vmatpush.bf16.msrb.mxu1 %v7921_v46  ;;  %1737 = vmatpush.bf16.msrb.mxu2 %v7925_v48  ;;  %vm929_vm8 = vcmp.eq.f32.partialorder %v928_v54, 8.507059e+37  ;;  %v10635_v46 = vld [vmem:[%s17362_s3 + $0xd4] sm:$0xf0]  ;;  %v10630_v54 = vld [vmem:[%s17362_s3 + $0xac] sm:$0xf0] }
 0x16b   :  { %v11224_v10 = vpop.eup %11223  ;;  %v903_v13 = vadd.f32 %v12769_v41, %v902_v6  ;;  %v920_v14 = vmul.f32 %v12825_v26, %v12755_v31  ;;  %11229 = vrcp.f32 %v12828_v8  ;;  %vm925_vm4 = vweird.f32 %v12825_v26 }
 0x16c   :  { %v11226_v16 = vpop.eup %11225  ;;  %v888_v22 = vsel %vm12834_vm1, %v12760_v34, %v884_v7  ;;  %v1180_v24 = vpop.f32.mrf.mxu2  ;;  %vm926_vm6 = vmor %vm924_vm5, %vm925_vm4  ;;  %v1215_v56 = vand.u32 2147483648, %v12828_v8  ;;  %v1213_v44 = vand.u32 2147483647, %v12828_v8  ;;  %vm1209_vm9 = vweird.f32 %v12828_v8 }
 0x16d   :  { %v1193_v25 = vpop.f32.mrf.mxu3  ;;  %v893_v27 = vsel %vm12806_vm15, %v892_v12, %v888_v22  ;;  %v907_v28 = vsel %vm12847_vm2, %v12769_v41, %v903_v13  ;;  %v921_v29 = vsub.f32 1.0, %v920_v14  ;;  %v12865_v30 = vadd.f32 1.0, %v11226_v16  ;;  %v10545_v41 = vld [vmem:[%s17363_s4 + $0xc] sm:$0xf]  ;;  %v10636_v22 = vld [vmem:[%s17362_s3 + $0xe4] sm:$0xf] }
 0x16e   :  { %v912_v33 = vsel %vm909_vm3, %v911_v21, %v907_v28  ;;  %v935_v34 = vmul.f32 %v11224_v10, %v893_v27  ;;  %v7929_v51 = vor.u32 %v10545_v41, %v7926_v43  ;;  %v1216_v5 = vor.u32 1.1754944e-38, %v1215_v56  ;;  %v8164_v21 = vld [vmem:[%s17362_s3 + $0xe0] sm:$0xf]  ;;  %v8166_v24 = vld [vmem:[%s17362_s3 + $0xf0] sm:$0xf0] }
 0x16f   :  { %v934_v39 = vmul.f32 %v912_v33, %v40_v61  ;;  %v922_v40 = vmul.f32 %v12825_v26, %v921_v29  ;;  %11231 = vrcp.f32 %v12865_v30  ;;  %v1234_v3 = vand.u32 2147483648, %v12865_v30  ;;  %v10638_v61 = vld [vmem:[%s17362_s3 + $0xec] sm:$0xf0]  ;;  %v10639_v27 = vld [vmem:[%s17362_s3 + $0xf4] sm:$0xf0] }
 0x170   :  { %v11228_v45 = vpop.eup %11227  ;;  %1750 = vmatpush.bf16.msrb.mxu3 %v7929_v51  ;;  %v1232_v57 = vand.u32 2147483647, %v12865_v30  ;;  %vm1214_vm12 = vcmp.eq.f32.partialorder %v1213_v44, 8.507059e+37  ;;  %vm1228_vm13 = vweird.f32 %v12865_v30  ;;  %v10637_v28 = vld [vmem:[%s17362_s3 + $0xec] sm:$0xf]  ;;  %v8165_v36 = vor.u32 %v10638_v61, %v8164_v21 }
 0x171   :  { %v12890_v20 = vadd.f32 %v935_v34, %v934_v39  ;;  %v12892_v47 = vadd.f32 1.0, %v11228_v45  ;;  %v11230_v49 = vpop.eup %11229  ;;  %v923_v50 = vadd.f32 %v12825_v26, %v922_v40  ;;  %v1235_v11 = vor.u32 1.1754944e-38, %v1234_v3  ;;  %v8174_v29 = vld [vmem:[%s17362_s3 + $0xf8] sm:$0xf0]  ;;  %v8150_v39 = vld [vmem:[%s17362_s3 + $0xd0] sm:$0xf0] }
 0x172   :  { %v1205_v52 = vmul.f32 %v11230_v49, %v12828_v8  ;;  %vm1210_vm7 = vweird.f32 %v11230_v49  ;;  %vm1233_vm15 = vcmp.eq.f32.partialorder %v1232_v57, 8.507059e+37  ;;  %v8169_v37 = vor.u32 %v10636_v22, %v8166_v24  ;;  %v8156_v40 = vld [vmem:[%s17362_s3 + $0xc8] sm:$0xf]  ;;  %v10629_v44 = vld [vmem:[%s17362_s3 + $0xac] sm:$0xf] }
 0x173   :  { %11233 = vtanh.f32 %v12890_v20  ;;  %v927_v58 = vsel %vm926_vm6, %v12825_v26, %v923_v50  ;;  %vm1211_vm11 = vmor %vm1209_vm9, %vm1210_vm7  ;;  %v1254_v34 = vand.u32 2147483648, %v12892_v47  ;;  %vm1248_vm1 = vweird.f32 %v12892_v47  ;;  %v8132_v50 = vld [vmem:[%s17362_s3 + $0xa0] sm:$0xf]  ;;  %v10624_v57 = vld [vmem:[%s17362_s3 + $0x84] sm:$0xf] }
 0x174   :  { %11235 = vrcp.f32 %v12892_v47  ;;  %v1206_v55 = vsub.f32 1.0, %v1205_v52  ;;  %v932_v2 = vsel %vm929_vm8, %v931_v59, %v927_v58  ;;  %v1252_v41 = vand.u32 2147483647, %v12892_v47  ;;  %v8134_v58 = vld [vmem:[%s17362_s3 + $0xb0] sm:$0xf0] }
 0x175   :  { %v11232_v38 = vpop.eup %11231  ;;  %11237 = vtanh.f32 %v1197_v53  ;;  %v8177_v35 = vor.u32 %v10637_v28, %v8174_v29  ;;  %v1255_v51 = vor.u32 1.1754944e-38, %v1254_v34  ;;  %v8153_v53 = vor.u32 %v10632_v32, %v8150_v39  ;;  %v8140_v59 = vld [vmem:[%s17362_s3 + $0xa8] sm:$0xf]  ;;  %v8102_v21 = vld [vmem:[%s17362_s3 + $0x70] sm:$0xf0] }
 0x176   :  { %v1224_v62 = vmul.f32 %v11232_v38, %v12865_v30  ;;  %v1207_v63 = vmul.f32 %v11230_v49, %v1206_v55  ;;  %vm1229_vm10 = vweird.f32 %v11232_v38  ;;  %v8148_v30 = vld [vmem:[%s17362_s3 + $0xc0] sm:$0xf]  ;;  %v8157_v55 = vor.u32 %v10635_v46, %v8156_v40  ;;  %v8108_v61 = vld [vmem:[%s17362_s3 + $0x68] sm:$0xf]  ;;  %v10623_v22 = vld [vmem:[%s17362_s3 + $0x74] sm:$0xf0] }
 0x177   :  { %vm1230_vm14 = vmor %vm1228_vm13, %vm1229_vm10  ;;  %v8149_v52 = vor.u32 %v10634_v0, %v8148_v30  ;;  %vm1253_vm3 = vcmp.eq.f32.partialorder %v1252_v41, 8.507059e+37  ;;  %v8133_v3 = vor.u32 %v10630_v54, %v8132_v50  ;;  %v10621_v24 = vld [vmem:[%s17362_s3 + $0x6c] sm:$0xf]  ;;  %v8084_v29 = vld [vmem:[%s17362_s3 + $0x40] sm:$0xf]  ;;  %v8109_v0 = vor.u32 %v10623_v22, %v8108_v61 }
 0x178   :  { %v1225_v31 = vsub.f32 1.0, %v1224_v62  ;;  %v1208_v4 = vadd.f32 %v11230_v49, %v1207_v63  ;;  %v10631_v63 = vld [vmem:[%s17362_s3 + $0xb4] sm:$0xf0]  ;;  %v10618_v30 = vld [vmem:[%s17362_s3 + $0x4c] sm:$0xf0] }
 0x179   :  { %v11234_v1 = vpop.eup %11233  ;;  %v8086_v34 = vld [vmem:[%s17362_s3 + $0x50] sm:$0xf0]  ;;  %v10617_v39 = vld [vmem:[%s17362_s3 + $0x4c] sm:$0xf]  ;;  %v8094_v40 = vld [vmem:[%s17362_s3 + $0x58] sm:$0xf0]  ;;  %v8085_v41 = vor.u32 %v10618_v30, %v8084_v29 }
 0x17a   :  { %v12909_v6 = vpop.eup %11235  ;;  %v938_v18 = vmul.f32 %v11234_v1, %v932_v2  ;;  %v1226_v19 = vmul.f32 %v11232_v38, %v1225_v31  ;;  %v1212_v23 = vsel %vm1211_vm11, %v11230_v49, %v1208_v4  ;;  %v10633_v49 = vld [vmem:[%s17362_s3 + $0xcc] sm:$0xf]  ;;  %v8142_v31 = vld [vmem:[%s17362_s3 + $0xb8] sm:$0xf0]  ;;  %v8097_v48 = vor.u32 %v10617_v39, %v8094_v40  ;;  %v8076_v50 = vld [vmem:[%s17362_s3 + $0x28] sm:$0xf] }
 0x17b   :  { %v1244_v26 = vmul.f32 %v12909_v6, %v12892_v47  ;;  %v1217_v8 = vsel %vm1214_vm12, %v1216_v5, %v1212_v23  ;;  %v11238_v10 = vpop.eup %11237  ;;  %vm1249_vm0 = vweird.f32 %v12909_v6  ;;  %v8158_v47 = vld [vmem:[%s17362_s3 + $0xd8] sm:$0xf0]  ;;  %v8116_v5 = vld [vmem:[%s17362_s3 + $0x80] sm:$0xf]  ;;  %v8118_v23 = vld [vmem:[%s17362_s3 + $0x90] sm:$0xf0] }
 0x17c   :  { %v942_v7 = vpack.c.bf16 %v938_v18, %v938_v18  ;;  %v1227_v9 = vadd.f32 %v11232_v38, %v1226_v19  ;;  %v1259_v14 = vmul.f32 %v11238_v10, %v1217_v8  ;;  %vm12973_vm2 = vmor %vm1248_vm1, %vm1249_vm0  ;;  %v8161_v56 = vor.u32 %v10633_v49, %v8158_v47  ;;  %v10627_v8 = vld [vmem:[%s17362_s3 + $0x94] sm:$0xf0]  ;;  %v8126_v10 = vld [vmem:[%s17362_s3 + $0x98] sm:$0xf0] }
 0x17d   :  { %v1245_v12 = vsub.f32 1.0, %v1244_v26  ;;  %v8141_v18 = vor.u32 %v10631_v63, %v8140_v59  ;;  %v8145_v19 = vor.u32 %v10629_v44, %v8142_v31  ;;  %v8124_v26 = vld [vmem:[%s17362_s3 + $0x88] sm:$0xf]  ;;  %v10612_v49 = vld [vmem:[%s17362_s3 + $0x24] sm:$0xf] }
 0x17e   :  { %943 = vst [vmem:[#allocation4 + $0x4] sm:$0xf] %v942_v7  ;;  %v1231_v13 = vsel %vm1230_vm14, %v11232_v38, %v1227_v9  ;;  %v10628_v38 = vld [vmem:[%s17362_s3 + $0xa4] sm:$0xf]  ;;  %v10625_v9 = vld [vmem:[%s17362_s3 + $0x8c] sm:$0xf] }
 0x17f   :  { %944 = vst [vmem:[%s17366_s7] sm:$0xf] %v942_v7  ;;  %v1236_v15 = vsel %vm1233_vm15, %v1235_v11, %v1231_v13  ;;  %v1246_v16 = vmul.f32 %v12909_v6, %v1245_v12  ;;  %v8137_v4 = vor.u32 %v10628_v38, %v8134_v58  ;;  %v8121_v12 = vor.u32 %v10624_v57, %v8118_v23  ;;  %v8100_v13 = vld [vmem:[%s17362_s3 + $0x60] sm:$0xf]  ;;  %v8070_v47 = vld [vmem:[%s17362_s3 + $0x30] sm:$0xf0] }
 0x180   :  { %v1258_v17 = vmul.f32 %v1236_v15, %v12388_v60  ;;  %v8172_v60 = vld [vmem:[%s17362_s3 + $0xe8] sm:$0xf]  ;;  %v8125_v15 = vor.u32 %v10627_v8, %v8124_v26  ;;  %v8073_v54 = vor.u32 %v10612_v49, %v8070_v47  ;;  %v8052_v38 = vld [vmem:[%s17362_s3] sm:$0xf]  ;;  %v10608_v59 = vld [vmem:[%s17362_s3 + $0x4] sm:$0xf] }
 0x181   :  { %v1247_v33 = vadd.f32 %v12909_v6, %v1246_v16  ;;  %v8173_v45 = vor.u32 %v10639_v27, %v8172_v60  ;;  %v8129_v16 = vor.u32 %v10625_v9, %v8126_v10  ;;  %v8110_v60 = vld [vmem:[%s17362_s3 + $0x78] sm:$0xf0]  ;;  %v8060_v63 = vld [vmem:[%s17362_s3 + $0x8] sm:$0xf]  ;;  %v10611_v44 = vld [vmem:[%s17362_s3 + $0x14] sm:$0xf0] }
 0x182   :  { %v12936_v25 = vadd.f32 %v1259_v14, %v1258_v17  ;;  %v10622_v14 = vld [vmem:[%s17362_s3 + $0x6c] sm:$0xf0]  ;;  %v10620_v17 = vld [vmem:[%s17362_s3 + $0x64] sm:$0xf]  ;;  %v8113_v32 = vor.u32 %v10621_v24, %v8110_v60  ;;  %v10609_v31 = vld [vmem:[%s17362_s3 + $0xc] sm:$0xf] }
 0x183   :  { %v1251_v42 = vsel %vm12973_vm2, %v12909_v6, %v1247_v33  ;;  %v10626_v6 = vld [vmem:[%s17362_s3 + $0x8c] sm:$0xf0]  ;;  %v8101_v27 = vor.u32 %v10622_v14, %v8100_v13  ;;  %v8105_v28 = vor.u32 %v10620_v17, %v8102_v21  ;;  %v10616_v33 = vld [vmem:[%s17362_s3 + $0x44] sm:$0xf]  ;;  %v8297_v26 = vld [vmem:[%s17364_s5 + $0xf0] sm:$0xf0] }
 0x184   :  { %11239 = vtanh.f32 %v12936_v25  ;;  %v1256_v1 = vsel %vm1253_vm3, %v1255_v51, %v1251_v42  ;;  %v8117_v11 = vor.u32 %v10626_v6, %v8116_v5  ;;  %v10615_v42 = vld [vmem:[%s17362_s3 + $0x34] sm:$0xf0]  ;;  %v10613_v51 = vld [vmem:[%s17362_s3 + $0x2c] sm:$0xf]  ;;  %v10700_v57 = vld [vmem:[%s17364_s5 + $0xe4] sm:$0xf] }
 0x185   :  { %v1299_v43 = vld [vmem:[#allocation4 + $0x4] sm:$0xf]  ;;  %v10703_v8 = vld [vmem:[%s17364_s5 + $0xf4] sm:$0xf0]  ;;  %v8300_v9 = vor.u32 %v10700_v57, %v8297_v26  ;;  %v8279_v14 = vld [vmem:[%s17364_s5 + $0xc0] sm:$0xf] }
 0x186   :  { %1500 = vmatmul.bf16.vlgmr.msra.gmra.mxu0 %v1299_v43  ;;  %1513 = vmatmul.bf16.vlgmr.msra.gmra.mxu1 %v1299_v43  ;;  %v8281_v21 = vld [vmem:[%s17364_s5 + $0xd0] sm:$0xf0]  ;;  %v8287_v61 = vld [vmem:[%s17364_s5 + $0xc8] sm:$0xf]  ;;  %v10699_v24 = vld [vmem:[%s17364_s5 + $0xd4] sm:$0xf0] }
 0x187   :  { %1526 = vmatmul.bf16.vlgmr.msra.gmra.mxu2 %v1299_v43  ;;  %1539 = vmatmul.bf16.vlgmr.msra.gmra.mxu3 %v1299_v43  ;;  %v8089_v43 = vor.u32 %v10616_v33, %v8086_v34  ;;  %v10697_v60 = vld [vmem:[%s17364_s5 + $0xcc] sm:$0xf]  ;;  %v8263_v30 = vld [vmem:[%s17364_s5 + $0xa0] sm:$0xf]  ;;  %v8265_v34 = vld [vmem:[%s17364_s5 + $0xb0] sm:$0xf0] }
 0x188   :  { %2038 = vmatpush.bf16.msra.mxu0 %v8165_v36  ;;  %2051 = vmatpush.bf16.msra.mxu1 %v8169_v37  ;;  %v8092_v36 = vld [vmem:[%s17362_s3 + $0x48] sm:$0xf]  ;;  %v10619_v37 = vld [vmem:[%s17362_s3 + $0x54] sm:$0xf0]  ;;  %v10690_v49 = vld [vmem:[%s17364_s5 + $0x8c] sm:$0xf0] }
 0x189   :  { %2064 = vmatpush.bf16.msra.mxu2 %v8173_v45  ;;  %2077 = vmatpush.bf16.msra.mxu3 %v8177_v35  ;;  %v8068_v45 = vld [vmem:[%s17362_s3 + $0x20] sm:$0xf]  ;;  %v10614_v35 = vld [vmem:[%s17362_s3 + $0x2c] sm:$0xf0]  ;;  %v8093_v46 = vor.u32 %v10619_v37, %v8092_v36  ;;  %v8271_v36 = vld [vmem:[%s17364_s5 + $0xa8] sm:$0xf] }
 0x18a   :  { %v11240_v62 = vpop.eup %11239  ;;  %v10695_v37 = vld [vmem:[%s17364_s5 + $0xb4] sm:$0xf0]  ;;  %v10688_v47 = vld [vmem:[%s17364_s5 + $0x84] sm:$0xf]  ;;  %v8215_v26 = vld [vmem:[%s17364_s5 + $0x40] sm:$0xf] }
 0x18b   :  { %v1262_v2 = vmul.f32 %v11240_v62, %v1256_v1  ;;  %v8054_v62 = vld [vmem:[%s17362_s3 + $0x10] sm:$0xf0]  ;;  %v8062_v1 = vld [vmem:[%s17362_s3 + $0x18] sm:$0xf0]  ;;  %v8272_v40 = vor.u32 %v10695_v37, %v8271_v36 }
 0x18c   :  { %2039 = vmatpush.bf16.msra.mxu0 %v8149_v52  ;;  %2052 = vmatpush.bf16.msra.mxu1 %v8153_v53  ;;  %v8078_v52 = vld [vmem:[%s17362_s3 + $0x38] sm:$0xf0]  ;;  %v8069_v53 = vor.u32 %v10614_v35, %v8068_v45  ;;  %v8065_v5 = vor.u32 %v10609_v31, %v8062_v1  ;;  %v8239_v31 = vld [vmem:[%s17364_s5 + $0x68] sm:$0xf]  ;;  %v10687_v1 = vld [vmem:[%s17364_s5 + $0x74] sm:$0xf0] }
 0x18d   :  { %2065 = vmatpush.bf16.msra.mxu2 %v8157_v55  ;;  %2078 = vmatpush.bf16.msra.mxu3 %v8161_v56  ;;  %v1265_v7 = vpack.c.bf16 %v1262_v2, %v1262_v2  ;;  %v10610_v55 = vld [vmem:[%s17362_s3 + $0xc] sm:$0xf0]  ;;  %v8077_v56 = vor.u32 %v10615_v42, %v8076_v50  ;;  %v8081_v58 = vor.u32 %v10613_v51, %v8078_v52  ;;  %v8249_v42 = vld [vmem:[%s17364_s5 + $0x90] sm:$0xf0]  ;;  %v8255_v51 = vld [vmem:[%s17364_s5 + $0x88] sm:$0xf] }
 0x18e   :  { %v8053_v2 = vor.u32 %v10610_v55, %v8052_v38  ;;  %v10691_v52 = vld [vmem:[%s17364_s5 + $0x94] sm:$0xf0]  ;;  %v10689_v38 = vld [vmem:[%s17364_s5 + $0x8c] sm:$0xf]  ;;  %v8257_v55 = vld [vmem:[%s17364_s5 + $0x98] sm:$0xf0] }
 0x18f   :  { %1266 = vst [vmem:[#allocation4] sm:$0xf] %v1265_v7 }
 0x190   :  { %2040 = vmatpush.bf16.msra.mxu0 %v8133_v3  ;;  %2053 = vmatpush.bf16.msra.mxu1 %v8137_v4  ;;  %v8057_v3 = vor.u32 %v10608_v59, %v8054_v62  ;;  %v8061_v4 = vor.u32 %v10611_v44, %v8060_v63  ;;  %v10686_v59 = vld [vmem:[%s17364_s5 + $0x6c] sm:$0xf0]  ;;  %v10684_v62 = vld [vmem:[%s17364_s5 + $0x64] sm:$0xf]  ;;  %v8233_v44 = vld [vmem:[%s17364_s5 + $0x70] sm:$0xf0] }
 0x191   :  { %2066 = vmatpush.bf16.msra.mxu2 %v8141_v18  ;;  %2079 = vmatpush.bf16.msra.mxu3 %v8145_v19  ;;  %v8295_v18 = vld [vmem:[%s17364_s5 + $0xe0] sm:$0xf]  ;;  %v10702_v19 = vld [vmem:[%s17364_s5 + $0xec] sm:$0xf0] }
 0x192   :  { %v8296_v23 = vor.u32 %v10702_v19, %v8295_v18 }
 0x194   :  { %2041 = vmatpush.bf16.msra.mxu0 %v8117_v11  ;;  %2054 = vmatpush.bf16.msra.mxu1 %v8121_v12  ;;  %v10701_v11 = vld [vmem:[%s17364_s5 + $0xec] sm:$0xf]  ;;  %v8305_v12 = vld [vmem:[%s17364_s5 + $0xf8] sm:$0xf0] }
 0x195   :  { %2067 = vmatpush.bf16.msra.mxu2 %v8125_v15  ;;  %2080 = vmatpush.bf16.msra.mxu3 %v8129_v16  ;;  %v8308_v13 = vor.u32 %v10701_v11, %v8305_v12  ;;  %v10698_v15 = vld [vmem:[%s17364_s5 + $0xcc] sm:$0xf0]  ;;  %v10696_v16 = vld [vmem:[%s17364_s5 + $0xc4] sm:$0xf]  ;;  %v8223_v12 = vld [vmem:[%s17364_s5 + $0x48] sm:$0xf] }
 0x196   :  { %1712 = vmatmul.bf16.vlgmr.msrb.gmra.mxu0 %v1265_v7  ;;  %1725 = vmatmul.bf16.vlgmr.msrb.gmra.mxu1 %v1265_v7  ;;  %v1845_v6 = vld [vmem:[#allocation4] sm:$0xf]  ;;  %v8280_v17 = vor.u32 %v10698_v15, %v8279_v14  ;;  %v8284_v22 = vor.u32 %v10696_v16, %v8281_v21  ;;  %v10681_v14 = vld [vmem:[%s17364_s5 + $0x4c] sm:$0xf] }
 0x197   :  { %1738 = vmatmul.bf16.vlgmr.msrb.gmra.mxu2 %v1265_v7  ;;  %1751 = vmatmul.bf16.vlgmr.msrb.gmra.mxu3 %v1265_v7  ;;  %v8303_v7 = vld [vmem:[%s17364_s5 + $0xe8] sm:$0xf]  ;;  %v13282_v15 = vld [vmem:[%s17365_s6] sm:$0xf] }
 0x198   :  { %2042 = vmatpush.bf16.msra.mxu0 %v8101_v27  ;;  %2055 = vmatpush.bf16.msra.mxu1 %v8105_v28  ;;  %v8304_v10 = vor.u32 %v10703_v8, %v8303_v7  ;;  %v8289_v27 = vld [vmem:[%s17364_s5 + $0xd8] sm:$0xf0]  ;;  %v8288_v28 = vor.u32 %v10699_v24, %v8287_v61  ;;  %v10682_v7 = vld [vmem:[%s17364_s5 + $0x4c] sm:$0xf0]  ;;  %v10680_v8 = vld [vmem:[%s17364_s5 + $0x44] sm:$0xf] }
 0x199   :  { %2068 = vmatpush.bf16.msra.mxu2 %v8109_v0  ;;  %2081 = vmatpush.bf16.msra.mxu3 %v8113_v32  ;;  %v8292_v29 = vor.u32 %v10697_v60, %v8289_v27  ;;  %v10694_v0 = vld [vmem:[%s17364_s5 + $0xac] sm:$0xf0]  ;;  %v10692_v32 = vld [vmem:[%s17364_s5 + $0xa4] sm:$0xf]  ;;  %v8199_v61 = vld [vmem:[%s17364_s5 + $0x20] sm:$0xf] }
 0x19a   :  { %v8264_v33 = vor.u32 %v10694_v0, %v8263_v30  ;;  %v8268_v39 = vor.u32 %v10692_v32, %v8265_v34  ;;  %v10676_v24 = vld [vmem:[%s17364_s5 + $0x24] sm:$0xf]  ;;  %v8201_v27 = vld [vmem:[%s17364_s5 + $0x30] sm:$0xf0]  ;;  %v10677_v32 = vld [vmem:[%s17364_s5 + $0x2c] sm:$0xf] }
 0x19b   :  { %v8204_v30 = vor.u32 %v10676_v24, %v8201_v27  ;;  %v1758_v36 = vperm.slane %v13282_v15, 0  ;;  %v1759_v37 = vperm.slane %v13282_v15, 1  ;;  %v8417_v27 = vld [vmem:[%s17363_s4 + $0xd8] sm:$0xf0] }
 0x19c   :  { %2043 = vmatpush.bf16.msra.mxu0 %v8085_v41  ;;  %2056 = vmatpush.bf16.msra.mxu1 %v8089_v43  ;;  %v10693_v41 = vld [vmem:[%s17364_s5 + $0xac] sm:$0xf]  ;;  %v8273_v43 = vld [vmem:[%s17364_s5 + $0xb8] sm:$0xf0] }
 0x19d   :  { %2069 = vmatpush.bf16.msra.mxu2 %v8093_v46  ;;  %2082 = vmatpush.bf16.msra.mxu3 %v8097_v48  ;;  %v8276_v45 = vor.u32 %v10693_v41, %v8273_v43  ;;  %v8247_v48 = vld [vmem:[%s17364_s5 + $0x80] sm:$0xf] }
 0x19e   :  { %v8248_v50 = vor.u32 %v10690_v49, %v8247_v48  ;;  %v8183_v48 = vld [vmem:[%s17364_s5] sm:$0xf]  ;;  %v10674_v49 = vld [vmem:[%s17364_s5 + $0xc] sm:$0xf0] }
 0x1a0   :  { %2044 = vmatpush.bf16.msra.mxu0 %v8069_v53  ;;  %2057 = vmatpush.bf16.msra.mxu1 %v8073_v54  ;;  %v8252_v53 = vor.u32 %v10688_v47, %v8249_v42  ;;  %v8256_v54 = vor.u32 %v10691_v52, %v8255_v51  ;;  %v10672_v47 = vld [vmem:[%s17364_s5 + $0x4] sm:$0xf]  ;;  %v8184_v51 = vor.u32 %v10674_v49, %v8183_v48  ;;  %v8185_v52 = vld [vmem:[%s17364_s5 + $0x10] sm:$0xf0] }
 0x1a1   :  { %2070 = vmatpush.bf16.msra.mxu2 %v8077_v56  ;;  %2083 = vmatpush.bf16.msra.mxu3 %v8081_v58  ;;  %v8260_v56 = vor.u32 %v10689_v38, %v8257_v55  ;;  %v8231_v58 = vld [vmem:[%s17364_s5 + $0x60] sm:$0xf]  ;;  %v8188_v38 = vor.u32 %v10672_v47, %v8185_v52 }
 0x1a2   :  { %v8232_v63 = vor.u32 %v10686_v59, %v8231_v58  ;;  %v8375_v47 = vld [vmem:[%s17363_s4 + $0x80] sm:$0xf] }
 0x1a4   :  { %2045 = vmatpush.bf16.msra.mxu0 %v8053_v2  ;;  %2058 = vmatpush.bf16.msra.mxu1 %v8057_v3  ;;  %v8236_v2 = vor.u32 %v10684_v62, %v8233_v44  ;;  %v8240_v3 = vor.u32 %v10687_v1, %v8239_v31  ;;  %v10668_v44 = vld [vmem:[%s17363_s4 + $0xe4] sm:$0xf]  ;;  %v8425_v31 = vld [vmem:[%s17363_s4 + $0xf0] sm:$0xf0] }
 0x1a5   :  { %2071 = vmatpush.bf16.msra.mxu2 %v8061_v4  ;;  %2084 = vmatpush.bf16.msra.mxu3 %v8065_v5  ;;  %v10685_v4 = vld [vmem:[%s17364_s5 + $0x6c] sm:$0xf]  ;;  %v8241_v5 = vld [vmem:[%s17364_s5 + $0x78] sm:$0xf0] }
 0x1a6   :  { %v8244_v19 = vor.u32 %v10685_v4, %v8241_v5  ;;  %v10671_v4 = vld [vmem:[%s17363_s4 + $0xf4] sm:$0xf0]  ;;  %v10669_v5 = vld [vmem:[%s17363_s4 + $0xec] sm:$0xf] }
 0x1a7   :  { %2046 = vmatmul.bf16.vlgmr.msra.gmra.mxu0 %v1845_v6  ;;  %2059 = vmatmul.bf16.vlgmr.msra.gmra.mxu1 %v1845_v6 }
 0x1a8   :  { %2072 = vmatmul.bf16.vlgmr.msra.gmra.mxu2 %v1845_v6  ;;  %2085 = vmatmul.bf16.vlgmr.msra.gmra.mxu3 %v1845_v6 }
 0x1a9   :  { %2387 = vmatpush.bf16.msrb.mxu0 %v8296_v23  ;;  %2400 = vmatpush.bf16.msrb.mxu1 %v8300_v9  ;;  %v8217_v9 = vld [vmem:[%s17364_s5 + $0x50] sm:$0xf0] }
 0x1aa   :  { %2413 = vmatpush.bf16.msrb.mxu2 %v8304_v10  ;;  %2426 = vmatpush.bf16.msrb.mxu3 %v8308_v13  ;;  %v8216_v10 = vor.u32 %v10682_v7, %v8215_v26  ;;  %v8220_v11 = vor.u32 %v10680_v8, %v8217_v9  ;;  %v10683_v13 = vld [vmem:[%s17364_s5 + $0x54] sm:$0xf0]  ;;  %v8433_v26 = vld [vmem:[%s17363_s4 + $0xf8] sm:$0xf0]  ;;  %v8407_v8 = vld [vmem:[%s17363_s4 + $0xc0] sm:$0xf] }
 0x1ab   :  { %v8224_v16 = vor.u32 %v10683_v13, %v8223_v12  ;;  %v8436_v7 = vor.u32 %v10669_v5, %v8433_v26  ;;  %v10666_v9 = vld [vmem:[%s17363_s4 + $0xcc] sm:$0xf0] }
 0x1ac   :  { %v8408_v13 = vor.u32 %v10666_v9, %v8407_v8  ;;  %v10654_v5 = vld [vmem:[%s17363_s4 + $0x6c] sm:$0xf0]  ;;  %v8361_v8 = vld [vmem:[%s17363_s4 + $0x70] sm:$0xf0]  ;;  %v8367_v9 = vld [vmem:[%s17363_s4 + $0x68] sm:$0xf] }
 0x1ad   :  { %2388 = vmatpush.bf16.msrb.mxu0 %v8280_v17  ;;  %2401 = vmatpush.bf16.msrb.mxu1 %v8284_v22  ;;  %v8225_v17 = vld [vmem:[%s17364_s5 + $0x58] sm:$0xf0]  ;;  %v10678_v22 = vld [vmem:[%s17364_s5 + $0x2c] sm:$0xf0] }
 0x1ae   :  { %2414 = vmatpush.bf16.msrb.mxu2 %v8288_v28  ;;  %2427 = vmatpush.bf16.msrb.mxu3 %v8292_v29  ;;  %v8228_v21 = vor.u32 %v10681_v14, %v8225_v17  ;;  %v8200_v60 = vor.u32 %v10678_v22, %v8199_v61  ;;  %v8207_v28 = vld [vmem:[%s17364_s5 + $0x28] sm:$0xf]  ;;  %v10679_v29 = vld [vmem:[%s17364_s5 + $0x34] sm:$0xf0]  ;;  %v8409_v14 = vld [vmem:[%s17363_s4 + $0xd0] sm:$0xf0] }
 0x1af   :  { %v8208_v0 = vor.u32 %v10679_v29, %v8207_v28  ;;  %v10667_v17 = vld [vmem:[%s17363_s4 + $0xd4] sm:$0xf0] }
 0x1b1   :  { %2389 = vmatpush.bf16.msrb.mxu0 %v8264_v33  ;;  %2402 = vmatpush.bf16.msrb.mxu1 %v8268_v39  ;;  %v1761_v39 = vperm.slane %v13282_v15, 3 }
 0x1b2   :  { %2415 = vmatpush.bf16.msrb.mxu2 %v8272_v40  ;;  %2428 = vmatpush.bf16.msrb.mxu3 %v8276_v45  ;;  %v8209_v40 = vld [vmem:[%s17364_s5 + $0x38] sm:$0xf0] }
 0x1b3   :  { %v8212_v45 = vor.u32 %v10677_v32, %v8209_v40 }
 0x1b5   :  { %2390 = vmatpush.bf16.msrb.mxu0 %v8248_v50  ;;  %2403 = vmatpush.bf16.msrb.mxu1 %v8252_v53  ;;  %v8191_v53 = vld [vmem:[%s17364_s5 + $0x8] sm:$0xf] }
 0x1b6   :  { %2416 = vmatpush.bf16.msrb.mxu2 %v8256_v54  ;;  %2429 = vmatpush.bf16.msrb.mxu3 %v8260_v56  ;;  %v10675_v54 = vld [vmem:[%s17364_s5 + $0x14] sm:$0xf0]  ;;  %v8423_v56 = vld [vmem:[%s17363_s4 + $0xe0] sm:$0xf] }
 0x1b7   :  { %v8192_v55 = vor.u32 %v10675_v54, %v8191_v53  ;;  %v8377_v54 = vld [vmem:[%s17363_s4 + $0x90] sm:$0xf0] }
 0x1b9   :  { %2391 = vmatpush.bf16.msrb.mxu0 %v8232_v63  ;;  %2404 = vmatpush.bf16.msrb.mxu1 %v8236_v2  ;;  %v10670_v63 = vld [vmem:[%s17363_s4 + $0xec] sm:$0xf0]  ;;  %v8428_v2 = vor.u32 %v10668_v44, %v8425_v31  ;;  %v8385_v44 = vld [vmem:[%s17363_s4 + $0x98] sm:$0xf0] }
 0x1ba   :  { %2417 = vmatpush.bf16.msrb.mxu2 %v8240_v3  ;;  %2430 = vmatpush.bf16.msrb.mxu3 %v8244_v19  ;;  %v8424_v1 = vor.u32 %v10670_v63, %v8423_v56  ;;  %v8431_v3 = vld [vmem:[%s17363_s4 + $0xe8] sm:$0xf] }
 0x1bb   :  { %v8383_v63 = vld [vmem:[%s17363_s4 + $0x88] sm:$0xf] }
 0x1bd   :  { %2392 = vmatpush.bf16.msrb.mxu0 %v8216_v10  ;;  %2405 = vmatpush.bf16.msrb.mxu1 %v8220_v11  ;;  %v10664_v10 = vld [vmem:[%s17363_s4 + $0xc4] sm:$0xf] }
 0x1be   :  { %2418 = vmatpush.bf16.msrb.mxu2 %v8224_v16  ;;  %2431 = vmatpush.bf16.msrb.mxu3 %v8228_v21  ;;  %v8415_v16 = vld [vmem:[%s17363_s4 + $0xc8] sm:$0xf]  ;;  %v8412_v24 = vor.u32 %v10664_v10, %v8409_v14 }
 0x1bf   :  { %v8416_v28 = vor.u32 %v10667_v17, %v8415_v16  ;;  %v10655_v16 = vld [vmem:[%s17363_s4 + $0x74] sm:$0xf0] }
 0x1c1   :  { %2393 = vmatpush.bf16.msrb.mxu0 %v8200_v60  ;;  %2406 = vmatpush.bf16.msrb.mxu1 %v8204_v30  ;;  %v10665_v60 = vld [vmem:[%s17363_s4 + $0xcc] sm:$0xf]  ;;  %v8391_v30 = vld [vmem:[%s17363_s4 + $0xa0] sm:$0xf] }
 0x1c2   :  { %2419 = vmatpush.bf16.msrb.mxu2 %v8208_v0  ;;  %2432 = vmatpush.bf16.msrb.mxu3 %v8212_v45  ;;  %v8420_v29 = vor.u32 %v10665_v60, %v8417_v27  ;;  %v10660_v0 = vld [vmem:[%s17363_s4 + $0xa4] sm:$0xf] }
 0x1c5   :  { %2394 = vmatpush.bf16.msrb.mxu0 %v8184_v51  ;;  %2407 = vmatpush.bf16.msrb.mxu1 %v8188_v38 }
 0x1c6   :  { %2420 = vmatpush.bf16.msrb.mxu2 %v8192_v55 }
 0x1c9   :  { %2599 = vmatpush.bf16.msra.mxu0 %v8424_v1  ;;  %2612 = vmatpush.bf16.msra.mxu1 %v8428_v2  ;;  %v8359_v2 = vld [vmem:[%s17363_s4 + $0x60] sm:$0xf] }
 0x1cd   :  { %2600 = vmatpush.bf16.msra.mxu0 %v8408_v13  ;;  %2613 = vmatpush.bf16.msra.mxu1 %v8412_v24  ;;  %v8360_v13 = vor.u32 %v10654_v5, %v8359_v2  ;;  %v10647_v2 = vld [vmem:[%s17363_s4 + $0x34] sm:$0xf0] }
 0x203   :  { %v13202_v35 = vpop.f32.mrf.mxu0  ;;  %v13204_v46 = vpop.f32.mrf.mxu1 }
 0x20a   :  { %v13254_v6 = vpop.f32.mrf.mxu2  ;;  %v13256_v18 = vpop.f32.mrf.mxu3 }
 0x20b   :  { %v1503_v57 = vpop.f32.mrf.mxu0  ;;  %v1516_v23 = vpop.f32.mrf.mxu1 }
 0x20c   :  { %v8432_v23 = vor.u32 %v10671_v4, %v8431_v3 }
 0x20e   :  { %2625 = vmatpush.bf16.msra.mxu2 %v8432_v23 }
 0x212   :  { %v1529_v33 = vpop.f32.mrf.mxu2  ;;  %v1542_v34 = vpop.f32.mrf.mxu3  ;;  %2626 = vmatpush.bf16.msra.mxu2 %v8416_v28  ;;  %v8049_v28 = vld [vmem:[%s17359_s0 + $0x58] sm:$0xff] }
 0x213   :  { %v1713_v41 = vpop.f32.mrf.mxu0  ;;  %v1726_v43 = vpop.f32.mrf.mxu1  ;;  %v8393_v34 = vld [vmem:[%s17363_s4 + $0xb0] sm:$0xf0] }
 0x214   :  { %v1714_v50 = vadd.f32 %v1713_v41, %v13202_v35  ;;  %v1727_v42 = vadd.f32 %v1726_v43, %v13204_v46  ;;  %v10673_v35 = vld [vmem:[%s17364_s5 + $0xc] sm:$0xf]  ;;  %v8193_v46 = vld [vmem:[%s17364_s5 + $0x18] sm:$0xf0]  ;;  %v8396_v40 = vor.u32 %v10660_v0, %v8393_v34  ;;  %v8345_v34 = vld [vmem:[%s17363_s4 + $0x50] sm:$0xf0] }
 0x215   :  { %v8196_v62 = vor.u32 %v10673_v35, %v8193_v46  ;;  %v8401_v43 = vld [vmem:[%s17363_s4 + $0xb8] sm:$0xf0]  ;;  %v1760_v35 = vperm.slane %v13282_v15, 2  ;;  %v10657_v15 = vld [vmem:[%s17363_s4 + $0x8c] sm:$0xf] }
 0x216   :  { %v1766_v58 = vadd.f32 %v1758_v36, %v1714_v50  ;;  %v1767_v59 = vadd.f32 %v1759_v37, %v1727_v42  ;;  %v8399_v36 = vld [vmem:[%s17363_s4 + $0xa8] sm:$0xf]  ;;  %v10663_v37 = vld [vmem:[%s17363_s4 + $0xb4] sm:$0xf0]  ;;  %v10658_v50 = vld [vmem:[%s17363_s4 + $0x8c] sm:$0xf0]  ;;  %2614 = vmatpush.bf16.msra.mxu1 %v8396_v40 }
 0x217   :  { %2433 = vmatpush.bf16.msrb.mxu3 %v8196_v62  ;;  %v8400_v41 = vor.u32 %v10663_v37, %v8399_v36  ;;  %v10656_v42 = vld [vmem:[%s17363_s4 + $0x84] sm:$0xf]  ;;  %v8376_v53 = vor.u32 %v10658_v50, %v8375_v47 }
 0x218   :  { %v8042_v19 = vmul.f32 -1.442695, %v1766_v58  ;;  %v8043_v57 = vmul.f32 -1.442695, %v1767_v59  ;;  %v8046_v58 = vld [vmem:[%s17359_s0 + $0x40] sm:$0xff]  ;;  %v8047_v59 = vld [vmem:[%s17359_s0 + $0x48] sm:$0xff]  ;;  %v8380_v62 = vor.u32 %v10656_v42, %v8377_v54 }
 0x219   :  { %2627 = vmatpush.bf16.msra.mxu2 %v8400_v41  ;;  %v8351_v41 = vld [vmem:[%s17363_s4 + $0x48] sm:$0xf]  ;;  %v8353_v42 = vld [vmem:[%s17363_s4 + $0x58] sm:$0xf0] }
 0x21a   :  { %11241 = vpow2.f32 %v8042_v19  ;;  %v1739_v11 = vpop.f32.mrf.mxu2  ;;  %v1752_v12 = vpop.f32.mrf.mxu3  ;;  %v10652_v19 = vld [vmem:[%s17363_s4 + $0x64] sm:$0xf]  ;;  %2615 = vmatpush.bf16.msra.mxu1 %v8380_v62  ;;  %v8329_v62 = vld [vmem:[%s17363_s4 + $0x30] sm:$0xf0] }
 0x21b   :  { %11243 = vpow2.f32 %v8043_v57  ;;  %v1753_v21 = vadd.f32 %v1752_v12, %v13256_v18  ;;  %v1715_v61 = vpop.f32.mrf.mxu0  ;;  %v1728_v22 = vpop.f32.mrf.mxu1  ;;  %2638 = vmatpush.bf16.msra.mxu3 %v8436_v7  ;;  %v10662_v18 = vld [vmem:[%s17363_s4 + $0xac] sm:$0xf0]  ;;  %v1740_v55 = vadd.f32 %v1739_v11, %v13254_v6  ;;  %v10659_v6 = vld [vmem:[%s17363_s4 + $0x94] sm:$0xf0]  ;;  %v8388_v7 = vor.u32 %v10657_v15, %v8385_v44 }
 0x21c   :  { %v8392_v33 = vor.u32 %v10662_v18, %v8391_v30  ;;  %v8384_v26 = vor.u32 %v10659_v6, %v8383_v63  ;;  %v8364_v14 = vor.u32 %v10652_v19, %v8361_v8  ;;  %v10653_v61 = vld [vmem:[%s17363_s4 + $0x6c] sm:$0xf]  ;;  %v8369_v22 = vld [vmem:[%s17363_s4 + $0x78] sm:$0xf0]  ;;  %v8343_v30 = vld [vmem:[%s17363_s4 + $0x40] sm:$0xf] }
 0x21d   :  { %v1769_v32 = vadd.f32 %v1761_v39, %v1753_v21  ;;  %v10661_v39 = vld [vmem:[%s17363_s4 + $0xac] sm:$0xf]  ;;  %v1768_v57 = vadd.f32 %v1760_v35, %v1740_v55  ;;  %v8368_v21 = vor.u32 %v10655_v16, %v8367_v9  ;;  %v10646_v35 = vld [vmem:[%s17363_s4 + $0x2c] sm:$0xf0] }
 0x21e   :  { %v8404_v48 = vor.u32 %v10661_v39, %v8401_v43  ;;  %2601 = vmatpush.bf16.msra.mxu0 %v8392_v33  ;;  %2628 = vmatpush.bf16.msra.mxu2 %v8384_v26  ;;  %v10648_v33 = vld [vmem:[%s17363_s4 + $0x44] sm:$0xf]  ;;  %v10651_v39 = vld [vmem:[%s17363_s4 + $0x54] sm:$0xf0]  ;;  %v10649_v43 = vld [vmem:[%s17363_s4 + $0x4c] sm:$0xf] }
 0x21f   :  { %v8044_v45 = vmul.f32 -1.442695, %v1769_v32  ;;  %2639 = vmatpush.bf16.msra.mxu3 %v8420_v29  ;;  %v8372_v29 = vor.u32 %v10653_v61, %v8369_v22  ;;  %2616 = vmatpush.bf16.msra.mxu1 %v8364_v14  ;;  %v10650_v32 = vld [vmem:[%s17363_s4 + $0x4c] sm:$0xf0]  ;;  %v8352_v15 = vor.u32 %v10651_v39, %v8351_v41  ;;  %v8356_v44 = vor.u32 %v10649_v43, %v8353_v42  ;;  %v10645_v61 = vld [vmem:[%s17363_s4 + $0x2c] sm:$0xf] }
 0x220   :  { %v11242_v49 = vpop.eup %11241  ;;  %v8344_v55 = vor.u32 %v10650_v32, %v8343_v30  ;;  %v10643_v32 = vld [vmem:[%s17363_s4 + $0x14] sm:$0xf0] }
 0x221   :  { %v11244_v51 = vpop.eup %11243  ;;  %v13424_v52 = vadd.f32 1.0, %v11242_v49  ;;  %11245 = vpow2.f32 %v8044_v45 }
 0x222   :  { %v13429_v38 = vadd.f32 1.0, %v11244_v51  ;;  %v1741_v46 = vpop.f32.mrf.mxu2  ;;  %v1754_v56 = vpop.f32.mrf.mxu3  ;;  %2602 = vmatpush.bf16.msra.mxu0 %v8376_v53  ;;  %2629 = vmatpush.bf16.msra.mxu2 %v8368_v21  ;;  %v8327_v51 = vld [vmem:[%s17363_s4 + $0x20] sm:$0xf] }
 0x223   :  { %11247 = vrcp.f32 %v13424_v52  ;;  %2640 = vmatpush.bf16.msra.mxu3 %v8404_v48  ;;  %v1784_v23 = vand.u32 2147483647, %v13424_v52  ;;  %v1786_v60 = vand.u32 2147483648, %v13424_v52  ;;  %vm1780_vm5 = vweird.f32 %v13424_v52 }
 0x224   :  { %11249 = vrcp.f32 %v13429_v38  ;;  %v2047_v31 = vpop.f32.mrf.mxu0  ;;  %v2060_v1 = vpop.f32.mrf.mxu1  ;;  %v1803_v27 = vand.u32 2147483647, %v13429_v38  ;;  %vm1799_vm4 = vweird.f32 %v13429_v38  ;;  %v1805_v48 = vand.u32 2147483648, %v13429_v38 }
 0x225   :  { %v2090_v3 = vadd.f32 %v8046_v58, %v2047_v31  ;;  %v2091_v4 = vadd.f32 %v8047_v59, %v2060_v1  ;;  %vm13527_vm7 = vcmp.eq.f32.partialorder %v1784_v23, 8.507059e+37  ;;  %v8348_v58 = vor.u32 %v10648_v33, %v8345_v34  ;;  %v10644_v59 = vld [vmem:[%s17363_s4 + $0x24] sm:$0xf]  ;;  %v8335_v1 = vld [vmem:[%s17363_s4 + $0x28] sm:$0xf] }
 0x226   :  { %2603 = vmatpush.bf16.msra.mxu0 %v8360_v13  ;;  %v8328_v31 = vor.u32 %v10646_v35, %v8327_v51  ;;  %v8332_v19 = vor.u32 %v10644_v59, %v8329_v62  ;;  %v1787_v23 = vor.u32 1.1754944e-38, %v1786_v60  ;;  %2630 = vmatpush.bf16.msra.mxu2 %v8352_v15  ;;  %v8336_v8 = vor.u32 %v10647_v2, %v8335_v1  ;;  %v8311_v60 = vld [vmem:[%s17363_s4] sm:$0xf] }
 0x227   :  { %v11246_v10 = vpop.eup %11245  ;;  %v8178_v11 = vmul.f32 -1.442695, %v2090_v3  ;;  %v8179_v12 = vmul.f32 -1.442695, %v2091_v4  ;;  %2641 = vmatpush.bf16.msra.mxu3 %v8388_v7  ;;  %2617 = vmatpush.bf16.msra.mxu1 %v8348_v58  ;;  %vm1804_vm11 = vcmp.eq.f32.partialorder %v1803_v27, 8.507059e+37 }
 0x228   :  { %v13472_v17 = vadd.f32 1.0, %v11246_v10  ;;  %v1806_v10 = vor.u32 1.1754944e-38, %v1805_v48  ;;  %v10642_v27 = vld [vmem:[%s17363_s4 + $0xc] sm:$0xf0] }
 0x229   :  { %v13480_v24 = vpop.eup %11247  ;;  %11251 = vpow2.f32 %v8178_v11  ;;  %v8312_v39 = vor.u32 %v10642_v27, %v8311_v60  ;;  %v10733_v60 = vld [vmem:[%s17362_s3 + $0xec] sm:$0xf]  ;;  %v8569_v27 = vld [vmem:[%s17362_s3 + $0xf8] sm:$0xf0] }
 0x22a   :  { %v13490_v18 = vpop.eup %11249  ;;  %v1776_v0 = vmul.f32 %v13480_v24, %v13424_v52  ;;  %11253 = vrcp.f32 %v13472_v17  ;;  %vm1781_vm6 = vweird.f32 %v13480_v24  ;;  %2604 = vmatpush.bf16.msra.mxu0 %v8344_v55  ;;  %2631 = vmatpush.bf16.msra.mxu2 %v8336_v8  ;;  %vm1819_vm13 = vweird.f32 %v13472_v17  ;;  %v10726_v55 = vld [vmem:[%s17362_s3 + $0xac] sm:$0xf0] }
 0x22b   :  { %v1795_v36 = vmul.f32 %v13490_v18, %v13429_v38  ;;  %11255 = vtanh.f32 %v1768_v57  ;;  %v13508_v37 = vpop.f32.mrf.mxu2  ;;  %v2086_v40 = vpop.f32.mrf.mxu3  ;;  %2642 = vmatpush.bf16.msra.mxu3 %v8372_v29  ;;  %vm1800_vm8 = vweird.f32 %v13490_v18  ;;  %vm1782_vm9 = vmor %vm1780_vm5, %vm1781_vm6  ;;  %v8337_v38 = vld [vmem:[%s17363_s4 + $0x38] sm:$0xf0]  ;;  %2618 = vmatpush.bf16.msra.mxu1 %v8332_v19 }
 0x22c   :  { %v1777_v45 = vsub.f32 1.0, %v1776_v0  ;;  %11257 = vpow2.f32 %v8179_v12  ;;  %v2093_v49 = vadd.f32 %v8049_v28, %v2086_v40  ;;  %v2049_v47 = vpop.f32.mrf.mxu0  ;;  %v2062_v50 = vpop.f32.mrf.mxu1  ;;  %vm1801_vm10 = vmor %vm1799_vm4, %vm1800_vm8  ;;  %v10640_v28 = vld [vmem:[%s17363_s4 + $0x4] sm:$0xf]  ;;  %v8319_v0 = vld [vmem:[%s17363_s4 + $0x8] sm:$0xf]  ;;  %v8340_v34 = vor.u32 %v10645_v61, %v8337_v38 }
 0x22d   :  { %v1796_v53 = vsub.f32 1.0, %v1795_v36  ;;  %v1825_v40 = vand.u32 2147483648, %v13472_v17  ;;  %v10641_v47 = vld [vmem:[%s17363_s4 + $0xc] sm:$0xf]  ;;  %v8321_v50 = vld [vmem:[%s17363_s4 + $0x18] sm:$0xf0] }
 0x22e   :  { %v1778_v46 = vmul.f32 %v13480_v24, %v1777_v45  ;;  %v8180_v56 = vmul.f32 -1.442695, %v2093_v49  ;;  %2605 = vmatpush.bf16.msra.mxu0 %v8328_v31  ;;  %v8320_v49 = vor.u32 %v10643_v32, %v8319_v0  ;;  %v10732_v61 = vld [vmem:[%s17362_s3 + $0xe4] sm:$0xf]  ;;  %v8561_v38 = vld [vmem:[%s17362_s3 + $0xf0] sm:$0xf0] }
 0x22f   :  { %v11252_v63 = vpop.eup %11251  ;;  %v1797_v6 = vmul.f32 %v13490_v18, %v1796_v53  ;;  %2643 = vmatpush.bf16.msra.mxu3 %v8356_v44  ;;  %v1823_v53 = vand.u32 2147483647, %v13472_v17 }
 0x230   :  { %v13549_v3 = vpop.eup %11253  ;;  %v1779_v4 = vadd.f32 %v13480_v24, %v1778_v46  ;;  %v13552_v5 = vadd.f32 1.0, %v11252_v63  ;;  %11259 = vpow2.f32 %v8180_v56  ;;  %2632 = vmatpush.bf16.msra.mxu2 %v8320_v49 }
 0x231   :  { %v11256_v57 = vpop.eup %11255  ;;  %v1798_v26 = vadd.f32 %v13490_v18, %v1797_v6  ;;  %v1815_v7 = vmul.f32 %v13549_v3, %v13472_v17  ;;  %vm1820_vm12 = vweird.f32 %v13549_v3  ;;  %v1826_v17 = vor.u32 1.1754944e-38, %v1825_v40 }
 0x232   :  { %v11258_v9 = vpop.eup %11257  ;;  %v1783_v11 = vsel %vm1782_vm9, %v13480_v24, %v1779_v4  ;;  %11261 = vrcp.f32 %v13552_v5  ;;  %2606 = vmatpush.bf16.msra.mxu0 %v8312_v39  ;;  %vm13625_vm14 = vmor %vm1819_vm13, %vm1820_vm12  ;;  %v2110_v46 = vand.u32 2147483648, %v13552_v5  ;;  %v2108_v62 = vand.u32 2147483647, %v13552_v5 }
 0x233   :  { %v1788_v52 = vsel %vm13527_vm7, %v1787_v23, %v1783_v11  ;;  %v1802_v12 = vsel %vm1801_vm10, %v13490_v18, %v1798_v26  ;;  %v1816_v13 = vsub.f32 1.0, %v1815_v7  ;;  %v13572_v14 = vadd.f32 1.0, %v11258_v9  ;;  %v2075_v16 = vpop.f32.mrf.mxu2  ;;  %v2088_v21 = vpop.f32.mrf.mxu3  ;;  %v8313_v18 = vld [vmem:[%s17363_s4 + $0x10] sm:$0xf0]  ;;  %2644 = vmatpush.bf16.msra.mxu3 %v8340_v34  ;;  %v8551_v34 = vld [vmem:[%s17362_s3 + $0xc8] sm:$0xf] }
 0x234   :  { %v1807_v22 = vsel %vm1804_vm11, %v1806_v10, %v1802_v12  ;;  %v1830_v24 = vmul.f32 %v11256_v57, %v1788_v52  ;;  %v8316_v48 = vor.u32 %v10640_v28, %v8313_v18  ;;  %vm1824_vm0 = vcmp.eq.f32.partialorder %v1823_v53, 8.507059e+37  ;;  %v10734_v21 = vld [vmem:[%s17362_s3 + $0xec] sm:$0xf0]  ;;  %v8543_v28 = vld [vmem:[%s17362_s3 + $0xc0] sm:$0xf] }
 0x235   :  { %v1829_v29 = vmul.f32 %v1807_v22, %v12890_v20  ;;  %v1817_v30 = vmul.f32 %v13549_v3, %v1816_v13  ;;  %11263 = vrcp.f32 %v13572_v14  ;;  %v8048_v20 = vld [vmem:[%s17359_s0 + $0x50] sm:$0xff]  ;;  %vm2104_vm1 = vweird.f32 %v13552_v5 }
 0x236   :  { %v11260_v33 = vpop.eup %11259  ;;  %v2092_v51 = vadd.f32 %v8048_v20, %v13508_v37  ;;  %2619 = vmatpush.bf16.msra.mxu1 %v8316_v48  ;;  %v8324_v37 = vor.u32 %v10641_v47, %v8321_v50  ;;  %v2129_v44 = vand.u32 2147483648, %v13572_v14  ;;  %v2111_v1 = vor.u32 1.1754944e-38, %v2110_v46  ;;  %v8545_v20 = vld [vmem:[%s17362_s3 + $0xd0] sm:$0xf0]  ;;  %v10731_v48 = vld [vmem:[%s17362_s3 + $0xd4] sm:$0xf0] }
 0x237   :  { %v13604_v36 = vadd.f32 %v1830_v24, %v1829_v29  ;;  %v13607_v41 = vadd.f32 1.0, %v11260_v33  ;;  %v1818_v45 = vadd.f32 %v13549_v3, %v1817_v30  ;;  %v2127_v19 = vand.u32 2147483647, %v13572_v14  ;;  %v10735_v24 = vld [vmem:[%s17362_s3 + $0xf4] sm:$0xf0] }
 0x238   :  { %v11262_v43 = vpop.eup %11261  ;;  %2645 = vmatpush.bf16.msra.mxu3 %v8324_v37  ;;  %vm2109_vm4 = vcmp.eq.f32.partialorder %v2108_v62, 8.507059e+37  ;;  %vm2123_vm5 = vweird.f32 %v13572_v14  ;;  %v2130_v9 = vor.u32 1.1754944e-38, %v2129_v44  ;;  %v10730_v29 = vld [vmem:[%s17362_s3 + $0xcc] sm:$0xf0]  ;;  %v10728_v30 = vld [vmem:[%s17362_s3 + $0xc4] sm:$0xf]  ;;  %v8564_v33 = vor.u32 %v10732_v61, %v8561_v38 }
 0x239   :  { %11265 = vtanh.f32 %v13604_v36  ;;  %v2100_v42 = vmul.f32 %v11262_v43, %v13552_v5  ;;  %v1822_v56 = vsel %vm13625_vm14, %v13549_v3, %v1818_v45  ;;  %vm2105_vm15 = vweird.f32 %v11262_v43  ;;  %v10729_v47 = vld [vmem:[%s17362_s3 + $0xcc] sm:$0xf]  ;;  %v8527_v50 = vld [vmem:[%s17362_s3 + $0xa0] sm:$0xf]  ;;  %v10719_v61 = vld [vmem:[%s17362_s3 + $0x74] sm:$0xf0] }
 0x23a   :  { %11267 = vrcp.f32 %v13607_v41  ;;  %v1827_v15 = vsel %vm1824_vm0, %v1826_v17, %v1822_v56  ;;  %vm2106_vm3 = vmor %vm2104_vm1, %vm2105_vm15  ;;  %vm2128_vm7 = vcmp.eq.f32.partialorder %v2127_v19, 8.507059e+37  ;;  %v2149_v0 = vand.u32 2147483648, %v13607_v41  ;;  %v8529_v56 = vld [vmem:[%s17362_s3 + $0xb0] sm:$0xf0]  ;;  %v8535_v17 = vld [vmem:[%s17362_s3 + $0xa8] sm:$0xf] }
 0x23b   :  { %v11264_v54 = vpop.eup %11263  ;;  %v2101_v35 = vsub.f32 1.0, %v2100_v42  ;;  %11269 = vtanh.f32 %v2092_v51  ;;  %vm2143_vm9 = vweird.f32 %v13607_v41  ;;  %v2147_v40 = vand.u32 2147483647, %v13607_v41  ;;  %v10725_v62 = vld [vmem:[%s17362_s3 + $0xac] sm:$0xf] }
 0x23c   :  { %v2119_v58 = vmul.f32 %v11264_v54, %v13572_v14  ;;  %vm2124_vm2 = vweird.f32 %v11264_v54  ;;  %v8559_v14 = vld [vmem:[%s17362_s3 + $0xe0] sm:$0xf]  ;;  %v8572_v45 = vor.u32 %v10733_v60, %v8569_v27  ;;  %v2150_v51 = vor.u32 1.1754944e-38, %v2149_v0  ;;  %v10720_v19 = vld [vmem:[%s17362_s3 + $0x84] sm:$0xf] }
 0x23d   :  { %v2102_v59 = vmul.f32 %v11262_v43, %v2101_v35  ;;  %vm2125_vm6 = vmor %vm2123_vm5, %vm2124_vm2  ;;  %v8560_v32 = vor.u32 %v10734_v21, %v8559_v14  ;;  %v8544_v53 = vor.u32 %v10730_v29, %v8543_v28  ;;  %v10724_v35 = vld [vmem:[%s17362_s3 + $0xa4] sm:$0xf]  ;;  %v8552_v46 = vor.u32 %v10731_v48, %v8551_v34  ;;  %v8497_v14 = vld [vmem:[%s17362_s3 + $0x70] sm:$0xf0] }
 0x23e   :  { %v2120_v63 = vsub.f32 1.0, %v2119_v58  ;;  %vm2148_vm11 = vcmp.eq.f32.partialorder %v2147_v40, 8.507059e+37  ;;  %v8528_v44 = vor.u32 %v10726_v55, %v8527_v50  ;;  %v8503_v21 = vld [vmem:[%s17362_s3 + $0x68] sm:$0xf]  ;;  %v10717_v38 = vld [vmem:[%s17362_s3 + $0x6c] sm:$0xf] }
 0x23f   :  { %v11266_v6 = vpop.eup %11265  ;;  %v2103_v31 = vadd.f32 %v11262_v43, %v2102_v59  ;;  %v10727_v59 = vld [vmem:[%s17362_s3 + $0xb4] sm:$0xf0]  ;;  %v8479_v27 = vld [vmem:[%s17362_s3 + $0x40] sm:$0xf]  ;;  %v10714_v28 = vld [vmem:[%s17362_s3 + $0x4c] sm:$0xf0]  ;;  %v8504_v29 = vor.u32 %v10719_v61, %v8503_v21 }
 0x240   :  { %v13637_v2 = vpop.eup %11267  ;;  %v1833_v3 = vmul.f32 %v11266_v6, %v1827_v15  ;;  %v2121_v4 = vmul.f32 %v11264_v54, %v2120_v63  ;;  %v8537_v63 = vld [vmem:[%s17362_s3 + $0xb8] sm:$0xf0]  ;;  %v8481_v0 = vld [vmem:[%s17362_s3 + $0x50] sm:$0xf0]  ;;  %v8480_v40 = vor.u32 %v10714_v28, %v8479_v27  ;;  %v8471_v50 = vld [vmem:[%s17362_s3 + $0x28] sm:$0xf] }
 0x241   :  { %v2107_v57 = vsel %vm2106_vm3, %v11262_v43, %v2103_v31  ;;  %v2139_v5 = vmul.f32 %v13637_v2, %v13607_v41  ;;  %v11270_v8 = vpop.eup %11269  ;;  %vm2144_vm8 = vweird.f32 %v13637_v2  ;;  %v8553_v41 = vld [vmem:[%s17362_s3 + $0xd8] sm:$0xf0]  ;;  %v8532_v31 = vor.u32 %v10724_v35, %v8529_v56  ;;  %v8447_v35 = vld [vmem:[%s17362_s3] sm:$0xf]  ;;  %v8682_v21 = vld [vmem:[%s17364_s5 + $0xc8] sm:$0xf] }
 0x242   :  { %v1836_v23 = vpack.c.bf16 %v1833_v3, %v1833_v3  ;;  %v2112_v26 = vsel %vm2109_vm4, %v2111_v1, %v2107_v57  ;;  %v2122_v7 = vadd.f32 %v11264_v54, %v2121_v4  ;;  %vm13701_vm10 = vmor %vm2143_vm9, %vm2144_vm8  ;;  %v8556_v37 = vor.u32 %v10729_v47, %v8553_v41  ;;  %v8511_v1 = vld [vmem:[%s17362_s3 + $0x80] sm:$0xf]  ;;  %v8513_v57 = vld [vmem:[%s17362_s3 + $0x90] sm:$0xf0] }
 0x243   :  { %v2140_v10 = vsub.f32 1.0, %v2139_v5  ;;  %v2154_v52 = vmul.f32 %v11270_v8, %v2112_v26  ;;  %v8536_v3 = vor.u32 %v10727_v59, %v8535_v17  ;;  %v8540_v4 = vor.u32 %v10725_v62, %v8537_v63  ;;  %v8519_v5 = vld [vmem:[%s17362_s3 + $0x88] sm:$0xf]  ;;  %v10723_v26 = vld [vmem:[%s17362_s3 + $0x94] sm:$0xf0] }
 0x244   :  { %1837 = vst [vmem:[#allocation4 + $0x4] sm:$0xf] %v1836_v23  ;;  %v2126_v11 = vsel %vm2125_vm6, %v11264_v54, %v2122_v7  ;;  %v8548_v54 = vor.u32 %v10728_v30, %v8545_v20  ;;  %v10721_v7 = vld [vmem:[%s17362_s3 + $0x8c] sm:$0xf]  ;;  %v8521_v8 = vld [vmem:[%s17362_s3 + $0x98] sm:$0xf0] }
 0x245   :  { %8045 = vst [vmem:[%s17366_s7 + $0x4] sm:$0xf] %v1836_v23  ;;  %v2131_v12 = vsel %vm2128_vm7, %v2130_v9, %v2126_v11  ;;  %v2141_v13 = vmul.f32 %v13637_v2, %v2140_v10  ;;  %v8516_v10 = vor.u32 %v10720_v19, %v8513_v57  ;;  %v8495_v11 = vld [vmem:[%s17362_s3 + $0x60] sm:$0xf]  ;;  %v10713_v20 = vld [vmem:[%s17362_s3 + $0x4c] sm:$0xf] }
 0x246   :  { %v2153_v16 = vmul.f32 %v2131_v12, %v12936_v25  ;;  %v8567_v25 = vld [vmem:[%s17362_s3 + $0xe8] sm:$0xf]  ;;  %v8520_v12 = vor.u32 %v10723_v26, %v8519_v5  ;;  %v8489_v34 = vld [vmem:[%s17362_s3 + $0x58] sm:$0xf0]  ;;  %v10708_v47 = vld [vmem:[%s17362_s3 + $0x24] sm:$0xf] }
 0x247   :  { %v2142_v18 = vadd.f32 %v13637_v2, %v2141_v13  ;;  %v8568_v43 = vor.u32 %v10735_v24, %v8567_v25  ;;  %v8524_v13 = vor.u32 %v10721_v7, %v8521_v8  ;;  %v8505_v25 = vld [vmem:[%s17362_s3 + $0x78] sm:$0xf0]  ;;  %v8492_v49 = vor.u32 %v10713_v20, %v8489_v34  ;;  %v8465_v41 = vld [vmem:[%s17362_s3 + $0x30] sm:$0xf0]  ;;  %v10704_v17 = vld [vmem:[%s17362_s3 + $0x4] sm:$0xf] }
 0x248   :  { %v13664_v22 = vadd.f32 %v2154_v52, %v2153_v16  ;;  %v10718_v52 = vld [vmem:[%s17362_s3 + $0x6c] sm:$0xf0]  ;;  %v10716_v16 = vld [vmem:[%s17362_s3 + $0x64] sm:$0xf]  ;;  %v8508_v30 = vor.u32 %v10717_v38, %v8505_v25  ;;  %v8468_v55 = vor.u32 %v10708_v47, %v8465_v41  ;;  %v8455_v59 = vld [vmem:[%s17362_s3 + $0x8] sm:$0xf] }
 0x249   :  { %v2146_v42 = vsel %vm13701_vm10, %v13637_v2, %v2142_v18  ;;  %v10722_v2 = vld [vmem:[%s17362_s3 + $0x8c] sm:$0xf0]  ;;  %v8496_v24 = vor.u32 %v10718_v52, %v8495_v11  ;;  %v8500_v60 = vor.u32 %v10716_v16, %v8497_v14  ;;  %v10712_v18 = vld [vmem:[%s17362_s3 + $0x44] sm:$0xf]  ;;  %v10707_v62 = vld [vmem:[%s17362_s3 + $0x14] sm:$0xf0] }
 0x24a   :  { %11271 = vtanh.f32 %v13664_v22  ;;  %v2151_v6 = vsel %vm2148_vm11, %v2150_v51, %v2146_v42  ;;  %v8512_v9 = vor.u32 %v10722_v2, %v8511_v1  ;;  %v10711_v42 = vld [vmem:[%s17362_s3 + $0x34] sm:$0xf0]  ;;  %v10709_v51 = vld [vmem:[%s17362_s3 + $0x2c] sm:$0xf]  ;;  %v10796_v19 = vld [vmem:[%s17364_s5 + $0xe4] sm:$0xf] }
 0x24b   :  { %v2194_v39 = vld [vmem:[#allocation4 + $0x4] sm:$0xf]  ;;  %v10705_v63 = vld [vmem:[%s17362_s3 + $0xc] sm:$0xf]  ;;  %v8692_v5 = vld [vmem:[%s17364_s5 + $0xf0] sm:$0xf0] }
 0x24c   :  { %2395 = vmatmul.bf16.vlgmr.msrb.gmra.mxu0 %v2194_v39  ;;  %2408 = vmatmul.bf16.vlgmr.msrb.gmra.mxu1 %v2194_v39  ;;  %v10799_v26 = vld [vmem:[%s17364_s5 + $0xf4] sm:$0xf0]  ;;  %v8695_v7 = vor.u32 %v10796_v19, %v8692_v5  ;;  %v8674_v52 = vld [vmem:[%s17364_s5 + $0xc0] sm:$0xf]  ;;  %v8676_v14 = vld [vmem:[%s17364_s5 + $0xd0] sm:$0xf0] }
 0x24d   :  { %2421 = vmatmul.bf16.vlgmr.msrb.gmra.mxu2 %v2194_v39  ;;  %2434 = vmatmul.bf16.vlgmr.msrb.gmra.mxu3 %v2194_v39  ;;  %v8484_v39 = vor.u32 %v10712_v18, %v8481_v0  ;;  %v10795_v38 = vld [vmem:[%s17364_s5 + $0xd4] sm:$0xf0]  ;;  %v10793_v25 = vld [vmem:[%s17364_s5 + $0xcc] sm:$0xf]  ;;  %v8658_v28 = vld [vmem:[%s17364_s5 + $0xa0] sm:$0xf] }
 0x24e   :  { %2933 = vmatpush.bf16.msrb.mxu0 %v8560_v32  ;;  %2946 = vmatpush.bf16.msrb.mxu1 %v8564_v33  ;;  %v8487_v32 = vld [vmem:[%s17362_s3 + $0x48] sm:$0xf]  ;;  %v10715_v33 = vld [vmem:[%s17362_s3 + $0x54] sm:$0xf0]  ;;  %v8660_v0 = vld [vmem:[%s17364_s5 + $0xb0] sm:$0xf0] }
 0x24f   :  { %2959 = vmatpush.bf16.msrb.mxu2 %v8568_v43  ;;  %2972 = vmatpush.bf16.msrb.mxu3 %v8572_v45  ;;  %v8463_v43 = vld [vmem:[%s17362_s3 + $0x20] sm:$0xf]  ;;  %v10710_v45 = vld [vmem:[%s17362_s3 + $0x2c] sm:$0xf0]  ;;  %v8488_v48 = vor.u32 %v10715_v33, %v8487_v32  ;;  %v8666_v32 = vld [vmem:[%s17364_s5 + $0xa8] sm:$0xf] }
 0x250   :  { %v11272_v58 = vpop.eup %11271  ;;  %v10791_v33 = vld [vmem:[%s17364_s5 + $0xb4] sm:$0xf0]  ;;  %v10786_v47 = vld [vmem:[%s17364_s5 + $0x8c] sm:$0xf0]  ;;  %v10784_v41 = vld [vmem:[%s17364_s5 + $0x84] sm:$0xf] }
 0x251   :  { %v2157_v15 = vmul.f32 %v11272_v58, %v2151_v6  ;;  %v8449_v58 = vld [vmem:[%s17362_s3 + $0x10] sm:$0xf0]  ;;  %v8457_v6 = vld [vmem:[%s17362_s3 + $0x18] sm:$0xf0]  ;;  %v8667_v34 = vor.u32 %v10791_v33, %v8666_v32  ;;  %v8610_v5 = vld [vmem:[%s17364_s5 + $0x40] sm:$0xf] }
 0x252   :  { %2934 = vmatpush.bf16.msrb.mxu0 %v8544_v53  ;;  %2947 = vmatpush.bf16.msrb.mxu1 %v8548_v54  ;;  %v8473_v53 = vld [vmem:[%s17362_s3 + $0x38] sm:$0xf0]  ;;  %v8464_v54 = vor.u32 %v10710_v45, %v8463_v43  ;;  %v8460_v1 = vor.u32 %v10705_v63, %v8457_v6  ;;  %v8634_v63 = vld [vmem:[%s17364_s5 + $0x68] sm:$0xf]  ;;  %v10783_v6 = vld [vmem:[%s17364_s5 + $0x74] sm:$0xf0] }
 0x253   :  { %2960 = vmatpush.bf16.msrb.mxu2 %v8552_v46  ;;  %2973 = vmatpush.bf16.msrb.mxu3 %v8556_v37  ;;  %v2160_v23 = vpack.c.bf16 %v2157_v15, %v2157_v15  ;;  %v10706_v46 = vld [vmem:[%s17362_s3 + $0xc] sm:$0xf0]  ;;  %v8472_v37 = vor.u32 %v10711_v42, %v8471_v50  ;;  %v8476_v56 = vor.u32 %v10709_v51, %v8473_v53  ;;  %v8644_v42 = vld [vmem:[%s17364_s5 + $0x90] sm:$0xf0]  ;;  %v8650_v51 = vld [vmem:[%s17364_s5 + $0x88] sm:$0xf] }
 0x254   :  { %v8448_v15 = vor.u32 %v10706_v46, %v8447_v35  ;;  %v10787_v53 = vld [vmem:[%s17364_s5 + $0x94] sm:$0xf0]  ;;  %v10785_v35 = vld [vmem:[%s17364_s5 + $0x8c] sm:$0xf]  ;;  %v8652_v46 = vld [vmem:[%s17364_s5 + $0x98] sm:$0xf0] }
 0x255   :  { %2161 = vst [vmem:[#allocation4] sm:$0xf] %v2160_v23  ;;  %v10773_v33 = vld [vmem:[%s17364_s5 + $0x2c] sm:$0xf] }
 0x256   :  { %2935 = vmatpush.bf16.msrb.mxu0 %v8528_v44  ;;  %2948 = vmatpush.bf16.msrb.mxu1 %v8532_v31  ;;  %v8452_v44 = vor.u32 %v10704_v17, %v8449_v58  ;;  %v8456_v31 = vor.u32 %v10707_v62, %v8455_v59  ;;  %v10782_v17 = vld [vmem:[%s17364_s5 + $0x6c] sm:$0xf0]  ;;  %v10780_v58 = vld [vmem:[%s17364_s5 + $0x64] sm:$0xf]  ;;  %v8628_v62 = vld [vmem:[%s17364_s5 + $0x70] sm:$0xf0] }
 0x257   :  { %2961 = vmatpush.bf16.msrb.mxu2 %v8536_v3  ;;  %2974 = vmatpush.bf16.msrb.mxu3 %v8540_v4  ;;  %v8690_v3 = vld [vmem:[%s17364_s5 + $0xe0] sm:$0xf]  ;;  %v10798_v4 = vld [vmem:[%s17364_s5 + $0xec] sm:$0xf0] }
 0x258   :  { %v8691_v57 = vor.u32 %v10798_v4, %v8690_v3  ;;  %v8636_v3 = vld [vmem:[%s17364_s5 + $0x78] sm:$0xf0] }
 0x25a   :  { %2936 = vmatpush.bf16.msrb.mxu0 %v8512_v9  ;;  %2949 = vmatpush.bf16.msrb.mxu1 %v8516_v10  ;;  %v10797_v9 = vld [vmem:[%s17364_s5 + $0xec] sm:$0xf]  ;;  %v8700_v10 = vld [vmem:[%s17364_s5 + $0xf8] sm:$0xf0] }
 0x25b   :  { %2962 = vmatpush.bf16.msrb.mxu2 %v8520_v12  ;;  %2975 = vmatpush.bf16.msrb.mxu3 %v8524_v13  ;;  %v8703_v11 = vor.u32 %v10797_v9, %v8700_v10  ;;  %v10794_v12 = vld [vmem:[%s17364_s5 + $0xcc] sm:$0xf0]  ;;  %v10792_v13 = vld [vmem:[%s17364_s5 + $0xc4] sm:$0xf]  ;;  %v8618_v10 = vld [vmem:[%s17364_s5 + $0x48] sm:$0xf] }
 0x25c   :  { %2607 = vmatmul.bf16.vlgmr.msra.gmra.mxu0 %v2160_v23  ;;  %2620 = vmatmul.bf16.vlgmr.msra.gmra.mxu1 %v2160_v23  ;;  %v2740_v2 = vld [vmem:[#allocation4] sm:$0xf]  ;;  %v8675_v16 = vor.u32 %v10794_v12, %v8674_v52  ;;  %v8679_v61 = vor.u32 %v10792_v13, %v8676_v14  ;;  %v10777_v52 = vld [vmem:[%s17364_s5 + $0x4c] sm:$0xf] }
 0x25d   :  { %2633 = vmatmul.bf16.vlgmr.msra.gmra.mxu2 %v2160_v23  ;;  %2646 = vmatmul.bf16.vlgmr.msra.gmra.mxu3 %v2160_v23  ;;  %v8698_v23 = vld [vmem:[%s17364_s5 + $0xe8] sm:$0xf]  ;;  %v14010_v12 = vld [vmem:[%s17365_s6] sm:$0xf] }
 0x25e   :  { %2937 = vmatpush.bf16.msrb.mxu0 %v8496_v24  ;;  %2950 = vmatpush.bf16.msrb.mxu1 %v8500_v60  ;;  %v8699_v8 = vor.u32 %v10799_v26, %v8698_v23  ;;  %v8684_v24 = vld [vmem:[%s17364_s5 + $0xd8] sm:$0xf0]  ;;  %v8683_v60 = vor.u32 %v10795_v38, %v8682_v21  ;;  %v10778_v23 = vld [vmem:[%s17364_s5 + $0x4c] sm:$0xf0]  ;;  %v10776_v26 = vld [vmem:[%s17364_s5 + $0x44] sm:$0xf] }
 0x25f   :  { %2963 = vmatpush.bf16.msrb.mxu2 %v8504_v29  ;;  %2976 = vmatpush.bf16.msrb.mxu3 %v8508_v30  ;;  %v8687_v27 = vor.u32 %v10793_v25, %v8684_v24  ;;  %v10790_v29 = vld [vmem:[%s17364_s5 + $0xac] sm:$0xf0]  ;;  %v10788_v30 = vld [vmem:[%s17364_s5 + $0xa4] sm:$0xf]  ;;  %v8594_v21 = vld [vmem:[%s17364_s5 + $0x20] sm:$0xf] }
 0x260   :  { %v8659_v18 = vor.u32 %v10790_v29, %v8658_v28  ;;  %v8663_v20 = vor.u32 %v10788_v30, %v8660_v0  ;;  %v10772_v38 = vld [vmem:[%s17364_s5 + $0x24] sm:$0xf]  ;;  %v8596_v24 = vld [vmem:[%s17364_s5 + $0x30] sm:$0xf0]  ;;  %v2653_v30 = vperm.slane %v14010_v12, 0 }
 0x261   :  { %v8599_v0 = vor.u32 %v10772_v38, %v8596_v24  ;;  %v8812_v24 = vld [vmem:[%s17363_s4 + $0xd8] sm:$0xf0] }
 0x262   :  { %2938 = vmatpush.bf16.msrb.mxu0 %v8480_v40  ;;  %2951 = vmatpush.bf16.msrb.mxu1 %v8484_v39  ;;  %v10789_v40 = vld [vmem:[%s17364_s5 + $0xac] sm:$0xf]  ;;  %v8668_v39 = vld [vmem:[%s17364_s5 + $0xb8] sm:$0xf0] }
 0x263   :  { %2964 = vmatpush.bf16.msrb.mxu2 %v8488_v48  ;;  %2977 = vmatpush.bf16.msrb.mxu3 %v8492_v49  ;;  %v8671_v48 = vor.u32 %v10789_v40, %v8668_v39  ;;  %v8642_v49 = vld [vmem:[%s17364_s5 + $0x80] sm:$0xf]  ;;  %v2656_v40 = vperm.slane %v14010_v12, 3  ;;  %v8604_v39 = vld [vmem:[%s17364_s5 + $0x38] sm:$0xf0] }
 0x264   :  { %v8643_v50 = vor.u32 %v10786_v47, %v8642_v49  ;;  %v8607_v47 = vor.u32 %v10773_v33, %v8604_v39  ;;  %v10759_v33 = vld [vmem:[%s17363_s4 + $0xb4] sm:$0xf0]  ;;  %v8796_v39 = vld [vmem:[%s17363_s4 + $0xb8] sm:$0xf0] }
 0x266   :  { %2939 = vmatpush.bf16.msrb.mxu0 %v8464_v54  ;;  %2952 = vmatpush.bf16.msrb.mxu1 %v8468_v55  ;;  %v8647_v54 = vor.u32 %v10784_v41, %v8644_v42  ;;  %v8651_v55 = vor.u32 %v10787_v53, %v8650_v51  ;;  %v8578_v41 = vld [vmem:[%s17364_s5] sm:$0xf]  ;;  %v10768_v42 = vld [vmem:[%s17364_s5 + $0x4] sm:$0xf]  ;;  %v10771_v53 = vld [vmem:[%s17364_s5 + $0x14] sm:$0xf0] }
 0x267   :  { %2965 = vmatpush.bf16.msrb.mxu2 %v8472_v37  ;;  %2978 = vmatpush.bf16.msrb.mxu3 %v8476_v56  ;;  %v8655_v37 = vor.u32 %v10785_v35, %v8652_v46  ;;  %v8626_v56 = vld [vmem:[%s17364_s5 + $0x60] sm:$0xf] }
 0x268   :  { %v8627_v59 = vor.u32 %v10782_v17, %v8626_v56  ;;  %v8588_v56 = vld [vmem:[%s17364_s5 + $0x18] sm:$0xf0]  ;;  %v8818_v17 = vld [vmem:[%s17363_s4 + $0xe0] sm:$0xf] }
 0x26a   :  { %2940 = vmatpush.bf16.msrb.mxu0 %v8448_v15  ;;  %2953 = vmatpush.bf16.msrb.mxu1 %v8452_v44 }
 0x26b   :  { %2966 = vmatpush.bf16.msrb.mxu2 %v8456_v31  ;;  %2979 = vmatpush.bf16.msrb.mxu3 %v8460_v1  ;;  %v8631_v31 = vor.u32 %v10780_v58, %v8628_v62  ;;  %v8635_v1 = vor.u32 %v10783_v6, %v8634_v63  ;;  %v10764_v62 = vld [vmem:[%s17363_s4 + $0xe4] sm:$0xf]  ;;  %v8820_v63 = vld [vmem:[%s17363_s4 + $0xf0] sm:$0xf0] }
 0x26d   :  { %2941 = vmatmul.bf16.vlgmr.msrb.gmra.mxu0 %v2740_v2  ;;  %2954 = vmatmul.bf16.vlgmr.msrb.gmra.mxu1 %v2740_v2 }
 0x26e   :  { %2967 = vmatmul.bf16.vlgmr.msrb.gmra.mxu2 %v2740_v2  ;;  %2980 = vmatmul.bf16.vlgmr.msrb.gmra.mxu3 %v2740_v2  ;;  %v10781_v2 = vld [vmem:[%s17364_s5 + $0x6c] sm:$0xf] }
 0x26f   :  { %3282 = vmatpush.bf16.msra.mxu0 %v8691_v57  ;;  %3295 = vmatpush.bf16.msra.mxu1 %v8695_v7  ;;  %v8639_v57 = vor.u32 %v10781_v2, %v8636_v3  ;;  %v8612_v7 = vld [vmem:[%s17364_s5 + $0x50] sm:$0xf0]  ;;  %v8823_v2 = vor.u32 %v10764_v62, %v8820_v63  ;;  %v8826_v3 = vld [vmem:[%s17363_s4 + $0xe8] sm:$0xf] }
 0x270   :  { %3308 = vmatpush.bf16.msra.mxu2 %v8699_v8  ;;  %3321 = vmatpush.bf16.msra.mxu3 %v8703_v11  ;;  %v8611_v8 = vor.u32 %v10778_v23, %v8610_v5  ;;  %v8615_v9 = vor.u32 %v10776_v26, %v8612_v7  ;;  %v10779_v11 = vld [vmem:[%s17364_s5 + $0x54] sm:$0xf0] }
 0x271   :  { %v8619_v13 = vor.u32 %v10779_v11, %v8618_v10  ;;  %v10760_v10 = vld [vmem:[%s17363_s4 + $0xc4] sm:$0xf] }
 0x273   :  { %3283 = vmatpush.bf16.msra.mxu0 %v8675_v16  ;;  %3296 = vmatpush.bf16.msra.mxu1 %v8679_v61  ;;  %v8620_v16 = vld [vmem:[%s17364_s5 + $0x58] sm:$0xf0]  ;;  %v10774_v61 = vld [vmem:[%s17364_s5 + $0x2c] sm:$0xf0] }
 0x274   :  { %3309 = vmatpush.bf16.msra.mxu2 %v8683_v60  ;;  %3322 = vmatpush.bf16.msra.mxu3 %v8687_v27  ;;  %v8623_v14 = vor.u32 %v10777_v52, %v8620_v16  ;;  %v8595_v25 = vor.u32 %v10774_v61, %v8594_v21  ;;  %v8602_v60 = vld [vmem:[%s17364_s5 + $0x28] sm:$0xf]  ;;  %v10775_v27 = vld [vmem:[%s17364_s5 + $0x34] sm:$0xf0] }
 0x275   :  { %v8603_v32 = vor.u32 %v10775_v27, %v8602_v60  ;;  %v8810_v21 = vld [vmem:[%s17363_s4 + $0xc8] sm:$0xf]  ;;  %v10763_v61 = vld [vmem:[%s17363_s4 + $0xd4] sm:$0xf0] }
 0x277   :  { %3284 = vmatpush.bf16.msra.mxu0 %v8659_v18  ;;  %3297 = vmatpush.bf16.msra.mxu1 %v8663_v20  ;;  %v2654_v18 = vperm.slane %v14010_v12, 1 }
 0x278   :  { %3310 = vmatpush.bf16.msra.mxu2 %v8667_v34  ;;  %3323 = vmatpush.bf16.msra.mxu3 %v8671_v48 }
 0x27b   :  { %3285 = vmatpush.bf16.msra.mxu0 %v8643_v50  ;;  %3298 = vmatpush.bf16.msra.mxu1 %v8647_v54  ;;  %v10770_v50 = vld [vmem:[%s17364_s5 + $0xc] sm:$0xf0] }
 0x27c   :  { %3311 = vmatpush.bf16.msra.mxu2 %v8651_v55  ;;  %3324 = vmatpush.bf16.msra.mxu3 %v8655_v37  ;;  %v8579_v51 = vor.u32 %v10770_v50, %v8578_v41  ;;  %v10769_v37 = vld [vmem:[%s17364_s5 + $0xc] sm:$0xf] }
 0x27d   :  { %v8591_v58 = vor.u32 %v10769_v37, %v8588_v56  ;;  %v8778_v56 = vld [vmem:[%s17363_s4 + $0x88] sm:$0xf] }
 0x27f   :  { %3286 = vmatpush.bf16.msra.mxu0 %v8627_v59  ;;  %3299 = vmatpush.bf16.msra.mxu1 %v8631_v31  ;;  %v10766_v59 = vld [vmem:[%s17363_s4 + $0xec] sm:$0xf0] }
 0x280   :  { %3312 = vmatpush.bf16.msra.mxu2 %v8635_v1  ;;  %3325 = vmatpush.bf16.msra.mxu3 %v8639_v57  ;;  %v8819_v1 = vor.u32 %v10766_v59, %v8818_v17  ;;  %v8828_v57 = vld [vmem:[%s17363_s4 + $0xf8] sm:$0xf0]  ;;  %v10755_v59 = vld [vmem:[%s17363_s4 + $0x94] sm:$0xf0] }
 0x283   :  { %3287 = vmatpush.bf16.msra.mxu0 %v8611_v8  ;;  %3300 = vmatpush.bf16.msra.mxu1 %v8615_v9  ;;  %v8802_v8 = vld [vmem:[%s17363_s4 + $0xc0] sm:$0xf]  ;;  %v10762_v9 = vld [vmem:[%s17363_s4 + $0xcc] sm:$0xf0] }
 0x284   :  { %3313 = vmatpush.bf16.msra.mxu2 %v8619_v13  ;;  %3326 = vmatpush.bf16.msra.mxu3 %v8623_v14  ;;  %v8803_v16 = vor.u32 %v10762_v9, %v8802_v8  ;;  %v8804_v14 = vld [vmem:[%s17363_s4 + $0xd0] sm:$0xf0]  ;;  %v10748_v9 = vld [vmem:[%s17363_s4 + $0x64] sm:$0xf] }
 0x285   :  { %v8807_v38 = vor.u32 %v10760_v10, %v8804_v14 }
 0x287   :  { %3288 = vmatpush.bf16.msra.mxu0 %v8595_v25  ;;  %3301 = vmatpush.bf16.msra.mxu1 %v8599_v0  ;;  %v10761_v25 = vld [vmem:[%s17363_s4 + $0xcc] sm:$0xf]  ;;  %v8788_v0 = vld [vmem:[%s17363_s4 + $0xb0] sm:$0xf0] }
 0x288   :  { %3314 = vmatpush.bf16.msra.mxu2 %v8603_v32  ;;  %3327 = vmatpush.bf16.msra.mxu3 %v8607_v47  ;;  %v8815_v27 = vor.u32 %v10761_v25, %v8812_v24  ;;  %v8794_v32 = vld [vmem:[%s17363_s4 + $0xa8] sm:$0xf]  ;;  %v10749_v24 = vld [vmem:[%s17363_s4 + $0x6c] sm:$0xf] }
 0x28b   :  { %3289 = vmatpush.bf16.msra.mxu0 %v8579_v51  ;;  %v10754_v51 = vld [vmem:[%s17363_s4 + $0x8c] sm:$0xf0] }
 0x28c   :  { %3328 = vmatpush.bf16.msra.mxu3 %v8591_v58 }
 0x28f   :  { %3494 = vmatpush.bf16.msrb.mxu0 %v8819_v1 }
 0x293   :  { %3495 = vmatpush.bf16.msrb.mxu0 %v8803_v16 }
 0x2c9   :  { %v13930_v43 = vpop.f32.mrf.mxu0  ;;  %v13932_v45 = vpop.f32.mrf.mxu1 }
 0x2d0   :  { %v13976_v15 = vpop.f32.mrf.mxu2  ;;  %v13978_v44 = vpop.f32.mrf.mxu3 }
 0x2d1   :  { %v2398_v4 = vpop.f32.mrf.mxu0  ;;  %v2411_v19 = vpop.f32.mrf.mxu1 }
 0x2d2   :  { %v10767_v4 = vld [vmem:[%s17363_s4 + $0xf4] sm:$0xf0]  ;;  %v10765_v19 = vld [vmem:[%s17363_s4 + $0xec] sm:$0xf] }
 0x2d3   :  { %v8827_v26 = vor.u32 %v10767_v4, %v8826_v3  ;;  %v8831_v7 = vor.u32 %v10765_v19, %v8828_v57  ;;  %v8779_v3 = vor.u32 %v10755_v59, %v8778_v56  ;;  %v8754_v4 = vld [vmem:[%s17363_s4 + $0x60] sm:$0xf]  ;;  %v10750_v19 = vld [vmem:[%s17363_s4 + $0x6c] sm:$0xf0] }
 0x2d4   :  { %v8755_v8 = vor.u32 %v10750_v19, %v8754_v4 }
 0x2d5   :  { %3533 = vmatpush.bf16.msrb.mxu3 %v8831_v7 }
 0x2d8   :  { %v2424_v28 = vpop.f32.mrf.mxu2  ;;  %v2437_v29 = vpop.f32.mrf.mxu3 }
 0x2d9   :  { %v2608_v20 = vpop.f32.mrf.mxu0  ;;  %v2621_v34 = vpop.f32.mrf.mxu1  ;;  %v8786_v28 = vld [vmem:[%s17363_s4 + $0xa0] sm:$0xf]  ;;  %v10758_v29 = vld [vmem:[%s17363_s4 + $0xac] sm:$0xf0]  ;;  %3534 = vmatpush.bf16.msrb.mxu3 %v8815_v27 }
 0x2da   :  { %v2609_v48 = vadd.f32 %v2608_v20, %v13930_v43  ;;  %v2622_v49 = vadd.f32 %v2621_v34, %v13932_v45  ;;  %v8580_v43 = vld [vmem:[%s17364_s5 + $0x10] sm:$0xf0]  ;;  %v8586_v45 = vld [vmem:[%s17364_s5 + $0x8] sm:$0xf]  ;;  %v8738_v27 = vld [vmem:[%s17363_s4 + $0x40] sm:$0xf] }
 0x2db   :  { %v8583_v35 = vor.u32 %v10768_v42, %v8580_v43  ;;  %v8587_v46 = vor.u32 %v10771_v53, %v8586_v45  ;;  %v8770_v42 = vld [vmem:[%s17363_s4 + $0x80] sm:$0xf]  ;;  %v2655_v53 = vperm.slane %v14010_v12, 2  ;;  %v8772_v12 = vld [vmem:[%s17363_s4 + $0x90] sm:$0xf0] }
 0x2dc   :  { %v2661_v54 = vadd.f32 %v2653_v30, %v2609_v48  ;;  %v2662_v55 = vadd.f32 %v2654_v18, %v2622_v49  ;;  %v10756_v30 = vld [vmem:[%s17363_s4 + $0xa4] sm:$0xf]  ;;  %v8787_v18 = vor.u32 %v10758_v29, %v8786_v28  ;;  %v8795_v49 = vor.u32 %v10759_v33, %v8794_v32  ;;  %v8740_v32 = vld [vmem:[%s17363_s4 + $0x50] sm:$0xf0] }
 0x2dd   :  { %3302 = vmatpush.bf16.msra.mxu1 %v8583_v35  ;;  %3315 = vmatpush.bf16.msra.mxu2 %v8587_v46  ;;  %v8791_v34 = vor.u32 %v10756_v30, %v8788_v0  ;;  %v8441_v35 = vld [vmem:[%s17359_s0 + $0x60] sm:$0xff]  ;;  %v8442_v46 = vld [vmem:[%s17359_s0 + $0x68] sm:$0xff]  ;;  %v8771_v37 = vor.u32 %v10754_v51, %v8770_v42 }
 0x2de   :  { %v8437_v6 = vmul.f32 -1.442695, %v2661_v54  ;;  %v8438_v31 = vmul.f32 -1.442695, %v2662_v55  ;;  %3496 = vmatpush.bf16.msrb.mxu0 %v8787_v18  ;;  %v10746_v18 = vld [vmem:[%s17363_s4 + $0x4c] sm:$0xf0] }
 0x2df   :  { %v10744_v0 = vld [vmem:[%s17363_s4 + $0x44] sm:$0xf]  ;;  %v10745_v51 = vld [vmem:[%s17363_s4 + $0x4c] sm:$0xf] }
 0x2e0   :  { %11273 = vpow2.f32 %v8437_v6  ;;  %v2634_v5 = vpop.f32.mrf.mxu2  ;;  %v2647_v23 = vpop.f32.mrf.mxu3  ;;  %v10753_v6 = vld [vmem:[%s17363_s4 + $0x8c] sm:$0xf] }
 0x2e1   :  { %11275 = vpow2.f32 %v8438_v31  ;;  %v2648_v11 = vadd.f32 %v2647_v23, %v13978_v44  ;;  %v2610_v52 = vpop.f32.mrf.mxu0  ;;  %v2623_v13 = vpop.f32.mrf.mxu1  ;;  %3507 = vmatpush.bf16.msrb.mxu1 %v8823_v2  ;;  %3520 = vmatpush.bf16.msrb.mxu2 %v8827_v26  ;;  %v8811_v44 = vor.u32 %v10763_v61, %v8810_v21  ;;  %v2635_v45 = vadd.f32 %v2634_v5, %v13976_v15  ;;  %v10752_v15 = vld [vmem:[%s17363_s4 + $0x84] sm:$0xf]  ;;  %v8780_v31 = vld [vmem:[%s17363_s4 + $0x98] sm:$0xf0]  ;;  %v8762_v61 = vld [vmem:[%s17363_s4 + $0x68] sm:$0xf] }
 0x2e2   :  { %3497 = vmatpush.bf16.msrb.mxu0 %v8771_v37  ;;  %v8775_v2 = vor.u32 %v10752_v15, %v8772_v12  ;;  %v8444_v26 = vld [vmem:[%s17359_s0 + $0x78] sm:$0xff]  ;;  %v8783_v7 = vor.u32 %v10753_v6, %v8780_v31  ;;  %v8756_v13 = vld [vmem:[%s17363_s4 + $0x70] sm:$0xf0]  ;;  %v8739_v15 = vor.u32 %v10746_v18, %v8738_v27  ;;  %v8743_v12 = vor.u32 %v10744_v0, %v8740_v32  ;;  %v10736_v0 = vld [vmem:[%s17363_s4 + $0x4] sm:$0xf] }
 0x2e3   :  { %v2664_v60 = vadd.f32 %v2656_v40, %v2648_v11  ;;  %v10757_v40 = vld [vmem:[%s17363_s4 + $0xac] sm:$0xf]  ;;  %v2663_v1 = vadd.f32 %v2655_v53, %v2635_v45  ;;  %v8759_v21 = vor.u32 %v10748_v9, %v8756_v13  ;;  %v10740_v9 = vld [vmem:[%s17363_s4 + $0x24] sm:$0xf]  ;;  %v8730_v13 = vld [vmem:[%s17363_s4 + $0x28] sm:$0xf] }
 0x2e4   :  { %v8799_v47 = vor.u32 %v10757_v40, %v8796_v39 }
 0x2e5   :  { %v8439_v20 = vmul.f32 -1.442695, %v2664_v60  ;;  %3508 = vmatpush.bf16.msrb.mxu1 %v8807_v38  ;;  %3521 = vmatpush.bf16.msrb.mxu2 %v8811_v44  ;;  %v10751_v38 = vld [vmem:[%s17363_s4 + $0x74] sm:$0xf0]  ;;  %v8764_v60 = vld [vmem:[%s17363_s4 + $0x78] sm:$0xf0] }
 0x2e6   :  { %v11274_v48 = vpop.eup %11273  ;;  %3535 = vmatpush.bf16.msrb.mxu3 %v8799_v47  ;;  %3498 = vmatpush.bf16.msrb.mxu0 %v8755_v8  ;;  %v8763_v42 = vor.u32 %v10751_v38, %v8762_v61  ;;  %v8732_v38 = vld [vmem:[%s17363_s4 + $0x38] sm:$0xf0] }
 0x2e7   :  { %v11276_v41 = vpop.eup %11275  ;;  %v14143_v50 = vadd.f32 1.0, %v11274_v48  ;;  %11277 = vpow2.f32 %v8439_v20  ;;  %v8746_v48 = vld [vmem:[%s17363_s4 + $0x48] sm:$0xf] }
 0x2e8   :  { %v14151_v43 = vadd.f32 1.0, %v11276_v41  ;;  %v2636_v54 = vpop.f32.mrf.mxu2  ;;  %v2649_v55 = vpop.f32.mrf.mxu3  ;;  %v10737_v41 = vld [vmem:[%s17363_s4 + $0xc] sm:$0xf] }
 0x2e9   :  { %11279 = vrcp.f32 %v14143_v50  ;;  %3509 = vmatpush.bf16.msrb.mxu1 %v8791_v34  ;;  %3522 = vmatpush.bf16.msrb.mxu2 %v8795_v49  ;;  %v2679_v5 = vand.u32 2147483647, %v14143_v50  ;;  %v2681_v10 = vand.u32 2147483648, %v14143_v50  ;;  %vm2675_vm13 = vweird.f32 %v14143_v50  ;;  %v10747_v49 = vld [vmem:[%s17363_s4 + $0x54] sm:$0xf0] }
 0x2ea   :  { %11281 = vrcp.f32 %v14151_v43  ;;  %v2942_v17 = vpop.f32.mrf.mxu0  ;;  %v2955_v58 = vpop.f32.mrf.mxu1  ;;  %v2698_v14 = vand.u32 2147483647, %v14151_v43  ;;  %3536 = vmatpush.bf16.msrb.mxu3 %v8783_v7  ;;  %vm2694_vm12 = vweird.f32 %v14151_v43  ;;  %v2700_v20 = vand.u32 2147483648, %v14151_v43  ;;  %v8748_v55 = vld [vmem:[%s17363_s4 + $0x58] sm:$0xf0]  ;;  %3499 = vmatpush.bf16.msrb.mxu0 %v8739_v15 }
 0x2eb   :  { %v2985_v62 = vadd.f32 %v8441_v35, %v2942_v17  ;;  %v2986_v63 = vadd.f32 %v8442_v46, %v2955_v58  ;;  %vm14246_vm15 = vcmp.eq.f32.partialorder %v2679_v5, 8.507059e+37  ;;  %v8767_v54 = vor.u32 %v10749_v24, %v8764_v60  ;;  %v8722_v35 = vld [vmem:[%s17363_s4 + $0x20] sm:$0xf]  ;;  %v10742_v17 = vld [vmem:[%s17363_s4 + $0x2c] sm:$0xf0] }
 0x2ec   :  { %v8747_v56 = vor.u32 %v10747_v49, %v8746_v48  ;;  %v2682_v31 = vor.u32 1.1754944e-38, %v2681_v10  ;;  %v2701_v19 = vor.u32 1.1754944e-38, %v2700_v20  ;;  %vm2699_vm3 = vcmp.eq.f32.partialorder %v2698_v14, 8.507059e+37  ;;  %v10741_v14 = vld [vmem:[%s17363_s4 + $0x2c] sm:$0xf] }
 0x2ed   :  { %v11278_v57 = vpop.eup %11277  ;;  %v8573_v23 = vmul.f32 -1.442695, %v2985_v62  ;;  %v8574_v52 = vmul.f32 -1.442695, %v2986_v63  ;;  %3510 = vmatpush.bf16.msrb.mxu1 %v8775_v2  ;;  %3523 = vmatpush.bf16.msrb.mxu2 %v8779_v3  ;;  %v8751_v63 = vor.u32 %v10745_v51, %v8748_v55  ;;  %v8723_v3 = vor.u32 %v10742_v17, %v8722_v35  ;;  %v10739_v48 = vld [vmem:[%s17363_s4 + $0x14] sm:$0xf0] }
 0x2ee   :  { %v14195_v11 = vadd.f32 1.0, %v11278_v57  ;;  %3537 = vmatpush.bf16.msrb.mxu3 %v8767_v54  ;;  %v8735_v20 = vor.u32 %v10741_v14, %v8732_v38  ;;  %v10828_v14 = vld [vmem:[%s17362_s3 + $0xe4] sm:$0xf]  ;;  %v10831_v38 = vld [vmem:[%s17362_s3 + $0xf4] sm:$0xf0] }
 0x2ef   :  { %v14200_v16 = vpop.eup %11279  ;;  %11283 = vpow2.f32 %v8573_v23  ;;  %3500 = vmatpush.bf16.msrb.mxu0 %v8723_v3 }
 0x2f0   :  { %v14209_v44 = vpop.eup %11281  ;;  %v2671_v25 = vmul.f32 %v14200_v16, %v14143_v50  ;;  %11285 = vrcp.f32 %v14195_v11  ;;  %vm2676_vm14 = vweird.f32 %v14200_v16  ;;  %vm2714_vm5 = vweird.f32 %v14195_v11 }
 0x2f1   :  { %v2690_v28 = vmul.f32 %v14209_v44, %v14151_v43  ;;  %11287 = vtanh.f32 %v2663_v1  ;;  %v14227_v29 = vpop.f32.mrf.mxu2  ;;  %v2981_v30 = vpop.f32.mrf.mxu3  ;;  %3511 = vmatpush.bf16.msrb.mxu1 %v8759_v21  ;;  %vm2695_vm0 = vweird.f32 %v14209_v44  ;;  %3524 = vmatpush.bf16.msrb.mxu2 %v8763_v42  ;;  %vm2677_vm1 = vmor %vm2675_vm13, %vm2676_vm14  ;;  %v8724_v43 = vld [vmem:[%s17363_s4 + $0x30] sm:$0xf0]  ;;  %v8716_v42 = vld [vmem:[%s17363_s4 + $0x18] sm:$0xf0]  ;;  %v2718_v51 = vand.u32 2147483647, %v14195_v11 }
 0x2f2   :  { %v2672_v33 = vsub.f32 1.0, %v2671_v25  ;;  %11289 = vpow2.f32 %v8574_v52  ;;  %v2988_v34 = vadd.f32 %v8444_v26, %v2981_v30  ;;  %v2944_v40 = vpop.f32.mrf.mxu0  ;;  %v2957_v39 = vpop.f32.mrf.mxu1  ;;  %vm2696_vm2 = vmor %vm2694_vm12, %vm2695_vm0  ;;  %3538 = vmatpush.bf16.msrb.mxu3 %v8751_v63  ;;  %v10738_v25 = vld [vmem:[%s17363_s4 + $0xc] sm:$0xf0]  ;;  %v8727_v60 = vor.u32 %v10740_v9, %v8724_v43 }
 0x2f3   :  { %v2691_v47 = vsub.f32 1.0, %v2690_v28  ;;  %v2720_v28 = vand.u32 2147483648, %v14195_v11  ;;  %v8708_v40 = vld [vmem:[%s17363_s4 + $0x10] sm:$0xf0]  ;;  %v8714_v39 = vld [vmem:[%s17363_s4 + $0x8] sm:$0xf]  ;;  %v8719_v15 = vor.u32 %v10737_v41, %v8716_v42 }
 0x2f4   :  { %v2673_v45 = vmul.f32 %v14200_v16, %v2672_v33  ;;  %v8575_v53 = vmul.f32 -1.442695, %v2988_v34  ;;  %v8711_v55 = vor.u32 %v10736_v0, %v8708_v40  ;;  %v8715_v35 = vor.u32 %v10739_v48, %v8714_v39  ;;  %v8946_v48 = vld [vmem:[%s17362_s3 + $0xc8] sm:$0xf]  ;;  %v8948_v41 = vld [vmem:[%s17362_s3 + $0xd8] sm:$0xf0] }
 0x2f5   :  { %v11284_v46 = vpop.eup %11283  ;;  %v2692_v37 = vmul.f32 %v14209_v44, %v2691_v47  ;;  %3512 = vmatpush.bf16.msrb.mxu1 %v8743_v12  ;;  %3525 = vmatpush.bf16.msrb.mxu2 %v8747_v56  ;;  %vm2719_vm8 = vcmp.eq.f32.partialorder %v2718_v51, 8.507059e+37  ;;  %v8922_v42 = vld [vmem:[%s17362_s3 + $0xa0] sm:$0xf] }
 0x2f6   :  { %v14265_v58 = vpop.eup %11285  ;;  %v2674_v59 = vadd.f32 %v14200_v16, %v2673_v45  ;;  %v14268_v62 = vadd.f32 1.0, %v11284_v46  ;;  %11291 = vpow2.f32 %v8575_v53  ;;  %3539 = vmatpush.bf16.msrb.mxu3 %v8735_v20  ;;  %v2721_v46 = vor.u32 1.1754944e-38, %v2720_v28  ;;  %v8940_v20 = vld [vmem:[%s17362_s3 + $0xd0] sm:$0xf0] }
 0x2f7   :  { %v11288_v6 = vpop.eup %11287  ;;  %v2693_v1 = vadd.f32 %v14209_v44, %v2692_v37  ;;  %v2710_v2 = vmul.f32 %v14265_v58, %v14195_v11  ;;  %vm2715_vm4 = vweird.f32 %v14265_v58 }
 0x2f8   :  { %v11290_v4 = vpop.eup %11289  ;;  %v2678_v57 = vsel %vm2677_vm1, %v14200_v16, %v2674_v59  ;;  %11293 = vrcp.f32 %v14268_v62  ;;  %v10743_v16 = vld [vmem:[%s17363_s4 + $0x34] sm:$0xf0]  ;;  %vm14355_vm6 = vmor %vm2714_vm5, %vm2715_vm4  ;;  %v3005_v54 = vand.u32 2147483648, %v14268_v62  ;;  %v3003_v56 = vand.u32 2147483647, %v14268_v62 }
 0x2f9   :  { %v2683_v50 = vsel %vm14246_vm15, %v2682_v31, %v2678_v57  ;;  %v2697_v5 = vsel %vm2696_vm2, %v14209_v44, %v2693_v1  ;;  %v2711_v23 = vsub.f32 1.0, %v2710_v2  ;;  %v14290_v26 = vadd.f32 1.0, %v11290_v4  ;;  %v2970_v7 = vpop.f32.mrf.mxu2  ;;  %v2983_v8 = vpop.f32.mrf.mxu3  ;;  %v8706_v44 = vld [vmem:[%s17363_s4] sm:$0xf]  ;;  %3513 = vmatpush.bf16.msrb.mxu1 %v8727_v60  ;;  %v10826_v60 = vld [vmem:[%s17362_s3 + $0xcc] sm:$0xf0] }
 0x2fa   :  { %v2702_v10 = vsel %vm2699_vm3, %v2701_v19, %v2697_v5  ;;  %v2725_v52 = vmul.f32 %v11288_v6, %v2683_v50  ;;  %v8731_v18 = vor.u32 %v10743_v16, %v8730_v13  ;;  %v8707_v34 = vor.u32 %v10738_v25, %v8706_v44  ;;  %3540 = vmatpush.bf16.msrb.mxu3 %v8719_v15  ;;  %v10830_v16 = vld [vmem:[%s17362_s3 + $0xec] sm:$0xf0]  ;;  %v10829_v44 = vld [vmem:[%s17362_s3 + $0xec] sm:$0xf]  ;;  %v8964_v25 = vld [vmem:[%s17362_s3 + $0xf8] sm:$0xf0] }
 0x2fb   :  { %v2724_v21 = vmul.f32 %v2702_v10, %v13604_v36  ;;  %v2712_v61 = vmul.f32 %v14265_v58, %v2711_v23  ;;  %11295 = vrcp.f32 %v14290_v26  ;;  %v8443_v36 = vld [vmem:[%s17359_s0 + $0x70] sm:$0xff]  ;;  %vm2999_vm9 = vweird.f32 %v14268_v62 }
 0x2fc   :  { %v11292_v24 = vpop.eup %11291  ;;  %v2987_v47 = vadd.f32 %v8443_v36, %v14227_v29  ;;  %3526 = vmatpush.bf16.msrb.mxu2 %v8731_v18  ;;  %3501 = vmatpush.bf16.msrb.mxu0 %v8707_v34  ;;  %v3006_v31 = vor.u32 1.1754944e-38, %v3005_v54  ;;  %v3022_v4 = vand.u32 2147483647, %v14290_v26  ;;  %vm3004_vm12 = vcmp.eq.f32.partialorder %v3003_v56, 8.507059e+37  ;;  %v8938_v36 = vld [vmem:[%s17362_s3 + $0xc0] sm:$0xf] }
 0x2fd   :  { %v14322_v27 = vadd.f32 %v2725_v52, %v2724_v21  ;;  %v14325_v30 = vadd.f32 1.0, %v11292_v24  ;;  %v2713_v33 = vadd.f32 %v14265_v58, %v2712_v61  ;;  %3514 = vmatpush.bf16.msrb.mxu1 %v8711_v55  ;;  %vm3018_vm13 = vweird.f32 %v14290_v26  ;;  %v8956_v21 = vld [vmem:[%s17362_s3 + $0xf0] sm:$0xf0]  ;;  %v10822_v54 = vld [vmem:[%s17362_s3 + $0xac] sm:$0xf0] }
 0x2fe   :  { %v11294_v32 = vpop.eup %11293  ;;  %vm3023_vm15 = vcmp.eq.f32.partialorder %v3022_v4, 8.507059e+37  ;;  %v8967_v39 = vor.u32 %v10829_v44, %v8964_v25  ;;  %v8939_v29 = vor.u32 %v10826_v60, %v8938_v36  ;;  %v10820_v55 = vld [vmem:[%s17362_s3 + $0xa4] sm:$0xf]  ;;  %v10821_v56 = vld [vmem:[%s17362_s3 + $0xac] sm:$0xf] }
 0x2ff   :  { %11297 = vtanh.f32 %v14322_v27  ;;  %v2995_v49 = vmul.f32 %v11294_v32, %v14268_v62  ;;  %v2717_v11 = vsel %vm14355_vm6, %v14265_v58, %v2713_v33  ;;  %vm3000_vm7 = vweird.f32 %v11294_v32  ;;  %v10824_v33 = vld [vmem:[%s17362_s3 + $0xc4] sm:$0xf]  ;;  %v8874_v25 = vld [vmem:[%s17362_s3 + $0x40] sm:$0xf] }
 0x300   :  { %11299 = vrcp.f32 %v14325_v30  ;;  %3527 = vmatpush.bf16.msrb.mxu2 %v8715_v35  ;;  %v2722_v63 = vsel %vm2719_vm8, %v2721_v46, %v2717_v11  ;;  %v3024_v58 = vand.u32 2147483648, %v14290_v26  ;;  %vm3001_vm11 = vmor %vm2999_vm9, %vm3000_vm7  ;;  %v3042_v24 = vand.u32 2147483647, %v14325_v30  ;;  %v8924_v46 = vld [vmem:[%s17362_s3 + $0xb0] sm:$0xf0] }
 0x301   :  { %v11296_v45 = vpop.eup %11295  ;;  %v2996_v53 = vsub.f32 1.0, %v2995_v49  ;;  %11301 = vtanh.f32 %v2987_v47  ;;  %v3044_v18 = vand.u32 2147483648, %v14325_v30  ;;  %vm3038_vm1 = vweird.f32 %v14325_v30  ;;  %v10827_v49 = vld [vmem:[%s17362_s3 + $0xd4] sm:$0xf0]  ;;  %v10816_v4 = vld [vmem:[%s17362_s3 + $0x84] sm:$0xf] }
 0x302   :  { %v3014_v37 = vmul.f32 %v11296_v45, %v14290_v26  ;;  %vm3019_vm10 = vweird.f32 %v11296_v45  ;;  %v3025_v7 = vor.u32 1.1754944e-38, %v3024_v58  ;;  %v8954_v26 = vld [vmem:[%s17362_s3 + $0xe0] sm:$0xf]  ;;  %v8947_v35 = vor.u32 %v10827_v49, %v8946_v48  ;;  %v10806_v48 = vld [vmem:[%s17362_s3 + $0x2c] sm:$0xf0] }
 0x303   :  { %v2997_v12 = vmul.f32 %v11294_v32, %v2996_v53  ;;  %vm3020_vm14 = vmor %vm3018_vm13, %vm3019_vm10  ;;  %v8955_v0 = vor.u32 %v10830_v16, %v8954_v26  ;;  %v8943_v53 = vor.u32 %v10824_v33, %v8940_v20  ;;  %vm3043_vm3 = vcmp.eq.f32.partialorder %v3042_v24, 8.507059e+37  ;;  %v8892_v26 = vld [vmem:[%s17362_s3 + $0x70] sm:$0xf0]  ;;  %v8898_v16 = vld [vmem:[%s17362_s3 + $0x68] sm:$0xf] }
 0x304   :  { %v3015_v17 = vsub.f32 1.0, %v3014_v37  ;;  %v8930_v37 = vld [vmem:[%s17362_s3 + $0xa8] sm:$0xf]  ;;  %v8923_v58 = vor.u32 %v10822_v54, %v8922_v42  ;;  %v10810_v24 = vld [vmem:[%s17362_s3 + $0x4c] sm:$0xf0] }
 0x305   :  { %v11298_v59 = vpop.eup %11297  ;;  %v2998_v6 = vadd.f32 %v11294_v32, %v2997_v12  ;;  %v10823_v12 = vld [vmem:[%s17362_s3 + $0xb4] sm:$0xf0]  ;;  %v10809_v33 = vld [vmem:[%s17362_s3 + $0x4c] sm:$0xf]  ;;  %v8884_v20 = vld [vmem:[%s17362_s3 + $0x58] sm:$0xf0] }
 0x306   :  { %v14367_v1 = vpop.eup %11299  ;;  %v2728_v2 = vmul.f32 %v11298_v59, %v2722_v63  ;;  %v3016_v3 = vmul.f32 %v11296_v45, %v3015_v17  ;;  %v8932_v17 = vld [vmem:[%s17362_s3 + $0xb8] sm:$0xf0]  ;;  %v8887_v47 = vor.u32 %v10809_v33, %v8884_v20  ;;  %v8866_v42 = vld [vmem:[%s17362_s3 + $0x28] sm:$0xf] }
 0x307   :  { %v3002_v19 = vsel %vm3001_vm11, %v11294_v32, %v2998_v6  ;;  %v3034_v62 = vmul.f32 %v14367_v1, %v14325_v30  ;;  %v11302_v23 = vpop.eup %11301  ;;  %vm3039_vm0 = vweird.f32 %v14367_v1  ;;  %v8959_v32 = vor.u32 %v10828_v14, %v8956_v21  ;;  %v10825_v30 = vld [vmem:[%s17362_s3 + $0xcc] sm:$0xf]  ;;  %v10815_v14 = vld [vmem:[%s17362_s3 + $0x74] sm:$0xf0] }
 0x308   :  { %v2731_v57 = vpack.c.bf16 %v2728_v2, %v2728_v2  ;;  %v3007_v50 = vsel %vm3004_vm12, %v3006_v31, %v3002_v19  ;;  %v3017_v5 = vadd.f32 %v11296_v45, %v3016_v3  ;;  %vm14431_vm2 = vmor %vm3038_vm1, %vm3039_vm0  ;;  %v8951_v11 = vor.u32 %v10825_v30, %v8948_v41  ;;  %v8906_v31 = vld [vmem:[%s17362_s3 + $0x80] sm:$0xf]  ;;  %v8908_v19 = vld [vmem:[%s17362_s3 + $0x90] sm:$0xf0] }
 0x309   :  { %v3035_v8 = vsub.f32 1.0, %v3034_v62  ;;  %v3049_v43 = vmul.f32 %v11302_v23, %v3007_v50  ;;  %v8927_v6 = vor.u32 %v10820_v55, %v8924_v46  ;;  %v8931_v2 = vor.u32 %v10823_v12, %v8930_v37  ;;  %v8914_v62 = vld [vmem:[%s17362_s3 + $0x88] sm:$0xf]  ;;  %v10819_v50 = vld [vmem:[%s17362_s3 + $0x94] sm:$0xf0] }
 0x30a   :  { %2732 = vst [vmem:[#allocation4 + $0x4] sm:$0xf] %v2731_v57  ;;  %v3021_v9 = vsel %vm3020_vm14, %v11296_v45, %v3017_v5  ;;  %v3045_v45 = vor.u32 1.1754944e-38, %v3044_v18  ;;  %v8935_v3 = vor.u32 %v10821_v56, %v8932_v17  ;;  %v10817_v5 = vld [vmem:[%s17362_s3 + $0x8c] sm:$0xf]  ;;  %v8899_v36 = vor.u32 %v10815_v14, %v8898_v16 }
 0x30b   :  { %8440 = vst [vmem:[%s17366_s7 + $0x8] sm:$0xf] %v2731_v57  ;;  %v3026_v10 = vsel %vm3023_vm15, %v3025_v7, %v3021_v9  ;;  %v3036_v52 = vmul.f32 %v14367_v1, %v3035_v8  ;;  %v8916_v23 = vld [vmem:[%s17362_s3 + $0x98] sm:$0xf0]  ;;  %v8911_v8 = vor.u32 %v10816_v4, %v8908_v19  ;;  %v8890_v9 = vld [vmem:[%s17362_s3 + $0x60] sm:$0xf] }
 0x30c   :  { %v3048_v13 = vmul.f32 %v3026_v10, %v13664_v22  ;;  %v8962_v22 = vld [vmem:[%s17362_s3 + $0xe8] sm:$0xf]  ;;  %v8915_v10 = vor.u32 %v10819_v50, %v8914_v62  ;;  %v10813_v21 = vld [vmem:[%s17362_s3 + $0x6c] sm:$0xf]  ;;  %v8876_v18 = vld [vmem:[%s17362_s3 + $0x50] sm:$0xf0] }
 0x30d   :  { %v3037_v28 = vadd.f32 %v14367_v1, %v3036_v52  ;;  %v8963_v40 = vor.u32 %v10831_v38, %v8962_v22  ;;  %v8919_v52 = vor.u32 %v10817_v5, %v8916_v23  ;;  %v8900_v22 = vld [vmem:[%s17362_s3 + $0x78] sm:$0xf0]  ;;  %v10804_v30 = vld [vmem:[%s17362_s3 + $0x24] sm:$0xf]  ;;  %v8860_v41 = vld [vmem:[%s17362_s3 + $0x30] sm:$0xf0] }
 0x30e   :  { %v14394_v61 = vadd.f32 %v3049_v43, %v3048_v13  ;;  %v10814_v43 = vld [vmem:[%s17362_s3 + $0x6c] sm:$0xf0]  ;;  %v10812_v13 = vld [vmem:[%s17362_s3 + $0x64] sm:$0xf]  ;;  %v8903_v60 = vor.u32 %v10813_v21, %v8900_v22  ;;  %v8863_v54 = vor.u32 %v10804_v30, %v8860_v41  ;;  %v8842_v55 = vld [vmem:[%s17362_s3] sm:$0xf] }
 0x30f   :  { %v3041_v51 = vsel %vm14431_vm2, %v14367_v1, %v3037_v28  ;;  %v10818_v1 = vld [vmem:[%s17362_s3 + $0x8c] sm:$0xf0]  ;;  %v8891_v38 = vor.u32 %v10814_v43, %v8890_v9  ;;  %v8895_v44 = vor.u32 %v10812_v13, %v8892_v26  ;;  %v10808_v28 = vld [vmem:[%s17362_s3 + $0x44] sm:$0xf]  ;;  %v8850_v12 = vld [vmem:[%s17362_s3 + $0x8] sm:$0xf] }
 0x310   :  { %11303 = vtanh.f32 %v14394_v61  ;;  %v3046_v59 = vsel %vm3043_vm3, %v3045_v45, %v3041_v51  ;;  %v8907_v7 = vor.u32 %v10818_v1, %v8906_v31  ;;  %v10807_v51 = vld [vmem:[%s17362_s3 + $0x34] sm:$0xf0]  ;;  %v10805_v45 = vld [vmem:[%s17362_s3 + $0x2c] sm:$0xf]  ;;  %v10800_v37 = vld [vmem:[%s17362_s3 + $0x4] sm:$0xf] }
 0x311   :  { %v3089_v34 = vld [vmem:[#allocation4 + $0x4] sm:$0xf]  ;;  %v10803_v56 = vld [vmem:[%s17362_s3 + $0x14] sm:$0xf0]  ;;  %v10801_v17 = vld [vmem:[%s17362_s3 + $0xc] sm:$0xf] }
 0x312   :  { %3290 = vmatmul.bf16.vlgmr.msra.gmra.mxu0 %v3089_v34  ;;  %3303 = vmatmul.bf16.vlgmr.msra.gmra.mxu1 %v3089_v34  ;;  %v10892_v4 = vld [vmem:[%s17364_s5 + $0xe4] sm:$0xf]  ;;  %v9087_v62 = vld [vmem:[%s17364_s5 + $0xf0] sm:$0xf0]  ;;  %v10895_v50 = vld [vmem:[%s17364_s5 + $0xf4] sm:$0xf0] }
 0x313   :  { %3316 = vmatmul.bf16.vlgmr.msra.gmra.mxu2 %v3089_v34  ;;  %3329 = vmatmul.bf16.vlgmr.msra.gmra.mxu3 %v3089_v34  ;;  %v8875_v34 = vor.u32 %v10810_v24, %v8874_v25  ;;  %v9090_v5 = vor.u32 %v10892_v4, %v9087_v62  ;;  %v9069_v43 = vld [vmem:[%s17364_s5 + $0xc0] sm:$0xf]  ;;  %v9071_v26 = vld [vmem:[%s17364_s5 + $0xd0] sm:$0xf0]  ;;  %v9077_v16 = vld [vmem:[%s17364_s5 + $0xc8] sm:$0xf] }
 0x314   :  { %3828 = vmatpush.bf16.msra.mxu0 %v8955_v0  ;;  %3841 = vmatpush.bf16.msra.mxu1 %v8959_v32  ;;  %v8882_v0 = vld [vmem:[%s17362_s3 + $0x48] sm:$0xf]  ;;  %v10811_v32 = vld [vmem:[%s17362_s3 + $0x54] sm:$0xf0]  ;;  %v10889_v22 = vld [vmem:[%s17364_s5 + $0xcc] sm:$0xf] }
 0x315   :  { %3854 = vmatpush.bf16.msra.mxu2 %v8963_v40  ;;  %3867 = vmatpush.bf16.msra.mxu3 %v8967_v39  ;;  %v8879_v40 = vor.u32 %v10808_v28, %v8876_v18  ;;  %v8858_v39 = vld [vmem:[%s17362_s3 + $0x20] sm:$0xf]  ;;  %v8883_v49 = vor.u32 %v10811_v32, %v8882_v0  ;;  %v10891_v21 = vld [vmem:[%s17364_s5 + $0xd4] sm:$0xf0]  ;;  %v9055_v18 = vld [vmem:[%s17364_s5 + $0xb0] sm:$0xf0] }
 0x316   :  { %v11304_v15 = vpop.eup %11303  ;;  %v9053_v24 = vld [vmem:[%s17364_s5 + $0xa0] sm:$0xf]  ;;  %v9061_v0 = vld [vmem:[%s17364_s5 + $0xa8] sm:$0xf]  ;;  %v10887_v32 = vld [vmem:[%s17364_s5 + $0xb4] sm:$0xf0] }
 0x317   :  { %v3052_v63 = vmul.f32 %v11304_v15, %v3046_v59  ;;  %v8844_v15 = vld [vmem:[%s17362_s3 + $0x10] sm:$0xf0]  ;;  %v8852_v59 = vld [vmem:[%s17362_s3 + $0x18] sm:$0xf0]  ;;  %v10882_v30 = vld [vmem:[%s17364_s5 + $0x8c] sm:$0xf0] }
 0x318   :  { %3829 = vmatpush.bf16.msra.mxu0 %v8939_v29  ;;  %3842 = vmatpush.bf16.msra.mxu1 %v8943_v53  ;;  %v8868_v29 = vld [vmem:[%s17362_s3 + $0x38] sm:$0xf0]  ;;  %v8859_v53 = vor.u32 %v10806_v48, %v8858_v39  ;;  %v8855_v31 = vor.u32 %v10801_v17, %v8852_v59  ;;  %v10885_v39 = vld [vmem:[%s17364_s5 + $0xac] sm:$0xf]  ;;  %v10880_v41 = vld [vmem:[%s17364_s5 + $0x84] sm:$0xf] }
 0x319   :  { %3855 = vmatpush.bf16.msra.mxu2 %v8947_v35  ;;  %3868 = vmatpush.bf16.msra.mxu3 %v8951_v11  ;;  %v3055_v57 = vpack.c.bf16 %v3052_v63, %v3052_v63  ;;  %v10802_v35 = vld [vmem:[%s17362_s3 + $0xc] sm:$0xf0]  ;;  %v8867_v11 = vor.u32 %v10807_v51, %v8866_v42  ;;  %v8871_v46 = vor.u32 %v10805_v45, %v8868_v29  ;;  %v9063_v48 = vld [vmem:[%s17364_s5 + $0xb8] sm:$0xf0]  ;;  %v9039_v51 = vld [vmem:[%s17364_s5 + $0x90] sm:$0xf0] }
 0x31a   :  { %v8843_v63 = vor.u32 %v10802_v35, %v8842_v55  ;;  %v9045_v45 = vld [vmem:[%s17364_s5 + $0x88] sm:$0xf]  ;;  %v10883_v29 = vld [vmem:[%s17364_s5 + $0x94] sm:$0xf0]  ;;  %v10881_v55 = vld [vmem:[%s17364_s5 + $0x8c] sm:$0xf] }
 0x31b   :  { %3056 = vst [vmem:[#allocation4] sm:$0xf] %v3055_v57  ;;  %v9047_v35 = vld [vmem:[%s17364_s5 + $0x98] sm:$0xf0]  ;;  %v9023_v59 = vld [vmem:[%s17364_s5 + $0x70] sm:$0xf0] }
 0x31c   :  { %3830 = vmatpush.bf16.msra.mxu0 %v8923_v58  ;;  %3843 = vmatpush.bf16.msra.mxu1 %v8927_v6  ;;  %v8847_v58 = vor.u32 %v10800_v37, %v8844_v15  ;;  %v8851_v6 = vor.u32 %v10803_v56, %v8850_v12  ;;  %v10878_v37 = vld [vmem:[%s17364_s5 + $0x6c] sm:$0xf0]  ;;  %v10876_v15 = vld [vmem:[%s17364_s5 + $0x64] sm:$0xf]  ;;  %v9031_v4 = vld [vmem:[%s17364_s5 + $0x78] sm:$0xf0] }
 0x31d   :  { %3856 = vmatpush.bf16.msra.mxu2 %v8931_v2  ;;  %3869 = vmatpush.bf16.msra.mxu3 %v8935_v3  ;;  %v9085_v2 = vld [vmem:[%s17364_s5 + $0xe0] sm:$0xf]  ;;  %v10894_v3 = vld [vmem:[%s17364_s5 + $0xec] sm:$0xf0] }
 0x31e   :  { %v9086_v19 = vor.u32 %v10894_v3, %v9085_v2  ;;  %v10877_v3 = vld [vmem:[%s17364_s5 + $0x6c] sm:$0xf]  ;;  %v14719_v62 = vld [vmem:[%s17365_s6] sm:$0xf] }
 0x320   :  { %3831 = vmatpush.bf16.msra.mxu0 %v8907_v7  ;;  %3844 = vmatpush.bf16.msra.mxu1 %v8911_v8  ;;  %v10893_v7 = vld [vmem:[%s17364_s5 + $0xec] sm:$0xf]  ;;  %v9095_v8 = vld [vmem:[%s17364_s5 + $0xf8] sm:$0xf0] }
 0x321   :  { %3857 = vmatpush.bf16.msra.mxu2 %v8915_v10  ;;  %3870 = vmatpush.bf16.msra.mxu3 %v8919_v52  ;;  %v9098_v9 = vor.u32 %v10893_v7, %v9095_v8  ;;  %v10890_v10 = vld [vmem:[%s17364_s5 + $0xcc] sm:$0xf0]  ;;  %v10888_v52 = vld [vmem:[%s17364_s5 + $0xc4] sm:$0xf] }
 0x322   :  { %3502 = vmatmul.bf16.vlgmr.msrb.gmra.mxu0 %v3055_v57  ;;  %3515 = vmatmul.bf16.vlgmr.msrb.gmra.mxu1 %v3055_v57  ;;  %v3635_v1 = vld [vmem:[#allocation4] sm:$0xf]  ;;  %v9070_v13 = vor.u32 %v10890_v10, %v9069_v43  ;;  %v9074_v14 = vor.u32 %v10888_v52, %v9071_v26  ;;  %v10875_v43 = vld [vmem:[%s17364_s5 + $0x54] sm:$0xf0]  ;;  %v10873_v10 = vld [vmem:[%s17364_s5 + $0x4c] sm:$0xf] }
 0x323   :  { %3528 = vmatmul.bf16.vlgmr.msrb.gmra.mxu2 %v3055_v57  ;;  %3541 = vmatmul.bf16.vlgmr.msrb.gmra.mxu3 %v3055_v57  ;;  %v9093_v57 = vld [vmem:[%s17364_s5 + $0xe8] sm:$0xf]  ;;  %v3548_v52 = vperm.slane %v14719_v62, 0 }
 0x324   :  { %3832 = vmatpush.bf16.msra.mxu0 %v8891_v38  ;;  %3845 = vmatpush.bf16.msra.mxu1 %v8895_v44  ;;  %v9094_v23 = vor.u32 %v10895_v50, %v9093_v57  ;;  %v9079_v38 = vld [vmem:[%s17364_s5 + $0xd8] sm:$0xf0]  ;;  %v9078_v44 = vor.u32 %v10891_v21, %v9077_v16  ;;  %v9005_v57 = vld [vmem:[%s17364_s5 + $0x40] sm:$0xf]  ;;  %v10874_v50 = vld [vmem:[%s17364_s5 + $0x4c] sm:$0xf0] }
 0x325   :  { %3858 = vmatpush.bf16.msra.mxu2 %v8899_v36  ;;  %3871 = vmatpush.bf16.msra.mxu3 %v8903_v60  ;;  %v9082_v25 = vor.u32 %v10889_v22, %v9079_v38  ;;  %v10886_v36 = vld [vmem:[%s17364_s5 + $0xac] sm:$0xf0]  ;;  %v10884_v60 = vld [vmem:[%s17364_s5 + $0xa4] sm:$0xf]  ;;  %v9006_v7 = vor.u32 %v10874_v50, %v9005_v57  ;;  %v9015_v16 = vld [vmem:[%s17364_s5 + $0x58] sm:$0xf0] }
 0x326   :  { %v9054_v28 = vor.u32 %v10886_v36, %v9053_v24  ;;  %v8989_v21 = vld [vmem:[%s17364_s5 + $0x20] sm:$0xf]  ;;  %v10870_v22 = vld [vmem:[%s17364_s5 + $0x2c] sm:$0xf0]  ;;  %v10868_v38 = vld [vmem:[%s17364_s5 + $0x24] sm:$0xf] }
 0x327   :  { %v8990_v24 = vor.u32 %v10870_v22, %v8989_v21  ;;  %v8991_v36 = vld [vmem:[%s17364_s5 + $0x30] sm:$0xf0]  ;;  %v10861_v57 = vld [vmem:[%s17363_s4 + $0xec] sm:$0xf]  ;;  %v9223_v50 = vld [vmem:[%s17363_s4 + $0xf8] sm:$0xf0] }
 0x328   :  { %3833 = vmatpush.bf16.msra.mxu0 %v8875_v34  ;;  %3846 = vmatpush.bf16.msra.mxu1 %v8879_v40  ;;  %v9058_v34 = vor.u32 %v10884_v60, %v9055_v18  ;;  %v9062_v40 = vor.u32 %v10887_v32, %v9061_v0  ;;  %v8997_v60 = vld [vmem:[%s17364_s5 + $0x28] sm:$0xf]  ;;  %v8994_v32 = vor.u32 %v10868_v38, %v8991_v36  ;;  %v10857_v38 = vld [vmem:[%s17363_s4 + $0xcc] sm:$0xf]  ;;  %v10854_v36 = vld [vmem:[%s17363_s4 + $0xac] sm:$0xf0] }
 0x329   :  { %3859 = vmatpush.bf16.msra.mxu2 %v8883_v49  ;;  %3872 = vmatpush.bf16.msra.mxu3 %v8887_v47  ;;  %v9066_v49 = vor.u32 %v10885_v39, %v9063_v48  ;;  %v9037_v47 = vld [vmem:[%s17364_s5 + $0x80] sm:$0xf] }
 0x32a   :  { %v9038_v42 = vor.u32 %v10882_v30, %v9037_v47  ;;  %v8999_v47 = vld [vmem:[%s17364_s5 + $0x38] sm:$0xf0] }
 0x32c   :  { %3834 = vmatpush.bf16.msra.mxu0 %v8859_v53  ;;  %3847 = vmatpush.bf16.msra.mxu1 %v8863_v54  ;;  %v9042_v53 = vor.u32 %v10880_v41, %v9039_v51  ;;  %v9046_v54 = vor.u32 %v10883_v29, %v9045_v45  ;;  %v8973_v41 = vld [vmem:[%s17364_s5] sm:$0xf]  ;;  %v8975_v29 = vld [vmem:[%s17364_s5 + $0x10] sm:$0xf0] }
 0x32d   :  { %3860 = vmatpush.bf16.msra.mxu2 %v8867_v11  ;;  %3873 = vmatpush.bf16.msra.mxu3 %v8871_v46  ;;  %v9050_v11 = vor.u32 %v10881_v55, %v9047_v35  ;;  %v9021_v46 = vld [vmem:[%s17364_s5 + $0x60] sm:$0xf] }
 0x32e   :  { %v9022_v17 = vor.u32 %v10878_v37, %v9021_v46  ;;  %v8983_v46 = vld [vmem:[%s17364_s5 + $0x18] sm:$0xf0]  ;;  %v9213_v37 = vld [vmem:[%s17363_s4 + $0xe0] sm:$0xf] }
 0x330   :  { %3835 = vmatpush.bf16.msra.mxu0 %v8843_v63  ;;  %3848 = vmatpush.bf16.msra.mxu1 %v8847_v58  ;;  %v9029_v63 = vld [vmem:[%s17364_s5 + $0x68] sm:$0xf]  ;;  %v10879_v58 = vld [vmem:[%s17364_s5 + $0x74] sm:$0xf0] }
 0x331   :  { %3861 = vmatpush.bf16.msra.mxu2 %v8851_v6  ;;  %3874 = vmatpush.bf16.msra.mxu3 %v8855_v31  ;;  %v9030_v2 = vor.u32 %v10879_v58, %v9029_v63  ;;  %v10862_v63 = vld [vmem:[%s17363_s4 + $0xec] sm:$0xf0] }
 0x332   :  { %v9214_v58 = vor.u32 %v10862_v63, %v9213_v37 }
 0x333   :  { %3836 = vmatmul.bf16.vlgmr.msra.gmra.mxu0 %v3635_v1  ;;  %3849 = vmatmul.bf16.vlgmr.msra.gmra.mxu1 %v3635_v1 }
 0x334   :  { %3862 = vmatmul.bf16.vlgmr.msra.gmra.mxu2 %v3635_v1  ;;  %3875 = vmatmul.bf16.vlgmr.msra.gmra.mxu3 %v3635_v1  ;;  %v9026_v1 = vor.u32 %v10876_v15, %v9023_v59 }
 0x335   :  { %4177 = vmatpush.bf16.msrb.mxu0 %v9086_v19  ;;  %4190 = vmatpush.bf16.msrb.mxu1 %v9090_v5  ;;  %v9034_v19 = vor.u32 %v10877_v3, %v9031_v4  ;;  %v10872_v5 = vld [vmem:[%s17364_s5 + $0x44] sm:$0xf] }
 0x336   :  { %4203 = vmatpush.bf16.msrb.mxu2 %v9094_v23  ;;  %4216 = vmatpush.bf16.msrb.mxu3 %v9098_v9  ;;  %v9007_v23 = vld [vmem:[%s17364_s5 + $0x50] sm:$0xf0]  ;;  %v9013_v9 = vld [vmem:[%s17364_s5 + $0x48] sm:$0xf] }
 0x337   :  { %v9010_v8 = vor.u32 %v10872_v5, %v9007_v23  ;;  %v9014_v26 = vor.u32 %v10875_v43, %v9013_v9  ;;  %v9197_v9 = vld [vmem:[%s17363_s4 + $0xc0] sm:$0xf]  ;;  %v10858_v43 = vld [vmem:[%s17363_s4 + $0xcc] sm:$0xf0] }
 0x339   :  { %4178 = vmatpush.bf16.msrb.mxu0 %v9070_v13  ;;  %4191 = vmatpush.bf16.msrb.mxu1 %v9074_v14  ;;  %v3549_v13 = vperm.slane %v14719_v62, 1  ;;  %v9018_v14 = vor.u32 %v10873_v10, %v9015_v16  ;;  %v10856_v10 = vld [vmem:[%s17363_s4 + $0xc4] sm:$0xf]  ;;  %v10859_v16 = vld [vmem:[%s17363_s4 + $0xd4] sm:$0xf0] }
 0x33a   :  { %4204 = vmatpush.bf16.msrb.mxu2 %v9078_v44  ;;  %4217 = vmatpush.bf16.msrb.mxu3 %v9082_v25 }
 0x33d   :  { %4179 = vmatpush.bf16.msrb.mxu0 %v9054_v28  ;;  %4192 = vmatpush.bf16.msrb.mxu1 %v9058_v34  ;;  %v10871_v28 = vld [vmem:[%s17364_s5 + $0x34] sm:$0xf0] }
 0x33e   :  { %4205 = vmatpush.bf16.msrb.mxu2 %v9062_v40  ;;  %4218 = vmatpush.bf16.msrb.mxu3 %v9066_v49  ;;  %v8998_v34 = vor.u32 %v10871_v28, %v8997_v60  ;;  %v10869_v40 = vld [vmem:[%s17364_s5 + $0x2c] sm:$0xf]  ;;  %v3551_v49 = vperm.slane %v14719_v62, 3  ;;  %v10852_v60 = vld [vmem:[%s17363_s4 + $0xa4] sm:$0xf] }
 0x33f   :  { %v9002_v30 = vor.u32 %v10869_v40, %v8999_v47 }
 0x341   :  { %4180 = vmatpush.bf16.msrb.mxu0 %v9038_v42  ;;  %4193 = vmatpush.bf16.msrb.mxu1 %v9042_v53  ;;  %v10866_v42 = vld [vmem:[%s17364_s5 + $0xc] sm:$0xf0]  ;;  %v8981_v53 = vld [vmem:[%s17364_s5 + $0x8] sm:$0xf] }
 0x342   :  { %4206 = vmatpush.bf16.msrb.mxu2 %v9046_v54  ;;  %4219 = vmatpush.bf16.msrb.mxu3 %v9050_v11  ;;  %v8974_v45 = vor.u32 %v10866_v42, %v8973_v41  ;;  %v10867_v54 = vld [vmem:[%s17364_s5 + $0x14] sm:$0xf0]  ;;  %v10865_v11 = vld [vmem:[%s17364_s5 + $0xc] sm:$0xf] }
 0x343   :  { %v8982_v35 = vor.u32 %v10867_v54, %v8981_v53  ;;  %v8986_v59 = vor.u32 %v10865_v11, %v8983_v46  ;;  %v8837_v53 = vld [vmem:[%s17359_s0 + $0x88] sm:$0xff]  ;;  %v9167_v46 = vld [vmem:[%s17363_s4 + $0x90] sm:$0xf0] }
 0x345   :  { %4181 = vmatpush.bf16.msrb.mxu0 %v9022_v17  ;;  %4194 = vmatpush.bf16.msrb.mxu1 %v9026_v1  ;;  %v9221_v1 = vld [vmem:[%s17363_s4 + $0xe8] sm:$0xf] }
 0x346   :  { %4207 = vmatpush.bf16.msrb.mxu2 %v9030_v2  ;;  %4220 = vmatpush.bf16.msrb.mxu3 %v9034_v19  ;;  %v10863_v19 = vld [vmem:[%s17363_s4 + $0xf4] sm:$0xf0] }
 0x349   :  { %4182 = vmatpush.bf16.msrb.mxu0 %v9006_v7  ;;  %4195 = vmatpush.bf16.msrb.mxu1 %v9010_v8  ;;  %v9222_v8 = vor.u32 %v10863_v19, %v9221_v1  ;;  %v9175_v1 = vld [vmem:[%s17363_s4 + $0x98] sm:$0xf0] }
 0x34a   :  { %4208 = vmatpush.bf16.msrb.mxu2 %v9014_v26  ;;  %4221 = vmatpush.bf16.msrb.mxu3 %v9018_v14  ;;  %v9205_v26 = vld [vmem:[%s17363_s4 + $0xc8] sm:$0xf]  ;;  %v8839_v19 = vld [vmem:[%s17359_s0 + $0x98] sm:$0xff] }
 0x34b   :  { %v9206_v22 = vor.u32 %v10859_v16, %v9205_v26 }
 0x34d   :  { %4183 = vmatpush.bf16.msrb.mxu0 %v8990_v24  ;;  %4196 = vmatpush.bf16.msrb.mxu1 %v8994_v32  ;;  %v9181_v24 = vld [vmem:[%s17363_s4 + $0xa0] sm:$0xf]  ;;  %v9189_v32 = vld [vmem:[%s17363_s4 + $0xa8] sm:$0xf] }
 0x34e   :  { %4209 = vmatpush.bf16.msrb.mxu2 %v8998_v34  ;;  %4222 = vmatpush.bf16.msrb.mxu3 %v9002_v30 }
 0x351   :  { %4184 = vmatpush.bf16.msrb.mxu0 %v8974_v45 }
 0x352   :  { %4210 = vmatpush.bf16.msrb.mxu2 %v8982_v35  ;;  %4223 = vmatpush.bf16.msrb.mxu3 %v8986_v59  ;;  %v10851_v59 = vld [vmem:[%s17363_s4 + $0x94] sm:$0xf0] }
 0x355   :  { %4389 = vmatpush.bf16.msra.mxu0 %v9214_v58 }
 0x356   :  { %4415 = vmatpush.bf16.msra.mxu2 %v9222_v8 }
 0x35a   :  { %4416 = vmatpush.bf16.msra.mxu2 %v9206_v22  ;;  %v10845_v22 = vld [vmem:[%s17363_s4 + $0x6c] sm:$0xf] }
 0x38f   :  { %v14654_v33 = vpop.f32.mrf.mxu0  ;;  %v14656_v20 = vpop.f32.mrf.mxu1 }
 0x396   :  { %v14697_v12 = vpop.f32.mrf.mxu2  ;;  %v14699_v56 = vpop.f32.mrf.mxu3 }
 0x397   :  { %v3293_v6 = vpop.f32.mrf.mxu0  ;;  %v3306_v31 = vpop.f32.mrf.mxu1 }
 0x398   :  { %v10860_v6 = vld [vmem:[%s17363_s4 + $0xe4] sm:$0xf]  ;;  %v9215_v31 = vld [vmem:[%s17363_s4 + $0xf0] sm:$0xf0] }
 0x399   :  { %v9218_v4 = vor.u32 %v10860_v6, %v9215_v31  ;;  %v10849_v31 = vld [vmem:[%s17363_s4 + $0x8c] sm:$0xf] }
 0x39e   :  { %v3319_v44 = vpop.f32.mrf.mxu2  ;;  %v3332_v25 = vpop.f32.mrf.mxu3 }
 0x39f   :  { %v3503_v18 = vpop.f32.mrf.mxu0  ;;  %v3516_v0 = vpop.f32.mrf.mxu1  ;;  %v9207_v44 = vld [vmem:[%s17363_s4 + $0xd8] sm:$0xf0] }
 0x3a0   :  { %v3504_v39 = vadd.f32 %v3503_v18, %v14654_v33  ;;  %v3517_v48 = vadd.f32 %v3516_v0, %v14656_v20  ;;  %v10864_v33 = vld [vmem:[%s17364_s5 + $0x4] sm:$0xf]  ;;  %v9210_v25 = vor.u32 %v10857_v38, %v9207_v44  ;;  %v9182_v18 = vor.u32 %v10854_v36, %v9181_v24  ;;  %v9183_v0 = vld [vmem:[%s17363_s4 + $0xb0] sm:$0xf0]  ;;  %v9159_v24 = vld [vmem:[%s17363_s4 + $0x78] sm:$0xf0] }
 0x3a1   :  { %v8978_v55 = vor.u32 %v10864_v33, %v8975_v29  ;;  %v9186_v40 = vor.u32 %v10852_v60, %v9183_v0  ;;  %v8836_v29 = vld [vmem:[%s17359_s0 + $0x80] sm:$0xff]  ;;  %v10842_v60 = vld [vmem:[%s17363_s4 + $0x4c] sm:$0xf0] }
 0x3a2   :  { %v3556_v20 = vadd.f32 %v3548_v52, %v3504_v39  ;;  %v3557_v51 = vadd.f32 %v3549_v13, %v3517_v48  ;;  %v9226_v52 = vor.u32 %v10861_v57, %v9223_v50  ;;  %v9199_v13 = vld [vmem:[%s17363_s4 + $0xd0] sm:$0xf0]  ;;  %v10855_v39 = vld [vmem:[%s17363_s4 + $0xb4] sm:$0xf0]  ;;  %v10853_v48 = vld [vmem:[%s17363_s4 + $0xac] sm:$0xf]  ;;  %v9178_v50 = vor.u32 %v10849_v31, %v9175_v1 }
 0x3a3   :  { %4197 = vmatpush.bf16.msrb.mxu1 %v8978_v55  ;;  %v9202_v21 = vor.u32 %v10856_v10, %v9199_v13  ;;  %v9190_v41 = vor.u32 %v10855_v39, %v9189_v32  ;;  %v10848_v55 = vld [vmem:[%s17363_s4 + $0x84] sm:$0xf]  ;;  %v9151_v13 = vld [vmem:[%s17363_s4 + $0x70] sm:$0xf0]  ;;  %v9133_v36 = vld [vmem:[%s17363_s4 + $0x40] sm:$0xf] }
 0x3a4   :  { %v8832_v15 = vmul.f32 -1.442695, %v3556_v20  ;;  %v8833_v17 = vmul.f32 -1.442695, %v3557_v51  ;;  %4428 = vmatpush.bf16.msra.mxu3 %v9226_v52  ;;  %v3550_v20 = vperm.slane %v14719_v62, 2  ;;  %v9170_v6 = vor.u32 %v10848_v55, %v9167_v46 }
 0x3a5   :  { %v10850_v62 = vld [vmem:[%s17363_s4 + $0x8c] sm:$0xf0]  ;;  %4417 = vmatpush.bf16.msra.mxu2 %v9190_v41  ;;  %v9135_v39 = vld [vmem:[%s17363_s4 + $0x50] sm:$0xf0]  ;;  %v9141_v41 = vld [vmem:[%s17363_s4 + $0x48] sm:$0xf] }
 0x3a6   :  { %11305 = vpow2.f32 %v8832_v15  ;;  %v3529_v2 = vpop.f32.mrf.mxu2  ;;  %v3542_v3 = vpop.f32.mrf.mxu3 }
 0x3a7   :  { %11307 = vpow2.f32 %v8833_v17  ;;  %v3543_v5 = vadd.f32 %v3542_v3, %v14699_v56  ;;  %v3505_v23 = vpop.f32.mrf.mxu0  ;;  %v3518_v7 = vpop.f32.mrf.mxu1  ;;  %4402 = vmatpush.bf16.msra.mxu1 %v9218_v4  ;;  %v9198_v56 = vor.u32 %v10858_v43, %v9197_v9  ;;  %v3530_v33 = vadd.f32 %v3529_v2, %v14697_v12  ;;  %v9165_v12 = vld [vmem:[%s17363_s4 + $0x80] sm:$0xf]  ;;  %v9173_v17 = vld [vmem:[%s17363_s4 + $0x88] sm:$0xf]  ;;  %v10846_v9 = vld [vmem:[%s17363_s4 + $0x6c] sm:$0xf0] }
 0x3a8   :  { %4429 = vmatpush.bf16.msra.mxu3 %v9210_v25  ;;  %v9166_v58 = vor.u32 %v10850_v62, %v9165_v12  ;;  %v9174_v57 = vor.u32 %v10851_v59, %v9173_v17  ;;  %v9162_v12 = vor.u32 %v10845_v22, %v9159_v24  ;;  %v9134_v62 = vor.u32 %v10842_v60, %v9133_v36  ;;  %v9101_v36 = vld [vmem:[%s17363_s4] sm:$0xf]  ;;  %v10834_v60 = vld [vmem:[%s17363_s4 + $0xc] sm:$0xf0] }
 0x3a9   :  { %v3559_v14 = vadd.f32 %v3551_v49, %v3543_v5  ;;  %4390 = vmatpush.bf16.msra.mxu0 %v9198_v56  ;;  %v9191_v49 = vld [vmem:[%s17363_s4 + $0xb8] sm:$0xf0]  ;;  %v3558_v63 = vadd.f32 %v3550_v20, %v3530_v33  ;;  %v9149_v5 = vld [vmem:[%s17363_s4 + $0x60] sm:$0xf]  ;;  %v10844_v56 = vld [vmem:[%s17363_s4 + $0x64] sm:$0xf] }
 0x3aa   :  { %v9194_v54 = vor.u32 %v10853_v48, %v9191_v49  ;;  %4418 = vmatpush.bf16.msra.mxu2 %v9174_v57  ;;  %v9150_v52 = vor.u32 %v10846_v9, %v9149_v5  ;;  %v9117_v5 = vld [vmem:[%s17363_s4 + $0x20] sm:$0xf]  ;;  %v10836_v9 = vld [vmem:[%s17363_s4 + $0x24] sm:$0xf] }
 0x3ab   :  { %v8834_v28 = vmul.f32 -1.442695, %v3559_v14  ;;  %4403 = vmatpush.bf16.msra.mxu1 %v9202_v21  ;;  %v9157_v14 = vld [vmem:[%s17363_s4 + $0x68] sm:$0xf]  ;;  %v10847_v21 = vld [vmem:[%s17363_s4 + $0x74] sm:$0xf0] }
 0x3ac   :  { %v11306_v34 = vpop.eup %11305  ;;  %4430 = vmatpush.bf16.msra.mxu3 %v9194_v54 }
 0x3ad   :  { %v11308_v47 = vpop.eup %11307  ;;  %v14871_v30 = vadd.f32 1.0, %v11306_v34  ;;  %11309 = vpow2.f32 %v8834_v28  ;;  %4391 = vmatpush.bf16.msra.mxu0 %v9182_v18 }
 0x3ae   :  { %v14873_v42 = vadd.f32 1.0, %v11308_v47  ;;  %v3531_v51 = vpop.f32.mrf.mxu2  ;;  %v3544_v45 = vpop.f32.mrf.mxu3  ;;  %v9154_v47 = vor.u32 %v10844_v56, %v9151_v13  ;;  %v10839_v13 = vld [vmem:[%s17363_s4 + $0x34] sm:$0xf0] }
 0x3af   :  { %11311 = vrcp.f32 %v14871_v30  ;;  %4404 = vmatpush.bf16.msra.mxu1 %v9186_v40  ;;  %v3574_v3 = vand.u32 2147483647, %v14871_v30  ;;  %v3576_v23 = vand.u32 2147483648, %v14871_v30  ;;  %vm3570_vm5 = vweird.f32 %v14871_v30  ;;  %v10840_v40 = vld [vmem:[%s17363_s4 + $0x44] sm:$0xf] }
 0x3b0   :  { %11313 = vrcp.f32 %v14873_v42  ;;  %v3837_v35 = vpop.f32.mrf.mxu0  ;;  %v3850_v11 = vpop.f32.mrf.mxu1  ;;  %v3593_v10 = vand.u32 2147483647, %v14873_v42  ;;  %4431 = vmatpush.bf16.msra.mxu3 %v9178_v50  ;;  %vm3589_vm4 = vweird.f32 %v14873_v42  ;;  %v3595_v18 = vand.u32 2147483648, %v14873_v42  ;;  %v10843_v45 = vld [vmem:[%s17363_s4 + $0x54] sm:$0xf0] }
 0x3b1   :  { %v3880_v37 = vadd.f32 %v8836_v29, %v3837_v35  ;;  %v3881_v15 = vadd.f32 %v8837_v53, %v3850_v11  ;;  %4392 = vmatpush.bf16.msra.mxu0 %v9166_v58  ;;  %vm14968_vm7 = vcmp.eq.f32.partialorder %v3574_v3, 8.507059e+37  ;;  %v9158_v51 = vor.u32 %v10847_v21, %v9157_v14  ;;  %v10841_v29 = vld [vmem:[%s17363_s4 + $0x4c] sm:$0xf]  ;;  %v9143_v35 = vld [vmem:[%s17363_s4 + $0x58] sm:$0xf0]  ;;  %v8838_v21 = vld [vmem:[%s17359_s0 + $0x90] sm:$0xff] }
 0x3b2   :  { %v9138_v55 = vor.u32 %v10840_v40, %v9135_v39  ;;  %v3577_v59 = vor.u32 1.1754944e-38, %v3576_v23  ;;  %v3596_v1 = vor.u32 1.1754944e-38, %v3595_v18  ;;  %vm3594_vm11 = vcmp.eq.f32.partialorder %v3593_v10, 8.507059e+37  ;;  %v9125_v10 = vld [vmem:[%s17363_s4 + $0x28] sm:$0xf] }
 0x3b3   :  { %v11310_v2 = vpop.eup %11309  ;;  %v8968_v4 = vmul.f32 -1.442695, %v3880_v37  ;;  %v8969_v8 = vmul.f32 -1.442695, %v3881_v15  ;;  %4405 = vmatpush.bf16.msra.mxu1 %v9170_v6  ;;  %4419 = vmatpush.bf16.msra.mxu2 %v9158_v51  ;;  %v9142_v15 = vor.u32 %v10843_v45, %v9141_v41  ;;  %v9146_v6 = vor.u32 %v10841_v29, %v9143_v35  ;;  %v9103_v40 = vld [vmem:[%s17363_s4 + $0x10] sm:$0xf0] }
 0x3b4   :  { %v14917_v7 = vadd.f32 1.0, %v11310_v2  ;;  %4432 = vmatpush.bf16.msra.mxu3 %v9162_v12  ;;  %v9109_v39 = vld [vmem:[%s17363_s4 + $0x8] sm:$0xf]  ;;  %v10833_v41 = vld [vmem:[%s17363_s4 + $0xc] sm:$0xf] }
 0x3b5   :  { %v14922_v43 = vpop.eup %11311  ;;  %11315 = vpow2.f32 %v8968_v4  ;;  %4393 = vmatpush.bf16.msra.mxu0 %v9150_v52 }
 0x3b6   :  { %v14931_v26 = vpop.eup %11313  ;;  %v3566_v16 = vmul.f32 %v14922_v43, %v14871_v30  ;;  %11317 = vrcp.f32 %v14917_v7  ;;  %vm3571_vm6 = vweird.f32 %v14922_v43  ;;  %vm3609_vm13 = vweird.f32 %v14917_v7 }
 0x3b7   :  { %v3585_v38 = vmul.f32 %v14931_v26, %v14873_v42  ;;  %11319 = vtanh.f32 %v3558_v63  ;;  %v14949_v44 = vpop.f32.mrf.mxu2  ;;  %v3876_v25 = vpop.f32.mrf.mxu3  ;;  %vm3590_vm8 = vweird.f32 %v14931_v26  ;;  %4406 = vmatpush.bf16.msra.mxu1 %v9154_v47  ;;  %vm3572_vm9 = vmor %vm3570_vm5, %vm3571_vm6  ;;  %v10838_v42 = vld [vmem:[%s17363_s4 + $0x2c] sm:$0xf0]  ;;  %4420 = vmatpush.bf16.msra.mxu2 %v9142_v15  ;;  %v10835_v47 = vld [vmem:[%s17363_s4 + $0x14] sm:$0xf0] }
 0x3b8   :  { %v3567_v28 = vsub.f32 1.0, %v3566_v16  ;;  %11321 = vpow2.f32 %v8969_v8  ;;  %v3883_v0 = vadd.f32 %v8839_v19, %v3876_v25  ;;  %v3839_v32 = vpop.f32.mrf.mxu0  ;;  %v3852_v34 = vpop.f32.mrf.mxu1  ;;  %vm3591_vm10 = vmor %vm3589_vm4, %vm3590_vm8  ;;  %4433 = vmatpush.bf16.msra.mxu3 %v9146_v6  ;;  %v9127_v16 = vld [vmem:[%s17363_s4 + $0x38] sm:$0xf0]  ;;  %v9118_v22 = vor.u32 %v10838_v42, %v9117_v5 }
 0x3b9   :  { %v3586_v48 = vsub.f32 1.0, %v3585_v38  ;;  %4394 = vmatpush.bf16.msra.mxu0 %v9134_v62  ;;  %v10832_v34 = vld [vmem:[%s17363_s4 + $0x4] sm:$0xf]  ;;  %v3882_v49 = vadd.f32 %v8838_v21, %v14949_v44  ;;  %v9359_v21 = vld [vmem:[%s17362_s3 + $0xf8] sm:$0xf0] }
 0x3ba   :  { %v3568_v33 = vmul.f32 %v14922_v43, %v3567_v28  ;;  %v8970_v20 = vmul.f32 -1.442695, %v3883_v0  ;;  %v9126_v0 = vor.u32 %v10839_v13, %v9125_v10  ;;  %v9106_v12 = vor.u32 %v10832_v34, %v9103_v40  ;;  %v10924_v13 = vld [vmem:[%s17362_s3 + $0xe4] sm:$0xf]  ;;  %v9335_v34 = vld [vmem:[%s17362_s3 + $0xd0] sm:$0xf0] }
 0x3bb   :  { %v11316_v53 = vpop.eup %11315  ;;  %v3587_v54 = vmul.f32 %v14931_v26, %v3586_v48  ;;  %4407 = vmatpush.bf16.msra.mxu1 %v9138_v55  ;;  %v9110_v55 = vor.u32 %v10835_v47, %v9109_v39  ;;  %v10923_v47 = vld [vmem:[%s17362_s3 + $0xd4] sm:$0xf0] }
 0x3bc   :  { %v14987_v11 = vpop.eup %11317  ;;  %v3569_v46 = vadd.f32 %v14922_v43, %v3568_v33  ;;  %v14990_v37 = vadd.f32 1.0, %v11316_v53  ;;  %11323 = vpow2.f32 %v8970_v20  ;;  %v9111_v33 = vld [vmem:[%s17363_s4 + $0x18] sm:$0xf0]  ;;  %v3613_v20 = vand.u32 2147483647, %v14917_v7  ;;  %4421 = vmatpush.bf16.msra.mxu2 %v9126_v0 }
 0x3bd   :  { %v11320_v17 = vpop.eup %11319  ;;  %v3588_v63 = vadd.f32 %v14931_v26, %v3587_v54  ;;  %v3605_v58 = vmul.f32 %v14987_v11, %v14917_v7  ;;  %vm3610_vm12 = vweird.f32 %v14987_v11  ;;  %4395 = vmatpush.bf16.msra.mxu0 %v9118_v22  ;;  %v9102_v54 = vor.u32 %v10834_v60, %v9101_v36  ;;  %v9333_v36 = vld [vmem:[%s17362_s3 + $0xc0] sm:$0xf]  ;;  %v10922_v0 = vld [vmem:[%s17362_s3 + $0xcc] sm:$0xf0] }
 0x3be   :  { %v11322_v31 = vpop.eup %11321  ;;  %v3573_v2 = vsel %vm3572_vm9, %v14922_v43, %v3569_v46  ;;  %11325 = vrcp.f32 %v14990_v37  ;;  %v9119_v43 = vld [vmem:[%s17363_s4 + $0x30] sm:$0xf0]  ;;  %vm15083_vm14 = vmor %vm3609_vm13, %vm3610_vm12  ;;  %v3900_v53 = vand.u32 2147483648, %v14990_v37  ;;  %v9114_v35 = vor.u32 %v10833_v41, %v9111_v33  ;;  %v9343_v33 = vld [vmem:[%s17362_s3 + $0xd8] sm:$0xf0] }
 0x3bf   :  { %v3578_v30 = vsel %vm14968_vm7, %v3577_v59, %v3573_v2  ;;  %v3592_v3 = vsel %vm3591_vm10, %v14931_v26, %v3588_v63  ;;  %v3606_v4 = vsub.f32 1.0, %v3605_v58  ;;  %v15012_v19 = vadd.f32 1.0, %v11322_v31  ;;  %v3865_v57 = vpop.f32.mrf.mxu2  ;;  %v3878_v50 = vpop.f32.mrf.mxu3  ;;  %v10837_v26 = vld [vmem:[%s17363_s4 + $0x2c] sm:$0xf] }
 0x3c0   :  { %v3597_v23 = vsel %vm3594_vm11, %v3596_v1, %v3592_v3  ;;  %v3620_v8 = vmul.f32 %v11320_v17, %v3578_v30  ;;  %v9122_v24 = vor.u32 %v10836_v9, %v9119_v43  ;;  %v9130_v32 = vor.u32 %v10837_v26, %v9127_v16  ;;  %4422 = vmatpush.bf16.msra.mxu2 %v9110_v55  ;;  %v9351_v26 = vld [vmem:[%s17362_s3 + $0xf0] sm:$0xf0]  ;;  %v9325_v55 = vld [vmem:[%s17362_s3 + $0xa8] sm:$0xf] }
 0x3c1   :  { %v3619_v52 = vmul.f32 %v3597_v23, %v14322_v27  ;;  %v3607_v56 = vmul.f32 %v14987_v11, %v3606_v4  ;;  %11327 = vrcp.f32 %v15012_v19  ;;  %v3615_v27 = vand.u32 2147483648, %v14917_v7  ;;  %4396 = vmatpush.bf16.msra.mxu0 %v9102_v54  ;;  %v10916_v54 = vld [vmem:[%s17362_s3 + $0xa4] sm:$0xf] }
 0x3c2   :  { %v11324_v14 = vpop.eup %11323  ;;  %4408 = vmatpush.bf16.msra.mxu1 %v9122_v24  ;;  %4434 = vmatpush.bf16.msra.mxu3 %v9130_v32  ;;  %v3898_v15 = vand.u32 2147483647, %v14990_v37  ;;  %vm3614_vm0 = vcmp.eq.f32.partialorder %v3613_v20, 8.507059e+37  ;;  %vm3894_vm1 = vweird.f32 %v14990_v37  ;;  %v3901_v6 = vor.u32 1.1754944e-38, %v3900_v53  ;;  %v10920_v32 = vld [vmem:[%s17362_s3 + $0xc4] sm:$0xf] }
 0x3c3   :  { %v15045_v38 = vadd.f32 %v3620_v8, %v3619_v52  ;;  %v15047_v25 = vadd.f32 1.0, %v11324_v14  ;;  %v3608_v18 = vadd.f32 %v14987_v11, %v3607_v56  ;;  %v3616_v51 = vor.u32 1.1754944e-38, %v3615_v27  ;;  %v10926_v56 = vld [vmem:[%s17362_s3 + $0xec] sm:$0xf0]  ;;  %v10927_v14 = vld [vmem:[%s17362_s3 + $0xf4] sm:$0xf0] }
 0x3c4   :  { %v11326_v28 = vpop.eup %11325  ;;  %v3917_v30 = vand.u32 2147483647, %v15012_v19  ;;  %vm3899_vm4 = vcmp.eq.f32.partialorder %v3898_v15, 8.507059e+37  ;;  %vm3913_vm5 = vweird.f32 %v15012_v19  ;;  %v10925_v27 = vld [vmem:[%s17362_s3 + $0xec] sm:$0xf]  ;;  %v9338_v45 = vor.u32 %v10920_v32, %v9335_v34 }
 0x3c5   :  { %11329 = vtanh.f32 %v15045_v38  ;;  %v3890_v48 = vmul.f32 %v11326_v28, %v14990_v37  ;;  %v3612_v7 = vsel %vm15083_vm14, %v14987_v11, %v3608_v18  ;;  %vm3895_vm15 = vweird.f32 %v11326_v28  ;;  %v10918_v53 = vld [vmem:[%s17362_s3 + $0xac] sm:$0xf0]  ;;  %v10917_v15 = vld [vmem:[%s17362_s3 + $0xac] sm:$0xf]  ;;  %v9279_v34 = vld [vmem:[%s17362_s3 + $0x58] sm:$0xf0] }
 0x3c6   :  { %11331 = vrcp.f32 %v15047_v25  ;;  %4409 = vmatpush.bf16.msra.mxu1 %v9106_v12  ;;  %4435 = vmatpush.bf16.msra.mxu3 %v9114_v35  ;;  %v3617_v63 = vsel %vm3614_vm0, %v3616_v51, %v3612_v7  ;;  %v3919_v11 = vand.u32 2147483648, %v15012_v19  ;;  %vm3896_vm3 = vmor %vm3894_vm1, %vm3895_vm15  ;;  %vm3918_vm7 = vcmp.eq.f32.partialorder %v3917_v30, 8.507059e+37  ;;  %v10912_v30 = vld [vmem:[%s17362_s3 + $0x84] sm:$0xf]  ;;  %v10905_v32 = vld [vmem:[%s17362_s3 + $0x4c] sm:$0xf] }
 0x3c7   :  { %v11328_v44 = vpop.eup %11327  ;;  %v3891_v29 = vsub.f32 1.0, %v3890_v48  ;;  %11333 = vtanh.f32 %v3882_v49  ;;  %v3937_v22 = vand.u32 2147483647, %v15047_v25  ;;  %v3939_v24 = vand.u32 2147483648, %v15047_v25  ;;  %v9341_v49 = vld [vmem:[%s17362_s3 + $0xc8] sm:$0xf] }
 0x3c8   :  { %v3909_v62 = vmul.f32 %v11328_v44, %v15012_v19  ;;  %vm3914_vm2 = vweird.f32 %v11328_v44  ;;  %v3920_v42 = vor.u32 1.1754944e-38, %v3919_v11  ;;  %v9349_v19 = vld [vmem:[%s17362_s3 + $0xe0] sm:$0xf]  ;;  %v9354_v18 = vor.u32 %v10924_v13, %v9351_v26  ;;  %v10911_v13 = vld [vmem:[%s17362_s3 + $0x74] sm:$0xf0] }
 0x3c9   :  { %v3892_v46 = vmul.f32 %v11326_v28, %v3891_v29  ;;  %vm3915_vm6 = vmor %vm3913_vm5, %vm3914_vm2  ;;  %vm3933_vm9 = vweird.f32 %v15047_v25  ;;  %v9362_v48 = vor.u32 %v10925_v27, %v9359_v21  ;;  %v3940_v20 = vor.u32 1.1754944e-38, %v3939_v24  ;;  %v9317_v29 = vld [vmem:[%s17362_s3 + $0xa0] sm:$0xf]  ;;  %v10909_v26 = vld [vmem:[%s17362_s3 + $0x6c] sm:$0xf] }
 0x3ca   :  { %v3910_v17 = vsub.f32 1.0, %v3909_v62  ;;  %v9342_v12 = vor.u32 %v10923_v47, %v9341_v49  ;;  %v9319_v62 = vld [vmem:[%s17362_s3 + $0xb0] sm:$0xf0]  ;;  %vm3938_vm11 = vcmp.eq.f32.partialorder %v3937_v22, 8.507059e+37  ;;  %v9318_v11 = vor.u32 %v10918_v53, %v9317_v29  ;;  %v9269_v21 = vld [vmem:[%s17362_s3 + $0x40] sm:$0xf] }
 0x3cb   :  { %v11330_v59 = vpop.eup %11329  ;;  %v3893_v58 = vadd.f32 %v11326_v28, %v3892_v46  ;;  %v10919_v46 = vld [vmem:[%s17362_s3 + $0xb4] sm:$0xf0]  ;;  %v10906_v22 = vld [vmem:[%s17362_s3 + $0x4c] sm:$0xf0]  ;;  %v9282_v41 = vor.u32 %v10905_v32, %v9279_v34 }
 0x3cc   :  { %v15095_v31 = vpop.eup %11331  ;;  %v3623_v1 = vmul.f32 %v11330_v59, %v3617_v63  ;;  %v3911_v2 = vmul.f32 %v11328_v44, %v3910_v17  ;;  %v9327_v17 = vld [vmem:[%s17362_s3 + $0xb8] sm:$0xf0]  ;;  %v10902_v49 = vld [vmem:[%s17362_s3 + $0x2c] sm:$0xf0] }
 0x3cd   :  { %v3897_v3 = vsel %vm3896_vm3, %v11326_v28, %v3893_v58  ;;  %v3929_v37 = vmul.f32 %v15095_v31, %v15047_v25  ;;  %v11334_v5 = vpop.eup %11333  ;;  %vm3934_vm8 = vweird.f32 %v15095_v31  ;;  %v9350_v28 = vor.u32 %v10926_v56, %v9349_v19  ;;  %v10921_v25 = vld [vmem:[%s17362_s3 + $0xcc] sm:$0xf]  ;;  %v9287_v19 = vld [vmem:[%s17362_s3 + $0x70] sm:$0xf0]  ;;  %v9293_v56 = vld [vmem:[%s17362_s3 + $0x68] sm:$0xf] }
 0x3ce   :  { %v3626_v4 = vpack.c.bf16 %v3623_v1, %v3623_v1  ;;  %v3902_v57 = vsel %vm3899_vm4, %v3901_v6, %v3897_v3  ;;  %v3912_v50 = vadd.f32 %v11328_v44, %v3911_v2  ;;  %vm15159_vm10 = vmor %vm3933_vm9, %vm3934_vm8  ;;  %v9346_v7 = vor.u32 %v10921_v25, %v9343_v33  ;;  %v9301_v6 = vld [vmem:[%s17362_s3 + $0x80] sm:$0xf]  ;;  %v9303_v3 = vld [vmem:[%s17362_s3 + $0x90] sm:$0xf0] }
 0x3cf   :  { %v3930_v23 = vsub.f32 1.0, %v3929_v37  ;;  %v3944_v9 = vmul.f32 %v11334_v5, %v3902_v57  ;;  %v9322_v58 = vor.u32 %v10916_v54, %v9319_v62  ;;  %v9326_v1 = vor.u32 %v10919_v46, %v9325_v55  ;;  %v9309_v37 = vld [vmem:[%s17362_s3 + $0x88] sm:$0xf]  ;;  %v10915_v57 = vld [vmem:[%s17362_s3 + $0x94] sm:$0xf0] }
 0x3d0   :  { %3627 = vst [vmem:[#allocation4 + $0x4] sm:$0xf] %v3626_v4  ;;  %v3916_v8 = vsel %vm3915_vm6, %v11328_v44, %v3912_v50  ;;  %v9334_v44 = vor.u32 %v10922_v0, %v9333_v36  ;;  %v9330_v2 = vor.u32 %v10917_v15, %v9327_v17  ;;  %v10913_v50 = vld [vmem:[%s17362_s3 + $0x8c] sm:$0xf]  ;;  %v9311_v5 = vld [vmem:[%s17362_s3 + $0x98] sm:$0xf0]  ;;  %v9294_v24 = vor.u32 %v10911_v13, %v9293_v56 }
 0x3d1   :  { %8835 = vst [vmem:[%s17366_s7 + $0xc] sm:$0xf] %v3626_v4  ;;  %v3921_v43 = vsel %vm3918_vm7, %v3920_v42, %v3916_v8  ;;  %v3931_v10 = vmul.f32 %v15095_v31, %v3930_v23  ;;  %v9306_v23 = vor.u32 %v10912_v30, %v9303_v3  ;;  %v9285_v8 = vld [vmem:[%s17362_s3 + $0x60] sm:$0xf]  ;;  %v10907_v0 = vld [vmem:[%s17362_s3 + $0x54] sm:$0xf0] }
 0x3d2   :  { %v3943_v52 = vmul.f32 %v3921_v43, %v14394_v61  ;;  %v9357_v61 = vld [vmem:[%s17362_s3 + $0xe8] sm:$0xf]  ;;  %v9310_v43 = vor.u32 %v10915_v57, %v9309_v37  ;;  %v10900_v25 = vld [vmem:[%s17362_s3 + $0x24] sm:$0xf]  ;;  %v9255_v33 = vld [vmem:[%s17362_s3 + $0x30] sm:$0xf0] }
 0x3d3   :  { %v3932_v60 = vadd.f32 %v15095_v31, %v3931_v10  ;;  %v9358_v39 = vor.u32 %v10927_v14, %v9357_v61  ;;  %v9314_v10 = vor.u32 %v10913_v50, %v9311_v5  ;;  %v9295_v61 = vld [vmem:[%s17362_s3 + $0x78] sm:$0xf0]  ;;  %v9258_v53 = vor.u32 %v10900_v25, %v9255_v33  ;;  %v9237_v54 = vld [vmem:[%s17362_s3] sm:$0xf]  ;;  %v10896_v55 = vld [vmem:[%s17362_s3 + $0x4] sm:$0xf] }
 0x3d4   :  { %v15122_v16 = vadd.f32 %v3944_v9, %v3943_v52  ;;  %v10910_v9 = vld [vmem:[%s17362_s3 + $0x6c] sm:$0xf0]  ;;  %v10908_v52 = vld [vmem:[%s17362_s3 + $0x64] sm:$0xf]  ;;  %v9298_v36 = vor.u32 %v10909_v26, %v9295_v61  ;;  %v9245_v46 = vld [vmem:[%s17362_s3 + $0x8] sm:$0xf] }
 0x3d5   :  { %v3936_v51 = vsel %vm15159_vm10, %v15095_v31, %v3932_v60  ;;  %v10914_v31 = vld [vmem:[%s17362_s3 + $0x8c] sm:$0xf0]  ;;  %v9286_v14 = vor.u32 %v10910_v9, %v9285_v8  ;;  %v9290_v27 = vor.u32 %v10908_v52, %v9287_v19  ;;  %v10904_v60 = vld [vmem:[%s17362_s3 + $0x44] sm:$0xf]  ;;  %v10899_v15 = vld [vmem:[%s17362_s3 + $0x14] sm:$0xf0] }
 0x3d6   :  { %11335 = vtanh.f32 %v15122_v16  ;;  %v3941_v59 = vsel %vm3938_vm11, %v3940_v20, %v3936_v51  ;;  %v9302_v42 = vor.u32 %v10914_v31, %v9301_v6  ;;  %v9261_v20 = vld [vmem:[%s17362_s3 + $0x28] sm:$0xf]  ;;  %v10903_v51 = vld [vmem:[%s17362_s3 + $0x34] sm:$0xf0]  ;;  %v10897_v17 = vld [vmem:[%s17362_s3 + $0xc] sm:$0xf] }
 0x3d7   :  { %v3984_v40 = vld [vmem:[#allocation4 + $0x4] sm:$0xf]  ;;  %v9482_v37 = vld [vmem:[%s17364_s5 + $0xf0] sm:$0xf0]  ;;  %v10991_v57 = vld [vmem:[%s17364_s5 + $0xf4] sm:$0xf0] }
 0x3d8   :  { %4185 = vmatmul.bf16.vlgmr.msrb.gmra.mxu0 %v3984_v40  ;;  %4198 = vmatmul.bf16.vlgmr.msrb.gmra.mxu1 %v3984_v40  ;;  %v10988_v30 = vld [vmem:[%s17364_s5 + $0xe4] sm:$0xf]  ;;  %v9464_v9 = vld [vmem:[%s17364_s5 + $0xc0] sm:$0xf]  ;;  %v9466_v19 = vld [vmem:[%s17364_s5 + $0xd0] sm:$0xf0] }
 0x3d9   :  { %4211 = vmatmul.bf16.vlgmr.msrb.gmra.mxu2 %v3984_v40  ;;  %4224 = vmatmul.bf16.vlgmr.msrb.gmra.mxu3 %v3984_v40  ;;  %v9270_v40 = vor.u32 %v10906_v22, %v9269_v21  ;;  %v9485_v50 = vor.u32 %v10988_v30, %v9482_v37  ;;  %v9472_v56 = vld [vmem:[%s17364_s5 + $0xc8] sm:$0xf]  ;;  %v10987_v26 = vld [vmem:[%s17364_s5 + $0xd4] sm:$0xf0]  ;;  %v10985_v61 = vld [vmem:[%s17364_s5 + $0xcc] sm:$0xf] }
 0x3da   :  { %4723 = vmatpush.bf16.msrb.mxu0 %v9350_v28  ;;  %4736 = vmatpush.bf16.msrb.mxu1 %v9354_v18  ;;  %v9271_v28 = vld [vmem:[%s17362_s3 + $0x50] sm:$0xf0]  ;;  %v9277_v18 = vld [vmem:[%s17362_s3 + $0x48] sm:$0xf]  ;;  %v9448_v22 = vld [vmem:[%s17364_s5 + $0xa0] sm:$0xf] }
 0x3db   :  { %4749 = vmatpush.bf16.msrb.mxu2 %v9358_v39  ;;  %4762 = vmatpush.bf16.msrb.mxu3 %v9362_v48  ;;  %v9274_v39 = vor.u32 %v10904_v60, %v9271_v28  ;;  %v9253_v48 = vld [vmem:[%s17362_s3 + $0x20] sm:$0xf]  ;;  %v9278_v47 = vor.u32 %v10907_v0, %v9277_v18  ;;  %v9450_v28 = vld [vmem:[%s17364_s5 + $0xb0] sm:$0xf0]  ;;  %v9456_v18 = vld [vmem:[%s17364_s5 + $0xa8] sm:$0xf] }
 0x3dc   :  { %v11336_v35 = vpop.eup %11335  ;;  %v9254_v29 = vor.u32 %v10902_v49, %v9253_v48  ;;  %v10983_v0 = vld [vmem:[%s17364_s5 + $0xb4] sm:$0xf0]  ;;  %v10981_v48 = vld [vmem:[%s17364_s5 + $0xac] sm:$0xf]  ;;  %v9458_v49 = vld [vmem:[%s17364_s5 + $0xb8] sm:$0xf0] }
 0x3dd   :  { %v3947_v63 = vmul.f32 %v11336_v35, %v3941_v59  ;;  %v9239_v35 = vld [vmem:[%s17362_s3 + $0x10] sm:$0xf0]  ;;  %v9247_v59 = vld [vmem:[%s17362_s3 + $0x18] sm:$0xf0]  ;;  %v10978_v25 = vld [vmem:[%s17364_s5 + $0x8c] sm:$0xf0] }
 0x3de   :  { %4724 = vmatpush.bf16.msrb.mxu0 %v9334_v44  ;;  %4737 = vmatpush.bf16.msrb.mxu1 %v9338_v45  ;;  %v10901_v44 = vld [vmem:[%s17362_s3 + $0x2c] sm:$0xf]  ;;  %v9263_v45 = vld [vmem:[%s17362_s3 + $0x38] sm:$0xf0]  ;;  %v9250_v6 = vor.u32 %v10897_v17, %v9247_v59  ;;  %v10976_v33 = vld [vmem:[%s17364_s5 + $0x84] sm:$0xf] }
 0x3df   :  { %4750 = vmatpush.bf16.msrb.mxu2 %v9342_v12  ;;  %4763 = vmatpush.bf16.msrb.mxu3 %v9346_v7  ;;  %v3950_v4 = vpack.c.bf16 %v3947_v63, %v3947_v63  ;;  %v10898_v12 = vld [vmem:[%s17362_s3 + $0xc] sm:$0xf0]  ;;  %v9262_v7 = vor.u32 %v10903_v51, %v9261_v20  ;;  %v9266_v62 = vor.u32 %v10901_v44, %v9263_v45  ;;  %v9434_v51 = vld [vmem:[%s17364_s5 + $0x90] sm:$0xf0]  ;;  %v9440_v44 = vld [vmem:[%s17364_s5 + $0x88] sm:$0xf] }
 0x3e0   :  { %v9238_v63 = vor.u32 %v10898_v12, %v9237_v54  ;;  %v10979_v45 = vld [vmem:[%s17364_s5 + $0x94] sm:$0xf0]  ;;  %v10977_v54 = vld [vmem:[%s17364_s5 + $0x8c] sm:$0xf]  ;;  %v9442_v12 = vld [vmem:[%s17364_s5 + $0x98] sm:$0xf0] }
 0x3e1   :  { %3951 = vst [vmem:[#allocation4] sm:$0xf] %v3950_v4  ;;  %v9418_v59 = vld [vmem:[%s17364_s5 + $0x70] sm:$0xf0]  ;;  %v9426_v30 = vld [vmem:[%s17364_s5 + $0x78] sm:$0xf0] }
 0x3e2   :  { %4725 = vmatpush.bf16.msrb.mxu0 %v9318_v11  ;;  %4738 = vmatpush.bf16.msrb.mxu1 %v9322_v58  ;;  %v9242_v11 = vor.u32 %v10896_v55, %v9239_v35  ;;  %v9246_v58 = vor.u32 %v10899_v15, %v9245_v46  ;;  %v10974_v55 = vld [vmem:[%s17364_s5 + $0x6c] sm:$0xf0]  ;;  %v10972_v35 = vld [vmem:[%s17364_s5 + $0x64] sm:$0xf]  ;;  %v15447_v37 = vld [vmem:[%s17365_s6] sm:$0xf] }
 0x3e3   :  { %4751 = vmatpush.bf16.msrb.mxu2 %v9326_v1  ;;  %4764 = vmatpush.bf16.msrb.mxu3 %v9330_v2  ;;  %v9480_v1 = vld [vmem:[%s17364_s5 + $0xe0] sm:$0xf]  ;;  %v10990_v2 = vld [vmem:[%s17364_s5 + $0xec] sm:$0xf0] }
 0x3e4   :  { %v9481_v3 = vor.u32 %v10990_v2, %v9480_v1  ;;  %v10973_v2 = vld [vmem:[%s17364_s5 + $0x6c] sm:$0xf] }
 0x3e6   :  { %4726 = vmatpush.bf16.msrb.mxu0 %v9302_v42  ;;  %4739 = vmatpush.bf16.msrb.mxu1 %v9306_v23  ;;  %v10989_v42 = vld [vmem:[%s17364_s5 + $0xec] sm:$0xf]  ;;  %v9490_v23 = vld [vmem:[%s17364_s5 + $0xf8] sm:$0xf0] }
 0x3e7   :  { %4752 = vmatpush.bf16.msrb.mxu2 %v9310_v43  ;;  %4765 = vmatpush.bf16.msrb.mxu3 %v9314_v10  ;;  %v9493_v8 = vor.u32 %v10989_v42, %v9490_v23  ;;  %v10986_v43 = vld [vmem:[%s17364_s5 + $0xcc] sm:$0xf0]  ;;  %v10984_v10 = vld [vmem:[%s17364_s5 + $0xc4] sm:$0xf] }
 0x3e8   :  { %4397 = vmatmul.bf16.vlgmr.msra.gmra.mxu0 %v3950_v4  ;;  %4410 = vmatmul.bf16.vlgmr.msra.gmra.mxu1 %v3950_v4  ;;  %v4530_v31 = vld [vmem:[#allocation4] sm:$0xf]  ;;  %v9465_v52 = vor.u32 %v10986_v43, %v9464_v9  ;;  %v9469_v13 = vor.u32 %v10984_v10, %v9466_v19  ;;  %v10971_v9 = vld [vmem:[%s17364_s5 + $0x54] sm:$0xf0]  ;;  %v10969_v43 = vld [vmem:[%s17364_s5 + $0x4c] sm:$0xf] }
 0x3e9   :  { %4423 = vmatmul.bf16.vlgmr.msra.gmra.mxu2 %v3950_v4  ;;  %4436 = vmatmul.bf16.vlgmr.msra.gmra.mxu3 %v3950_v4  ;;  %v9488_v4 = vld [vmem:[%s17364_s5 + $0xe8] sm:$0xf]  ;;  %v4443_v10 = vperm.slane %v15447_v37, 0 }
 0x3ea   :  { %4727 = vmatpush.bf16.msrb.mxu0 %v9286_v14  ;;  %4740 = vmatpush.bf16.msrb.mxu1 %v9290_v27  ;;  %v9489_v5 = vor.u32 %v10991_v57, %v9488_v4  ;;  %v9474_v14 = vld [vmem:[%s17364_s5 + $0xd8] sm:$0xf0]  ;;  %v9473_v27 = vor.u32 %v10987_v26, %v9472_v56  ;;  %v9400_v4 = vld [vmem:[%s17364_s5 + $0x40] sm:$0xf]  ;;  %v10970_v57 = vld [vmem:[%s17364_s5 + $0x4c] sm:$0xf0] }
 0x3eb   :  { %4753 = vmatpush.bf16.msrb.mxu2 %v9294_v24  ;;  %4766 = vmatpush.bf16.msrb.mxu3 %v9298_v36  ;;  %v9477_v21 = vor.u32 %v10985_v61, %v9474_v14  ;;  %v10982_v24 = vld [vmem:[%s17364_s5 + $0xac] sm:$0xf0]  ;;  %v10980_v36 = vld [vmem:[%s17364_s5 + $0xa4] sm:$0xf]  ;;  %v9401_v42 = vor.u32 %v10970_v57, %v9400_v4  ;;  %v9410_v56 = vld [vmem:[%s17364_s5 + $0x58] sm:$0xf0] }
 0x3ec   :  { %v9449_v60 = vor.u32 %v10982_v24, %v9448_v22  ;;  %v9384_v26 = vld [vmem:[%s17364_s5 + $0x20] sm:$0xf]  ;;  %v10966_v61 = vld [vmem:[%s17364_s5 + $0x2c] sm:$0xf0]  ;;  %v10964_v14 = vld [vmem:[%s17364_s5 + $0x24] sm:$0xf] }
 0x3ed   :  { %v9385_v22 = vor.u32 %v10966_v61, %v9384_v26  ;;  %v9386_v24 = vld [vmem:[%s17364_s5 + $0x30] sm:$0xf0]  ;;  %v10957_v4 = vld [vmem:[%s17363_s4 + $0xec] sm:$0xf]  ;;  %v9618_v57 = vld [vmem:[%s17363_s4 + $0xf8] sm:$0xf0] }
 0x3ee   :  { %4728 = vmatpush.bf16.msrb.mxu0 %v9270_v40  ;;  %4741 = vmatpush.bf16.msrb.mxu1 %v9274_v39  ;;  %v9453_v40 = vor.u32 %v10980_v36, %v9450_v28  ;;  %v9457_v39 = vor.u32 %v10983_v0, %v9456_v18  ;;  %v9392_v36 = vld [vmem:[%s17364_s5 + $0x28] sm:$0xf]  ;;  %v9389_v0 = vor.u32 %v10964_v14, %v9386_v24  ;;  %v10953_v14 = vld [vmem:[%s17363_s4 + $0xcc] sm:$0xf]  ;;  %v10950_v24 = vld [vmem:[%s17363_s4 + $0xac] sm:$0xf0] }
 0x3ef   :  { %4754 = vmatpush.bf16.msrb.mxu2 %v9278_v47  ;;  %4767 = vmatpush.bf16.msrb.mxu3 %v9282_v41  ;;  %v9461_v47 = vor.u32 %v10981_v48, %v9458_v49  ;;  %v9432_v41 = vld [vmem:[%s17364_s5 + $0x80] sm:$0xf] }
 0x3f0   :  { %v9433_v20 = vor.u32 %v10978_v25, %v9432_v41  ;;  %v9394_v41 = vld [vmem:[%s17364_s5 + $0x38] sm:$0xf0] }
 0x3f2   :  { %4729 = vmatpush.bf16.msrb.mxu0 %v9254_v29  ;;  %4742 = vmatpush.bf16.msrb.mxu1 %v9258_v53  ;;  %v9437_v29 = vor.u32 %v10976_v33, %v9434_v51  ;;  %v9441_v53 = vor.u32 %v10979_v45, %v9440_v44  ;;  %v9368_v33 = vld [vmem:[%s17364_s5] sm:$0xf]  ;;  %v9370_v45 = vld [vmem:[%s17364_s5 + $0x10] sm:$0xf0] }
 0x3f3   :  { %4755 = vmatpush.bf16.msrb.mxu2 %v9262_v7  ;;  %4768 = vmatpush.bf16.msrb.mxu3 %v9266_v62  ;;  %v9445_v7 = vor.u32 %v10977_v54, %v9442_v12  ;;  %v9416_v62 = vld [vmem:[%s17364_s5 + $0x60] sm:$0xf] }
 0x3f4   :  { %v9417_v17 = vor.u32 %v10974_v55, %v9416_v62  ;;  %v9378_v62 = vld [vmem:[%s17364_s5 + $0x18] sm:$0xf0]  ;;  %v9608_v55 = vld [vmem:[%s17363_s4 + $0xe0] sm:$0xf] }
 0x3f6   :  { %4730 = vmatpush.bf16.msrb.mxu0 %v9238_v63  ;;  %4743 = vmatpush.bf16.msrb.mxu1 %v9242_v11  ;;  %v9424_v63 = vld [vmem:[%s17364_s5 + $0x68] sm:$0xf]  ;;  %v10975_v11 = vld [vmem:[%s17364_s5 + $0x74] sm:$0xf0] }
 0x3f7   :  { %4756 = vmatpush.bf16.msrb.mxu2 %v9246_v58  ;;  %4769 = vmatpush.bf16.msrb.mxu3 %v9250_v6  ;;  %v9425_v1 = vor.u32 %v10975_v11, %v9424_v63  ;;  %v10958_v63 = vld [vmem:[%s17363_s4 + $0xec] sm:$0xf0] }
 0x3f8   :  { %v9609_v11 = vor.u32 %v10958_v63, %v9608_v55 }
 0x3f9   :  { %4731 = vmatmul.bf16.vlgmr.msrb.gmra.mxu0 %v4530_v31  ;;  %4744 = vmatmul.bf16.vlgmr.msrb.gmra.mxu1 %v4530_v31 }
 0x3fa   :  { %4757 = vmatmul.bf16.vlgmr.msrb.gmra.mxu2 %v4530_v31  ;;  %4770 = vmatmul.bf16.vlgmr.msrb.gmra.mxu3 %v4530_v31  ;;  %v9421_v31 = vor.u32 %v10972_v35, %v9418_v59 }
 0x3fb   :  { %5072 = vmatpush.bf16.msra.mxu0 %v9481_v3  ;;  %5085 = vmatpush.bf16.msra.mxu1 %v9485_v50  ;;  %v9429_v3 = vor.u32 %v10973_v2, %v9426_v30  ;;  %v10968_v50 = vld [vmem:[%s17364_s5 + $0x44] sm:$0xf] }
 0x3fc   :  { %5098 = vmatpush.bf16.msra.mxu2 %v9489_v5  ;;  %5111 = vmatpush.bf16.msra.mxu3 %v9493_v8  ;;  %v9402_v5 = vld [vmem:[%s17364_s5 + $0x50] sm:$0xf0]  ;;  %v9408_v8 = vld [vmem:[%s17364_s5 + $0x48] sm:$0xf] }
 0x3fd   :  { %v9405_v23 = vor.u32 %v10968_v50, %v9402_v5  ;;  %v9409_v19 = vor.u32 %v10971_v9, %v9408_v8  ;;  %v9592_v8 = vld [vmem:[%s17363_s4 + $0xc0] sm:$0xf]  ;;  %v10954_v9 = vld [vmem:[%s17363_s4 + $0xcc] sm:$0xf0] }
 0x3ff   :  { %5073 = vmatpush.bf16.msra.mxu0 %v9465_v52  ;;  %5086 = vmatpush.bf16.msra.mxu1 %v9469_v13  ;;  %v4444_v52 = vperm.slane %v15447_v37, 1  ;;  %v9413_v13 = vor.u32 %v10969_v43, %v9410_v56  ;;  %v10952_v43 = vld [vmem:[%s17363_s4 + $0xc4] sm:$0xf]  ;;  %v10955_v56 = vld [vmem:[%s17363_s4 + $0xd4] sm:$0xf0] }
 0x400   :  { %5099 = vmatpush.bf16.msra.mxu2 %v9473_v27  ;;  %5112 = vmatpush.bf16.msra.mxu3 %v9477_v21 }
 0x403   :  { %5074 = vmatpush.bf16.msra.mxu0 %v9449_v60  ;;  %5087 = vmatpush.bf16.msra.mxu1 %v9453_v40  ;;  %v10967_v60 = vld [vmem:[%s17364_s5 + $0x34] sm:$0xf0] }
 0x404   :  { %5100 = vmatpush.bf16.msra.mxu2 %v9457_v39  ;;  %5113 = vmatpush.bf16.msra.mxu3 %v9461_v47  ;;  %v9393_v40 = vor.u32 %v10967_v60, %v9392_v36  ;;  %v10965_v39 = vld [vmem:[%s17364_s5 + $0x2c] sm:$0xf]  ;;  %v4446_v47 = vperm.slane %v15447_v37, 3  ;;  %v10948_v36 = vld [vmem:[%s17363_s4 + $0xa4] sm:$0xf] }
 0x405   :  { %v9397_v25 = vor.u32 %v10965_v39, %v9394_v41 }
 0x407   :  { %5075 = vmatpush.bf16.msra.mxu0 %v9433_v20  ;;  %5088 = vmatpush.bf16.msra.mxu1 %v9437_v29  ;;  %v10962_v20 = vld [vmem:[%s17364_s5 + $0xc] sm:$0xf0]  ;;  %v9376_v29 = vld [vmem:[%s17364_s5 + $0x8] sm:$0xf] }
 0x408   :  { %5101 = vmatpush.bf16.msra.mxu2 %v9441_v53  ;;  %5114 = vmatpush.bf16.msra.mxu3 %v9445_v7  ;;  %v9369_v44 = vor.u32 %v10962_v20, %v9368_v33  ;;  %v10963_v53 = vld [vmem:[%s17364_s5 + $0x14] sm:$0xf0]  ;;  %v10961_v7 = vld [vmem:[%s17364_s5 + $0xc] sm:$0xf] }
 0x409   :  { %v9377_v12 = vor.u32 %v10963_v53, %v9376_v29  ;;  %v9381_v59 = vor.u32 %v10961_v7, %v9378_v62  ;;  %v9232_v29 = vld [vmem:[%s17359_s0 + $0xa8] sm:$0xff]  ;;  %v9562_v62 = vld [vmem:[%s17363_s4 + $0x90] sm:$0xf0] }
 0x40b   :  { %5076 = vmatpush.bf16.msra.mxu0 %v9417_v17  ;;  %5089 = vmatpush.bf16.msra.mxu1 %v9421_v31  ;;  %v9616_v31 = vld [vmem:[%s17363_s4 + $0xe8] sm:$0xf] }
 0x40c   :  { %5102 = vmatpush.bf16.msra.mxu2 %v9425_v1  ;;  %5115 = vmatpush.bf16.msra.mxu3 %v9429_v3  ;;  %v10959_v3 = vld [vmem:[%s17363_s4 + $0xf4] sm:$0xf0] }
 0x40f   :  { %5077 = vmatpush.bf16.msra.mxu0 %v9401_v42  ;;  %5090 = vmatpush.bf16.msra.mxu1 %v9405_v23  ;;  %v9617_v23 = vor.u32 %v10959_v3, %v9616_v31  ;;  %v9570_v31 = vld [vmem:[%s17363_s4 + $0x98] sm:$0xf0] }
 0x410   :  { %5103 = vmatpush.bf16.msra.mxu2 %v9409_v19  ;;  %5116 = vmatpush.bf16.msra.mxu3 %v9413_v13  ;;  %v9600_v19 = vld [vmem:[%s17363_s4 + $0xc8] sm:$0xf]  ;;  %v9234_v3 = vld [vmem:[%s17359_s0 + $0xb8] sm:$0xff] }
 0x411   :  { %v9601_v61 = vor.u32 %v10955_v56, %v9600_v19 }
 0x413   :  { %5078 = vmatpush.bf16.msra.mxu0 %v9385_v22  ;;  %5091 = vmatpush.bf16.msra.mxu1 %v9389_v0  ;;  %v9576_v22 = vld [vmem:[%s17363_s4 + $0xa0] sm:$0xf]  ;;  %v9584_v0 = vld [vmem:[%s17363_s4 + $0xa8] sm:$0xf] }
 0x414   :  { %5104 = vmatpush.bf16.msra.mxu2 %v9393_v40  ;;  %5117 = vmatpush.bf16.msra.mxu3 %v9397_v25 }
 0x417   :  { %5079 = vmatpush.bf16.msra.mxu0 %v9369_v44 }
 0x418   :  { %5105 = vmatpush.bf16.msra.mxu2 %v9377_v12  ;;  %5118 = vmatpush.bf16.msra.mxu3 %v9381_v59  ;;  %v10947_v59 = vld [vmem:[%s17363_s4 + $0x94] sm:$0xf0] }
 0x41b   :  { %5284 = vmatpush.bf16.msrb.mxu0 %v9609_v11 }
 0x41c   :  { %5310 = vmatpush.bf16.msrb.mxu2 %v9617_v23 }
 0x420   :  { %5311 = vmatpush.bf16.msrb.mxu2 %v9601_v61  ;;  %v10941_v61 = vld [vmem:[%s17363_s4 + $0x6c] sm:$0xf] }
 0x455   :  { %v15382_v32 = vpop.f32.mrf.mxu0  ;;  %v15384_v34 = vpop.f32.mrf.mxu1 }
 0x45c   :  { %v15425_v46 = vpop.f32.mrf.mxu2  ;;  %v15427_v15 = vpop.f32.mrf.mxu3 }
 0x45d   :  { %v4188_v58 = vpop.f32.mrf.mxu0  ;;  %v4201_v6 = vpop.f32.mrf.mxu1 }
 0x45e   :  { %v10956_v58 = vld [vmem:[%s17363_s4 + $0xe4] sm:$0xf]  ;;  %v9610_v6 = vld [vmem:[%s17363_s4 + $0xf0] sm:$0xf0] }
 0x45f   :  { %v9613_v30 = vor.u32 %v10956_v58, %v9610_v6  ;;  %v10945_v6 = vld [vmem:[%s17363_s4 + $0x8c] sm:$0xf] }
 0x464   :  { %v4214_v27 = vpop.f32.mrf.mxu2  ;;  %v4227_v21 = vpop.f32.mrf.mxu3 }
 0x465   :  { %v4398_v28 = vpop.f32.mrf.mxu0  ;;  %v4411_v18 = vpop.f32.mrf.mxu1  ;;  %v9602_v27 = vld [vmem:[%s17363_s4 + $0xd8] sm:$0xf0] }
 0x466   :  { %v4399_v48 = vadd.f32 %v4398_v28, %v15382_v32  ;;  %v4412_v49 = vadd.f32 %v4411_v18, %v15384_v34  ;;  %v10960_v32 = vld [vmem:[%s17364_s5 + $0x4] sm:$0xf]  ;;  %v9605_v21 = vor.u32 %v10953_v14, %v9602_v27  ;;  %v9577_v28 = vor.u32 %v10950_v24, %v9576_v22  ;;  %v9578_v18 = vld [vmem:[%s17363_s4 + $0xb0] sm:$0xf0]  ;;  %v9554_v22 = vld [vmem:[%s17363_s4 + $0x78] sm:$0xf0] }
 0x467   :  { %v9373_v54 = vor.u32 %v10960_v32, %v9370_v45  ;;  %v9581_v39 = vor.u32 %v10948_v36, %v9578_v18  ;;  %v9231_v45 = vld [vmem:[%s17359_s0 + $0xa0] sm:$0xff]  ;;  %v10938_v36 = vld [vmem:[%s17363_s4 + $0x4c] sm:$0xf0] }
 0x468   :  { %v4451_v34 = vadd.f32 %v4443_v10, %v4399_v48  ;;  %v4452_v51 = vadd.f32 %v4444_v52, %v4412_v49  ;;  %v9621_v10 = vor.u32 %v10957_v4, %v9618_v57  ;;  %v9594_v52 = vld [vmem:[%s17363_s4 + $0xd0] sm:$0xf0]  ;;  %v10951_v48 = vld [vmem:[%s17363_s4 + $0xb4] sm:$0xf0]  ;;  %v10949_v49 = vld [vmem:[%s17363_s4 + $0xac] sm:$0xf]  ;;  %v9573_v57 = vor.u32 %v10945_v6, %v9570_v31 }
 0x469   :  { %5092 = vmatpush.bf16.msra.mxu1 %v9373_v54  ;;  %v9597_v26 = vor.u32 %v10952_v43, %v9594_v52  ;;  %v9585_v33 = vor.u32 %v10951_v48, %v9584_v0  ;;  %v10944_v54 = vld [vmem:[%s17363_s4 + $0x84] sm:$0xf]  ;;  %v9546_v52 = vld [vmem:[%s17363_s4 + $0x70] sm:$0xf0]  ;;  %v9528_v24 = vld [vmem:[%s17363_s4 + $0x40] sm:$0xf] }
 0x46a   :  { %v9227_v35 = vmul.f32 -1.442695, %v4451_v34  ;;  %v9228_v17 = vmul.f32 -1.442695, %v4452_v51  ;;  %5323 = vmatpush.bf16.msrb.mxu3 %v9621_v10  ;;  %v4445_v34 = vperm.slane %v15447_v37, 2  ;;  %v9565_v58 = vor.u32 %v10944_v54, %v9562_v62 }
 0x46b   :  { %v10946_v37 = vld [vmem:[%s17363_s4 + $0x8c] sm:$0xf0]  ;;  %5312 = vmatpush.bf16.msrb.mxu2 %v9585_v33  ;;  %v9530_v48 = vld [vmem:[%s17363_s4 + $0x50] sm:$0xf0]  ;;  %v9536_v33 = vld [vmem:[%s17363_s4 + $0x48] sm:$0xf] }
 0x46c   :  { %11337 = vpow2.f32 %v9227_v35  ;;  %v4424_v1 = vpop.f32.mrf.mxu2  ;;  %v4437_v2 = vpop.f32.mrf.mxu3 }
 0x46d   :  { %11339 = vpow2.f32 %v9228_v17  ;;  %v4438_v50 = vadd.f32 %v4437_v2, %v15427_v15  ;;  %v4400_v5 = vpop.f32.mrf.mxu0  ;;  %v4413_v42 = vpop.f32.mrf.mxu1  ;;  %5297 = vmatpush.bf16.msrb.mxu1 %v9613_v30  ;;  %v9593_v15 = vor.u32 %v10954_v9, %v9592_v8  ;;  %v4425_v32 = vadd.f32 %v4424_v1, %v15425_v46  ;;  %v9560_v46 = vld [vmem:[%s17363_s4 + $0x80] sm:$0xf]  ;;  %v9568_v17 = vld [vmem:[%s17363_s4 + $0x88] sm:$0xf]  ;;  %v10942_v8 = vld [vmem:[%s17363_s4 + $0x6c] sm:$0xf0] }
 0x46e   :  { %5324 = vmatpush.bf16.msrb.mxu3 %v9605_v21  ;;  %v9561_v11 = vor.u32 %v10946_v37, %v9560_v46  ;;  %v9569_v4 = vor.u32 %v10947_v59, %v9568_v17  ;;  %v9557_v46 = vor.u32 %v10941_v61, %v9554_v22  ;;  %v9529_v37 = vor.u32 %v10938_v36, %v9528_v24  ;;  %v9496_v24 = vld [vmem:[%s17363_s4] sm:$0xf]  ;;  %v10930_v36 = vld [vmem:[%s17363_s4 + $0xc] sm:$0xf0] }
 0x46f   :  { %v4454_v13 = vadd.f32 %v4446_v47, %v4438_v50  ;;  %5285 = vmatpush.bf16.msrb.mxu0 %v9593_v15  ;;  %v9586_v47 = vld [vmem:[%s17363_s4 + $0xb8] sm:$0xf0]  ;;  %v4453_v63 = vadd.f32 %v4445_v34, %v4425_v32  ;;  %v9544_v50 = vld [vmem:[%s17363_s4 + $0x60] sm:$0xf]  ;;  %v10940_v15 = vld [vmem:[%s17363_s4 + $0x64] sm:$0xf] }
 0x470   :  { %v9589_v53 = vor.u32 %v10949_v49, %v9586_v47  ;;  %5313 = vmatpush.bf16.msrb.mxu2 %v9569_v4  ;;  %v9545_v10 = vor.u32 %v10942_v8, %v9544_v50  ;;  %v9512_v50 = vld [vmem:[%s17363_s4 + $0x20] sm:$0xf]  ;;  %v10932_v8 = vld [vmem:[%s17363_s4 + $0x24] sm:$0xf] }
 0x471   :  { %v9229_v60 = vmul.f32 -1.442695, %v4454_v13  ;;  %5298 = vmatpush.bf16.msrb.mxu1 %v9597_v26  ;;  %v9552_v13 = vld [vmem:[%s17363_s4 + $0x68] sm:$0xf]  ;;  %v10943_v26 = vld [vmem:[%s17363_s4 + $0x74] sm:$0xf0] }
 0x472   :  { %v11338_v40 = vpop.eup %11337  ;;  %5325 = vmatpush.bf16.msrb.mxu3 %v9589_v53 }
 0x473   :  { %v11340_v41 = vpop.eup %11339  ;;  %v15599_v25 = vadd.f32 1.0, %v11338_v40  ;;  %11341 = vpow2.f32 %v9229_v60  ;;  %5286 = vmatpush.bf16.msrb.mxu0 %v9577_v28 }
 0x474   :  { %v15601_v20 = vadd.f32 1.0, %v11340_v41  ;;  %v4426_v51 = vpop.f32.mrf.mxu2  ;;  %v4439_v44 = vpop.f32.mrf.mxu3  ;;  %v9549_v41 = vor.u32 %v10940_v15, %v9546_v52  ;;  %v10935_v52 = vld [vmem:[%s17363_s4 + $0x34] sm:$0xf0] }
 0x475   :  { %11343 = vrcp.f32 %v15599_v25  ;;  %5299 = vmatpush.bf16.msrb.mxu1 %v9581_v39  ;;  %v4469_v2 = vand.u32 2147483647, %v15599_v25  ;;  %v4471_v5 = vand.u32 2147483648, %v15599_v25  ;;  %vm4465_vm13 = vweird.f32 %v15599_v25  ;;  %v10936_v39 = vld [vmem:[%s17363_s4 + $0x44] sm:$0xf] }
 0x476   :  { %11345 = vrcp.f32 %v15601_v20  ;;  %v4732_v12 = vpop.f32.mrf.mxu0  ;;  %v4745_v7 = vpop.f32.mrf.mxu1  ;;  %v4488_v43 = vand.u32 2147483647, %v15601_v20  ;;  %5326 = vmatpush.bf16.msrb.mxu3 %v9573_v57  ;;  %vm4484_vm12 = vweird.f32 %v15601_v20  ;;  %v4490_v28 = vand.u32 2147483648, %v15601_v20  ;;  %v10939_v44 = vld [vmem:[%s17363_s4 + $0x54] sm:$0xf0] }
 0x477   :  { %v4775_v55 = vadd.f32 %v9231_v45, %v4732_v12  ;;  %v4776_v35 = vadd.f32 %v9232_v29, %v4745_v7  ;;  %5287 = vmatpush.bf16.msrb.mxu0 %v9561_v11  ;;  %vm15696_vm15 = vcmp.eq.f32.partialorder %v4469_v2, 8.507059e+37  ;;  %v9553_v51 = vor.u32 %v10943_v26, %v9552_v13  ;;  %v10937_v45 = vld [vmem:[%s17363_s4 + $0x4c] sm:$0xf]  ;;  %v9538_v12 = vld [vmem:[%s17363_s4 + $0x58] sm:$0xf0]  ;;  %v9233_v26 = vld [vmem:[%s17359_s0 + $0xb0] sm:$0xff] }
 0x478   :  { %v9533_v54 = vor.u32 %v10936_v39, %v9530_v48  ;;  %v4472_v59 = vor.u32 1.1754944e-38, %v4471_v5  ;;  %v4491_v31 = vor.u32 1.1754944e-38, %v4490_v28  ;;  %vm4489_vm3 = vcmp.eq.f32.partialorder %v4488_v43, 8.507059e+37  ;;  %v9520_v43 = vld [vmem:[%s17363_s4 + $0x28] sm:$0xf] }
 0x479   :  { %v11342_v1 = vpop.eup %11341  ;;  %v9363_v30 = vmul.f32 -1.442695, %v4775_v55  ;;  %v9364_v23 = vmul.f32 -1.442695, %v4776_v35  ;;  %5300 = vmatpush.bf16.msrb.mxu1 %v9565_v58  ;;  %5314 = vmatpush.bf16.msrb.mxu2 %v9553_v51  ;;  %v9537_v35 = vor.u32 %v10939_v44, %v9536_v33  ;;  %v9541_v58 = vor.u32 %v10937_v45, %v9538_v12  ;;  %v9498_v39 = vld [vmem:[%s17363_s4 + $0x10] sm:$0xf0] }
 0x47a   :  { %v15645_v42 = vadd.f32 1.0, %v11342_v1  ;;  %5327 = vmatpush.bf16.msrb.mxu3 %v9557_v46  ;;  %v9504_v48 = vld [vmem:[%s17363_s4 + $0x8] sm:$0xf]  ;;  %v10929_v33 = vld [vmem:[%s17363_s4 + $0xc] sm:$0xf] }
 0x47b   :  { %v15650_v9 = vpop.eup %11343  ;;  %11347 = vpow2.f32 %v9363_v30  ;;  %5288 = vmatpush.bf16.msrb.mxu0 %v9545_v10 }
 0x47c   :  { %v15659_v19 = vpop.eup %11345  ;;  %v4461_v56 = vmul.f32 %v15650_v9, %v15599_v25  ;;  %11349 = vrcp.f32 %v15645_v42  ;;  %vm4466_vm14 = vweird.f32 %v15650_v9  ;;  %vm4504_vm5 = vweird.f32 %v15645_v42 }
 0x47d   :  { %v4480_v14 = vmul.f32 %v15659_v19, %v15601_v20  ;;  %11351 = vtanh.f32 %v4453_v63  ;;  %v15677_v27 = vpop.f32.mrf.mxu2  ;;  %v4771_v21 = vpop.f32.mrf.mxu3  ;;  %vm4485_vm0 = vweird.f32 %v15659_v19  ;;  %5301 = vmatpush.bf16.msrb.mxu1 %v9549_v41  ;;  %vm4467_vm1 = vmor %vm4465_vm13, %vm4466_vm14  ;;  %v10934_v20 = vld [vmem:[%s17363_s4 + $0x2c] sm:$0xf0]  ;;  %5315 = vmatpush.bf16.msrb.mxu2 %v9537_v35  ;;  %v10931_v41 = vld [vmem:[%s17363_s4 + $0x14] sm:$0xf0] }
 0x47e   :  { %v4462_v60 = vsub.f32 1.0, %v4461_v56  ;;  %11353 = vpow2.f32 %v9364_v23  ;;  %v4778_v18 = vadd.f32 %v9234_v3, %v4771_v21  ;;  %v4734_v0 = vpop.f32.mrf.mxu0  ;;  %v4747_v40 = vpop.f32.mrf.mxu1  ;;  %vm4486_vm2 = vmor %vm4484_vm12, %vm4485_vm0  ;;  %5328 = vmatpush.bf16.msrb.mxu3 %v9541_v58  ;;  %v9522_v56 = vld [vmem:[%s17363_s4 + $0x38] sm:$0xf0]  ;;  %v9513_v61 = vor.u32 %v10934_v20, %v9512_v50 }
 0x47f   :  { %v4481_v49 = vsub.f32 1.0, %v4480_v14  ;;  %5289 = vmatpush.bf16.msrb.mxu0 %v9529_v37  ;;  %v10928_v40 = vld [vmem:[%s17363_s4 + $0x4] sm:$0xf]  ;;  %v4777_v47 = vadd.f32 %v9233_v26, %v15677_v27  ;;  %v9754_v26 = vld [vmem:[%s17362_s3 + $0xf8] sm:$0xf0] }
 0x480   :  { %v4463_v32 = vmul.f32 %v15650_v9, %v4462_v60  ;;  %v9365_v34 = vmul.f32 -1.442695, %v4778_v18  ;;  %v9521_v18 = vor.u32 %v10935_v52, %v9520_v43  ;;  %v9501_v46 = vor.u32 %v10928_v40, %v9498_v39  ;;  %v9730_v40 = vld [vmem:[%s17362_s3 + $0xd0] sm:$0xf0] }
 0x481   :  { %v11348_v29 = vpop.eup %11347  ;;  %v4482_v53 = vmul.f32 %v15659_v19, %v4481_v49  ;;  %5302 = vmatpush.bf16.msrb.mxu1 %v9533_v54  ;;  %v9505_v54 = vor.u32 %v10931_v41, %v9504_v48  ;;  %v11019_v41 = vld [vmem:[%s17362_s3 + $0xd4] sm:$0xf0] }
 0x482   :  { %v15715_v7 = vpop.eup %11349  ;;  %v4464_v62 = vadd.f32 %v15650_v9, %v4463_v32  ;;  %v15718_v55 = vadd.f32 1.0, %v11348_v29  ;;  %11355 = vpow2.f32 %v9365_v34  ;;  %v9506_v32 = vld [vmem:[%s17363_s4 + $0x18] sm:$0xf0]  ;;  %v4508_v34 = vand.u32 2147483647, %v15645_v42  ;;  %5316 = vmatpush.bf16.msrb.mxu2 %v9521_v18 }
 0x483   :  { %v11352_v17 = vpop.eup %11351  ;;  %v4483_v63 = vadd.f32 %v15659_v19, %v4482_v53  ;;  %v4500_v11 = vmul.f32 %v15715_v7, %v15645_v42  ;;  %vm4505_vm4 = vweird.f32 %v15715_v7  ;;  %5290 = vmatpush.bf16.msrb.mxu0 %v9513_v61  ;;  %v9497_v53 = vor.u32 %v10930_v36, %v9496_v24  ;;  %v9728_v36 = vld [vmem:[%s17362_s3 + $0xc0] sm:$0xf]  ;;  %v11018_v18 = vld [vmem:[%s17362_s3 + $0xcc] sm:$0xf0] }
 0x484   :  { %v11354_v6 = vpop.eup %11353  ;;  %v4468_v1 = vsel %vm4467_vm1, %v15650_v9, %v4464_v62  ;;  %11357 = vrcp.f32 %v15718_v55  ;;  %v9514_v9 = vld [vmem:[%s17363_s4 + $0x30] sm:$0xf0]  ;;  %vm15811_vm6 = vmor %vm4504_vm5, %vm4505_vm4  ;;  %v4795_v29 = vand.u32 2147483648, %v15718_v55  ;;  %v9509_v12 = vor.u32 %v10929_v33, %v9506_v32  ;;  %v11017_v33 = vld [vmem:[%s17362_s3 + $0xcc] sm:$0xf] }
 0x485   :  { %v4473_v25 = vsel %vm15696_vm15, %v4472_v59, %v4468_v1  ;;  %v4487_v2 = vsel %vm4486_vm2, %v15659_v19, %v4483_v63  ;;  %v4501_v30 = vsub.f32 1.0, %v4500_v11  ;;  %v15740_v3 = vadd.f32 1.0, %v11354_v6  ;;  %v4760_v4 = vpop.f32.mrf.mxu2  ;;  %v4773_v57 = vpop.f32.mrf.mxu3  ;;  %v10933_v19 = vld [vmem:[%s17363_s4 + $0x2c] sm:$0xf]  ;;  %v9738_v32 = vld [vmem:[%s17362_s3 + $0xd8] sm:$0xf0] }
 0x486   :  { %v4492_v5 = vsel %vm4489_vm3, %v4491_v31, %v4487_v2  ;;  %v4515_v23 = vmul.f32 %v11352_v17, %v4473_v25  ;;  %v9517_v22 = vor.u32 %v10932_v8, %v9514_v9  ;;  %v9525_v0 = vor.u32 %v10933_v19, %v9522_v56  ;;  %5317 = vmatpush.bf16.msrb.mxu2 %v9505_v54  ;;  %v11020_v19 = vld [vmem:[%s17362_s3 + $0xe4] sm:$0xf]  ;;  %v9746_v56 = vld [vmem:[%s17362_s3 + $0xf0] sm:$0xf0] }
 0x487   :  { %v4514_v10 = vmul.f32 %v4492_v5, %v15045_v38  ;;  %v4502_v15 = vmul.f32 %v15715_v7, %v4501_v30  ;;  %11359 = vrcp.f32 %v15740_v3  ;;  %v4510_v38 = vand.u32 2147483648, %v15645_v42  ;;  %5291 = vmatpush.bf16.msrb.mxu0 %v9497_v53  ;;  %v9714_v54 = vld [vmem:[%s17362_s3 + $0xb0] sm:$0xf0] }
 0x488   :  { %v11356_v13 = vpop.eup %11355  ;;  %5303 = vmatpush.bf16.msrb.mxu1 %v9517_v22  ;;  %5329 = vmatpush.bf16.msrb.mxu3 %v9525_v0  ;;  %v4793_v35 = vand.u32 2147483647, %v15718_v55  ;;  %vm4509_vm8 = vcmp.eq.f32.partialorder %v4508_v34, 8.507059e+37  ;;  %vm4789_vm9 = vweird.f32 %v15718_v55  ;;  %v4796_v58 = vor.u32 1.1754944e-38, %v4795_v29  ;;  %v11016_v0 = vld [vmem:[%s17362_s3 + $0xc4] sm:$0xf] }
 0x489   :  { %v15773_v14 = vadd.f32 %v4515_v23, %v4514_v10  ;;  %v15775_v21 = vadd.f32 1.0, %v11356_v13  ;;  %v4503_v28 = vadd.f32 %v15715_v7, %v4502_v15  ;;  %v4511_v51 = vor.u32 1.1754944e-38, %v4510_v38  ;;  %v11022_v15 = vld [vmem:[%s17362_s3 + $0xec] sm:$0xf0]  ;;  %v11023_v13 = vld [vmem:[%s17362_s3 + $0xf4] sm:$0xf0] }
 0x48a   :  { %v11358_v60 = vpop.eup %11357  ;;  %v4812_v25 = vand.u32 2147483647, %v15740_v3  ;;  %vm4794_vm12 = vcmp.eq.f32.partialorder %v4793_v35, 8.507059e+37  ;;  %vm4808_vm13 = vweird.f32 %v15740_v3  ;;  %v11021_v38 = vld [vmem:[%s17362_s3 + $0xec] sm:$0xf]  ;;  %v9733_v44 = vor.u32 %v11016_v0, %v9730_v40 }
 0x48b   :  { %11361 = vtanh.f32 %v15773_v14  ;;  %v4785_v49 = vmul.f32 %v11358_v60, %v15718_v55  ;;  %v4507_v42 = vsel %vm15811_vm6, %v15715_v7, %v4503_v28  ;;  %vm4790_vm7 = vweird.f32 %v11358_v60  ;;  %v11014_v29 = vld [vmem:[%s17362_s3 + $0xac] sm:$0xf0]  ;;  %v11015_v35 = vld [vmem:[%s17362_s3 + $0xb4] sm:$0xf0]  ;;  %v11001_v0 = vld [vmem:[%s17362_s3 + $0x4c] sm:$0xf] }
 0x48c   :  { %11363 = vrcp.f32 %v15775_v21  ;;  %5304 = vmatpush.bf16.msrb.mxu1 %v9501_v46  ;;  %5330 = vmatpush.bf16.msrb.mxu3 %v9509_v12  ;;  %v4512_v63 = vsel %vm4509_vm8, %v4511_v51, %v4507_v42  ;;  %v4814_v7 = vand.u32 2147483648, %v15740_v3  ;;  %vm4791_vm11 = vmor %vm4789_vm9, %vm4790_vm7  ;;  %vm4813_vm15 = vcmp.eq.f32.partialorder %v4812_v25, 8.507059e+37  ;;  %v9720_v12 = vld [vmem:[%s17362_s3 + $0xa8] sm:$0xf]  ;;  %v9674_v40 = vld [vmem:[%s17362_s3 + $0x58] sm:$0xf0] }
 0x48d   :  { %v11360_v27 = vpop.eup %11359  ;;  %v4786_v45 = vsub.f32 1.0, %v4785_v49  ;;  %11365 = vtanh.f32 %v4777_v47  ;;  %v4832_v22 = vand.u32 2147483647, %v15775_v21  ;;  %v4834_v24 = vand.u32 2147483648, %v15775_v21  ;;  %v9736_v47 = vld [vmem:[%s17362_s3 + $0xc8] sm:$0xf] }
 0x48e   :  { %v4804_v37 = vmul.f32 %v11360_v27, %v15740_v3  ;;  %vm4809_vm10 = vweird.f32 %v11360_v27  ;;  %v4815_v20 = vor.u32 1.1754944e-38, %v4814_v7  ;;  %v9744_v3 = vld [vmem:[%s17362_s3 + $0xe0] sm:$0xf]  ;;  %vm4828_vm1 = vweird.f32 %v15775_v21 }
 0x48f   :  { %v4787_v62 = vmul.f32 %v11358_v60, %v4786_v45  ;;  %vm4810_vm14 = vmor %vm4808_vm13, %vm4809_vm10  ;;  %v9749_v28 = vor.u32 %v11020_v19, %v9746_v56  ;;  %v9757_v49 = vor.u32 %v11021_v38, %v9754_v26  ;;  %v4835_v51 = vor.u32 1.1754944e-38, %v4834_v24  ;;  %v9712_v45 = vld [vmem:[%s17362_s3 + $0xa0] sm:$0xf]  ;;  %v11007_v19 = vld [vmem:[%s17362_s3 + $0x74] sm:$0xf0] }
 0x490   :  { %v4805_v17 = vsub.f32 1.0, %v4804_v37  ;;  %vm4833_vm3 = vcmp.eq.f32.partialorder %v4832_v22, 8.507059e+37  ;;  %v9737_v46 = vor.u32 %v11019_v41, %v9736_v47  ;;  %v9741_v42 = vor.u32 %v11017_v33, %v9738_v32  ;;  %v11012_v37 = vld [vmem:[%s17362_s3 + $0xa4] sm:$0xf]  ;;  %v11005_v56 = vld [vmem:[%s17362_s3 + $0x6c] sm:$0xf] }
 0x491   :  { %v11362_v59 = vpop.eup %11361  ;;  %v4788_v11 = vadd.f32 %v11358_v60, %v4787_v62  ;;  %v9713_v7 = vor.u32 %v11014_v29, %v9712_v45  ;;  %v9721_v25 = vor.u32 %v11015_v35, %v9720_v12  ;;  %v9664_v26 = vld [vmem:[%s17362_s3 + $0x40] sm:$0xf]  ;;  %v9677_v41 = vor.u32 %v11001_v0, %v9674_v40  ;;  %v10996_v33 = vld [vmem:[%s17362_s3 + $0x24] sm:$0xf]  ;;  %v9650_v32 = vld [vmem:[%s17362_s3 + $0x30] sm:$0xf0] }
 0x492   :  { %v15823_v6 = vpop.eup %11363  ;;  %v4518_v31 = vmul.f32 %v11362_v59, %v4512_v63  ;;  %v4806_v1 = vmul.f32 %v11360_v27, %v4805_v17  ;;  %v11013_v17 = vld [vmem:[%s17362_s3 + $0xac] sm:$0xf]  ;;  %v9722_v59 = vld [vmem:[%s17362_s3 + $0xb8] sm:$0xf0]  ;;  %v9653_v29 = vor.u32 %v10996_v33, %v9650_v32  ;;  %v9634_v12 = vld [vmem:[%s17362_s3 + $0x10] sm:$0xf0] }
 0x493   :  { %v4792_v2 = vsel %vm4791_vm11, %v11358_v60, %v4788_v11  ;;  %v4824_v55 = vmul.f32 %v15823_v6, %v15775_v21  ;;  %v11366_v50 = vpop.eup %11365  ;;  %vm4829_vm0 = vweird.f32 %v15823_v6  ;;  %v9745_v60 = vor.u32 %v11022_v15, %v9744_v3  ;;  %v9682_v3 = vld [vmem:[%s17362_s3 + $0x70] sm:$0xf0]  ;;  %v9688_v15 = vld [vmem:[%s17362_s3 + $0x68] sm:$0xf]  ;;  %v10995_v35 = vld [vmem:[%s17362_s3 + $0x14] sm:$0xf0] }
 0x494   :  { %v4521_v30 = vpack.c.bf16 %v4518_v31, %v4518_v31  ;;  %v4797_v4 = vsel %vm4794_vm12, %v4796_v58, %v4792_v2  ;;  %v4807_v57 = vadd.f32 %v11360_v27, %v4806_v1  ;;  %vm15881_vm2 = vmor %vm4828_vm1, %vm4829_vm0  ;;  %v9717_v11 = vor.u32 %v11012_v37, %v9714_v54  ;;  %v9696_v58 = vld [vmem:[%s17362_s3 + $0x80] sm:$0xf]  ;;  %v11008_v31 = vld [vmem:[%s17362_s3 + $0x84] sm:$0xf] }
 0x495   :  { %v4825_v5 = vsub.f32 1.0, %v4824_v55  ;;  %v4839_v8 = vmul.f32 %v11366_v50, %v4797_v4  ;;  %v9725_v2 = vor.u32 %v11013_v17, %v9722_v59  ;;  %v9698_v55 = vld [vmem:[%s17362_s3 + $0x90] sm:$0xf0]  ;;  %v11011_v4 = vld [vmem:[%s17362_s3 + $0x94] sm:$0xf0]  ;;  %v9689_v22 = vor.u32 %v11007_v19, %v9688_v15 }
 0x496   :  { %9230 = vst [vmem:[%s17366_s7 + $0x10] sm:$0xf] %v4521_v30  ;;  %v4811_v23 = vsel %vm4810_vm14, %v11360_v27, %v4807_v57  ;;  %v9729_v27 = vor.u32 %v11018_v18, %v9728_v36  ;;  %v11009_v57 = vld [vmem:[%s17362_s3 + $0x8c] sm:$0xf]  ;;  %v9706_v50 = vld [vmem:[%s17362_s3 + $0x98] sm:$0xf0] }
 0x497   :  { %4522 = vst [vmem:[#allocation4 + $0x4] sm:$0xf] %v4521_v30  ;;  %v4816_v9 = vsel %vm4813_vm15, %v4815_v20, %v4811_v23  ;;  %v4826_v43 = vmul.f32 %v15823_v6, %v4825_v5  ;;  %v9704_v30 = vld [vmem:[%s17362_s3 + $0x88] sm:$0xf]  ;;  %v9701_v5 = vor.u32 %v11008_v31, %v9698_v55  ;;  %v9680_v23 = vld [vmem:[%s17362_s3 + $0x60] sm:$0xf] }
 0x498   :  { %v4838_v10 = vmul.f32 %v4816_v9, %v15122_v16  ;;  %v9752_v16 = vld [vmem:[%s17362_s3 + $0xe8] sm:$0xf]  ;;  %v9705_v9 = vor.u32 %v11011_v4, %v9704_v30  ;;  %v11000_v36 = vld [vmem:[%s17362_s3 + $0x44] sm:$0xf]  ;;  %v11003_v18 = vld [vmem:[%s17362_s3 + $0x54] sm:$0xf0] }
 0x499   :  { %v4827_v61 = vadd.f32 %v15823_v6, %v4826_v43  ;;  %v9753_v48 = vor.u32 %v11023_v13, %v9752_v16  ;;  %v9709_v43 = vor.u32 %v11009_v57, %v9706_v50  ;;  %v9690_v16 = vld [vmem:[%s17362_s3 + $0x78] sm:$0xf0]  ;;  %v10992_v54 = vld [vmem:[%s17362_s3 + $0x4] sm:$0xf]  ;;  %v10993_v17 = vld [vmem:[%s17362_s3 + $0xc] sm:$0xf] }
 0x49a   :  { %v15841_v52 = vadd.f32 %v4839_v8, %v4838_v10  ;;  %v11006_v8 = vld [vmem:[%s17362_s3 + $0x6c] sm:$0xf0]  ;;  %v11004_v10 = vld [vmem:[%s17362_s3 + $0x64] sm:$0xf]  ;;  %v9693_v24 = vor.u32 %v11005_v56, %v9690_v16  ;;  %v9642_v59 = vld [vmem:[%s17362_s3 + $0x18] sm:$0xf0] }
 0x49b   :  { %v4831_v34 = vsel %vm15881_vm2, %v15823_v6, %v4827_v61  ;;  %v11010_v6 = vld [vmem:[%s17362_s3 + $0x8c] sm:$0xf0]  ;;  %v9681_v13 = vor.u32 %v11006_v8, %v9680_v23  ;;  %v9685_v38 = vor.u32 %v11004_v10, %v9682_v3  ;;  %v9875_v31 = vld [vmem:[%s17364_s5 + $0xe0] sm:$0xf]  ;;  %v9877_v55 = vld [vmem:[%s17364_s5 + $0xf0] sm:$0xf0] }
 0x49c   :  { %11367 = vtanh.f32 %v15841_v52  ;;  %v4836_v62 = vsel %vm4833_vm3, %v4835_v51, %v4831_v34  ;;  %v9697_v20 = vor.u32 %v11010_v6, %v9696_v58  ;;  %v11002_v61 = vld [vmem:[%s17362_s3 + $0x4c] sm:$0xf0]  ;;  %v9656_v34 = vld [vmem:[%s17362_s3 + $0x28] sm:$0xf]  ;;  %v10999_v51 = vld [vmem:[%s17362_s3 + $0x34] sm:$0xf0]  ;;  %v9645_v58 = vor.u32 %v10993_v17, %v9642_v59 }
 0x49d   :  { %v9665_v39 = vor.u32 %v11002_v61, %v9664_v26  ;;  %v9883_v30 = vld [vmem:[%s17364_s5 + $0xe8] sm:$0xf]  ;;  %v11087_v4 = vld [vmem:[%s17364_s5 + $0xf4] sm:$0xf0]  ;;  %v9859_v8 = vld [vmem:[%s17364_s5 + $0xc0] sm:$0xf] }
 0x49e   :  { %v4879_v21 = vld [vmem:[#allocation4 + $0x4] sm:$0xf]  ;;  %v9884_v50 = vor.u32 %v11087_v4, %v9883_v30  ;;  %v9861_v3 = vld [vmem:[%s17364_s5 + $0xd0] sm:$0xf0]  ;;  %v9867_v15 = vld [vmem:[%s17364_s5 + $0xc8] sm:$0xf] }
 0x49f   :  { %5080 = vmatmul.bf16.vlgmr.msra.gmra.mxu0 %v4879_v21  ;;  %5093 = vmatmul.bf16.vlgmr.msra.gmra.mxu1 %v4879_v21  ;;  %v11083_v56 = vld [vmem:[%s17364_s5 + $0xd4] sm:$0xf0]  ;;  %v11081_v16 = vld [vmem:[%s17364_s5 + $0xcc] sm:$0xf]  ;;  %v9843_v61 = vld [vmem:[%s17364_s5 + $0xa0] sm:$0xf] }
 0x4a0   :  { %5106 = vmatmul.bf16.vlgmr.msra.gmra.mxu2 %v4879_v21  ;;  %5119 = vmatmul.bf16.vlgmr.msra.gmra.mxu3 %v4879_v21  ;;  %v11074_v33 = vld [vmem:[%s17364_s5 + $0x8c] sm:$0xf0]  ;;  %v11072_v32 = vld [vmem:[%s17364_s5 + $0x84] sm:$0xf]  ;;  %v9819_v17 = vld [vmem:[%s17364_s5 + $0x68] sm:$0xf] }
 0x4a1   :  { %5618 = vmatpush.bf16.msra.mxu0 %v9745_v60  ;;  %5631 = vmatpush.bf16.msra.mxu1 %v9749_v28  ;;  %v9666_v60 = vld [vmem:[%s17362_s3 + $0x50] sm:$0xf0]  ;;  %v9672_v28 = vld [vmem:[%s17362_s3 + $0x48] sm:$0xf]  ;;  %v11071_v59 = vld [vmem:[%s17364_s5 + $0x74] sm:$0xf0] }
 0x4a2   :  { %v11368_v53 = vpop.eup %11367  ;;  %5644 = vmatpush.bf16.msra.mxu2 %v9753_v48  ;;  %5657 = vmatpush.bf16.msra.mxu3 %v9757_v49  ;;  %v9669_v21 = vor.u32 %v11000_v36, %v9666_v60  ;;  %v9648_v48 = vld [vmem:[%s17362_s3 + $0x20] sm:$0xf]  ;;  %v10998_v49 = vld [vmem:[%s17362_s3 + $0x2c] sm:$0xf0]  ;;  %v9673_v47 = vor.u32 %v11003_v18, %v9672_v28  ;;  %v9845_v60 = vld [vmem:[%s17364_s5 + $0xb0] sm:$0xf0] }
 0x4a3   :  { %v4842_v63 = vmul.f32 %v11368_v53, %v4836_v62  ;;  %v9649_v45 = vor.u32 %v10998_v49, %v9648_v48  ;;  %v9632_v53 = vld [vmem:[%s17362_s3] sm:$0xf]  ;;  %v9640_v62 = vld [vmem:[%s17362_s3 + $0x8] sm:$0xf]  ;;  %v11079_v18 = vld [vmem:[%s17364_s5 + $0xb4] sm:$0xf0] }
 0x4a4   :  { %v9851_v28 = vld [vmem:[%s17364_s5 + $0xa8] sm:$0xf]  ;;  %v11066_v30 = vld [vmem:[%s17364_s5 + $0x4c] sm:$0xf0]  ;;  %v11064_v4 = vld [vmem:[%s17364_s5 + $0x44] sm:$0xf] }
 0x4a5   :  { %5619 = vmatpush.bf16.msra.mxu0 %v9729_v27  ;;  %5632 = vmatpush.bf16.msra.mxu1 %v9733_v44  ;;  %v4845_v1 = vpack.c.bf16 %v4842_v63, %v4842_v63  ;;  %v10997_v27 = vld [vmem:[%s17362_s3 + $0x2c] sm:$0xf]  ;;  %v9658_v44 = vld [vmem:[%s17362_s3 + $0x38] sm:$0xf0]  ;;  %v9852_v40 = vor.u32 %v11079_v18, %v9851_v28 }
 0x4a6   :  { %5645 = vmatpush.bf16.msra.mxu2 %v9737_v46  ;;  %5658 = vmatpush.bf16.msra.mxu3 %v9741_v42  ;;  %v10994_v46 = vld [vmem:[%s17362_s3 + $0xc] sm:$0xf0]  ;;  %v9657_v42 = vor.u32 %v10999_v51, %v9656_v34  ;;  %v9661_v37 = vor.u32 %v10997_v27, %v9658_v44  ;;  %v9829_v51 = vld [vmem:[%s17364_s5 + $0x90] sm:$0xf0]  ;;  %v9835_v27 = vld [vmem:[%s17364_s5 + $0x88] sm:$0xf] }
 0x4a7   :  { %4846 = vst [vmem:[#allocation4] sm:$0xf] %v4845_v1  ;;  %v9633_v63 = vor.u32 %v10994_v46, %v9632_v53  ;;  %v11075_v44 = vld [vmem:[%s17364_s5 + $0x94] sm:$0xf0]  ;;  %v11073_v53 = vld [vmem:[%s17364_s5 + $0x8c] sm:$0xf] }
 0x4a8   :  { %v9837_v46 = vld [vmem:[%s17364_s5 + $0x98] sm:$0xf0]  ;;  %v11061_v18 = vld [vmem:[%s17364_s5 + $0x2c] sm:$0xf] }
 0x4a9   :  { %5620 = vmatpush.bf16.msra.mxu0 %v9713_v7  ;;  %5633 = vmatpush.bf16.msra.mxu1 %v9717_v11  ;;  %v9637_v7 = vor.u32 %v10992_v54, %v9634_v12  ;;  %v9641_v11 = vor.u32 %v10995_v35, %v9640_v62  ;;  %v11070_v54 = vld [vmem:[%s17364_s5 + $0x6c] sm:$0xf0]  ;;  %v11068_v12 = vld [vmem:[%s17364_s5 + $0x64] sm:$0xf]  ;;  %v9813_v35 = vld [vmem:[%s17364_s5 + $0x70] sm:$0xf0] }
 0x4aa   :  { %5646 = vmatpush.bf16.msra.mxu2 %v9721_v25  ;;  %5659 = vmatpush.bf16.msra.mxu3 %v9725_v2  ;;  %v11084_v25 = vld [vmem:[%s17364_s5 + $0xe4] sm:$0xf] }
 0x4ab   :  { %v9880_v57 = vor.u32 %v11084_v25, %v9877_v55  ;;  %v9795_v55 = vld [vmem:[%s17364_s5 + $0x40] sm:$0xf] }
 0x4ad   :  { %5621 = vmatpush.bf16.msra.mxu0 %v9697_v20  ;;  %5634 = vmatpush.bf16.msra.mxu1 %v9701_v5  ;;  %v11085_v20 = vld [vmem:[%s17364_s5 + $0xec] sm:$0xf]  ;;  %v9885_v5 = vld [vmem:[%s17364_s5 + $0xf8] sm:$0xf0] }
 0x4ae   :  { %5647 = vmatpush.bf16.msra.mxu2 %v9705_v9  ;;  %5660 = vmatpush.bf16.msra.mxu3 %v9709_v43  ;;  %v5425_v6 = vld [vmem:[#allocation4] sm:$0xf]  ;;  %v9888_v23 = vor.u32 %v11085_v20, %v9885_v5  ;;  %v11082_v9 = vld [vmem:[%s17364_s5 + $0xcc] sm:$0xf0]  ;;  %v11080_v43 = vld [vmem:[%s17364_s5 + $0xc4] sm:$0xf] }
 0x4af   :  { %5292 = vmatmul.bf16.vlgmr.msrb.gmra.mxu0 %v4845_v1  ;;  %5305 = vmatmul.bf16.vlgmr.msrb.gmra.mxu1 %v4845_v1  ;;  %v9860_v10 = vor.u32 %v11082_v9, %v9859_v8  ;;  %v9864_v19 = vor.u32 %v11080_v43, %v9861_v3  ;;  %v9803_v5 = vld [vmem:[%s17364_s5 + $0x48] sm:$0xf]  ;;  %v11065_v8 = vld [vmem:[%s17364_s5 + $0x4c] sm:$0xf]  ;;  %v16196_v9 = vld [vmem:[%s17365_s6] sm:$0xf] }
 0x4b0   :  { %5318 = vmatmul.bf16.vlgmr.msrb.gmra.mxu2 %v4845_v1  ;;  %5331 = vmatmul.bf16.vlgmr.msrb.gmra.mxu3 %v4845_v1  ;;  %v11086_v1 = vld [vmem:[%s17364_s5 + $0xec] sm:$0xf0] }
 0x4b1   :  { %5622 = vmatpush.bf16.msra.mxu0 %v9681_v13  ;;  %5635 = vmatpush.bf16.msra.mxu1 %v9685_v38  ;;  %v9876_v2 = vor.u32 %v11086_v1, %v9875_v31  ;;  %v9869_v13 = vld [vmem:[%s17364_s5 + $0xd8] sm:$0xf0]  ;;  %v9868_v38 = vor.u32 %v11083_v56, %v9867_v15  ;;  %v9779_v15 = vld [vmem:[%s17364_s5 + $0x20] sm:$0xf]  ;;  %v11060_v56 = vld [vmem:[%s17364_s5 + $0x24] sm:$0xf] }
 0x4b2   :  { %5648 = vmatpush.bf16.msra.mxu2 %v9689_v22  ;;  %5661 = vmatpush.bf16.msra.mxu3 %v9693_v24  ;;  %v9872_v26 = vor.u32 %v11081_v16, %v9869_v13  ;;  %v11078_v22 = vld [vmem:[%s17364_s5 + $0xac] sm:$0xf0]  ;;  %v11076_v24 = vld [vmem:[%s17364_s5 + $0xa4] sm:$0xf]  ;;  %v9821_v31 = vld [vmem:[%s17364_s5 + $0x78] sm:$0xf0] }
 0x4b3   :  { %v9844_v36 = vor.u32 %v11078_v22, %v9843_v61  ;;  %v9848_v0 = vor.u32 %v11076_v24, %v9845_v60  ;;  %v9781_v13 = vld [vmem:[%s17364_s5 + $0x30] sm:$0xf0]  ;;  %v5338_v24 = vperm.slane %v16196_v9, 0 }
 0x4b4   :  { %v9784_v60 = vor.u32 %v11060_v56, %v9781_v13  ;;  %v9997_v13 = vld [vmem:[%s17363_s4 + $0xd8] sm:$0xf0] }
 0x4b5   :  { %5623 = vmatpush.bf16.msra.mxu0 %v9665_v39  ;;  %5636 = vmatpush.bf16.msra.mxu1 %v9669_v21  ;;  %v11077_v39 = vld [vmem:[%s17364_s5 + $0xac] sm:$0xf]  ;;  %v9853_v21 = vld [vmem:[%s17364_s5 + $0xb8] sm:$0xf0] }
 0x4b6   :  { %5649 = vmatpush.bf16.msra.mxu2 %v9673_v47  ;;  %5662 = vmatpush.bf16.msra.mxu3 %v9677_v41  ;;  %v9856_v47 = vor.u32 %v11077_v39, %v9853_v21  ;;  %v9827_v41 = vld [vmem:[%s17364_s5 + $0x80] sm:$0xf]  ;;  %v5341_v39 = vperm.slane %v16196_v9, 3  ;;  %v9789_v21 = vld [vmem:[%s17364_s5 + $0x38] sm:$0xf0] }
 0x4b7   :  { %v9828_v34 = vor.u32 %v11074_v33, %v9827_v41  ;;  %v9792_v33 = vor.u32 %v11061_v18, %v9789_v21  ;;  %v11047_v18 = vld [vmem:[%s17363_s4 + $0xb4] sm:$0xf0]  ;;  %v9981_v21 = vld [vmem:[%s17363_s4 + $0xb8] sm:$0xf0] }
 0x4b9   :  { %5624 = vmatpush.bf16.msra.mxu0 %v9649_v45  ;;  %5637 = vmatpush.bf16.msra.mxu1 %v9653_v29  ;;  %v9832_v45 = vor.u32 %v11072_v32, %v9829_v51  ;;  %v9836_v29 = vor.u32 %v11075_v44, %v9835_v27  ;;  %v9763_v32 = vld [vmem:[%s17364_s5] sm:$0xf]  ;;  %v11056_v51 = vld [vmem:[%s17364_s5 + $0x4] sm:$0xf]  ;;  %v11059_v44 = vld [vmem:[%s17364_s5 + $0x14] sm:$0xf0] }
 0x4ba   :  { %5650 = vmatpush.bf16.msra.mxu2 %v9657_v42  ;;  %5663 = vmatpush.bf16.msra.mxu3 %v9661_v37  ;;  %v9840_v42 = vor.u32 %v11073_v53, %v9837_v46  ;;  %v9811_v37 = vld [vmem:[%s17364_s5 + $0x60] sm:$0xf] }
 0x4bb   :  { %v9812_v62 = vor.u32 %v11070_v54, %v9811_v37  ;;  %v9773_v37 = vld [vmem:[%s17364_s5 + $0x18] sm:$0xf0]  ;;  %v10003_v54 = vld [vmem:[%s17363_s4 + $0xe0] sm:$0xf] }
 0x4bd   :  { %5625 = vmatpush.bf16.msra.mxu0 %v9633_v63  ;;  %5638 = vmatpush.bf16.msra.mxu1 %v9637_v7 }
 0x4be   :  { %5651 = vmatpush.bf16.msra.mxu2 %v9641_v11  ;;  %5664 = vmatpush.bf16.msra.mxu3 %v9645_v58  ;;  %v9816_v11 = vor.u32 %v11068_v12, %v9813_v35  ;;  %v9820_v58 = vor.u32 %v11071_v59, %v9819_v17  ;;  %v11052_v35 = vld [vmem:[%s17363_s4 + $0xe4] sm:$0xf]  ;;  %v10005_v17 = vld [vmem:[%s17363_s4 + $0xf0] sm:$0xf0] }
 0x4c0   :  { %5626 = vmatmul.bf16.vlgmr.msra.gmra.mxu0 %v5425_v6  ;;  %5639 = vmatmul.bf16.vlgmr.msra.gmra.mxu1 %v5425_v6 }
 0x4c1   :  { %5652 = vmatmul.bf16.vlgmr.msra.gmra.mxu2 %v5425_v6  ;;  %5665 = vmatmul.bf16.vlgmr.msra.gmra.mxu3 %v5425_v6  ;;  %v11069_v6 = vld [vmem:[%s17364_s5 + $0x6c] sm:$0xf] }
 0x4c2   :  { %5967 = vmatpush.bf16.msrb.mxu0 %v9876_v2  ;;  %5980 = vmatpush.bf16.msrb.mxu1 %v9880_v57  ;;  %v9824_v2 = vor.u32 %v11069_v6, %v9821_v31  ;;  %v9797_v57 = vld [vmem:[%s17364_s5 + $0x50] sm:$0xf0]  ;;  %v10008_v6 = vor.u32 %v11052_v35, %v10005_v17  ;;  %v10011_v31 = vld [vmem:[%s17363_s4 + $0xe8] sm:$0xf] }
 0x4c3   :  { %5993 = vmatpush.bf16.msrb.mxu2 %v9884_v50  ;;  %6006 = vmatpush.bf16.msrb.mxu3 %v9888_v23  ;;  %v9796_v50 = vor.u32 %v11066_v30, %v9795_v55  ;;  %v9800_v20 = vor.u32 %v11064_v4, %v9797_v57  ;;  %v11067_v23 = vld [vmem:[%s17364_s5 + $0x54] sm:$0xf0] }
 0x4c4   :  { %v9804_v43 = vor.u32 %v11067_v23, %v9803_v5  ;;  %v11048_v5 = vld [vmem:[%s17363_s4 + $0xc4] sm:$0xf] }
 0x4c6   :  { %5968 = vmatpush.bf16.msrb.mxu0 %v9860_v10  ;;  %5981 = vmatpush.bf16.msrb.mxu1 %v9864_v19  ;;  %v9805_v10 = vld [vmem:[%s17364_s5 + $0x58] sm:$0xf0]  ;;  %v11062_v19 = vld [vmem:[%s17364_s5 + $0x2c] sm:$0xf0] }
 0x4c7   :  { %5994 = vmatpush.bf16.msrb.mxu2 %v9868_v38  ;;  %6007 = vmatpush.bf16.msrb.mxu3 %v9872_v26  ;;  %v9808_v3 = vor.u32 %v11065_v8, %v9805_v10  ;;  %v9780_v16 = vor.u32 %v11062_v19, %v9779_v15  ;;  %v9787_v38 = vld [vmem:[%s17364_s5 + $0x28] sm:$0xf]  ;;  %v11063_v26 = vld [vmem:[%s17364_s5 + $0x34] sm:$0xf0] }
 0x4c8   :  { %v9788_v28 = vor.u32 %v11063_v26, %v9787_v38  ;;  %v9995_v15 = vld [vmem:[%s17363_s4 + $0xc8] sm:$0xf]  ;;  %v11051_v19 = vld [vmem:[%s17363_s4 + $0xd4] sm:$0xf0] }
 0x4ca   :  { %5969 = vmatpush.bf16.msrb.mxu0 %v9844_v36  ;;  %5982 = vmatpush.bf16.msrb.mxu1 %v9848_v0  ;;  %v5339_v36 = vperm.slane %v16196_v9, 1 }
 0x4cb   :  { %5995 = vmatpush.bf16.msrb.mxu2 %v9852_v40  ;;  %6008 = vmatpush.bf16.msrb.mxu3 %v9856_v47 }
 0x4ce   :  { %5970 = vmatpush.bf16.msrb.mxu0 %v9828_v34  ;;  %5983 = vmatpush.bf16.msrb.mxu1 %v9832_v45  ;;  %v11058_v34 = vld [vmem:[%s17364_s5 + $0xc] sm:$0xf0] }
 0x4cf   :  { %5996 = vmatpush.bf16.msrb.mxu2 %v9836_v29  ;;  %6009 = vmatpush.bf16.msrb.mxu3 %v9840_v42  ;;  %v9764_v27 = vor.u32 %v11058_v34, %v9763_v32  ;;  %v11057_v42 = vld [vmem:[%s17364_s5 + $0xc] sm:$0xf] }
 0x4d0   :  { %v9776_v12 = vor.u32 %v11057_v42, %v9773_v37  ;;  %v9963_v37 = vld [vmem:[%s17363_s4 + $0x88] sm:$0xf] }
 0x4d2   :  { %5971 = vmatpush.bf16.msrb.mxu0 %v9812_v62  ;;  %5984 = vmatpush.bf16.msrb.mxu1 %v9816_v11  ;;  %v11054_v62 = vld [vmem:[%s17363_s4 + $0xec] sm:$0xf0] }
 0x4d3   :  { %5997 = vmatpush.bf16.msrb.mxu2 %v9820_v58  ;;  %6010 = vmatpush.bf16.msrb.mxu3 %v9824_v2  ;;  %v10004_v58 = vor.u32 %v11054_v62, %v10003_v54  ;;  %v10013_v2 = vld [vmem:[%s17363_s4 + $0xf8] sm:$0xf0]  ;;  %v11043_v62 = vld [vmem:[%s17363_s4 + $0x94] sm:$0xf0] }
 0x4d6   :  { %5972 = vmatpush.bf16.msrb.mxu0 %v9796_v50  ;;  %5985 = vmatpush.bf16.msrb.mxu1 %v9800_v20  ;;  %v9987_v50 = vld [vmem:[%s17363_s4 + $0xc0] sm:$0xf]  ;;  %v11050_v20 = vld [vmem:[%s17363_s4 + $0xcc] sm:$0xf0] }
 0x4d7   :  { %5998 = vmatpush.bf16.msrb.mxu2 %v9804_v43  ;;  %6011 = vmatpush.bf16.msrb.mxu3 %v9808_v3  ;;  %v9988_v10 = vor.u32 %v11050_v20, %v9987_v50  ;;  %v9989_v3 = vld [vmem:[%s17363_s4 + $0xd0] sm:$0xf0]  ;;  %v11036_v20 = vld [vmem:[%s17363_s4 + $0x64] sm:$0xf] }
 0x4d8   :  { %v9992_v56 = vor.u32 %v11048_v5, %v9989_v3 }
 0x4da   :  { %5973 = vmatpush.bf16.msrb.mxu0 %v9780_v16  ;;  %5986 = vmatpush.bf16.msrb.mxu1 %v9784_v60  ;;  %v11049_v16 = vld [vmem:[%s17363_s4 + $0xcc] sm:$0xf]  ;;  %v9973_v60 = vld [vmem:[%s17363_s4 + $0xb0] sm:$0xf0] }
 0x4db   :  { %5999 = vmatpush.bf16.msrb.mxu2 %v9788_v28  ;;  %6012 = vmatpush.bf16.msrb.mxu3 %v9792_v33  ;;  %v10000_v26 = vor.u32 %v11049_v16, %v9997_v13  ;;  %v9979_v28 = vld [vmem:[%s17363_s4 + $0xa8] sm:$0xf]  ;;  %v11037_v13 = vld [vmem:[%s17363_s4 + $0x6c] sm:$0xf] }
 0x4de   :  { %5974 = vmatpush.bf16.msrb.mxu0 %v9764_v27  ;;  %v11042_v27 = vld [vmem:[%s17363_s4 + $0x8c] sm:$0xf0] }
 0x4df   :  { %6013 = vmatpush.bf16.msrb.mxu3 %v9776_v12 }
 0x4e2   :  { %6179 = vmatpush.bf16.msra.mxu0 %v10004_v58 }
 0x4e6   :  { %6180 = vmatpush.bf16.msra.mxu0 %v9988_v10 }
 0x51c   :  { %v16116_v48 = vpop.f32.mrf.mxu0  ;;  %v16118_v49 = vpop.f32.mrf.mxu1 }
 0x523   :  { %v16162_v63 = vpop.f32.mrf.mxu2  ;;  %v16164_v7 = vpop.f32.mrf.mxu3 }
 0x524   :  { %v5083_v1 = vpop.f32.mrf.mxu0  ;;  %v5096_v25 = vpop.f32.mrf.mxu1 }
 0x525   :  { %v11055_v1 = vld [vmem:[%s17363_s4 + $0xf4] sm:$0xf0]  ;;  %v11053_v25 = vld [vmem:[%s17363_s4 + $0xec] sm:$0xf] }
 0x526   :  { %v10012_v4 = vor.u32 %v11055_v1, %v10011_v31  ;;  %v10016_v57 = vor.u32 %v11053_v25, %v10013_v2  ;;  %v9964_v31 = vor.u32 %v11043_v62, %v9963_v37  ;;  %v9939_v1 = vld [vmem:[%s17363_s4 + $0x60] sm:$0xf]  ;;  %v11038_v25 = vld [vmem:[%s17363_s4 + $0x6c] sm:$0xf0] }
 0x527   :  { %v9940_v50 = vor.u32 %v11038_v25, %v9939_v1 }
 0x528   :  { %6218 = vmatpush.bf16.msra.mxu3 %v10016_v57 }
 0x52b   :  { %v5109_v61 = vpop.f32.mrf.mxu2  ;;  %v5122_v22 = vpop.f32.mrf.mxu3 }
 0x52c   :  { %v5293_v0 = vpop.f32.mrf.mxu0  ;;  %v5306_v40 = vpop.f32.mrf.mxu1  ;;  %v9971_v61 = vld [vmem:[%s17363_s4 + $0xa0] sm:$0xf]  ;;  %v11046_v22 = vld [vmem:[%s17363_s4 + $0xac] sm:$0xf0]  ;;  %6219 = vmatpush.bf16.msra.mxu3 %v10000_v26 }
 0x52d   :  { %v5294_v47 = vadd.f32 %v5293_v0, %v16116_v48  ;;  %v5307_v41 = vadd.f32 %v5306_v40, %v16118_v49  ;;  %v9765_v48 = vld [vmem:[%s17364_s5 + $0x10] sm:$0xf0]  ;;  %v9771_v49 = vld [vmem:[%s17364_s5 + $0x8] sm:$0xf]  ;;  %v9923_v26 = vld [vmem:[%s17363_s4 + $0x40] sm:$0xf] }
 0x52e   :  { %v9768_v53 = vor.u32 %v11056_v51, %v9765_v48  ;;  %v9772_v46 = vor.u32 %v11059_v44, %v9771_v49  ;;  %v9955_v51 = vld [vmem:[%s17363_s4 + $0x80] sm:$0xf]  ;;  %v5340_v44 = vperm.slane %v16196_v9, 2  ;;  %v9957_v9 = vld [vmem:[%s17363_s4 + $0x90] sm:$0xf0] }
 0x52f   :  { %v5346_v45 = vadd.f32 %v5338_v24, %v5294_v47  ;;  %v5347_v29 = vadd.f32 %v5339_v36, %v5307_v41  ;;  %v11044_v24 = vld [vmem:[%s17363_s4 + $0xa4] sm:$0xf]  ;;  %v9972_v36 = vor.u32 %v11046_v22, %v9971_v61  ;;  %v9980_v41 = vor.u32 %v11047_v18, %v9979_v28  ;;  %v9925_v28 = vld [vmem:[%s17363_s4 + $0x50] sm:$0xf0] }
 0x530   :  { %5987 = vmatpush.bf16.msrb.mxu1 %v9768_v53  ;;  %6000 = vmatpush.bf16.msrb.mxu2 %v9772_v46  ;;  %v9976_v40 = vor.u32 %v11044_v24, %v9973_v60  ;;  %v9626_v53 = vld [vmem:[%s17359_s0 + $0xc0] sm:$0xff]  ;;  %v9627_v46 = vld [vmem:[%s17359_s0 + $0xc8] sm:$0xff]  ;;  %v9956_v42 = vor.u32 %v11042_v27, %v9955_v51 }
 0x531   :  { %v9622_v59 = vmul.f32 -1.442695, %v5346_v45  ;;  %v9623_v11 = vmul.f32 -1.442695, %v5347_v29  ;;  %6181 = vmatpush.bf16.msra.mxu0 %v9972_v36  ;;  %v11034_v36 = vld [vmem:[%s17363_s4 + $0x4c] sm:$0xf0] }
 0x532   :  { %v11032_v60 = vld [vmem:[%s17363_s4 + $0x44] sm:$0xf]  ;;  %v11033_v27 = vld [vmem:[%s17363_s4 + $0x4c] sm:$0xf] }
 0x533   :  { %11369 = vpow2.f32 %v9622_v59  ;;  %v5319_v55 = vpop.f32.mrf.mxu2  ;;  %v5332_v30 = vpop.f32.mrf.mxu3  ;;  %v11041_v59 = vld [vmem:[%s17363_s4 + $0x8c] sm:$0xf] }
 0x534   :  { %11371 = vpow2.f32 %v9623_v11  ;;  %v5333_v23 = vadd.f32 %v5332_v30, %v16164_v7  ;;  %v5295_v8 = vpop.f32.mrf.mxu0  ;;  %v5308_v43 = vpop.f32.mrf.mxu1  ;;  %6192 = vmatpush.bf16.msra.mxu1 %v10008_v6  ;;  %6205 = vmatpush.bf16.msra.mxu2 %v10012_v4  ;;  %v9996_v7 = vor.u32 %v11051_v19, %v9995_v15  ;;  %v5320_v49 = vadd.f32 %v5319_v55, %v16162_v63  ;;  %v11040_v63 = vld [vmem:[%s17363_s4 + $0x84] sm:$0xf]  ;;  %v9965_v11 = vld [vmem:[%s17363_s4 + $0x98] sm:$0xf0]  ;;  %v9947_v19 = vld [vmem:[%s17363_s4 + $0x68] sm:$0xf] }
 0x535   :  { %6182 = vmatpush.bf16.msra.mxu0 %v9956_v42  ;;  %v9960_v6 = vor.u32 %v11040_v63, %v9957_v9  ;;  %v9629_v4 = vld [vmem:[%s17359_s0 + $0xd8] sm:$0xff]  ;;  %v9968_v57 = vor.u32 %v11041_v59, %v9965_v11  ;;  %v9941_v43 = vld [vmem:[%s17363_s4 + $0x70] sm:$0xf0]  ;;  %v9924_v63 = vor.u32 %v11034_v36, %v9923_v26  ;;  %v9928_v9 = vor.u32 %v11032_v60, %v9925_v28  ;;  %v11024_v60 = vld [vmem:[%s17363_s4 + $0x4] sm:$0xf] }
 0x536   :  { %v5349_v38 = vadd.f32 %v5341_v39, %v5333_v23  ;;  %v11045_v39 = vld [vmem:[%s17363_s4 + $0xac] sm:$0xf]  ;;  %v5348_v58 = vadd.f32 %v5340_v44, %v5320_v49  ;;  %v9944_v15 = vor.u32 %v11036_v20, %v9941_v43  ;;  %v11028_v20 = vld [vmem:[%s17363_s4 + $0x24] sm:$0xf]  ;;  %v9915_v43 = vld [vmem:[%s17363_s4 + $0x28] sm:$0xf] }
 0x537   :  { %v9984_v33 = vor.u32 %v11045_v39, %v9981_v21 }
 0x538   :  { %v9624_v0 = vmul.f32 -1.442695, %v5349_v38  ;;  %6193 = vmatpush.bf16.msra.mxu1 %v9992_v56  ;;  %6206 = vmatpush.bf16.msra.mxu2 %v9996_v7  ;;  %v11039_v56 = vld [vmem:[%s17363_s4 + $0x74] sm:$0xf0]  ;;  %v9949_v38 = vld [vmem:[%s17363_s4 + $0x78] sm:$0xf0] }
 0x539   :  { %v11370_v47 = vpop.eup %11369  ;;  %6220 = vmatpush.bf16.msra.mxu3 %v9984_v33  ;;  %6183 = vmatpush.bf16.msra.mxu0 %v9940_v50  ;;  %v9948_v51 = vor.u32 %v11039_v56, %v9947_v19  ;;  %v9917_v56 = vld [vmem:[%s17363_s4 + $0x38] sm:$0xf0] }
 0x53a   :  { %v11372_v32 = vpop.eup %11371  ;;  %v16329_v34 = vadd.f32 1.0, %v11370_v47  ;;  %11373 = vpow2.f32 %v9624_v0  ;;  %v9931_v47 = vld [vmem:[%s17363_s4 + $0x48] sm:$0xf] }
 0x53b   :  { %v16337_v48 = vadd.f32 1.0, %v11372_v32  ;;  %v5321_v45 = vpop.f32.mrf.mxu2  ;;  %v5334_v29 = vpop.f32.mrf.mxu3  ;;  %v11025_v32 = vld [vmem:[%s17363_s4 + $0xc] sm:$0xf] }
 0x53c   :  { %11375 = vrcp.f32 %v16329_v34  ;;  %6194 = vmatpush.bf16.msra.mxu1 %v9976_v40  ;;  %6207 = vmatpush.bf16.msra.mxu2 %v9980_v41  ;;  %v5364_v55 = vand.u32 2147483647, %v16329_v34  ;;  %v5366_v5 = vand.u32 2147483648, %v16329_v34  ;;  %vm5360_vm5 = vweird.f32 %v16329_v34  ;;  %v11035_v41 = vld [vmem:[%s17363_s4 + $0x54] sm:$0xf0] }
 0x53d   :  { %11377 = vrcp.f32 %v16337_v48  ;;  %v5627_v54 = vpop.f32.mrf.mxu0  ;;  %v5640_v12 = vpop.f32.mrf.mxu1  ;;  %v5383_v3 = vand.u32 2147483647, %v16337_v48  ;;  %6221 = vmatpush.bf16.msra.mxu3 %v9968_v57  ;;  %vm5379_vm4 = vweird.f32 %v16337_v48  ;;  %v5385_v0 = vand.u32 2147483648, %v16337_v48  ;;  %v9933_v29 = vld [vmem:[%s17363_s4 + $0x58] sm:$0xf0]  ;;  %6184 = vmatpush.bf16.msra.mxu0 %v9924_v63 }
 0x53e   :  { %v5670_v35 = vadd.f32 %v9626_v53, %v5627_v54  ;;  %v5671_v17 = vadd.f32 %v9627_v46, %v5640_v12  ;;  %vm16432_vm7 = vcmp.eq.f32.partialorder %v5364_v55, 8.507059e+37  ;;  %v9952_v45 = vor.u32 %v11037_v13, %v9949_v38  ;;  %v9907_v53 = vld [vmem:[%s17363_s4 + $0x20] sm:$0xf]  ;;  %v11030_v54 = vld [vmem:[%s17363_s4 + $0x2c] sm:$0xf0] }
 0x53f   :  { %v9932_v37 = vor.u32 %v11035_v41, %v9931_v47  ;;  %v5367_v11 = vor.u32 1.1754944e-38, %v5366_v5  ;;  %v5386_v25 = vor.u32 1.1754944e-38, %v5385_v0  ;;  %vm5384_vm11 = vcmp.eq.f32.partialorder %v5383_v3, 8.507059e+37  ;;  %v11029_v3 = vld [vmem:[%s17363_s4 + $0x2c] sm:$0xf] }
 0x540   :  { %v11374_v2 = vpop.eup %11373  ;;  %v9758_v30 = vmul.f32 -1.442695, %v5670_v35  ;;  %v9759_v8 = vmul.f32 -1.442695, %v5671_v17  ;;  %6195 = vmatpush.bf16.msra.mxu1 %v9960_v6  ;;  %6208 = vmatpush.bf16.msra.mxu2 %v9964_v31  ;;  %v9936_v17 = vor.u32 %v11033_v27, %v9933_v29  ;;  %v9908_v31 = vor.u32 %v11030_v54, %v9907_v53  ;;  %v11027_v47 = vld [vmem:[%s17363_s4 + $0x14] sm:$0xf0] }
 0x541   :  { %v16381_v23 = vadd.f32 1.0, %v11374_v2  ;;  %6222 = vmatpush.bf16.msra.mxu3 %v9952_v45  ;;  %v9920_v0 = vor.u32 %v11029_v3, %v9917_v56  ;;  %v11119_v56 = vld [vmem:[%s17362_s3 + $0xf4] sm:$0xf0] }
 0x542   :  { %v16386_v10 = vpop.eup %11375  ;;  %11379 = vpow2.f32 %v9758_v30  ;;  %6185 = vmatpush.bf16.msra.mxu0 %v9908_v31 }
 0x543   :  { %v16395_v7 = vpop.eup %11377  ;;  %v5356_v16 = vmul.f32 %v16386_v10, %v16329_v34  ;;  %11381 = vrcp.f32 %v16381_v23  ;;  %vm5361_vm6 = vweird.f32 %v16386_v10  ;;  %vm5399_vm13 = vweird.f32 %v16381_v23 }
 0x544   :  { %v5375_v61 = vmul.f32 %v16395_v7, %v16337_v48  ;;  %11383 = vtanh.f32 %v5348_v58  ;;  %v16413_v22 = vpop.f32.mrf.mxu2  ;;  %v5666_v24 = vpop.f32.mrf.mxu3  ;;  %6196 = vmatpush.bf16.msra.mxu1 %v9944_v15  ;;  %vm5380_vm8 = vweird.f32 %v16395_v7  ;;  %6209 = vmatpush.bf16.msra.mxu2 %v9948_v51  ;;  %vm5362_vm9 = vmor %vm5360_vm5, %vm5361_vm6  ;;  %v9909_v48 = vld [vmem:[%s17363_s4 + $0x30] sm:$0xf0]  ;;  %v9901_v51 = vld [vmem:[%s17363_s4 + $0x18] sm:$0xf0]  ;;  %v5403_v27 = vand.u32 2147483647, %v16381_v23 }
 0x545   :  { %v5357_v18 = vsub.f32 1.0, %v5356_v16  ;;  %11385 = vpow2.f32 %v9759_v8  ;;  %v5673_v40 = vadd.f32 %v9629_v4, %v5666_v24  ;;  %v5629_v39 = vpop.f32.mrf.mxu0  ;;  %v5642_v21 = vpop.f32.mrf.mxu1  ;;  %vm5381_vm10 = vmor %vm5379_vm4, %vm5380_vm8  ;;  %6223 = vmatpush.bf16.msra.mxu3 %v9936_v17  ;;  %v11026_v16 = vld [vmem:[%s17363_s4 + $0xc] sm:$0xf0]  ;;  %v9912_v38 = vor.u32 %v11028_v20, %v9909_v48 }
 0x546   :  { %v5376_v33 = vsub.f32 1.0, %v5375_v61  ;;  %v5405_v61 = vand.u32 2147483648, %v16381_v23  ;;  %v9893_v39 = vld [vmem:[%s17363_s4 + $0x10] sm:$0xf0]  ;;  %v9899_v21 = vld [vmem:[%s17363_s4 + $0x8] sm:$0xf]  ;;  %v9904_v63 = vor.u32 %v11025_v32, %v9901_v51 }
 0x547   :  { %v5358_v49 = vmul.f32 %v16386_v10, %v5357_v18  ;;  %v9760_v44 = vmul.f32 -1.442695, %v5673_v40  ;;  %v9896_v29 = vor.u32 %v11024_v60, %v9893_v39  ;;  %v9900_v53 = vor.u32 %v11027_v47, %v9899_v21  ;;  %v10133_v32 = vld [vmem:[%s17362_s3 + $0xd8] sm:$0xf0] }
 0x548   :  { %v11380_v46 = vpop.eup %11379  ;;  %v5377_v42 = vmul.f32 %v16395_v7, %v5376_v33  ;;  %6197 = vmatpush.bf16.msra.mxu1 %v9928_v9  ;;  %6210 = vmatpush.bf16.msra.mxu2 %v9932_v37  ;;  %vm5404_vm0 = vcmp.eq.f32.partialorder %v5403_v27, 8.507059e+37 }
 0x549   :  { %v16451_v12 = vpop.eup %11381  ;;  %v5359_v62 = vadd.f32 %v16386_v10, %v5358_v49  ;;  %v16454_v35 = vadd.f32 1.0, %v11380_v46  ;;  %11387 = vpow2.f32 %v9760_v44  ;;  %6224 = vmatpush.bf16.msra.mxu3 %v9920_v0  ;;  %v5406_v46 = vor.u32 1.1754944e-38, %v5405_v61  ;;  %v11114_v61 = vld [vmem:[%s17362_s3 + $0xcc] sm:$0xf0]  ;;  %v10125_v0 = vld [vmem:[%s17362_s3 + $0xd0] sm:$0xf0] }
 0x54a   :  { %v11384_v59 = vpop.eup %11383  ;;  %v5378_v58 = vadd.f32 %v16395_v7, %v5377_v42  ;;  %v5395_v6 = vmul.f32 %v16451_v12, %v16381_v23  ;;  %vm5400_vm12 = vweird.f32 %v16451_v12 }
 0x54b   :  { %v11386_v1 = vpop.eup %11385  ;;  %v5363_v2 = vsel %vm5362_vm9, %v16386_v10, %v5359_v62  ;;  %11389 = vrcp.f32 %v16454_v35  ;;  %v11031_v10 = vld [vmem:[%s17363_s4 + $0x34] sm:$0xf0]  ;;  %vm16541_vm14 = vmor %vm5399_vm13, %vm5400_vm12  ;;  %v5690_v45 = vand.u32 2147483648, %v16454_v35  ;;  %v5688_v37 = vand.u32 2147483647, %v16454_v35 }
 0x54c   :  { %v5368_v34 = vsel %vm16432_vm7, %v5367_v11, %v5363_v2  ;;  %v5382_v55 = vsel %vm5381_vm10, %v16395_v7, %v5378_v58  ;;  %v5396_v30 = vsub.f32 1.0, %v5395_v6  ;;  %v16476_v4 = vadd.f32 1.0, %v11386_v1  ;;  %v5655_v57 = vpop.f32.mrf.mxu2  ;;  %v5668_v50 = vpop.f32.mrf.mxu3  ;;  %v9891_v7 = vld [vmem:[%s17363_s4] sm:$0xf]  ;;  %6198 = vmatpush.bf16.msra.mxu1 %v9912_v38 }
 0x54d   :  { %v5387_v5 = vsel %vm5384_vm11, %v5386_v25, %v5382_v55  ;;  %v5410_v8 = vmul.f32 %v11384_v59, %v5368_v34  ;;  %v9916_v36 = vor.u32 %v11031_v10, %v9915_v43  ;;  %v9892_v40 = vor.u32 %v11026_v16, %v9891_v7  ;;  %6225 = vmatpush.bf16.msra.mxu3 %v9904_v63  ;;  %v11118_v10 = vld [vmem:[%s17362_s3 + $0xec] sm:$0xf0]  ;;  %v11117_v7 = vld [vmem:[%s17362_s3 + $0xec] sm:$0xf]  ;;  %v10149_v16 = vld [vmem:[%s17362_s3 + $0xf8] sm:$0xf0] }
 0x54e   :  { %v5409_v15 = vmul.f32 %v5387_v5, %v15773_v14  ;;  %v5397_v19 = vmul.f32 %v16451_v12, %v5396_v30  ;;  %11391 = vrcp.f32 %v16476_v4  ;;  %v9628_v14 = vld [vmem:[%s17359_s0 + $0xd0] sm:$0xff]  ;;  %vm5684_vm1 = vweird.f32 %v16454_v35  ;;  %v10123_v38 = vld [vmem:[%s17362_s3 + $0xc0] sm:$0xf]  ;;  %v10115_v63 = vld [vmem:[%s17362_s3 + $0xa8] sm:$0xf] }
 0x54f   :  { %v11388_v13 = vpop.eup %11387  ;;  %v5672_v33 = vadd.f32 %v9628_v14, %v16413_v22  ;;  %6211 = vmatpush.bf16.msra.mxu2 %v9916_v36  ;;  %6186 = vmatpush.bf16.msra.mxu0 %v9892_v40  ;;  %v5691_v11 = vor.u32 1.1754944e-38, %v5690_v45  ;;  %v5707_v1 = vand.u32 2147483647, %v16476_v4  ;;  %vm5689_vm4 = vcmp.eq.f32.partialorder %v5688_v37, 8.507059e+37  ;;  %v11110_v45 = vld [vmem:[%s17362_s3 + $0xac] sm:$0xf0] }
 0x550   :  { %v16508_v26 = vadd.f32 %v5410_v8, %v5409_v15  ;;  %v16511_v24 = vadd.f32 1.0, %v11388_v13  ;;  %v5398_v18 = vadd.f32 %v16451_v12, %v5397_v19  ;;  %6199 = vmatpush.bf16.msra.mxu1 %v9896_v29  ;;  %vm5703_vm5 = vweird.f32 %v16476_v4  ;;  %v11116_v15 = vld [vmem:[%s17362_s3 + $0xe4] sm:$0xf]  ;;  %v10141_v19 = vld [vmem:[%s17362_s3 + $0xf0] sm:$0xf0] }
 0x551   :  { %v11390_v28 = vpop.eup %11389  ;;  %vm5708_vm7 = vcmp.eq.f32.partialorder %v5707_v1, 8.507059e+37  ;;  %v10152_v47 = vor.u32 %v11117_v7, %v10149_v16  ;;  %v11111_v37 = vld [vmem:[%s17362_s3 + $0xb4] sm:$0xf0]  ;;  %v10059_v16 = vld [vmem:[%s17362_s3 + $0x40] sm:$0xf] }
 0x552   :  { %11393 = vtanh.f32 %v16508_v26  ;;  %v5680_v41 = vmul.f32 %v11390_v28, %v16454_v35  ;;  %v5402_v23 = vsel %vm16541_vm14, %v16451_v12, %v5398_v18  ;;  %vm5685_vm15 = vweird.f32 %v11390_v28  ;;  %v11112_v18 = vld [vmem:[%s17362_s3 + $0xc4] sm:$0xf] }
 0x553   :  { %11395 = vrcp.f32 %v16511_v24  ;;  %6212 = vmatpush.bf16.msra.mxu2 %v9900_v53  ;;  %v5407_v17 = vsel %vm5404_vm0, %v5406_v46, %v5402_v23  ;;  %v5709_v12 = vand.u32 2147483648, %v16476_v4  ;;  %vm5686_vm3 = vmor %vm5684_vm1, %vm5685_vm15  ;;  %v5729_v14 = vand.u32 2147483648, %v16511_v24  ;;  %v11108_v46 = vld [vmem:[%s17362_s3 + $0xa4] sm:$0xf] }
 0x554   :  { %v11392_v49 = vpop.eup %11391  ;;  %v5681_v44 = vsub.f32 1.0, %v5680_v41  ;;  %11397 = vtanh.f32 %v5672_v33  ;;  %vm5723_vm9 = vweird.f32 %v16511_v24  ;;  %v5727_v36 = vand.u32 2147483647, %v16511_v24  ;;  %v11115_v41 = vld [vmem:[%s17362_s3 + $0xd4] sm:$0xf0] }
 0x555   :  { %v5699_v42 = vmul.f32 %v11392_v49, %v16476_v4  ;;  %vm5704_vm2 = vweird.f32 %v11392_v49  ;;  %v5710_v57 = vor.u32 1.1754944e-38, %v5709_v12  ;;  %v10139_v4 = vld [vmem:[%s17362_s3 + $0xe0] sm:$0xf]  ;;  %v11113_v33 = vld [vmem:[%s17362_s3 + $0xcc] sm:$0xf]  ;;  %v5730_v27 = vor.u32 1.1754944e-38, %v5729_v14 }
 0x556   :  { %v5682_v9 = vmul.f32 %v11390_v28, %v5681_v44  ;;  %vm5705_vm6 = vmor %vm5703_vm5, %vm5704_vm2  ;;  %v10140_v60 = vor.u32 %v11118_v10, %v10139_v4  ;;  %v10128_v22 = vor.u32 %v11112_v18, %v10125_v0  ;;  %v10107_v44 = vld [vmem:[%s17362_s3 + $0xa0] sm:$0xf]  ;;  %vm5728_vm11 = vcmp.eq.f32.partialorder %v5727_v36, 8.507059e+37  ;;  %v10077_v4 = vld [vmem:[%s17362_s3 + $0x70] sm:$0xf0] }
 0x557   :  { %v5700_v54 = vsub.f32 1.0, %v5699_v42  ;;  %v10136_v23 = vor.u32 %v11113_v33, %v10133_v32  ;;  %v10109_v42 = vld [vmem:[%s17362_s3 + $0xb0] sm:$0xf0]  ;;  %v10108_v12 = vor.u32 %v11110_v45, %v10107_v44  ;;  %v10116_v1 = vor.u32 %v11111_v37, %v10115_v63  ;;  %v10083_v10 = vld [vmem:[%s17362_s3 + $0x68] sm:$0xf] }
 0x558   :  { %v11394_v62 = vpop.eup %11393  ;;  %v5683_v59 = vadd.f32 %v11390_v28, %v5682_v9  ;;  %v10061_v36 = vld [vmem:[%s17362_s3 + $0x50] sm:$0xf0]  ;;  %v11097_v18 = vld [vmem:[%s17362_s3 + $0x4c] sm:$0xf]  ;;  %v10069_v0 = vld [vmem:[%s17362_s3 + $0x58] sm:$0xf0] }
 0x559   :  { %v16553_v58 = vpop.eup %11395  ;;  %v5413_v6 = vmul.f32 %v11394_v62, %v5407_v17  ;;  %v5701_v31 = vmul.f32 %v11392_v49, %v5700_v54  ;;  %v11109_v54 = vld [vmem:[%s17362_s3 + $0xac] sm:$0xf]  ;;  %v10117_v62 = vld [vmem:[%s17362_s3 + $0xb8] sm:$0xf0]  ;;  %v11092_v33 = vld [vmem:[%s17362_s3 + $0x24] sm:$0xf] }
 0x55a   :  { %v5687_v25 = vsel %vm5686_vm3, %v11390_v28, %v5683_v59  ;;  %v5719_v35 = vmul.f32 %v16553_v58, %v16511_v24  ;;  %v11398_v30 = vpop.eup %11397  ;;  %vm5724_vm8 = vweird.f32 %v16553_v58  ;;  %v10144_v28 = vor.u32 %v11116_v15, %v10141_v19  ;;  %v10131_v24 = vld [vmem:[%s17362_s3 + $0xc8] sm:$0xf]  ;;  %v11103_v15 = vld [vmem:[%s17362_s3 + $0x74] sm:$0xf0]  ;;  %v11101_v19 = vld [vmem:[%s17362_s3 + $0x6c] sm:$0xf] }
 0x55b   :  { %v5416_v2 = vpack.c.bf16 %v5413_v6, %v5413_v6  ;;  %v5692_v34 = vsel %vm5689_vm4, %v5691_v11, %v5687_v25  ;;  %v5702_v55 = vadd.f32 %v11392_v49, %v5701_v31  ;;  %vm16611_vm10 = vmor %vm5723_vm9, %vm5724_vm8  ;;  %v10132_v53 = vor.u32 %v11115_v41, %v10131_v24  ;;  %v10091_v11 = vld [vmem:[%s17362_s3 + $0x80] sm:$0xf]  ;;  %v11104_v6 = vld [vmem:[%s17362_s3 + $0x84] sm:$0xf] }
 0x55c   :  { %v5720_v50 = vsub.f32 1.0, %v5719_v35  ;;  %v5734_v48 = vmul.f32 %v11398_v30, %v5692_v34  ;;  %v10112_v59 = vor.u32 %v11108_v46, %v10109_v42  ;;  %v10120_v25 = vor.u32 %v11109_v54, %v10117_v62  ;;  %v10093_v35 = vld [vmem:[%s17362_s3 + $0x90] sm:$0xf0]  ;;  %v11107_v34 = vld [vmem:[%s17362_s3 + $0x94] sm:$0xf0] }
 0x55d   :  { %9625 = vst [vmem:[%s17366_s7 + $0x14] sm:$0xf] %v5416_v2  ;;  %v5706_v20 = vsel %vm5705_vm6, %v11392_v49, %v5702_v55  ;;  %v10124_v49 = vor.u32 %v11114_v61, %v10123_v38  ;;  %v11105_v55 = vld [vmem:[%s17362_s3 + $0x8c] sm:$0xf]  ;;  %v10101_v30 = vld [vmem:[%s17362_s3 + $0x98] sm:$0xf0]  ;;  %v10084_v14 = vor.u32 %v11103_v15, %v10083_v10  ;;  %v10072_v41 = vor.u32 %v11097_v18, %v10069_v0 }
 0x55e   :  { %5417 = vst [vmem:[#allocation4 + $0x4] sm:$0xf] %v5416_v2  ;;  %v5711_v5 = vsel %vm5708_vm7, %v5710_v57, %v5706_v20  ;;  %v5721_v8 = vmul.f32 %v16553_v58, %v5720_v50  ;;  %v10099_v2 = vld [vmem:[%s17362_s3 + $0x88] sm:$0xf]  ;;  %v10096_v50 = vor.u32 %v11104_v6, %v10093_v35  ;;  %v10075_v20 = vld [vmem:[%s17362_s3 + $0x60] sm:$0xf] }
 0x55f   :  { %v5733_v43 = vmul.f32 %v5711_v5, %v15841_v52  ;;  %v10147_v52 = vld [vmem:[%s17362_s3 + $0xe8] sm:$0xf]  ;;  %v10100_v5 = vor.u32 %v11107_v34, %v10099_v2  ;;  %v11096_v61 = vld [vmem:[%s17362_s3 + $0x44] sm:$0xf]  ;;  %v10045_v32 = vld [vmem:[%s17362_s3 + $0x30] sm:$0xf0] }
 0x560   :  { %v5722_v13 = vadd.f32 %v16553_v58, %v5721_v8  ;;  %v10148_v21 = vor.u32 %v11119_v56, %v10147_v52  ;;  %v10104_v8 = vor.u32 %v11105_v55, %v10101_v30  ;;  %v10085_v52 = vld [vmem:[%s17362_s3 + $0x78] sm:$0xf0]  ;;  %v10048_v45 = vor.u32 %v11092_v33, %v10045_v32  ;;  %v11088_v42 = vld [vmem:[%s17362_s3 + $0x4] sm:$0xf]  ;;  %v10029_v63 = vld [vmem:[%s17362_s3 + $0x10] sm:$0xf0] }
 0x561   :  { %v16571_v3 = vadd.f32 %v5734_v48, %v5733_v43  ;;  %v11102_v48 = vld [vmem:[%s17362_s3 + $0x6c] sm:$0xf0]  ;;  %v11100_v43 = vld [vmem:[%s17362_s3 + $0x64] sm:$0xf]  ;;  %v10088_v38 = vor.u32 %v11101_v19, %v10085_v52  ;;  %v11091_v37 = vld [vmem:[%s17362_s3 + $0x14] sm:$0xf0] }
 0x562   :  { %v5726_v51 = vsel %vm16611_vm10, %v16553_v58, %v5722_v13  ;;  %v11106_v58 = vld [vmem:[%s17362_s3 + $0x8c] sm:$0xf0]  ;;  %v10076_v56 = vor.u32 %v11102_v48, %v10075_v20  ;;  %v10080_v7 = vor.u32 %v11100_v43, %v10077_v4  ;;  %v11089_v54 = vld [vmem:[%s17362_s3 + $0xc] sm:$0xf]  ;;  %v10037_v62 = vld [vmem:[%s17362_s3 + $0x18] sm:$0xf0] }
 0x563   :  { %11399 = vtanh.f32 %v16571_v3  ;;  %v5731_v9 = vsel %vm5728_vm11, %v5730_v27, %v5726_v51  ;;  %v10092_v57 = vor.u32 %v11106_v58, %v10091_v11  ;;  %v11098_v13 = vld [vmem:[%s17362_s3 + $0x4c] sm:$0xf0]  ;;  %v10051_v51 = vld [vmem:[%s17362_s3 + $0x28] sm:$0xf]  ;;  %v11095_v27 = vld [vmem:[%s17362_s3 + $0x34] sm:$0xf0]  ;;  %v10040_v11 = vor.u32 %v11089_v54, %v10037_v62 }
 0x564   :  { %v10060_v40 = vor.u32 %v11098_v13, %v10059_v16  ;;  %v11180_v35 = vld [vmem:[%s17364_s5 + $0xe4] sm:$0xf]  ;;  %v10272_v34 = vld [vmem:[%s17364_s5 + $0xf0] sm:$0xf0]  ;;  %v10278_v55 = vld [vmem:[%s17364_s5 + $0xe8] sm:$0xf] }
 0x565   :  { %v5774_v39 = vld [vmem:[#allocation4 + $0x4] sm:$0xf]  ;;  %v11183_v30 = vld [vmem:[%s17364_s5 + $0xf4] sm:$0xf0]  ;;  %v11181_v20 = vld [vmem:[%s17364_s5 + $0xec] sm:$0xf] }
 0x566   :  { %5975 = vmatmul.bf16.vlgmr.msrb.gmra.mxu0 %v5774_v39  ;;  %5988 = vmatmul.bf16.vlgmr.msrb.gmra.mxu1 %v5774_v39  ;;  %v10280_v48 = vld [vmem:[%s17364_s5 + $0xf8] sm:$0xf0]  ;;  %v11178_v43 = vld [vmem:[%s17364_s5 + $0xcc] sm:$0xf0]  ;;  %v11176_v4 = vld [vmem:[%s17364_s5 + $0xc4] sm:$0xf] }
 0x567   :  { %6001 = vmatmul.bf16.vlgmr.msrb.gmra.mxu2 %v5774_v39  ;;  %6014 = vmatmul.bf16.vlgmr.msrb.gmra.mxu3 %v5774_v39  ;;  %v10064_v39 = vor.u32 %v11096_v61, %v10061_v36  ;;  %v10256_v52 = vld [vmem:[%s17364_s5 + $0xd0] sm:$0xf0]  ;;  %v11177_v61 = vld [vmem:[%s17364_s5 + $0xcc] sm:$0xf]  ;;  %v10264_v36 = vld [vmem:[%s17364_s5 + $0xd8] sm:$0xf0] }
 0x568   :  { %6513 = vmatpush.bf16.msrb.mxu0 %v10140_v60  ;;  %6526 = vmatpush.bf16.msrb.mxu1 %v10144_v28  ;;  %v10067_v60 = vld [vmem:[%s17362_s3 + $0x48] sm:$0xf]  ;;  %v11099_v28 = vld [vmem:[%s17362_s3 + $0x54] sm:$0xf0]  ;;  %v11174_v18 = vld [vmem:[%s17364_s5 + $0xac] sm:$0xf0] }
 0x569   :  { %v11400_v29 = vpop.eup %11399  ;;  %6539 = vmatpush.bf16.msrb.mxu2 %v10148_v21  ;;  %6552 = vmatpush.bf16.msrb.mxu3 %v10152_v47  ;;  %v10043_v21 = vld [vmem:[%s17362_s3 + $0x20] sm:$0xf]  ;;  %v11094_v47 = vld [vmem:[%s17362_s3 + $0x2c] sm:$0xf0]  ;;  %v10068_v24 = vor.u32 %v11099_v28, %v10067_v60  ;;  %v10267_v60 = vor.u32 %v11177_v61, %v10264_v36  ;;  %v11172_v0 = vld [vmem:[%s17364_s5 + $0xa4] sm:$0xf] }
 0x56a   :  { %v5737_v17 = vmul.f32 %v11400_v29, %v5731_v9  ;;  %v10044_v44 = vor.u32 %v11094_v47, %v10043_v21  ;;  %v10027_v29 = vld [vmem:[%s17362_s3] sm:$0xf]  ;;  %v10035_v9 = vld [vmem:[%s17362_s3 + $0x8] sm:$0xf]  ;;  %v11175_v47 = vld [vmem:[%s17364_s5 + $0xb4] sm:$0xf0] }
 0x56b   :  { %v10238_v28 = vld [vmem:[%s17364_s5 + $0xa0] sm:$0xf]  ;;  %v10246_v21 = vld [vmem:[%s17364_s5 + $0xa8] sm:$0xf]  ;;  %v11173_v32 = vld [vmem:[%s17364_s5 + $0xac] sm:$0xf] }
 0x56c   :  { %6514 = vmatpush.bf16.msrb.mxu0 %v10124_v49  ;;  %6527 = vmatpush.bf16.msrb.mxu1 %v10128_v22  ;;  %v5740_v31 = vpack.c.bf16 %v5737_v17, %v5737_v17  ;;  %v11093_v49 = vld [vmem:[%s17362_s3 + $0x2c] sm:$0xf]  ;;  %v10053_v22 = vld [vmem:[%s17362_s3 + $0x38] sm:$0xf0]  ;;  %v10247_v33 = vor.u32 %v11175_v47, %v10246_v21  ;;  %v10230_v54 = vld [vmem:[%s17364_s5 + $0x88] sm:$0xf] }
 0x56d   :  { %6540 = vmatpush.bf16.msrb.mxu2 %v10132_v53  ;;  %6553 = vmatpush.bf16.msrb.mxu3 %v10136_v23  ;;  %v11090_v53 = vld [vmem:[%s17362_s3 + $0xc] sm:$0xf0]  ;;  %v10052_v23 = vor.u32 %v11095_v27, %v10051_v51  ;;  %v10056_v46 = vor.u32 %v11093_v49, %v10053_v22  ;;  %v10248_v51 = vld [vmem:[%s17364_s5 + $0xb8] sm:$0xf0]  ;;  %v10222_v49 = vld [vmem:[%s17364_s5 + $0x80] sm:$0xf] }
 0x56e   :  { %5741 = vst [vmem:[#allocation4] sm:$0xf] %v5740_v31  ;;  %v10028_v17 = vor.u32 %v11090_v53, %v10027_v29  ;;  %v10251_v27 = vor.u32 %v11173_v32, %v10248_v51  ;;  %v11170_v22 = vld [vmem:[%s17364_s5 + $0x8c] sm:$0xf0]  ;;  %v11171_v62 = vld [vmem:[%s17364_s5 + $0x94] sm:$0xf0] }
 0x56f   :  { %v10198_v61 = vld [vmem:[%s17364_s5 + $0x48] sm:$0xf]  ;;  %v11163_v36 = vld [vmem:[%s17364_s5 + $0x54] sm:$0xf0]  ;;  %v11156_v32 = vld [vmem:[%s17364_s5 + $0x24] sm:$0xf] }
 0x570   :  { %6515 = vmatpush.bf16.msrb.mxu0 %v10108_v12  ;;  %6528 = vmatpush.bf16.msrb.mxu1 %v10112_v59  ;;  %v10032_v12 = vor.u32 %v11088_v42, %v10029_v63  ;;  %v10036_v59 = vor.u32 %v11091_v37, %v10035_v9  ;;  %v10224_v42 = vld [vmem:[%s17364_s5 + $0x90] sm:$0xf0]  ;;  %v10199_v21 = vor.u32 %v11163_v36, %v10198_v61  ;;  %s11503_s3 = smov 8  }
 0x571   :  { %6541 = vmatpush.bf16.msrb.mxu2 %v10116_v1  ;;  %6554 = vmatpush.bf16.msrb.mxu3 %v10120_v25  ;;  %v10270_v1 = vld [vmem:[%s17364_s5 + $0xe0] sm:$0xf]  ;;  %v11182_v25 = vld [vmem:[%s17364_s5 + $0xec] sm:$0xf0]  ;;  %v10400_v36 = vld [vmem:[%s17363_s4 + $0xf0] sm:$0xf0] }
 0x572   :  { %v10271_v2 = vor.u32 %v11182_v25, %v10270_v1  ;;  %v10206_v25 = vld [vmem:[%s17364_s5 + $0x60] sm:$0xf] }
 0x574   :  { %6516 = vmatpush.bf16.msrb.mxu0 %v10092_v57  ;;  %6529 = vmatpush.bf16.msrb.mxu1 %v10096_v50  ;;  %v10275_v57 = vor.u32 %v11180_v35, %v10272_v34  ;;  %v10279_v50 = vor.u32 %v11183_v30, %v10278_v55  ;;  %v11166_v35 = vld [vmem:[%s17364_s5 + $0x6c] sm:$0xf0]  ;;  %v10208_v55 = vld [vmem:[%s17364_s5 + $0x70] sm:$0xf0]  ;;  %v10214_v30 = vld [vmem:[%s17364_s5 + $0x68] sm:$0xf] }
 0x575   :  { %6542 = vmatpush.bf16.msrb.mxu2 %v10100_v5  ;;  %6555 = vmatpush.bf16.msrb.mxu3 %v10104_v8  ;;  %v6320_v58 = vld [vmem:[#allocation4] sm:$0xf]  ;;  %v10283_v5 = vor.u32 %v11181_v20, %v10280_v48  ;;  %v10207_v34 = vor.u32 %v11166_v35, %v10206_v25  ;;  %v11165_v48 = vld [vmem:[%s17364_s5 + $0x6c] sm:$0xf]  ;;  %v10166_v35 = vld [vmem:[%s17364_s5 + $0x8] sm:$0xf] }
 0x576   :  { %6187 = vmatmul.bf16.vlgmr.msra.gmra.mxu0 %v5740_v31  ;;  %6200 = vmatmul.bf16.vlgmr.msra.gmra.mxu1 %v5740_v31  ;;  %v10254_v8 = vld [vmem:[%s17364_s5 + $0xc0] sm:$0xf] }
 0x577   :  { %6213 = vmatmul.bf16.vlgmr.msra.gmra.mxu2 %v5740_v31  ;;  %6226 = vmatmul.bf16.vlgmr.msra.gmra.mxu3 %v5740_v31  ;;  %v10255_v19 = vor.u32 %v11178_v43, %v10254_v8 }
 0x578   :  { %6517 = vmatpush.bf16.msrb.mxu0 %v10076_v56  ;;  %6530 = vmatpush.bf16.msrb.mxu1 %v10080_v7  ;;  %v10262_v56 = vld [vmem:[%s17364_s5 + $0xc8] sm:$0xf]  ;;  %v11179_v7 = vld [vmem:[%s17364_s5 + $0xd4] sm:$0xf0] }
 0x579   :  { %6543 = vmatpush.bf16.msrb.mxu2 %v10084_v14  ;;  %6556 = vmatpush.bf16.msrb.mxu3 %v10088_v38  ;;  %v10259_v14 = vor.u32 %v11176_v4, %v10256_v52  ;;  %v10263_v38 = vor.u32 %v11179_v7, %v10262_v56  ;;  %v10190_v52 = vld [vmem:[%s17364_s5 + $0x40] sm:$0xf]  ;;  %v11162_v56 = vld [vmem:[%s17364_s5 + $0x4c] sm:$0xf0]  ;;  %v11160_v7 = vld [vmem:[%s17364_s5 + $0x44] sm:$0xf] }
 0x57c   :  { %6518 = vmatpush.bf16.msrb.mxu0 %v10060_v40  ;;  %6531 = vmatpush.bf16.msrb.mxu1 %v10064_v39  ;;  %v10239_v40 = vor.u32 %v11174_v18, %v10238_v28  ;;  %v10240_v39 = vld [vmem:[%s17364_s5 + $0xb0] sm:$0xf0] }
 0x57d   :  { %6544 = vmatpush.bf16.msrb.mxu2 %v10068_v24  ;;  %6557 = vmatpush.bf16.msrb.mxu3 %v10072_v41  ;;  %v16851_v24 = vld [vmem:[%s17365_s6] sm:$0xf]  ;;  %v10243_v41 = vor.u32 %v11172_v0, %v10240_v39  ;;  %v10200_v39 = vld [vmem:[%s17364_s5 + $0x58] sm:$0xf0] }
 0x57e   :  { %v6233_v53 = vperm.slane %v16851_v24, 0  ;;  %v6236_v4 = vperm.slane %v16851_v24, 3 }
 0x580   :  { %6519 = vmatpush.bf16.msrb.mxu0 %v10044_v44  ;;  %6532 = vmatpush.bf16.msrb.mxu1 %v10048_v45  ;;  %v11168_v44 = vld [vmem:[%s17364_s5 + $0x84] sm:$0xf] }
 0x581   :  { %6545 = vmatpush.bf16.msrb.mxu2 %v10052_v23  ;;  %6558 = vmatpush.bf16.msrb.mxu3 %v10056_v46  ;;  %v6234_v23 = vperm.slane %v16851_v24, 1  ;;  %v10223_v46 = vor.u32 %v11170_v22, %v10222_v49  ;;  %v10227_v37 = vor.u32 %v11168_v44, %v10224_v42  ;;  %v10182_v49 = vld [vmem:[%s17364_s5 + $0x28] sm:$0xf]  ;;  %v11159_v22 = vld [vmem:[%s17364_s5 + $0x34] sm:$0xf0] }
 0x584   :  { %6520 = vmatpush.bf16.msrb.mxu0 %v10028_v17  ;;  %6533 = vmatpush.bf16.msrb.mxu1 %v10032_v12  ;;  %v11169_v17 = vld [vmem:[%s17364_s5 + $0x8c] sm:$0xf] }
 0x585   :  { %6546 = vmatpush.bf16.msrb.mxu2 %v10036_v59  ;;  %6559 = vmatpush.bf16.msrb.mxu3 %v10040_v11  ;;  %v10231_v11 = vor.u32 %v11171_v62, %v10230_v54  ;;  %v11154_v54 = vld [vmem:[%s17364_s5 + $0xc] sm:$0xf0] }
 0x587   :  { %6521 = vmatmul.bf16.vlgmr.msrb.gmra.mxu0 %v6320_v58  ;;  %6534 = vmatmul.bf16.vlgmr.msrb.gmra.mxu1 %v6320_v58 }
 0x588   :  { %6547 = vmatmul.bf16.vlgmr.msrb.gmra.mxu2 %v6320_v58  ;;  %6560 = vmatmul.bf16.vlgmr.msrb.gmra.mxu3 %v6320_v58  ;;  %v10232_v58 = vld [vmem:[%s17364_s5 + $0x98] sm:$0xf0] }
 0x589   :  { %6862 = vmatpush.bf16.msra.mxu0 %v10271_v2  ;;  %6875 = vmatpush.bf16.msra.mxu1 %v10275_v57  ;;  %v10235_v1 = vor.u32 %v11169_v17, %v10232_v58  ;;  %v11167_v57 = vld [vmem:[%s17364_s5 + $0x74] sm:$0xf0]  ;;  %v10021_v58 = vld [vmem:[%s17359_s0 + $0xe0] sm:$0xff] }
 0x58a   :  { %6888 = vmatpush.bf16.msra.mxu2 %v10279_v50  ;;  %6901 = vmatpush.bf16.msra.mxu3 %v10283_v5  ;;  %v10215_v20 = vor.u32 %v11167_v57, %v10214_v30  ;;  %v10216_v5 = vld [vmem:[%s17364_s5 + $0x78] sm:$0xf0]  ;;  %v11153_v57 = vld [vmem:[%s17364_s5 + $0xc] sm:$0xf] }
 0x58d   :  { %6863 = vmatpush.bf16.msra.mxu0 %v10255_v19  ;;  %6876 = vmatpush.bf16.msra.mxu1 %v10259_v14  ;;  %v10219_v19 = vor.u32 %v11165_v48, %v10216_v5  ;;  %v10191_v14 = vor.u32 %v11162_v56, %v10190_v52 }
 0x58e   :  { %6889 = vmatpush.bf16.msra.mxu2 %v10263_v38  ;;  %6902 = vmatpush.bf16.msra.mxu3 %v10267_v60  ;;  %v10192_v38 = vld [vmem:[%s17364_s5 + $0x50] sm:$0xf0] }
 0x58f   :  { %v10195_v0 = vor.u32 %v11160_v7, %v10192_v38 }
 0x591   :  { %6864 = vmatpush.bf16.msra.mxu0 %v10239_v40  ;;  %6877 = vmatpush.bf16.msra.mxu1 %v10243_v41  ;;  %v11161_v40 = vld [vmem:[%s17364_s5 + $0x4c] sm:$0xf] }
 0x592   :  { %6890 = vmatpush.bf16.msra.mxu2 %v10247_v33  ;;  %6903 = vmatpush.bf16.msra.mxu3 %v10251_v27  ;;  %v10203_v47 = vor.u32 %v11161_v40, %v10200_v39  ;;  %v11158_v33 = vld [vmem:[%s17364_s5 + $0x2c] sm:$0xf0]  ;;  %v10176_v27 = vld [vmem:[%s17364_s5 + $0x30] sm:$0xf0]  ;;  %v10406_v40 = vld [vmem:[%s17363_s4 + $0xe8] sm:$0xf] }
 0x593   :  { %v11151_v39 = vld [vmem:[%s17363_s4 + $0xf4] sm:$0xf0] }
 0x595   :  { %6865 = vmatpush.bf16.msra.mxu0 %v10223_v46  ;;  %6878 = vmatpush.bf16.msra.mxu1 %v10227_v37  ;;  %v10158_v37 = vld [vmem:[%s17364_s5] sm:$0xf] }
 0x596   :  { %6891 = vmatpush.bf16.msra.mxu2 %v10231_v11  ;;  %6904 = vmatpush.bf16.msra.mxu3 %v10235_v1  ;;  %v10022_v1 = vld [vmem:[%s17359_s0 + $0xe8] sm:$0xff]  ;;  %v10159_v25 = vor.u32 %v11154_v54, %v10158_v37  ;;  %v11147_v37 = vld [vmem:[%s17363_s4 + $0xd4] sm:$0xf0] }
 0x599   :  { %6866 = vmatpush.bf16.msra.mxu0 %v10207_v34 }
 0x59a   :  { %6892 = vmatpush.bf16.msra.mxu2 %v10215_v20  ;;  %6905 = vmatpush.bf16.msra.mxu3 %v10219_v19 }
 0x59d   :  { %6867 = vmatpush.bf16.msra.mxu0 %v10191_v14 }
 0x59e   :  { %6893 = vmatpush.bf16.msra.mxu2 %v10199_v21  ;;  %6906 = vmatpush.bf16.msra.mxu3 %v10203_v47 }
 0x5e3   :  { %v16774_v6 = vpop.f32.mrf.mxu0  ;;  %v16776_v31 = vpop.f32.mrf.mxu1 }
 0x5ea   :  { %v16811_v10 = vpop.f32.mrf.mxu2  ;;  %v16813_v15 = vpop.f32.mrf.mxu3 }
 0x5eb   :  { %v5978_v16 = vpop.f32.mrf.mxu0  ;;  %v5991_v13 = vpop.f32.mrf.mxu1 }
 0x5f2   :  { %v6004_v45 = vpop.f32.mrf.mxu2  ;;  %v6017_v29 = vpop.f32.mrf.mxu3 }
 0x5f3   :  { %v6188_v63 = vpop.f32.mrf.mxu0  ;;  %v6201_v9 = vpop.f32.mrf.mxu1  ;;  %v10179_v45 = vor.u32 %v11156_v32, %v10176_v27  ;;  %v10183_v29 = vor.u32 %v11159_v22, %v10182_v49  ;;  %v10382_v32 = vld [vmem:[%s17363_s4 + $0xc0] sm:$0xf]  ;;  %v11146_v22 = vld [vmem:[%s17363_s4 + $0xcc] sm:$0xf0] }
 0x5f4   :  { %v6189_v12 = vadd.f32 %v6188_v63, %v16774_v6  ;;  %v6202_v59 = vadd.f32 %v6201_v9, %v16776_v31  ;;  %v11164_v6 = vld [vmem:[%s17364_s5 + $0x64] sm:$0xf] }
 0x5f5   :  { %v10211_v50 = vor.u32 %v11164_v6, %v10208_v55  ;;  %6894 = vmatpush.bf16.msra.mxu2 %v10183_v29 }
 0x5f6   :  { %v6241_v31 = vadd.f32 %v6233_v53, %v6189_v12  ;;  %v6242_v2 = vadd.f32 %v6234_v23, %v6202_v59  ;;  %v11157_v53 = vld [vmem:[%s17364_s5 + $0x2c] sm:$0xf]  ;;  %v10184_v23 = vld [vmem:[%s17364_s5 + $0x38] sm:$0xf0]  ;;  %v6235_v12 = vperm.slane %v16851_v24, 2 }
 0x5f7   :  { %6879 = vmatpush.bf16.msra.mxu1 %v10211_v50  ;;  %v10187_v42 = vor.u32 %v11157_v53, %v10184_v23  ;;  %v10160_v24 = vld [vmem:[%s17364_s5 + $0x10] sm:$0xf0]  ;;  %v10168_v50 = vld [vmem:[%s17364_s5 + $0x18] sm:$0xf0] }
 0x5f8   :  { %v10017_v8 = vmul.f32 -1.442695, %v6241_v31  ;;  %v10018_v43 = vmul.f32 -1.442695, %v6242_v2  ;;  %v11155_v2 = vld [vmem:[%s17364_s5 + $0x14] sm:$0xf0]  ;;  %v10171_v7 = vor.u32 %v11153_v57, %v10168_v50 }
 0x5f9   :  { %6907 = vmatpush.bf16.msra.mxu3 %v10187_v42 }
 0x5fa   :  { %11401 = vpow2.f32 %v10017_v8  ;;  %v6214_v16 = vpop.f32.mrf.mxu2  ;;  %v6227_v13 = vpop.f32.mrf.mxu3  ;;  %v10167_v8 = vor.u32 %v11155_v2, %v10166_v35 }
 0x5fb   :  { %11403 = vpow2.f32 %v10018_v43  ;;  %v6228_v60 = vadd.f32 %v6227_v13, %v16813_v15  ;;  %v6190_v28 = vpop.f32.mrf.mxu0  ;;  %v6203_v18 = vpop.f32.mrf.mxu1  ;;  %6880 = vmatpush.bf16.msra.mxu1 %v10195_v0  ;;  %v10174_v15 = vld [vmem:[%s17364_s5 + $0x20] sm:$0xf]  ;;  %v6215_v17 = vadd.f32 %v6214_v16, %v16811_v10  ;;  %v11152_v10 = vld [vmem:[%s17364_s5 + $0x4] sm:$0xf] }
 0x5fc   :  { %v10175_v51 = vor.u32 %v11158_v33, %v10174_v15  ;;  %v10163_v5 = vor.u32 %v11152_v10, %v10160_v24  ;;  %v10398_v43 = vld [vmem:[%s17363_s4 + $0xe0] sm:$0xf]  ;;  %v11148_v13 = vld [vmem:[%s17363_s4 + $0xe4] sm:$0xf]  ;;  %6895 = vmatpush.bf16.msra.mxu2 %v10167_v8  ;;  %v10024_v18 = vld [vmem:[%s17359_s0 + $0xf8] sm:$0xff] }
 0x5fd   :  { %v6244_v41 = vadd.f32 %v6236_v4, %v6228_v60  ;;  %v6243_v20 = vadd.f32 %v6235_v12, %v6215_v17  ;;  %v11150_v4 = vld [vmem:[%s17363_s4 + $0xec] sm:$0xf0]  ;;  %6908 = vmatpush.bf16.msra.mxu3 %v10171_v7  ;;  %v10403_v0 = vor.u32 %v11148_v13, %v10400_v36  ;;  %v11149_v15 = vld [vmem:[%s17363_s4 + $0xec] sm:$0xf]  ;;  %v10408_v33 = vld [vmem:[%s17363_s4 + $0xf8] sm:$0xf0]  ;;  %v10407_v12 = vor.u32 %v11151_v39, %v10406_v40 }
 0x5fe   :  { %6868 = vmatpush.bf16.msra.mxu0 %v10175_v51  ;;  %v10399_v16 = vor.u32 %v11150_v4, %v10398_v43  ;;  %v10366_v10 = vld [vmem:[%s17363_s4 + $0xa0] sm:$0xf]  ;;  %v11143_v39 = vld [vmem:[%s17363_s4 + $0xb4] sm:$0xf0] }
 0x5ff   :  { %v10019_v44 = vmul.f32 -1.442695, %v6244_v41  ;;  %6881 = vmatpush.bf16.msra.mxu1 %v10179_v45  ;;  %v10384_v45 = vld [vmem:[%s17363_s4 + $0xd0] sm:$0xf0] }
 0x600   :  { %v11402_v46 = vpop.eup %11401  ;;  %7100 = vmatpush.bf16.msrb.mxu2 %v10407_v12  ;;  %v11139_v12 = vld [vmem:[%s17363_s4 + $0x94] sm:$0xf0] }
 0x601   :  { %v11404_v63 = vpop.eup %11403  ;;  %v16961_v9 = vadd.f32 1.0, %v11402_v46  ;;  %11405 = vpow2.f32 %v10019_v44  ;;  %v11144_v44 = vld [vmem:[%s17363_s4 + $0xc4] sm:$0xf] }
 0x602   :  { %v16969_v62 = vadd.f32 1.0, %v11404_v63  ;;  %v6216_v59 = vpop.f32.mrf.mxu2  ;;  %v6229_v11 = vpop.f32.mrf.mxu3  ;;  %6869 = vmatpush.bf16.msra.mxu0 %v10159_v25  ;;  %v10390_v63 = vld [vmem:[%s17363_s4 + $0xc8] sm:$0xf]  ;;  %v10392_v25 = vld [vmem:[%s17363_s4 + $0xd8] sm:$0xf0]  ;;  %v10387_v2 = vor.u32 %v11144_v44, %v10384_v45 }
 0x603   :  { %11407 = vrcp.f32 %v16961_v9  ;;  %v6261_v34 = vand.u32 2147483648, %v16961_v9  ;;  %v6259_v48 = vand.u32 2147483647, %v16961_v9  ;;  %6882 = vmatpush.bf16.msra.mxu1 %v10163_v5  ;;  %vm6255_vm14 = vweird.f32 %v16961_v9  ;;  %v11145_v59 = vld [vmem:[%s17363_s4 + $0xcc] sm:$0xf] }
 0x604   :  { %11409 = vrcp.f32 %v16969_v62  ;;  %v6522_v6 = vpop.f32.mrf.mxu0  ;;  %v6535_v31 = vpop.f32.mrf.mxu1  ;;  %v6278_v52 = vand.u32 2147483647, %v16969_v62  ;;  %v6280_v14 = vand.u32 2147483648, %v16969_v62  ;;  %vm6274_vm13 = vweird.f32 %v16969_v62  ;;  %v11136_v44 = vld [vmem:[%s17363_s4 + $0x84] sm:$0xf] }
 0x605   :  { %v6565_v55 = vadd.f32 %v10021_v58, %v6522_v6  ;;  %v6566_v30 = vadd.f32 %v10022_v1, %v6535_v31  ;;  %v17019_v28 = vor.u32 1.1754944e-38, %v6261_v34  ;;  %vm17034_vm12 = vcmp.eq.f32.partialorder %v6259_v48, 8.507059e+37  ;;  %v10023_v6 = vld [vmem:[%s17359_s0 + $0xf0] sm:$0xff]  ;;  %s7229_s0 = sshll.u32 %s17367_s8, 4  ;;  %s7230_s0 = int_to_ptr.hbm [resolvable:$true] %s7229_s0 }
 0x606   :  { %7074 = vmatpush.bf16.msrb.mxu0 %v10399_v16  ;;  %v6281_v53 = vor.u32 1.1754944e-38, %v6280_v14  ;;  %vm17068_vm0 = vcmp.eq.f32.partialorder %v6278_v52, 8.507059e+37  ;;  %v10411_v1 = vor.u32 %v11149_v15, %v10408_v33  ;;  %v10383_v31 = vor.u32 %v11146_v22, %v10382_v32  ;;  %v11140_v16 = vld [vmem:[%s17363_s4 + $0xa4] sm:$0xf]  ;;  %v10350_v32 = vld [vmem:[%s17363_s4 + $0x80] sm:$0xf] }
 0x607   :  { %v11406_v19 = vpop.eup %11405  ;;  %v10153_v56 = vmul.f32 -1.442695, %v6565_v55  ;;  %v10154_v61 = vmul.f32 -1.442695, %v6566_v30  ;;  %7087 = vmatpush.bf16.msrb.mxu1 %v10403_v0  ;;  %v10391_v34 = vor.u32 %v11147_v37, %v10390_v63  ;;  %v11142_v55 = vld [vmem:[%s17363_s4 + $0xac] sm:$0xf0] }
 0x608   :  { %v17012_v38 = vadd.f32 1.0, %v11406_v19  ;;  %7113 = vmatpush.bf16.msrb.mxu3 %v10411_v1  ;;  %v10367_v4 = vor.u32 %v11142_v55, %v10366_v10  ;;  %v10374_v0 = vld [vmem:[%s17363_s4 + $0xa8] sm:$0xf]  ;;  %v11134_v10 = vld [vmem:[%s17363_s4 + $0x6c] sm:$0xf0] }
 0x609   :  { %v17017_v60 = vpop.eup %11407  ;;  %11411 = vpow2.f32 %v10153_v56  ;;  %7101 = vmatpush.bf16.msrb.mxu2 %v10391_v34  ;;  %v10318_v52 = vld [vmem:[%s17363_s4 + $0x40] sm:$0xf]  ;;  %v10312_v1 = vld [vmem:[%s17363_s4 + $0x38] sm:$0xf0] }
 0x60a   :  { %v17030_v21 = vpop.eup %11409  ;;  %v6251_v47 = vmul.f32 %v17017_v60, %v16961_v9  ;;  %11413 = vrcp.f32 %v17012_v38  ;;  %vm6256_vm15 = vweird.f32 %v17017_v60  ;;  %v6298_v43 = vand.u32 2147483647, %v17012_v38  ;;  %7075 = vmatpush.bf16.msrb.mxu0 %v10383_v31  ;;  %v11135_v31 = vld [vmem:[%s17363_s4 + $0x74] sm:$0xf0] }
 0x60b   :  { %v6270_v51 = vmul.f32 %v17030_v21, %v16969_v62  ;;  %11415 = vtanh.f32 %v6243_v20  ;;  %v6548_v27 = vpop.f32.mrf.mxu2  ;;  %v6561_v49 = vpop.f32.mrf.mxu3  ;;  %vm6275_vm1 = vweird.f32 %v17030_v21  ;;  %v10395_v20 = vor.u32 %v11145_v59, %v10392_v25  ;;  %vm6257_vm2 = vmor %vm6255_vm14, %vm6256_vm15  ;;  %7088 = vmatpush.bf16.msrb.mxu1 %v10387_v2  ;;  %v11137_v59 = vld [vmem:[%s17363_s4 + $0x8c] sm:$0xf]  ;;  %v10334_v25 = vld [vmem:[%s17363_s4 + $0x60] sm:$0xf] }
 0x60c   :  { %v6252_v29 = vsub.f32 1.0, %v6251_v47  ;;  %11417 = vpow2.f32 %v10154_v61  ;;  %v6568_v23 = vadd.f32 %v10024_v18, %v6561_v49  ;;  %v6524_v46 = vpop.f32.mrf.mxu0  ;;  %v6537_v42 = vpop.f32.mrf.mxu1  ;;  %vm17107_vm3 = vmor %vm6274_vm13, %vm6275_vm1  ;;  %v6300_v56 = vand.u32 2147483648, %v17012_v38  ;;  %v10368_v18 = vld [vmem:[%s17363_s4 + $0xb0] sm:$0xf0]  ;;  %v10376_v47 = vld [vmem:[%s17363_s4 + $0xb8] sm:$0xf0] }
 0x60d   :  { %v6271_v54 = vsub.f32 1.0, %v6270_v51  ;;  %v6567_v7 = vadd.f32 %v10023_v6, %v6548_v27  ;;  %7114 = vmatpush.bf16.msrb.mxu3 %v10395_v20  ;;  %v11138_v51 = vld [vmem:[%s17363_s4 + $0x8c] sm:$0xf0]  ;;  %vm17152_vm4 = vcmp.eq.f32.partialorder %v6298_v43, 8.507059e+37  ;;  %v10371_v22 = vor.u32 %v11140_v16, %v10368_v18  ;;  %v10352_v46 = vld [vmem:[%s17363_s4 + $0x90] sm:$0xf0] }
 0x60e   :  { %v6253_v11 = vmul.f32 %v17017_v60, %v6252_v29  ;;  %v10155_v58 = vmul.f32 -1.442695, %v6568_v23  ;;  %7076 = vmatpush.bf16.msrb.mxu0 %v10367_v4  ;;  %v10375_v23 = vor.u32 %v11143_v39, %v10374_v0  ;;  %v10358_v42 = vld [vmem:[%s17363_s4 + $0x88] sm:$0xf]  ;;  %v10351_v17 = vor.u32 %v11138_v51, %v10350_v32  ;;  %v11133_v20 = vld [vmem:[%s17363_s4 + $0x6c] sm:$0xf] }
 0x60f   :  { %v11412_v24 = vpop.eup %11411  ;;  %v6272_v35 = vmul.f32 %v17030_v21, %v6271_v54  ;;  %7089 = vmatpush.bf16.msrb.mxu1 %v10371_v22  ;;  %vm6294_vm7 = vweird.f32 %v17012_v38  ;;  %v10342_v6 = vld [vmem:[%s17363_s4 + $0x68] sm:$0xf]  ;;  %v10355_v55 = vor.u32 %v11136_v44, %v10352_v46  ;;  %v11128_v16 = vld [vmem:[%s17363_s4 + $0x44] sm:$0xf]  ;;  %v11131_v0 = vld [vmem:[%s17363_s4 + $0x54] sm:$0xf0] }
 0x610   :  { %v17090_v30 = vpop.eup %11413  ;;  %v6254_v57 = vadd.f32 %v17017_v60, %v6253_v11  ;;  %v17093_v50 = vadd.f32 1.0, %v11412_v24  ;;  %11419 = vpow2.f32 %v10155_v58  ;;  %v10360_v11 = vld [vmem:[%s17363_s4 + $0x98] sm:$0xf0]  ;;  %7102 = vmatpush.bf16.msrb.mxu2 %v10375_v23  ;;  %v11132_v24 = vld [vmem:[%s17363_s4 + $0x64] sm:$0xf] }
 0x611   :  { %v11416_v48 = vpop.eup %11415  ;;  %v6273_v5 = vadd.f32 %v17030_v21, %v6272_v35  ;;  %v6290_v8 = vmul.f32 %v17090_v30, %v17012_v38  ;;  %vm6295_vm5 = vweird.f32 %v17090_v30  ;;  %v10336_v35 = vld [vmem:[%s17363_s4 + $0x70] sm:$0xf0]  ;;  %v10326_v18 = vld [vmem:[%s17363_s4 + $0x48] sm:$0xf]  ;;  %v10302_v49 = vld [vmem:[%s17363_s4 + $0x20] sm:$0xf] }
 0x612   :  { %v11418_v19 = vpop.eup %11417  ;;  %v6258_v9 = vsel %vm6257_vm2, %v17017_v60, %v6254_v57  ;;  %11421 = vrcp.f32 %v17093_v50  ;;  %v6583_v33 = vand.u32 2147483647, %v17093_v50  ;;  %v6585_v29 = vand.u32 2147483648, %v17093_v50  ;;  %7077 = vmatpush.bf16.msrb.mxu0 %v10351_v17  ;;  %vm17217_vm9 = vmor %vm6294_vm7, %vm6295_vm5  ;;  %v10304_v46 = vld [vmem:[%s17363_s4 + $0x30] sm:$0xf0] }
 0x613   :  { %v6263_v13 = vsel %vm17034_vm12, %v17019_v28, %v6258_v9  ;;  %v6277_v62 = vsel %vm17107_vm3, %v17030_v21, %v6273_v5  ;;  %v6291_v14 = vsub.f32 1.0, %v6290_v8  ;;  %v17123_v61 = vadd.f32 1.0, %v11418_v19  ;;  %v6550_v36 = vpop.f32.mrf.mxu2  ;;  %v6563_v60 = vpop.f32.mrf.mxu3  ;;  %v11141_v21 = vld [vmem:[%s17363_s4 + $0xac] sm:$0xf]  ;;  %v11130_v9 = vld [vmem:[%s17363_s4 + $0x4c] sm:$0xf0]  ;;  %7090 = vmatpush.bf16.msrb.mxu1 %v10355_v55 }
 0x614   :  { %v6282_v28 = vsel %vm17068_vm0, %v6281_v53, %v6277_v62  ;;  %v6305_v40 = vmul.f32 %v11416_v48, %v6263_v13  ;;  %v10379_v54 = vor.u32 %v11141_v21, %v10376_v47  ;;  %vm17188_vm6 = vcmp.eq.f32.partialorder %v6583_v33, 8.507059e+37  ;;  %v10344_v48 = vld [vmem:[%s17363_s4 + $0x78] sm:$0xf0]  ;;  %v10320_v13 = vld [vmem:[%s17363_s4 + $0x50] sm:$0xf0] }
 0x615   :  { %v6304_v41 = vmul.f32 %v6282_v28, %v16508_v26  ;;  %v6292_v15 = vmul.f32 %v17090_v30, %v6291_v14  ;;  %11423 = vrcp.f32 %v17123_v61  ;;  %v17156_v26 = vor.u32 1.1754944e-38, %v6300_v56  ;;  %v10310_v17 = vld [vmem:[%s17363_s4 + $0x28] sm:$0xf] }
 0x616   :  { %v11420_v27 = vpop.eup %11419  ;;  %11425 = vtanh.f32 %v6567_v7  ;;  %vm6579_vm8 = vweird.f32 %v17093_v50  ;;  %7115 = vmatpush.bf16.msrb.mxu3 %v10379_v54  ;;  %vm6598_vm10 = vweird.f32 %v17123_v61  ;;  %v10359_v57 = vor.u32 %v11139_v12, %v10358_v42  ;;  %v11127_v12 = vld [vmem:[%s17363_s4 + $0x34] sm:$0xf0] }
 0x617   :  { %v17161_v45 = vadd.f32 %v6305_v40, %v6304_v41  ;;  %v17164_v53 = vadd.f32 1.0, %v11420_v27  ;;  %v6293_v37 = vadd.f32 %v17090_v30, %v6292_v15  ;;  %v6604_v4 = vand.u32 2147483648, %v17123_v61  ;;  %v11129_v41 = vld [vmem:[%s17363_s4 + $0x4c] sm:$0xf]  ;;  %v10328_v15 = vld [vmem:[%s17363_s4 + $0x58] sm:$0xf0] }
 0x618   :  { %v17172_v63 = vpop.eup %11421  ;;  %v10363_v19 = vor.u32 %v11137_v59, %v10360_v11  ;;  %7103 = vmatpush.bf16.msrb.mxu2 %v10359_v57  ;;  %v10339_v7 = vor.u32 %v11132_v24, %v10336_v35  ;;  %v6586_v14 = vor.u32 1.1754944e-38, %v6585_v29  ;;  %v10343_v36 = vor.u32 %v11135_v31, %v10342_v6  ;;  %v10286_v24 = vld [vmem:[%s17363_s4] sm:$0xf]  ;;  %v11122_v35 = vld [vmem:[%s17363_s4 + $0xc] sm:$0xf0] }
 0x619   :  { %11427 = vtanh.f32 %v17161_v45  ;;  %v6575_v58 = vmul.f32 %v17172_v63, %v17093_v50  ;;  %v6297_v8 = vsel %vm17217_vm9, %v17090_v30, %v6293_v37  ;;  %vm6580_vm11 = vweird.f32 %v17172_v63  ;;  %v11124_v50 = vld [vmem:[%s17363_s4 + $0x24] sm:$0xf] }
 0x61a   :  { %11429 = vrcp.f32 %v17164_v53  ;;  %v10335_v30 = vor.u32 %v11134_v10, %v10334_v25  ;;  %7116 = vmatpush.bf16.msrb.mxu3 %v10363_v19  ;;  %v10347_v60 = vor.u32 %v11133_v20, %v10344_v48  ;;  %v6302_v40 = vsel %vm17152_vm4, %v17156_v26, %v6297_v8  ;;  %vm6581_vm13 = vmor %vm6579_vm8, %vm6580_vm11  ;;  %v11126_v26 = vld [vmem:[%s17363_s4 + $0x2c] sm:$0xf0]  ;;  %7091 = vmatpush.bf16.msrb.mxu1 %v10339_v7  ;;  %v11120_v57 = vld [vmem:[%s17363_s4 + $0x4] sm:$0xf] }
 0x61b   :  { %v17213_v2 = vpop.eup %11423  ;;  %v6576_v34 = vsub.f32 1.0, %v6575_v58  ;;  %v6602_v21 = vand.u32 2147483647, %v17123_v61  ;;  %v10319_v47 = vor.u32 %v11130_v9, %v10318_v52  ;;  %v10323_v27 = vor.u32 %v11128_v16, %v10320_v13  ;;  %v11125_v58 = vld [vmem:[%s17363_s4 + $0x2c] sm:$0xf] }
 0x61c   :  { %v17228_v5 = vpop.eup %11425  ;;  %v6594_v43 = vmul.f32 %v17213_v2, %v17123_v61  ;;  %7078 = vmatpush.bf16.msrb.mxu0 %v10335_v30  ;;  %vm6599_vm12 = vweird.f32 %v17213_v2  ;;  %v6605_v22 = vor.u32 1.1754944e-38, %v6604_v4  ;;  %7104 = vmatpush.bf16.msrb.mxu2 %v10343_v36  ;;  %v10327_v23 = vor.u32 %v11131_v0, %v10326_v18  ;;  %v10288_v48 = vld [vmem:[%s17363_s4 + $0x10] sm:$0xf0]  ;;  %v10296_v4 = vld [vmem:[%s17363_s4 + $0x18] sm:$0xf0] }
 0x61d   :  { %v6577_v56 = vmul.f32 %v17172_v63, %v6576_v34  ;;  %v10331_v54 = vor.u32 %v11129_v41, %v10328_v15  ;;  %vm6600_vm14 = vmor %vm6598_vm10, %vm6599_vm12  ;;  %vm6603_vm15 = vcmp.eq.f32.partialorder %v6602_v21, 8.507059e+37  ;;  %v10303_v11 = vor.u32 %v11126_v26, %v10302_v49  ;;  %v7126_v21 = vld [vmem:[%s17365_s6] sm:$0xf]  ;;  %s11501_s6 = smov [#allocation7]  }
 0x61e   :  { %v6595_v62 = vsub.f32 1.0, %v6594_v43  ;;  %7117 = vmatpush.bf16.msrb.mxu3 %v10347_v60  ;;  %v10307_v10 = vor.u32 %v11124_v50, %v10304_v46  ;;  %7092 = vmatpush.bf16.msrb.mxu1 %v10323_v27  ;;  %v10311_v38 = vor.u32 %v11127_v12, %v10310_v17  ;;  %v10315_v34 = vor.u32 %v11125_v58, %v10312_v1  ;;  %v11121_v43 = vld [vmem:[%s17363_s4 + $0xc] sm:$0xf]  ;;  %s7240_s25 = sshll.u32 %s11501_s6, 4  ;;  %s7241_s25 = int_to_ptr.vmem [resolvable:$true] %s7240_s25 }
 0x61f   :  { %v11428_v28 = vpop.eup %11427  ;;  %v6578_v39 = vadd.f32 %v17172_v63, %v6577_v56  ;;  %v10287_v55 = vor.u32 %v11122_v35, %v10286_v24  ;;  %v6624_v19 = vand.u32 2147483648, %v17164_v53  ;;  %vm6618_vm1 = vweird.f32 %v17164_v53 }
 0x620   :  { %v17267_v33 = vpop.eup %11429  ;;  %v6308_v32 = vmul.f32 %v11428_v28, %v6302_v40  ;;  %v6596_v51 = vmul.f32 %v17213_v2, %v6595_v62  ;;  %7079 = vmatpush.bf16.msrb.mxu0 %v10319_v47  ;;  %7105 = vmatpush.bf16.msrb.mxu2 %v10327_v23  ;;  %v6622_v52 = vand.u32 2147483647, %v17164_v53  ;;  %v10291_v9 = vor.u32 %v11120_v57, %v10288_v48 }
 0x621   :  { %v6582_v44 = vsel %vm6581_vm13, %v17172_v63, %v6578_v39  ;;  %v6614_v29 = vmul.f32 %v17267_v33, %v17164_v53  ;;  %vm6619_vm0 = vweird.f32 %v17267_v33  ;;  %v10299_v7 = vor.u32 %v11121_v43, %v10296_v4 }
 0x622   :  { %v6311_v42 = vpack.c.bf16 %v6308_v32, %v6308_v32  ;;  %v6587_v37 = vsel %vm17188_vm6, %v6586_v14, %v6582_v44  ;;  %v6597_v63 = vadd.f32 %v17213_v2, %v6596_v51  ;;  %7118 = vmatpush.bf16.msrb.mxu3 %v10331_v54  ;;  %7093 = vmatpush.bf16.msrb.mxu1 %v10307_v10  ;;  %vm6620_vm2 = vmor %vm6618_vm1, %vm6619_vm0  ;;  %v6625_v13 = vor.u32 1.1754944e-38, %v6624_v19 }
 0x623   :  { %v6615_v59 = vsub.f32 1.0, %v6614_v29  ;;  %v6629_v61 = vmul.f32 %v17228_v5, %v6587_v37  ;;  %v10294_v5 = vld [vmem:[%s17363_s4 + $0x8] sm:$0xf]  ;;  %vm6623_vm3 = vcmp.eq.f32.partialorder %v6622_v52, 8.507059e+37  ;;  %v7128_v15 = vperm.slane %v7126_v21, 0 }
 0x624   :  { %10020 = vst [vmem:[%s17366_s7 + $0x18] sm:$0xf] %v6311_v42  ;;  %v6601_v25 = vsel %vm6600_vm14, %v17213_v2, %v6597_v63  ;;  %7080 = vmatpush.bf16.msrb.mxu0 %v10303_v11  ;;  %7106 = vmatpush.bf16.msrb.mxu2 %v10311_v38  ;;  %v7131_v23 = vperm.slane %v7126_v21, 3  ;;  %v7130_v10 = vperm.slane %v7126_v21, 2 }
 0x625   :  { %6312 = vst [vmem:[#allocation4 + $0x4] sm:$0xf] %v6311_v42  ;;  %v6606_v6 = vsel %vm6603_vm15, %v6605_v22, %v6601_v25  ;;  %v6616_v31 = vmul.f32 %v17267_v33, %v6615_v59 }
 0x626   :  { %v6628_v2 = vmul.f32 %v6606_v6, %v16571_v3  ;;  %v11123_v3 = vld [vmem:[%s17363_s4 + $0x14] sm:$0xf0]  ;;  %7119 = vmatpush.bf16.msrb.mxu3 %v10315_v34  ;;  %7094 = vmatpush.bf16.msrb.mxu1 %v10291_v9 }
 0x627   :  { %v6617_v8 = vadd.f32 %v17267_v33, %v6616_v31  ;;  %v10295_v56 = vor.u32 %v11123_v3, %v10294_v5 }
 0x628   :  { %v6630_v20 = vadd.f32 %v6629_v61, %v6628_v2  ;;  %7081 = vmatpush.bf16.msrb.mxu0 %v10287_v55 }
 0x629   :  { %v6621_v16 = vsel %vm6620_vm2, %v17267_v33, %v6617_v8  ;;  %7107 = vmatpush.bf16.msrb.mxu2 %v10295_v56  ;;  %v7129_v33 = vperm.slane %v7126_v21, 1 }
 0x62a   :  { %11431 = vtanh.f32 %v6630_v20  ;;  %7219 = vst [vmem:[#allocation7] sm:$0xff] %v6630_v20  ;;  %7120 = vmatpush.bf16.msrb.mxu3 %v10299_v7  ;;  %v6626_v14 = vsel %vm6623_vm3, %v6625_v13, %v6621_v16 }
 0x62c   :  { %v6669_v30 = vld [vmem:[#allocation4 + $0x4] sm:$0xf] }
 0x62d   :  { %6870 = vmatmul.bf16.vlgmr.msra.gmra.mxu0 %v6669_v30  ;;  %6883 = vmatmul.bf16.vlgmr.msra.gmra.mxu1 %v6669_v30 }
 0x62e   :  { %6896 = vmatmul.bf16.vlgmr.msra.gmra.mxu2 %v6669_v30  ;;  %6909 = vmatmul.bf16.vlgmr.msra.gmra.mxu3 %v6669_v30 }
 0x630   :  { %v11432_v62 = vpop.eup %11431 }
 0x631   :  { %v6632_v53 = vmul.f32 %v11432_v62, %v6626_v14 }
 0x633   :  { %v6635_v36 = vpack.c.bf16 %v6632_v53, %v6632_v53  ;;  %7215 = vst [vmem:[#allocation5] sm:$0xff] %v6632_v53 }
 0x635   :  { %6636 = vst [vmem:[#allocation4] sm:$0xf] %v6635_v36 }
 0x63d   :  { %7082 = vmatmul.bf16.vlgmr.msrb.gmra.mxu0 %v6635_v36  ;;  %7095 = vmatmul.bf16.vlgmr.msrb.gmra.mxu1 %v6635_v36 }
 0x63e   :  { %7108 = vmatmul.bf16.vlgmr.msrb.gmra.mxu2 %v6635_v36  ;;  %7121 = vmatmul.bf16.vlgmr.msrb.gmra.mxu3 %v6635_v36 }
 0x6aa   :  { %v6871_v60 = vpop.f32.mrf.mxu0  ;;  %v6884_v18 = vpop.f32.mrf.mxu1 }
 0x6b1   :  { %v6897_v0 = vpop.f32.mrf.mxu2  ;;  %v6910_v28 = vpop.f32.mrf.mxu3 }
 0x6b2   :  { %v6873_v40 = vpop.f32.mrf.mxu0  ;;  %v6886_v39 = vpop.f32.mrf.mxu1 }
 0x6b9   :  { %v6899_v47 = vpop.f32.mrf.mxu2  ;;  %v6912_v41 = vpop.f32.mrf.mxu3 }
 0x6ba   :  { %v7083_v32 = vpop.f32.mrf.mxu0  ;;  %v7096_v51 = vpop.f32.mrf.mxu1 }
 0x6bb   :  { %v7084_v27 = vadd.f32 %v7083_v32, %v6871_v60  ;;  %v7097_v49 = vadd.f32 %v7096_v51, %v6884_v18 }
 0x6bd   :  { %v7136_v26 = vadd.f32 %v7128_v15, %v7084_v27  ;;  %v7137_v22 = vadd.f32 %v7129_v33, %v7097_v49 }
 0x6bf   :  { %v10412_v44 = vmul.f32 -1.442695, %v7136_v26  ;;  %v10413_v29 = vmul.f32 -1.442695, %v7137_v22 }
 0x6c1   :  { %11433 = vpow2.f32 %v10412_v44  ;;  %v7109_v50 = vpop.f32.mrf.mxu2  ;;  %v7122_v46 = vpop.f32.mrf.mxu3 }
 0x6c2   :  { %11435 = vpow2.f32 %v10413_v29  ;;  %v7123_v42 = vadd.f32 %v7122_v46, %v6910_v28  ;;  %v7085_v37 = vpop.f32.mrf.mxu0  ;;  %v7098_v63 = vpop.f32.mrf.mxu1  ;;  %v7110_v61 = vadd.f32 %v7109_v50, %v6897_v0 }
 0x6c4   :  { %v7139_v54 = vadd.f32 %v7131_v23, %v7123_v42  ;;  %v7138_v31 = vadd.f32 %v7130_v10, %v7110_v61 }
 0x6c6   :  { %v10414_v17 = vmul.f32 -1.442695, %v7139_v54 }
 0x6c7   :  { %v11434_v12 = vpop.eup %11433 }
 0x6c8   :  { %v11436_v59 = vpop.eup %11435  ;;  %v7144_v11 = vadd.f32 1.0, %v11434_v12  ;;  %11437 = vpow2.f32 %v10414_v17 }
 0x6c9   :  { %v7163_v58 = vadd.f32 1.0, %v11436_v59  ;;  %v7111_v1 = vpop.f32.mrf.mxu2  ;;  %v7124_v25 = vpop.f32.mrf.mxu3 }
 0x6ca   :  { %11439 = vrcp.f32 %v7144_v11  ;;  %v7156_v20 = vand.u32 2147483648, %v7144_v11  ;;  %v7154_v3 = vand.u32 2147483647, %v7144_v11  ;;  %vm7150_vm6 = vweird.f32 %v7144_v11 }
 0x6cb   :  { %11441 = vrcp.f32 %v7163_v58  ;;  %v7175_v48 = vand.u32 2147483648, %v7163_v58  ;;  %v7173_v43 = vand.u32 2147483647, %v7163_v58  ;;  %vm7169_vm7 = vweird.f32 %v7163_v58 }
 0x6cc   :  { %v7157_v52 = vor.u32 1.1754944e-38, %v7156_v20  ;;  %vm7155_vm10 = vcmp.eq.f32.partialorder %v7154_v3, 8.507059e+37 }
 0x6cd   :  { %v7176_v30 = vor.u32 1.1754944e-38, %v7175_v48  ;;  %vm7174_vm11 = vcmp.eq.f32.partialorder %v7173_v43, 8.507059e+37 }
 0x6ce   :  { %v11438_v24 = vpop.eup %11437 }
 0x6cf   :  { %v7183_v35 = vadd.f32 1.0, %v11438_v24 }
 0x6d0   :  { %v11440_v6 = vpop.eup %11439 }
 0x6d1   :  { %v11442_v38 = vpop.eup %11441  ;;  %v7146_v2 = vmul.f32 %v11440_v6, %v7144_v11  ;;  %11443 = vrcp.f32 %v7183_v35  ;;  %vm7151_vm4 = vweird.f32 %v11440_v6  ;;  %v7195_v40 = vand.u32 2147483648, %v7183_v35 }
 0x6d2   :  { %v7165_v34 = vmul.f32 %v11442_v38, %v7163_v58  ;;  %11445 = vtanh.f32 %v7138_v31  ;;  %vm7170_vm5 = vweird.f32 %v11442_v38  ;;  %vm7152_vm8 = vmor %vm7150_vm6, %vm7151_vm4  ;;  %vm7189_vm13 = vweird.f32 %v7183_v35 }
 0x6d3   :  { %v7147_v55 = vsub.f32 1.0, %v7146_v2  ;;  %vm7171_vm9 = vmor %vm7169_vm7, %vm7170_vm5  ;;  %v7193_v39 = vand.u32 2147483647, %v7183_v35  ;;  %v7196_v47 = vor.u32 1.1754944e-38, %v7195_v40 }
 0x6d4   :  { %v7166_v57 = vsub.f32 1.0, %v7165_v34 }
 0x6d5   :  { %v7148_v5 = vmul.f32 %v11440_v6, %v7147_v55  ;;  %vm7194_vm15 = vcmp.eq.f32.partialorder %v7193_v39, 8.507059e+37 }
 0x6d6   :  { %v7167_v8 = vmul.f32 %v11442_v38, %v7166_v57 }
 0x6d7   :  { %v11444_v4 = vpop.eup %11443  ;;  %v7149_v19 = vadd.f32 %v11440_v6, %v7148_v5 }
 0x6d8   :  { %v7168_v9 = vadd.f32 %v11442_v38, %v7167_v8  ;;  %v7185_v56 = vmul.f32 %v11444_v4, %v7183_v35  ;;  %v11446_v16 = vpop.eup %11445  ;;  %vm7190_vm12 = vweird.f32 %v11444_v4 }
 0x6d9   :  { %v7153_v7 = vsel %vm7152_vm8, %v11440_v6, %v7149_v19  ;;  %vm7191_vm14 = vmor %vm7189_vm13, %vm7190_vm12 }
 0x6da   :  { %v7158_v13 = vsel %vm7155_vm10, %v7157_v52, %v7153_v7  ;;  %v7172_v62 = vsel %vm7171_vm9, %v11442_v38, %v7168_v9  ;;  %v7186_v14 = vsub.f32 1.0, %v7185_v56 }
 0x6db   :  { %v7177_v53 = vsel %vm7174_vm11, %v7176_v30, %v7172_v62  ;;  %v7200_v36 = vmul.f32 %v11446_v16, %v7158_v13 }
 0x6dc   :  { %v7199_v60 = vmul.f32 %v7177_v53, %v17161_v45  ;;  %v7187_v18 = vmul.f32 %v11444_v4, %v7186_v14 }
 0x6de   :  { %v7201_v0 = vadd.f32 %v7200_v36, %v7199_v60  ;;  %v7188_v28 = vadd.f32 %v11444_v4, %v7187_v18 }
 0x6e0   :  { %11447 = vtanh.f32 %v7201_v0  ;;  %7220 = vst [vmem:[#allocation7 + $0x8] sm:$0xff] %v7201_v0  ;;  %v7192_v21 = vsel %vm7191_vm14, %v11444_v4, %v7188_v28 }
 0x6e1   :  { %7248 = dma.vmem_to_hbm [thread:$0]  %s7241_s25, 256, %s7243_s28, [#allocation8], %s11502_s29, %s11502_s29, %s11503_s3   ;;  %v7197_v41 = vsel %vm7194_vm15, %v7196_v47, %v7192_v21 }
 0x6e6   :  { %v11448_v45 = vpop.eup %11447 }
 0x6e7   :  { %v7203_v15 = vmul.f32 %v11448_v45, %v7197_v41 }
 0x6e9   :  { %v7206_v33 = vpack.c.bf16 %v7203_v15, %v7203_v15  ;;  %7216 = vst [vmem:[#allocation5 + $0x8] sm:$0xff] %v7203_v15 }
 0x6ea   :  { %7235 = dma.vmem_to_hbm [thread:$0]  %s7228_s30, 256, %s7230_s0, [#allocation6], %s11502_s29, %s11502_s29, %s11503_s3  }
 0x6eb   :  { %7207 = vst [vmem:[#allocation4 + $0x4] sm:$0xf] %v7206_v33 }
 0x6ec   :  { %10415 = vst [vmem:[%s17366_s7 + $0x1c] sm:$0xf] %v7206_v33 }
 0x6ed   :  { %11497 = dma.done.wait [#allocation6], 256  }
 0x6ee   :  { %11498 = vsyncadd [#allocation6], 4294967040 }
 0x6ef   :  { %11499 = dma.done.wait [#allocation8], 256  }
 0x6f0   :  { %11500 = vsyncadd [#allocation8], 4294967040 }
 0x6f1   :  { %7259 = vsyncpa [#allocation6], 1 }
 0x6f2   :  { %7260 = vsyncpa [#allocation8], 1 }

</bundles_post_ra>
